<compile_context>
chip_gen: v7x
topology: tpu7x:2x2x1
jax: 0.10.0
libtpu: 0.0.40
codegen_flags: <defaults>
</compile_context>

<pallas_src>
import jax
import jax.numpy as jnp
from jax.experimental import pallas as pl
from jax.experimental.pallas import tpu as pltpu


def _make_fused_kernel(H, W, chans):
    """Build the fused multi-layer conv3x3+ReLU kernel for static channel list."""
    n_layers = len(chans) - 1

    def kernel(*refs):
        x_ref = refs[0]                                   # (1, H, W, chans[0])
        w_refs = refs[1:1 + n_layers]                     # (9, Cin_l, Cout_l)
        b_refs = refs[1 + n_layers:1 + 2 * n_layers]      # (1, Cout_l)
        o_ref = refs[1 + 2 * n_layers]                    # (1, H, W, chans[-1])
        pad_refs = refs[2 + 2 * n_layers:]                # (H+2, W+2, Cin_l)

        # Zero the padded scratch buffers every grid step (keeps the 1-pixel
        # halo at zero and stays correct when the parallel grid axis is split
        # across TensorCores, each with its own scratch).
        for p in pad_refs:
            p[...] = jnp.zeros_like(p)

        # Load this image into the interior of the first padded buffer.
        pad_refs[0][1:H + 1, 1:W + 1, :] = x_ref[0]

        y = None
        for layer in range(n_layers):
            cin, cout = chans[layer], chans[layer + 1]
            cur = pad_refs[layer]
            w_ref = w_refs[layer]

            acc = jnp.zeros((H * W, cout), jnp.float32)
            for dx in range(3):
                # One sublane-offset window per dx, shared by the 3 dy taps.
                shifted = cur[:, dx:dx + W, :]            # (H+2, W, cin)
                for dy in range(3):
                    patch = shifted[dy:dy + H].reshape(H * W, cin)
                    acc = acc + jnp.dot(
                        patch, w_ref[dy * 3 + dx],
                        preferred_element_type=jnp.float32)

            acc = jnp.maximum(acc + b_refs[layer][...], 0.0)
            y = acc.reshape(H, W, cout)

            if layer + 1 < n_layers:
                # Next layer's input: interior of its zero-padded scratch.
                pad_refs[layer + 1][1:H + 1, 1:W + 1, :] = y

        o_ref[...] = y.reshape(1, H, W, chans[-1]).astype(o_ref.dtype)

    return kernel


def lr_frame_feature_extractor_nhwc(x_nhwc, params):
    """Fused forward pass in NHWC.  params: list of (w_hwio(3,3,Ci,Co), b(Co,))."""
    N, H, W, c_in = x_nhwc.shape
    chans = (int(c_in),) + tuple(int(w.shape[-1]) for w, _ in params)
    n_layers = len(params)

    w_args = [w.reshape(9, w.shape[2], w.shape[3]) for w, _ in params]
    b_args = [b.reshape(1, -1) for _, b in params]

    in_specs = [pl.BlockSpec((1, H, W, c_in), lambda n: (n, 0, 0, 0))]
    in_specs += [pl.BlockSpec(w.shape, lambda n: (0, 0, 0)) for w in w_args]
    in_specs += [pl.BlockSpec(b.shape, lambda n: (0, 0)) for b in b_args]

    return pl.pallas_call(
        _make_fused_kernel(H, W, chans),
        out_shape=jax.ShapeDtypeStruct((N, H, W, chans[-1]), jnp.float32),
        grid=(N,),
        in_specs=in_specs,
        out_specs=pl.BlockSpec((1, H, W, chans[-1]), lambda n: (n, 0, 0, 0)),
        scratch_shapes=[pltpu.VMEM((H + 2, W + 2, c), jnp.float32)
                        for c in chans[:-1]],
        compiler_params=pltpu.CompilerParams(
            dimension_semantics=("parallel",)),
    )(x_nhwc, *w_args, *b_args)


def init_params(key, in_channels, out_channels, layers):
    """Deterministic synthetic parameters matching the nn.Conv2d shapes (HWIO)."""
    params = []
    chans = [in_channels] + list(layers) + [out_channels]
    for i in range(len(chans) - 1):
        c_in, c_out = chans[i], chans[i + 1]
        key, kw, kb = jax.random.split(key, 3)
        fan_in = c_in * 3 * 3
        bound = 1.0 / jnp.sqrt(fan_in)
        w = jax.random.uniform(kw, (3, 3, c_in, c_out), jnp.float32,
                               -bound, bound)
        bvec = jax.random.uniform(kb, (c_out,), jnp.float32, -bound, bound)
        params.append((w, bvec))
    return params


@jax.jit
def lr_frame_feature_extractor(x_nchw, params):
    """Forward pass equivalent to LRFrameFeatureExtractor.forward (NCHW in/out)."""
    x = jnp.transpose(x_nchw, (0, 2, 3, 1))   # NCHW -> NHWC
    y = lr_frame_feature_extractor_nhwc(x, params)
    return jnp.transpose(y, (0, 3, 1, 2))     # NHWC -> NCHW


def _reference(x_nchw, params):
    """Pure-JAX reference (lax conv) for correctness checking."""
    x = jnp.transpose(x_nchw, (0, 2, 3, 1))
    for w, b in params:
        y = jax.lax.conv_general_dilated(
            x, w, window_strides=(1, 1), padding="SAME",
            dimension_numbers=("NHWC", "HWIO", "NHWC"))
        x = jnp.maximum(y + b[None, None, None, :], 0.0)
    return jnp.transpose(x, (0, 3, 1, 2))


if __name__ == "__main__":
    key = jax.random.PRNGKey(0)
    k_x, k_p = jax.random.split(key)

    # Small shapes consistent with the module: batch=2, in_channels=4,
    # spatial 16x16, layers=[32, 48, 48], out_channels=32.
    N, C_IN, H, W = 2, 4, 16, 16
    LAYERS = [32, 48, 48]
    C_OUT = 32

    x = jax.random.normal(k_x, (N, C_IN, H, W), jnp.float32)
    params = init_params(k_p, C_IN, C_OUT, LAYERS)
    params = tuple((jnp.asarray(w), jnp.asarray(b)) for w, b in params)

    out = lr_frame_feature_extractor(x, params)
    out = jax.block_until_ready(out)

    assert out.shape == (N, C_OUT, H, W), out.shape

    ref = jax.block_until_ready(_reference(x, params))
    assert jnp.allclose(out, ref, atol=1e-4, rtol=1e-4), float(
        jnp.max(jnp.abs(out - ref)))

    print("KERNEL_OK")
</pallas_src>

<mosaic_0001>
module attributes {stable_mosaic.version = 11 : i64} {
  func.func @kernel(%arg0: i32, %arg1: memref<1x16x16x4xf32, #tpu.memory_space<vmem>>, %arg2: memref<9x4x32xf32, #tpu.memory_space<vmem>>, %arg3: memref<9x32x48xf32, #tpu.memory_space<vmem>>, %arg4: memref<9x48x48xf32, #tpu.memory_space<vmem>>, %arg5: memref<9x48x32xf32, #tpu.memory_space<vmem>>, %arg6: memref<1x32xf32, #tpu.memory_space<vmem>>, %arg7: memref<1x48xf32, #tpu.memory_space<vmem>>, %arg8: memref<1x48xf32, #tpu.memory_space<vmem>>, %arg9: memref<1x32xf32, #tpu.memory_space<vmem>>, %arg10: memref<1x16x16x32xf32, #tpu.memory_space<vmem>>, %arg11: memref<18x18x4xf32, #tpu.memory_space<vmem>>, %arg12: memref<18x18x32xf32, #tpu.memory_space<vmem>>, %arg13: memref<18x18x48xf32, #tpu.memory_space<vmem>>, %arg14: memref<18x18x48xf32, #tpu.memory_space<vmem>>) attributes {dimension_semantics = [#tpu.dimension_semantics<parallel>], iteration_bounds = array<i64: 2>, scalar_prefetch = 0 : i64, scratch_operands = 4 : i64, tpu.core_type = #tpu.core_type<tc>, window_params = [{transform_indices = @transform_0, window_bounds = array<i64: 1, 16, 16, 4>}, {pipeline_mode = #tpu.pipeline_mode<synchronous>, transform_indices = @transform_1, window_bounds = array<i64: 9, 4, 32>}, {pipeline_mode = #tpu.pipeline_mode<synchronous>, transform_indices = @transform_2, window_bounds = array<i64: 9, 32, 48>}, {pipeline_mode = #tpu.pipeline_mode<synchronous>, transform_indices = @transform_3, window_bounds = array<i64: 9, 48, 48>}, {pipeline_mode = #tpu.pipeline_mode<synchronous>, transform_indices = @transform_4, window_bounds = array<i64: 9, 48, 32>}, {pipeline_mode = #tpu.pipeline_mode<synchronous>, transform_indices = @transform_5, window_bounds = array<i64: 1, 32>}, {pipeline_mode = #tpu.pipeline_mode<synchronous>, transform_indices = @transform_6, window_bounds = array<i64: 1, 48>}, {pipeline_mode = #tpu.pipeline_mode<synchronous>, transform_indices = @transform_7, window_bounds = array<i64: 1, 48>}, {pipeline_mode = #tpu.pipeline_mode<synchronous>, transform_indices = @transform_8, window_bounds = array<i64: 1, 32>}, {transform_indices = @transform_9, window_bounds = array<i64: 1, 16, 16, 32>}]} {
    %cst = arith.constant 0.000000e+00 : f32
    %0 = vector.broadcast %cst : f32 to vector<18x18x4xf32>
    %c0 = arith.constant 0 : index
    %c0_0 = arith.constant 0 : index
    %c0_1 = arith.constant 0 : index
    %1 = vector.load %arg11[%c0, %c0_0, %c0_1] : memref<18x18x4xf32, #tpu.memory_space<vmem>>, vector<18x18x4xf32>
    tpu.vector_store %arg11[%c0, %c0_0, %c0_1], %0 {strides = array<i32>} : memref<18x18x4xf32, #tpu.memory_space<vmem>>, vector<18x18x4xf32>,
    %cst_2 = arith.constant 0.000000e+00 : f32
    %2 = vector.broadcast %cst_2 : f32 to vector<18x18x32xf32>
    %c0_3 = arith.constant 0 : index
    %c0_4 = arith.constant 0 : index
    %c0_5 = arith.constant 0 : index
    %3 = vector.load %arg12[%c0_3, %c0_4, %c0_5] : memref<18x18x32xf32, #tpu.memory_space<vmem>>, vector<18x18x32xf32>
    tpu.vector_store %arg12[%c0_3, %c0_4, %c0_5], %2 {strides = array<i32>} : memref<18x18x32xf32, #tpu.memory_space<vmem>>, vector<18x18x32xf32>,
    %cst_6 = arith.constant 0.000000e+00 : f32
    %4 = vector.broadcast %cst_6 : f32 to vector<18x18x48xf32>
    %c0_7 = arith.constant 0 : index
    %c0_8 = arith.constant 0 : index
    %c0_9 = arith.constant 0 : index
    %5 = vector.load %arg13[%c0_7, %c0_8, %c0_9] : memref<18x18x48xf32, #tpu.memory_space<vmem>>, vector<18x18x48xf32>
    tpu.vector_store %arg13[%c0_7, %c0_8, %c0_9], %4 {strides = array<i32>} : memref<18x18x48xf32, #tpu.memory_space<vmem>>, vector<18x18x48xf32>,
    %cst_10 = arith.constant 0.000000e+00 : f32
    %6 = vector.broadcast %cst_10 : f32 to vector<18x18x48xf32>
    %c0_11 = arith.constant 0 : index
    %c0_12 = arith.constant 0 : index
    %c0_13 = arith.constant 0 : index
    %7 = vector.load %arg14[%c0_11, %c0_12, %c0_13] : memref<18x18x48xf32, #tpu.memory_space<vmem>>, vector<18x18x48xf32>
    tpu.vector_store %arg14[%c0_11, %c0_12, %c0_13], %6 {strides = array<i32>} : memref<18x18x48xf32, #tpu.memory_space<vmem>>, vector<18x18x48xf32>,
    %c0_14 = arith.constant 0 : index
    %c0_15 = arith.constant 0 : index
    %c0_16 = arith.constant 0 : index
    %c0_17 = arith.constant 0 : index
    %8 = vector.load %arg1[%c0_14, %c0_15, %c0_16, %c0_17] : memref<1x16x16x4xf32, #tpu.memory_space<vmem>>, vector<1x16x16x4xf32>
    %9 = vector.shape_cast %8 : vector<1x16x16x4xf32> to vector<16x16x4xf32>
    %c1 = arith.constant 1 : index
    %c1_18 = arith.constant 1 : index
    %c0_19 = arith.constant 0 : index
    %10 = vector.load %arg11[%c1, %c1_18, %c0_19] : memref<18x18x4xf32, #tpu.memory_space<vmem>>, vector<16x16x4xf32>
    tpu.vector_store %arg11[%c1, %c1_18, %c0_19], %9 {strides = array<i32>} : memref<18x18x4xf32, #tpu.memory_space<vmem>>, vector<16x16x4xf32>,
    %cst_20 = arith.constant 0.000000e+00 : f32
    %11 = vector.broadcast %cst_20 : f32 to vector<256x32xf32>
    %c0_21 = arith.constant 0 : index
    %c0_22 = arith.constant 0 : index
    %c0_23 = arith.constant 0 : index
    %12 = vector.load %arg11[%c0_21, %c0_22, %c0_23] : memref<18x18x4xf32, #tpu.memory_space<vmem>>, vector<18x16x4xf32>
    %13 = vector.extract_strided_slice %12 {offsets = [0, 0, 0], sizes = [16, 16, 4], strides = [1, 1, 1]} : vector<18x16x4xf32> to vector<16x16x4xf32>
    %14 = vector.shape_cast %13 : vector<16x16x4xf32> to vector<256x4xf32>
    %c0_24 = arith.constant 0 : index
    %c0_25 = arith.constant 0 : index
    %c0_26 = arith.constant 0 : index
    %15 = vector.load %arg2[%c0_24, %c0_25, %c0_26] : memref<9x4x32xf32, #tpu.memory_space<vmem>>, vector<1x4x32xf32>
    %16 = vector.shape_cast %15 : vector<1x4x32xf32> to vector<4x32xf32>
    %cst_27 = arith.constant dense<0.000000e+00> : vector<256x32xf32>
    %17 = tpu.matmul %14, %16, %cst_27 {dimension_numbers = #tpu.dot_dimension_numbers<[1], [0], [0], [1], [0, 0, 1, 1], [], []>} : vector<256x4xf32>, vector<4x32xf32>, vector<256x32xf32> -> vector<256x32xf32>
    %18 = arith.addf %11, %17 : vector<256x32xf32>
    %19 = vector.extract_strided_slice %12 {offsets = [1, 0, 0], sizes = [16, 16, 4], strides = [1, 1, 1]} : vector<18x16x4xf32> to vector<16x16x4xf32>
    %20 = vector.shape_cast %19 : vector<16x16x4xf32> to vector<256x4xf32>
    %c3 = arith.constant 3 : index
    %c0_28 = arith.constant 0 : index
    %c0_29 = arith.constant 0 : index
    %21 = vector.load %arg2[%c3, %c0_28, %c0_29] : memref<9x4x32xf32, #tpu.memory_space<vmem>>, vector<1x4x32xf32>
    %22 = vector.shape_cast %21 : vector<1x4x32xf32> to vector<4x32xf32>
    %cst_30 = arith.constant dense<0.000000e+00> : vector<256x32xf32>
    %23 = tpu.matmul %20, %22, %cst_30 {dimension_numbers = #tpu.dot_dimension_numbers<[1], [0], [0], [1], [0, 0, 1, 1], [], []>} : vector<256x4xf32>, vector<4x32xf32>, vector<256x32xf32> -> vector<256x32xf32>
    %24 = arith.addf %18, %23 : vector<256x32xf32>
    %25 = vector.extract_strided_slice %12 {offsets = [2, 0, 0], sizes = [16, 16, 4], strides = [1, 1, 1]} : vector<18x16x4xf32> to vector<16x16x4xf32>
    %26 = vector.shape_cast %25 : vector<16x16x4xf32> to vector<256x4xf32>
    %c6 = arith.constant 6 : index
    %c0_31 = arith.constant 0 : index
    %c0_32 = arith.constant 0 : index
    %27 = vector.load %arg2[%c6, %c0_31, %c0_32] : memref<9x4x32xf32, #tpu.memory_space<vmem>>, vector<1x4x32xf32>
    %28 = vector.shape_cast %27 : vector<1x4x32xf32> to vector<4x32xf32>
    %cst_33 = arith.constant dense<0.000000e+00> : vector<256x32xf32>
    %29 = tpu.matmul %26, %28, %cst_33 {dimension_numbers = #tpu.dot_dimension_numbers<[1], [0], [0], [1], [0, 0, 1, 1], [], []>} : vector<256x4xf32>, vector<4x32xf32>, vector<256x32xf32> -> vector<256x32xf32>
    %30 = arith.addf %24, %29 : vector<256x32xf32>
    %c0_34 = arith.constant 0 : index
    %c1_35 = arith.constant 1 : index
    %c0_36 = arith.constant 0 : index
    %31 = vector.load %arg11[%c0_34, %c1_35, %c0_36] : memref<18x18x4xf32, #tpu.memory_space<vmem>>, vector<18x16x4xf32>
    %32 = vector.extract_strided_slice %31 {offsets = [0, 0, 0], sizes = [16, 16, 4], strides = [1, 1, 1]} : vector<18x16x4xf32> to vector<16x16x4xf32>
    %33 = vector.shape_cast %32 : vector<16x16x4xf32> to vector<256x4xf32>
    %c1_37 = arith.constant 1 : index
    %c0_38 = arith.constant 0 : index
    %c0_39 = arith.constant 0 : index
    %34 = vector.load %arg2[%c1_37, %c0_38, %c0_39] : memref<9x4x32xf32, #tpu.memory_space<vmem>>, vector<1x4x32xf32>
    %35 = vector.shape_cast %34 : vector<1x4x32xf32> to vector<4x32xf32>
    %cst_40 = arith.constant dense<0.000000e+00> : vector<256x32xf32>
    %36 = tpu.matmul %33, %35, %cst_40 {dimension_numbers = #tpu.dot_dimension_numbers<[1], [0], [0], [1], [0, 0, 1, 1], [], []>} : vector<256x4xf32>, vector<4x32xf32>, vector<256x32xf32> -> vector<256x32xf32>
    %37 = arith.addf %30, %36 : vector<256x32xf32>
    %38 = vector.extract_strided_slice %31 {offsets = [1, 0, 0], sizes = [16, 16, 4], strides = [1, 1, 1]} : vector<18x16x4xf32> to vector<16x16x4xf32>
    %39 = vector.shape_cast %38 : vector<16x16x4xf32> to vector<256x4xf32>
    %c4 = arith.constant 4 : index
    %c0_41 = arith.constant 0 : index
    %c0_42 = arith.constant 0 : index
    %40 = vector.load %arg2[%c4, %c0_41, %c0_42] : memref<9x4x32xf32, #tpu.memory_space<vmem>>, vector<1x4x32xf32>
    %41 = vector.shape_cast %40 : vector<1x4x32xf32> to vector<4x32xf32>
    %cst_43 = arith.constant dense<0.000000e+00> : vector<256x32xf32>
    %42 = tpu.matmul %39, %41, %cst_43 {dimension_numbers = #tpu.dot_dimension_numbers<[1], [0], [0], [1], [0, 0, 1, 1], [], []>} : vector<256x4xf32>, vector<4x32xf32>, vector<256x32xf32> -> vector<256x32xf32>
    %43 = arith.addf %37, %42 : vector<256x32xf32>
    %44 = vector.extract_strided_slice %31 {offsets = [2, 0, 0], sizes = [16, 16, 4], strides = [1, 1, 1]} : vector<18x16x4xf32> to vector<16x16x4xf32>
    %45 = vector.shape_cast %44 : vector<16x16x4xf32> to vector<256x4xf32>
    %c7 = arith.constant 7 : index
    %c0_44 = arith.constant 0 : index
    %c0_45 = arith.constant 0 : index
    %46 = vector.load %arg2[%c7, %c0_44, %c0_45] : memref<9x4x32xf32, #tpu.memory_space<vmem>>, vector<1x4x32xf32>
    %47 = vector.shape_cast %46 : vector<1x4x32xf32> to vector<4x32xf32>
    %cst_46 = arith.constant dense<0.000000e+00> : vector<256x32xf32>
    %48 = tpu.matmul %45, %47, %cst_46 {dimension_numbers = #tpu.dot_dimension_numbers<[1], [0], [0], [1], [0, 0, 1, 1], [], []>} : vector<256x4xf32>, vector<4x32xf32>, vector<256x32xf32> -> vector<256x32xf32>
    %49 = arith.addf %43, %48 : vector<256x32xf32>
    %c0_47 = arith.constant 0 : index
    %c2 = arith.constant 2 : index
    %c0_48 = arith.constant 0 : index
    %50 = vector.load %arg11[%c0_47, %c2, %c0_48] : memref<18x18x4xf32, #tpu.memory_space<vmem>>, vector<18x16x4xf32>
    %51 = vector.extract_strided_slice %50 {offsets = [0, 0, 0], sizes = [16, 16, 4], strides = [1, 1, 1]} : vector<18x16x4xf32> to vector<16x16x4xf32>
    %52 = vector.shape_cast %51 : vector<16x16x4xf32> to vector<256x4xf32>
    %c2_49 = arith.constant 2 : index
    %c0_50 = arith.constant 0 : index
    %c0_51 = arith.constant 0 : index
    %53 = vector.load %arg2[%c2_49, %c0_50, %c0_51] : memref<9x4x32xf32, #tpu.memory_space<vmem>>, vector<1x4x32xf32>
    %54 = vector.shape_cast %53 : vector<1x4x32xf32> to vector<4x32xf32>
    %cst_52 = arith.constant dense<0.000000e+00> : vector<256x32xf32>
    %55 = tpu.matmul %52, %54, %cst_52 {dimension_numbers = #tpu.dot_dimension_numbers<[1], [0], [0], [1], [0, 0, 1, 1], [], []>} : vector<256x4xf32>, vector<4x32xf32>, vector<256x32xf32> -> vector<256x32xf32>
    %56 = arith.addf %49, %55 : vector<256x32xf32>
    %57 = vector.extract_strided_slice %50 {offsets = [1, 0, 0], sizes = [16, 16, 4], strides = [1, 1, 1]} : vector<18x16x4xf32> to vector<16x16x4xf32>
    %58 = vector.shape_cast %57 : vector<16x16x4xf32> to vector<256x4xf32>
    %c5 = arith.constant 5 : index
    %c0_53 = arith.constant 0 : index
    %c0_54 = arith.constant 0 : index
    %59 = vector.load %arg2[%c5, %c0_53, %c0_54] : memref<9x4x32xf32, #tpu.memory_space<vmem>>, vector<1x4x32xf32>
    %60 = vector.shape_cast %59 : vector<1x4x32xf32> to vector<4x32xf32>
    %cst_55 = arith.constant dense<0.000000e+00> : vector<256x32xf32>
    %61 = tpu.matmul %58, %60, %cst_55 {dimension_numbers = #tpu.dot_dimension_numbers<[1], [0], [0], [1], [0, 0, 1, 1], [], []>} : vector<256x4xf32>, vector<4x32xf32>, vector<256x32xf32> -> vector<256x32xf32>
    %62 = arith.addf %56, %61 : vector<256x32xf32>
    %63 = vector.extract_strided_slice %50 {offsets = [2, 0, 0], sizes = [16, 16, 4], strides = [1, 1, 1]} : vector<18x16x4xf32> to vector<16x16x4xf32>
    %64 = vector.shape_cast %63 : vector<16x16x4xf32> to vector<256x4xf32>
    %c8 = arith.constant 8 : index
    %c0_56 = arith.constant 0 : index
    %c0_57 = arith.constant 0 : index
    %65 = vector.load %arg2[%c8, %c0_56, %c0_57] : memref<9x4x32xf32, #tpu.memory_space<vmem>>, vector<1x4x32xf32>
    %66 = vector.shape_cast %65 : vector<1x4x32xf32> to vector<4x32xf32>
    %cst_58 = arith.constant dense<0.000000e+00> : vector<256x32xf32>
    %67 = tpu.matmul %64, %66, %cst_58 {dimension_numbers = #tpu.dot_dimension_numbers<[1], [0], [0], [1], [0, 0, 1, 1], [], []>} : vector<256x4xf32>, vector<4x32xf32>, vector<256x32xf32> -> vector<256x32xf32>
    %68 = arith.addf %62, %67 : vector<256x32xf32>
    %c0_59 = arith.constant 0 : index
    %c0_60 = arith.constant 0 : index
    %69 = vector.load %arg6[%c0_59, %c0_60] : memref<1x32xf32, #tpu.memory_space<vmem>>, vector<1x32xf32>
    %70 = vector.broadcast %69 : vector<1x32xf32> to vector<256x32xf32>
    %71 = arith.addf %68, %70 : vector<256x32xf32>
    %cst_61 = arith.constant 0.000000e+00 : f32
    %72 = vector.broadcast %cst_61 : f32 to vector<256x32xf32>
    %73 = arith.maximumf %71, %72 : vector<256x32xf32>
    %74 = vector.shape_cast %73 : vector<256x32xf32> to vector<16x16x32xf32>
    %c1_62 = arith.constant 1 : index
    %c1_63 = arith.constant 1 : index
    %c0_64 = arith.constant 0 : index
    %75 = vector.load %arg12[%c1_62, %c1_63, %c0_64] : memref<18x18x32xf32, #tpu.memory_space<vmem>>, vector<16x16x32xf32>
    tpu.vector_store %arg12[%c1_62, %c1_63, %c0_64], %74 {strides = array<i32>} : memref<18x18x32xf32, #tpu.memory_space<vmem>>, vector<16x16x32xf32>,
    %cst_65 = arith.constant 0.000000e+00 : f32
    %76 = vector.broadcast %cst_65 : f32 to vector<256x48xf32>
    %c0_66 = arith.constant 0 : index
    %c0_67 = arith.constant 0 : index
    %c0_68 = arith.constant 0 : index
    %77 = vector.load %arg12[%c0_66, %c0_67, %c0_68] : memref<18x18x32xf32, #tpu.memory_space<vmem>>, vector<18x16x32xf32>
    %78 = vector.extract_strided_slice %77 {offsets = [0, 0, 0], sizes = [16, 16, 32], strides = [1, 1, 1]} : vector<18x16x32xf32> to vector<16x16x32xf32>
    %79 = vector.shape_cast %78 : vector<16x16x32xf32> to vector<256x32xf32>
    %c0_69 = arith.constant 0 : index
    %c0_70 = arith.constant 0 : index
    %c0_71 = arith.constant 0 : index
    %80 = vector.load %arg3[%c0_69, %c0_70, %c0_71] : memref<9x32x48xf32, #tpu.memory_space<vmem>>, vector<1x32x48xf32>
    %81 = vector.shape_cast %80 : vector<1x32x48xf32> to vector<32x48xf32>
    %cst_72 = arith.constant dense<0.000000e+00> : vector<256x48xf32>
    %82 = tpu.matmul %79, %81, %cst_72 {dimension_numbers = #tpu.dot_dimension_numbers<[1], [0], [0], [1], [0, 0, 1, 1], [], []>} : vector<256x32xf32>, vector<32x48xf32>, vector<256x48xf32> -> vector<256x48xf32>
    %83 = arith.addf %76, %82 : vector<256x48xf32>
    %84 = vector.extract_strided_slice %77 {offsets = [1, 0, 0], sizes = [16, 16, 32], strides = [1, 1, 1]} : vector<18x16x32xf32> to vector<16x16x32xf32>
    %85 = vector.shape_cast %84 : vector<16x16x32xf32> to vector<256x32xf32>
    %c3_73 = arith.constant 3 : index
    %c0_74 = arith.constant 0 : index
    %c0_75 = arith.constant 0 : index
    %86 = vector.load %arg3[%c3_73, %c0_74, %c0_75] : memref<9x32x48xf32, #tpu.memory_space<vmem>>, vector<1x32x48xf32>
    %87 = vector.shape_cast %86 : vector<1x32x48xf32> to vector<32x48xf32>
    %cst_76 = arith.constant dense<0.000000e+00> : vector<256x48xf32>
    %88 = tpu.matmul %85, %87, %cst_76 {dimension_numbers = #tpu.dot_dimension_numbers<[1], [0], [0], [1], [0, 0, 1, 1], [], []>} : vector<256x32xf32>, vector<32x48xf32>, vector<256x48xf32> -> vector<256x48xf32>
    %89 = arith.addf %83, %88 : vector<256x48xf32>
    %90 = vector.extract_strided_slice %77 {offsets = [2, 0, 0], sizes = [16, 16, 32], strides = [1, 1, 1]} : vector<18x16x32xf32> to vector<16x16x32xf32>
    %91 = vector.shape_cast %90 : vector<16x16x32xf32> to vector<256x32xf32>
    %c6_77 = arith.constant 6 : index
    %c0_78 = arith.constant 0 : index
    %c0_79 = arith.constant 0 : index
    %92 = vector.load %arg3[%c6_77, %c0_78, %c0_79] : memref<9x32x48xf32, #tpu.memory_space<vmem>>, vector<1x32x48xf32>
    %93 = vector.shape_cast %92 : vector<1x32x48xf32> to vector<32x48xf32>
    %cst_80 = arith.constant dense<0.000000e+00> : vector<256x48xf32>
    %94 = tpu.matmul %91, %93, %cst_80 {dimension_numbers = #tpu.dot_dimension_numbers<[1], [0], [0], [1], [0, 0, 1, 1], [], []>} : vector<256x32xf32>, vector<32x48xf32>, vector<256x48xf32> -> vector<256x48xf32>
    %95 = arith.addf %89, %94 : vector<256x48xf32>
    %c0_81 = arith.constant 0 : index
    %c1_82 = arith.constant 1 : index
    %c0_83 = arith.constant 0 : index
    %96 = vector.load %arg12[%c0_81, %c1_82, %c0_83] : memref<18x18x32xf32, #tpu.memory_space<vmem>>, vector<18x16x32xf32>
    %97 = vector.extract_strided_slice %96 {offsets = [0, 0, 0], sizes = [16, 16, 32], strides = [1, 1, 1]} : vector<18x16x32xf32> to vector<16x16x32xf32>
    %98 = vector.shape_cast %97 : vector<16x16x32xf32> to vector<256x32xf32>
    %c1_84 = arith.constant 1 : index
    %c0_85 = arith.constant 0 : index
    %c0_86 = arith.constant 0 : index
    %99 = vector.load %arg3[%c1_84, %c0_85, %c0_86] : memref<9x32x48xf32, #tpu.memory_space<vmem>>, vector<1x32x48xf32>
    %100 = vector.shape_cast %99 : vector<1x32x48xf32> to vector<32x48xf32>
    %cst_87 = arith.constant dense<0.000000e+00> : vector<256x48xf32>
    %101 = tpu.matmul %98, %100, %cst_87 {dimension_numbers = #tpu.dot_dimension_numbers<[1], [0], [0], [1], [0, 0, 1, 1], [], []>} : vector<256x32xf32>, vector<32x48xf32>, vector<256x48xf32> -> vector<256x48xf32>
    %102 = arith.addf %95, %101 : vector<256x48xf32>
    %103 = vector.extract_strided_slice %96 {offsets = [1, 0, 0], sizes = [16, 16, 32], strides = [1, 1, 1]} : vector<18x16x32xf32> to vector<16x16x32xf32>
    %104 = vector.shape_cast %103 : vector<16x16x32xf32> to vector<256x32xf32>
    %c4_88 = arith.constant 4 : index
    %c0_89 = arith.constant 0 : index
    %c0_90 = arith.constant 0 : index
    %105 = vector.load %arg3[%c4_88, %c0_89, %c0_90] : memref<9x32x48xf32, #tpu.memory_space<vmem>>, vector<1x32x48xf32>
    %106 = vector.shape_cast %105 : vector<1x32x48xf32> to vector<32x48xf32>
    %cst_91 = arith.constant dense<0.000000e+00> : vector<256x48xf32>
    %107 = tpu.matmul %104, %106, %cst_91 {dimension_numbers = #tpu.dot_dimension_numbers<[1], [0], [0], [1], [0, 0, 1, 1], [], []>} : vector<256x32xf32>, vector<32x48xf32>, vector<256x48xf32> -> vector<256x48xf32>
    %108 = arith.addf %102, %107 : vector<256x48xf32>
    %109 = vector.extract_strided_slice %96 {offsets = [2, 0, 0], sizes = [16, 16, 32], strides = [1, 1, 1]} : vector<18x16x32xf32> to vector<16x16x32xf32>
    %110 = vector.shape_cast %109 : vector<16x16x32xf32> to vector<256x32xf32>
    %c7_92 = arith.constant 7 : index
    %c0_93 = arith.constant 0 : index
    %c0_94 = arith.constant 0 : index
    %111 = vector.load %arg3[%c7_92, %c0_93, %c0_94] : memref<9x32x48xf32, #tpu.memory_space<vmem>>, vector<1x32x48xf32>
    %112 = vector.shape_cast %111 : vector<1x32x48xf32> to vector<32x48xf32>
    %cst_95 = arith.constant dense<0.000000e+00> : vector<256x48xf32>
    %113 = tpu.matmul %110, %112, %cst_95 {dimension_numbers = #tpu.dot_dimension_numbers<[1], [0], [0], [1], [0, 0, 1, 1], [], []>} : vector<256x32xf32>, vector<32x48xf32>, vector<256x48xf32> -> vector<256x48xf32>
    %114 = arith.addf %108, %113 : vector<256x48xf32>
    %c0_96 = arith.constant 0 : index
    %c2_97 = arith.constant 2 : index
    %c0_98 = arith.constant 0 : index
    %115 = vector.load %arg12[%c0_96, %c2_97, %c0_98] : memref<18x18x32xf32, #tpu.memory_space<vmem>>, vector<18x16x32xf32>
    %116 = vector.extract_strided_slice %115 {offsets = [0, 0, 0], sizes = [16, 16, 32], strides = [1, 1, 1]} : vector<18x16x32xf32> to vector<16x16x32xf32>
    %117 = vector.shape_cast %116 : vector<16x16x32xf32> to vector<256x32xf32>
    %c2_99 = arith.constant 2 : index
    %c0_100 = arith.constant 0 : index
    %c0_101 = arith.constant 0 : index
    %118 = vector.load %arg3[%c2_99, %c0_100, %c0_101] : memref<9x32x48xf32, #tpu.memory_space<vmem>>, vector<1x32x48xf32>
    %119 = vector.shape_cast %118 : vector<1x32x48xf32> to vector<32x48xf32>
    %cst_102 = arith.constant dense<0.000000e+00> : vector<256x48xf32>
    %120 = tpu.matmul %117, %119, %cst_102 {dimension_numbers = #tpu.dot_dimension_numbers<[1], [0], [0], [1], [0, 0, 1, 1], [], []>} : vector<256x32xf32>, vector<32x48xf32>, vector<256x48xf32> -> vector<256x48xf32>
    %121 = arith.addf %114, %120 : vector<256x48xf32>
    %122 = vector.extract_strided_slice %115 {offsets = [1, 0, 0], sizes = [16, 16, 32], strides = [1, 1, 1]} : vector<18x16x32xf32> to vector<16x16x32xf32>
    %123 = vector.shape_cast %122 : vector<16x16x32xf32> to vector<256x32xf32>
    %c5_103 = arith.constant 5 : index
    %c0_104 = arith.constant 0 : index
    %c0_105 = arith.constant 0 : index
    %124 = vector.load %arg3[%c5_103, %c0_104, %c0_105] : memref<9x32x48xf32, #tpu.memory_space<vmem>>, vector<1x32x48xf32>
    %125 = vector.shape_cast %124 : vector<1x32x48xf32> to vector<32x48xf32>
    %cst_106 = arith.constant dense<0.000000e+00> : vector<256x48xf32>
    %126 = tpu.matmul %123, %125, %cst_106 {dimension_numbers = #tpu.dot_dimension_numbers<[1], [0], [0], [1], [0, 0, 1, 1], [], []>} : vector<256x32xf32>, vector<32x48xf32>, vector<256x48xf32> -> vector<256x48xf32>
    %127 = arith.addf %121, %126 : vector<256x48xf32>
    %128 = vector.extract_strided_slice %115 {offsets = [2, 0, 0], sizes = [16, 16, 32], strides = [1, 1, 1]} : vector<18x16x32xf32> to vector<16x16x32xf32>
    %129 = vector.shape_cast %128 : vector<16x16x32xf32> to vector<256x32xf32>
    %c8_107 = arith.constant 8 : index
    %c0_108 = arith.constant 0 : index
    %c0_109 = arith.constant 0 : index
    %130 = vector.load %arg3[%c8_107, %c0_108, %c0_109] : memref<9x32x48xf32, #tpu.memory_space<vmem>>, vector<1x32x48xf32>
    %131 = vector.shape_cast %130 : vector<1x32x48xf32> to vector<32x48xf32>
    %cst_110 = arith.constant dense<0.000000e+00> : vector<256x48xf32>
    %132 = tpu.matmul %129, %131, %cst_110 {dimension_numbers = #tpu.dot_dimension_numbers<[1], [0], [0], [1], [0, 0, 1, 1], [], []>} : vector<256x32xf32>, vector<32x48xf32>, vector<256x48xf32> -> vector<256x48xf32>
    %133 = arith.addf %127, %132 : vector<256x48xf32>
    %c0_111 = arith.constant 0 : index
    %c0_112 = arith.constant 0 : index
    %134 = vector.load %arg7[%c0_111, %c0_112] : memref<1x48xf32, #tpu.memory_space<vmem>>, vector<1x48xf32>
    %135 = vector.broadcast %134 : vector<1x48xf32> to vector<256x48xf32>
    %136 = arith.addf %133, %135 : vector<256x48xf32>
    %cst_113 = arith.constant 0.000000e+00 : f32
    %137 = vector.broadcast %cst_113 : f32 to vector<256x48xf32>
    %138 = arith.maximumf %136, %137 : vector<256x48xf32>
    %139 = vector.shape_cast %138 : vector<256x48xf32> to vector<16x16x48xf32>
    %c1_114 = arith.constant 1 : index
    %c1_115 = arith.constant 1 : index
    %c0_116 = arith.constant 0 : index
    %140 = vector.load %arg13[%c1_114, %c1_115, %c0_116] : memref<18x18x48xf32, #tpu.memory_space<vmem>>, vector<16x16x48xf32>
    tpu.vector_store %arg13[%c1_114, %c1_115, %c0_116], %139 {strides = array<i32>} : memref<18x18x48xf32, #tpu.memory_space<vmem>>, vector<16x16x48xf32>,
    %cst_117 = arith.constant 0.000000e+00 : f32
    %141 = vector.broadcast %cst_117 : f32 to vector<256x48xf32>
    %c0_118 = arith.constant 0 : index
    %c0_119 = arith.constant 0 : index
    %c0_120 = arith.constant 0 : index
    %142 = vector.load %arg13[%c0_118, %c0_119, %c0_120] : memref<18x18x48xf32, #tpu.memory_space<vmem>>, vector<18x16x48xf32>
    %143 = vector.extract_strided_slice %142 {offsets = [0, 0, 0], sizes = [16, 16, 48], strides = [1, 1, 1]} : vector<18x16x48xf32> to vector<16x16x48xf32>
    %144 = vector.shape_cast %143 : vector<16x16x48xf32> to vector<256x48xf32>
    %c0_121 = arith.constant 0 : index
    %c0_122 = arith.constant 0 : index
    %c0_123 = arith.constant 0 : index
    %145 = vector.load %arg4[%c0_121, %c0_122, %c0_123] : memref<9x48x48xf32, #tpu.memory_space<vmem>>, vector<1x48x48xf32>
    %146 = vector.shape_cast %145 : vector<1x48x48xf32> to vector<48x48xf32>
    %cst_124 = arith.constant dense<0.000000e+00> : vector<256x48xf32>
    %147 = tpu.matmul %144, %146, %cst_124 {dimension_numbers = #tpu.dot_dimension_numbers<[1], [0], [0], [1], [0, 0, 1, 1], [], []>} : vector<256x48xf32>, vector<48x48xf32>, vector<256x48xf32> -> vector<256x48xf32>
    %148 = arith.addf %141, %147 : vector<256x48xf32>
    %149 = vector.extract_strided_slice %142 {offsets = [1, 0, 0], sizes = [16, 16, 48], strides = [1, 1, 1]} : vector<18x16x48xf32> to vector<16x16x48xf32>
    %150 = vector.shape_cast %149 : vector<16x16x48xf32> to vector<256x48xf32>
    %c3_125 = arith.constant 3 : index
    %c0_126 = arith.constant 0 : index
    %c0_127 = arith.constant 0 : index
    %151 = vector.load %arg4[%c3_125, %c0_126, %c0_127] : memref<9x48x48xf32, #tpu.memory_space<vmem>>, vector<1x48x48xf32>
    %152 = vector.shape_cast %151 : vector<1x48x48xf32> to vector<48x48xf32>
    %cst_128 = arith.constant dense<0.000000e+00> : vector<256x48xf32>
    %153 = tpu.matmul %150, %152, %cst_128 {dimension_numbers = #tpu.dot_dimension_numbers<[1], [0], [0], [1], [0, 0, 1, 1], [], []>} : vector<256x48xf32>, vector<48x48xf32>, vector<256x48xf32> -> vector<256x48xf32>
    %154 = arith.addf %148, %153 : vector<256x48xf32>
    %155 = vector.extract_strided_slice %142 {offsets = [2, 0, 0], sizes = [16, 16, 48], strides = [1, 1, 1]} : vector<18x16x48xf32> to vector<16x16x48xf32>
    %156 = vector.shape_cast %155 : vector<16x16x48xf32> to vector<256x48xf32>
    %c6_129 = arith.constant 6 : index
    %c0_130 = arith.constant 0 : index
    %c0_131 = arith.constant 0 : index
    %157 = vector.load %arg4[%c6_129, %c0_130, %c0_131] : memref<9x48x48xf32, #tpu.memory_space<vmem>>, vector<1x48x48xf32>
    %158 = vector.shape_cast %157 : vector<1x48x48xf32> to vector<48x48xf32>
    %cst_132 = arith.constant dense<0.000000e+00> : vector<256x48xf32>
    %159 = tpu.matmul %156, %158, %cst_132 {dimension_numbers = #tpu.dot_dimension_numbers<[1], [0], [0], [1], [0, 0, 1, 1], [], []>} : vector<256x48xf32>, vector<48x48xf32>, vector<256x48xf32> -> vector<256x48xf32>
    %160 = arith.addf %154, %159 : vector<256x48xf32>
    %c0_133 = arith.constant 0 : index
    %c1_134 = arith.constant 1 : index
    %c0_135 = arith.constant 0 : index
    %161 = vector.load %arg13[%c0_133, %c1_134, %c0_135] : memref<18x18x48xf32, #tpu.memory_space<vmem>>, vector<18x16x48xf32>
    %162 = vector.extract_strided_slice %161 {offsets = [0, 0, 0], sizes = [16, 16, 48], strides = [1, 1, 1]} : vector<18x16x48xf32> to vector<16x16x48xf32>
    %163 = vector.shape_cast %162 : vector<16x16x48xf32> to vector<256x48xf32>
    %c1_136 = arith.constant 1 : index
    %c0_137 = arith.constant 0 : index
    %c0_138 = arith.constant 0 : index
    %164 = vector.load %arg4[%c1_136, %c0_137, %c0_138] : memref<9x48x48xf32, #tpu.memory_space<vmem>>, vector<1x48x48xf32>
    %165 = vector.shape_cast %164 : vector<1x48x48xf32> to vector<48x48xf32>
    %cst_139 = arith.constant dense<0.000000e+00> : vector<256x48xf32>
    %166 = tpu.matmul %163, %165, %cst_139 {dimension_numbers = #tpu.dot_dimension_numbers<[1], [0], [0], [1], [0, 0, 1, 1], [], []>} : vector<256x48xf32>, vector<48x48xf32>, vector<256x48xf32> -> vector<256x48xf32>
    %167 = arith.addf %160, %166 : vector<256x48xf32>
    %168 = vector.extract_strided_slice %161 {offsets = [1, 0, 0], sizes = [16, 16, 48], strides = [1, 1, 1]} : vector<18x16x48xf32> to vector<16x16x48xf32>
    %169 = vector.shape_cast %168 : vector<16x16x48xf32> to vector<256x48xf32>
    %c4_140 = arith.constant 4 : index
    %c0_141 = arith.constant 0 : index
    %c0_142 = arith.constant 0 : index
    %170 = vector.load %arg4[%c4_140, %c0_141, %c0_142] : memref<9x48x48xf32, #tpu.memory_space<vmem>>, vector<1x48x48xf32>
    %171 = vector.shape_cast %170 : vector<1x48x48xf32> to vector<48x48xf32>
    %cst_143 = arith.constant dense<0.000000e+00> : vector<256x48xf32>
    %172 = tpu.matmul %169, %171, %cst_143 {dimension_numbers = #tpu.dot_dimension_numbers<[1], [0], [0], [1], [0, 0, 1, 1], [], []>} : vector<256x48xf32>, vector<48x48xf32>, vector<256x48xf32> -> vector<256x48xf32>
    %173 = arith.addf %167, %172 : vector<256x48xf32>
    %174 = vector.extract_strided_slice %161 {offsets = [2, 0, 0], sizes = [16, 16, 48], strides = [1, 1, 1]} : vector<18x16x48xf32> to vector<16x16x48xf32>
    %175 = vector.shape_cast %174 : vector<16x16x48xf32> to vector<256x48xf32>
    %c7_144 = arith.constant 7 : index
    %c0_145 = arith.constant 0 : index
    %c0_146 = arith.constant 0 : index
    %176 = vector.load %arg4[%c7_144, %c0_145, %c0_146] : memref<9x48x48xf32, #tpu.memory_space<vmem>>, vector<1x48x48xf32>
    %177 = vector.shape_cast %176 : vector<1x48x48xf32> to vector<48x48xf32>
    %cst_147 = arith.constant dense<0.000000e+00> : vector<256x48xf32>
    %178 = tpu.matmul %175, %177, %cst_147 {dimension_numbers = #tpu.dot_dimension_numbers<[1], [0], [0], [1], [0, 0, 1, 1], [], []>} : vector<256x48xf32>, vector<48x48xf32>, vector<256x48xf32> -> vector<256x48xf32>
    %179 = arith.addf %173, %178 : vector<256x48xf32>
    %c0_148 = arith.constant 0 : index
    %c2_149 = arith.constant 2 : index
    %c0_150 = arith.constant 0 : index
    %180 = vector.load %arg13[%c0_148, %c2_149, %c0_150] : memref<18x18x48xf32, #tpu.memory_space<vmem>>, vector<18x16x48xf32>
    %181 = vector.extract_strided_slice %180 {offsets = [0, 0, 0], sizes = [16, 16, 48], strides = [1, 1, 1]} : vector<18x16x48xf32> to vector<16x16x48xf32>
    %182 = vector.shape_cast %181 : vector<16x16x48xf32> to vector<256x48xf32>
    %c2_151 = arith.constant 2 : index
    %c0_152 = arith.constant 0 : index
    %c0_153 = arith.constant 0 : index
    %183 = vector.load %arg4[%c2_151, %c0_152, %c0_153] : memref<9x48x48xf32, #tpu.memory_space<vmem>>, vector<1x48x48xf32>
    %184 = vector.shape_cast %183 : vector<1x48x48xf32> to vector<48x48xf32>
    %cst_154 = arith.constant dense<0.000000e+00> : vector<256x48xf32>
    %185 = tpu.matmul %182, %184, %cst_154 {dimension_numbers = #tpu.dot_dimension_numbers<[1], [0], [0], [1], [0, 0, 1, 1], [], []>} : vector<256x48xf32>, vector<48x48xf32>, vector<256x48xf32> -> vector<256x48xf32>
    %186 = arith.addf %179, %185 : vector<256x48xf32>
    %187 = vector.extract_strided_slice %180 {offsets = [1, 0, 0], sizes = [16, 16, 48], strides = [1, 1, 1]} : vector<18x16x48xf32> to vector<16x16x48xf32>
    %188 = vector.shape_cast %187 : vector<16x16x48xf32> to vector<256x48xf32>
    %c5_155 = arith.constant 5 : index
    %c0_156 = arith.constant 0 : index
    %c0_157 = arith.constant 0 : index
    %189 = vector.load %arg4[%c5_155, %c0_156, %c0_157] : memref<9x48x48xf32, #tpu.memory_space<vmem>>, vector<1x48x48xf32>
    %190 = vector.shape_cast %189 : vector<1x48x48xf32> to vector<48x48xf32>
    %cst_158 = arith.constant dense<0.000000e+00> : vector<256x48xf32>
    %191 = tpu.matmul %188, %190, %cst_158 {dimension_numbers = #tpu.dot_dimension_numbers<[1], [0], [0], [1], [0, 0, 1, 1], [], []>} : vector<256x48xf32>, vector<48x48xf32>, vector<256x48xf32> -> vector<256x48xf32>
    %192 = arith.addf %186, %191 : vector<256x48xf32>
    %193 = vector.extract_strided_slice %180 {offsets = [2, 0, 0], sizes = [16, 16, 48], strides = [1, 1, 1]} : vector<18x16x48xf32> to vector<16x16x48xf32>
    %194 = vector.shape_cast %193 : vector<16x16x48xf32> to vector<256x48xf32>
    %c8_159 = arith.constant 8 : index
    %c0_160 = arith.constant 0 : index
    %c0_161 = arith.constant 0 : index
    %195 = vector.load %arg4[%c8_159, %c0_160, %c0_161] : memref<9x48x48xf32, #tpu.memory_space<vmem>>, vector<1x48x48xf32>
    %196 = vector.shape_cast %195 : vector<1x48x48xf32> to vector<48x48xf32>
    %cst_162 = arith.constant dense<0.000000e+00> : vector<256x48xf32>
    %197 = tpu.matmul %194, %196, %cst_162 {dimension_numbers = #tpu.dot_dimension_numbers<[1], [0], [0], [1], [0, 0, 1, 1], [], []>} : vector<256x48xf32>, vector<48x48xf32>, vector<256x48xf32> -> vector<256x48xf32>
    %198 = arith.addf %192, %197 : vector<256x48xf32>
    %c0_163 = arith.constant 0 : index
    %c0_164 = arith.constant 0 : index
    %199 = vector.load %arg8[%c0_163, %c0_164] : memref<1x48xf32, #tpu.memory_space<vmem>>, vector<1x48xf32>
    %200 = vector.broadcast %199 : vector<1x48xf32> to vector<256x48xf32>
    %201 = arith.addf %198, %200 : vector<256x48xf32>
    %cst_165 = arith.constant 0.000000e+00 : f32
    %202 = vector.broadcast %cst_165 : f32 to vector<256x48xf32>
    %203 = arith.maximumf %201, %202 : vector<256x48xf32>
    %204 = vector.shape_cast %203 : vector<256x48xf32> to vector<16x16x48xf32>
    %c1_166 = arith.constant 1 : index
    %c1_167 = arith.constant 1 : index
    %c0_168 = arith.constant 0 : index
    %205 = vector.load %arg14[%c1_166, %c1_167, %c0_168] : memref<18x18x48xf32, #tpu.memory_space<vmem>>, vector<16x16x48xf32>
    tpu.vector_store %arg14[%c1_166, %c1_167, %c0_168], %204 {strides = array<i32>} : memref<18x18x48xf32, #tpu.memory_space<vmem>>, vector<16x16x48xf32>,
    %cst_169 = arith.constant 0.000000e+00 : f32
    %206 = vector.broadcast %cst_169 : f32 to vector<256x32xf32>
    %c0_170 = arith.constant 0 : index
    %c0_171 = arith.constant 0 : index
    %c0_172 = arith.constant 0 : index
    %207 = vector.load %arg14[%c0_170, %c0_171, %c0_172] : memref<18x18x48xf32, #tpu.memory_space<vmem>>, vector<18x16x48xf32>
    %208 = vector.extract_strided_slice %207 {offsets = [0, 0, 0], sizes = [16, 16, 48], strides = [1, 1, 1]} : vector<18x16x48xf32> to vector<16x16x48xf32>
    %209 = vector.shape_cast %208 : vector<16x16x48xf32> to vector<256x48xf32>
    %c0_173 = arith.constant 0 : index
    %c0_174 = arith.constant 0 : index
    %c0_175 = arith.constant 0 : index
    %210 = vector.load %arg5[%c0_173, %c0_174, %c0_175] : memref<9x48x32xf32, #tpu.memory_space<vmem>>, vector<1x48x32xf32>
    %211 = vector.shape_cast %210 : vector<1x48x32xf32> to vector<48x32xf32>
    %cst_176 = arith.constant dense<0.000000e+00> : vector<256x32xf32>
    %212 = tpu.matmul %209, %211, %cst_176 {dimension_numbers = #tpu.dot_dimension_numbers<[1], [0], [0], [1], [0, 0, 1, 1], [], []>} : vector<256x48xf32>, vector<48x32xf32>, vector<256x32xf32> -> vector<256x32xf32>
    %213 = arith.addf %206, %212 : vector<256x32xf32>
    %214 = vector.extract_strided_slice %207 {offsets = [1, 0, 0], sizes = [16, 16, 48], strides = [1, 1, 1]} : vector<18x16x48xf32> to vector<16x16x48xf32>
    %215 = vector.shape_cast %214 : vector<16x16x48xf32> to vector<256x48xf32>
    %c3_177 = arith.constant 3 : index
    %c0_178 = arith.constant 0 : index
    %c0_179 = arith.constant 0 : index
    %216 = vector.load %arg5[%c3_177, %c0_178, %c0_179] : memref<9x48x32xf32, #tpu.memory_space<vmem>>, vector<1x48x32xf32>
    %217 = vector.shape_cast %216 : vector<1x48x32xf32> to vector<48x32xf32>
    %cst_180 = arith.constant dense<0.000000e+00> : vector<256x32xf32>
    %218 = tpu.matmul %215, %217, %cst_180 {dimension_numbers = #tpu.dot_dimension_numbers<[1], [0], [0], [1], [0, 0, 1, 1], [], []>} : vector<256x48xf32>, vector<48x32xf32>, vector<256x32xf32> -> vector<256x32xf32>
    %219 = arith.addf %213, %218 : vector<256x32xf32>
    %220 = vector.extract_strided_slice %207 {offsets = [2, 0, 0], sizes = [16, 16, 48], strides = [1, 1, 1]} : vector<18x16x48xf32> to vector<16x16x48xf32>
    %221 = vector.shape_cast %220 : vector<16x16x48xf32> to vector<256x48xf32>
    %c6_181 = arith.constant 6 : index
    %c0_182 = arith.constant 0 : index
    %c0_183 = arith.constant 0 : index
    %222 = vector.load %arg5[%c6_181, %c0_182, %c0_183] : memref<9x48x32xf32, #tpu.memory_space<vmem>>, vector<1x48x32xf32>
    %223 = vector.shape_cast %222 : vector<1x48x32xf32> to vector<48x32xf32>
    %cst_184 = arith.constant dense<0.000000e+00> : vector<256x32xf32>
    %224 = tpu.matmul %221, %223, %cst_184 {dimension_numbers = #tpu.dot_dimension_numbers<[1], [0], [0], [1], [0, 0, 1, 1], [], []>} : vector<256x48xf32>, vector<48x32xf32>, vector<256x32xf32> -> vector<256x32xf32>
    %225 = arith.addf %219, %224 : vector<256x32xf32>
    %c0_185 = arith.constant 0 : index
    %c1_186 = arith.constant 1 : index
    %c0_187 = arith.constant 0 : index
    %226 = vector.load %arg14[%c0_185, %c1_186, %c0_187] : memref<18x18x48xf32, #tpu.memory_space<vmem>>, vector<18x16x48xf32>
    %227 = vector.extract_strided_slice %226 {offsets = [0, 0, 0], sizes = [16, 16, 48], strides = [1, 1, 1]} : vector<18x16x48xf32> to vector<16x16x48xf32>
    %228 = vector.shape_cast %227 : vector<16x16x48xf32> to vector<256x48xf32>
    %c1_188 = arith.constant 1 : index
    %c0_189 = arith.constant 0 : index
    %c0_190 = arith.constant 0 : index
    %229 = vector.load %arg5[%c1_188, %c0_189, %c0_190] : memref<9x48x32xf32, #tpu.memory_space<vmem>>, vector<1x48x32xf32>
    %230 = vector.shape_cast %229 : vector<1x48x32xf32> to vector<48x32xf32>
    %cst_191 = arith.constant dense<0.000000e+00> : vector<256x32xf32>
    %231 = tpu.matmul %228, %230, %cst_191 {dimension_numbers = #tpu.dot_dimension_numbers<[1], [0], [0], [1], [0, 0, 1, 1], [], []>} : vector<256x48xf32>, vector<48x32xf32>, vector<256x32xf32> -> vector<256x32xf32>
    %232 = arith.addf %225, %231 : vector<256x32xf32>
    %233 = vector.extract_strided_slice %226 {offsets = [1, 0, 0], sizes = [16, 16, 48], strides = [1, 1, 1]} : vector<18x16x48xf32> to vector<16x16x48xf32>
    %234 = vector.shape_cast %233 : vector<16x16x48xf32> to vector<256x48xf32>
    %c4_192 = arith.constant 4 : index
    %c0_193 = arith.constant 0 : index
    %c0_194 = arith.constant 0 : index
    %235 = vector.load %arg5[%c4_192, %c0_193, %c0_194] : memref<9x48x32xf32, #tpu.memory_space<vmem>>, vector<1x48x32xf32>
    %236 = vector.shape_cast %235 : vector<1x48x32xf32> to vector<48x32xf32>
    %cst_195 = arith.constant dense<0.000000e+00> : vector<256x32xf32>
    %237 = tpu.matmul %234, %236, %cst_195 {dimension_numbers = #tpu.dot_dimension_numbers<[1], [0], [0], [1], [0, 0, 1, 1], [], []>} : vector<256x48xf32>, vector<48x32xf32>, vector<256x32xf32> -> vector<256x32xf32>
    %238 = arith.addf %232, %237 : vector<256x32xf32>
    %239 = vector.extract_strided_slice %226 {offsets = [2, 0, 0], sizes = [16, 16, 48], strides = [1, 1, 1]} : vector<18x16x48xf32> to vector<16x16x48xf32>
    %240 = vector.shape_cast %239 : vector<16x16x48xf32> to vector<256x48xf32>
    %c7_196 = arith.constant 7 : index
    %c0_197 = arith.constant 0 : index
    %c0_198 = arith.constant 0 : index
    %241 = vector.load %arg5[%c7_196, %c0_197, %c0_198] : memref<9x48x32xf32, #tpu.memory_space<vmem>>, vector<1x48x32xf32>
    %242 = vector.shape_cast %241 : vector<1x48x32xf32> to vector<48x32xf32>
    %cst_199 = arith.constant dense<0.000000e+00> : vector<256x32xf32>
    %243 = tpu.matmul %240, %242, %cst_199 {dimension_numbers = #tpu.dot_dimension_numbers<[1], [0], [0], [1], [0, 0, 1, 1], [], []>} : vector<256x48xf32>, vector<48x32xf32>, vector<256x32xf32> -> vector<256x32xf32>
    %244 = arith.addf %238, %243 : vector<256x32xf32>
    %c0_200 = arith.constant 0 : index
    %c2_201 = arith.constant 2 : index
    %c0_202 = arith.constant 0 : index
    %245 = vector.load %arg14[%c0_200, %c2_201, %c0_202] : memref<18x18x48xf32, #tpu.memory_space<vmem>>, vector<18x16x48xf32>
    %246 = vector.extract_strided_slice %245 {offsets = [0, 0, 0], sizes = [16, 16, 48], strides = [1, 1, 1]} : vector<18x16x48xf32> to vector<16x16x48xf32>
    %247 = vector.shape_cast %246 : vector<16x16x48xf32> to vector<256x48xf32>
    %c2_203 = arith.constant 2 : index
    %c0_204 = arith.constant 0 : index
    %c0_205 = arith.constant 0 : index
    %248 = vector.load %arg5[%c2_203, %c0_204, %c0_205] : memref<9x48x32xf32, #tpu.memory_space<vmem>>, vector<1x48x32xf32>
    %249 = vector.shape_cast %248 : vector<1x48x32xf32> to vector<48x32xf32>
    %cst_206 = arith.constant dense<0.000000e+00> : vector<256x32xf32>
    %250 = tpu.matmul %247, %249, %cst_206 {dimension_numbers = #tpu.dot_dimension_numbers<[1], [0], [0], [1], [0, 0, 1, 1], [], []>} : vector<256x48xf32>, vector<48x32xf32>, vector<256x32xf32> -> vector<256x32xf32>
    %251 = arith.addf %244, %250 : vector<256x32xf32>
    %252 = vector.extract_strided_slice %245 {offsets = [1, 0, 0], sizes = [16, 16, 48], strides = [1, 1, 1]} : vector<18x16x48xf32> to vector<16x16x48xf32>
    %253 = vector.shape_cast %252 : vector<16x16x48xf32> to vector<256x48xf32>
    %c5_207 = arith.constant 5 : index
    %c0_208 = arith.constant 0 : index
    %c0_209 = arith.constant 0 : index
    %254 = vector.load %arg5[%c5_207, %c0_208, %c0_209] : memref<9x48x32xf32, #tpu.memory_space<vmem>>, vector<1x48x32xf32>
    %255 = vector.shape_cast %254 : vector<1x48x32xf32> to vector<48x32xf32>
    %cst_210 = arith.constant dense<0.000000e+00> : vector<256x32xf32>
    %256 = tpu.matmul %253, %255, %cst_210 {dimension_numbers = #tpu.dot_dimension_numbers<[1], [0], [0], [1], [0, 0, 1, 1], [], []>} : vector<256x48xf32>, vector<48x32xf32>, vector<256x32xf32> -> vector<256x32xf32>
    %257 = arith.addf %251, %256 : vector<256x32xf32>
    %258 = vector.extract_strided_slice %245 {offsets = [2, 0, 0], sizes = [16, 16, 48], strides = [1, 1, 1]} : vector<18x16x48xf32> to vector<16x16x48xf32>
    %259 = vector.shape_cast %258 : vector<16x16x48xf32> to vector<256x48xf32>
    %c8_211 = arith.constant 8 : index
    %c0_212 = arith.constant 0 : index
    %c0_213 = arith.constant 0 : index
    %260 = vector.load %arg5[%c8_211, %c0_212, %c0_213] : memref<9x48x32xf32, #tpu.memory_space<vmem>>, vector<1x48x32xf32>
    %261 = vector.shape_cast %260 : vector<1x48x32xf32> to vector<48x32xf32>
    %cst_214 = arith.constant dense<0.000000e+00> : vector<256x32xf32>
    %262 = tpu.matmul %259, %261, %cst_214 {dimension_numbers = #tpu.dot_dimension_numbers<[1], [0], [0], [1], [0, 0, 1, 1], [], []>} : vector<256x48xf32>, vector<48x32xf32>, vector<256x32xf32> -> vector<256x32xf32>
    %263 = arith.addf %257, %262 : vector<256x32xf32>
    %c0_215 = arith.constant 0 : index
    %c0_216 = arith.constant 0 : index
    %264 = vector.load %arg9[%c0_215, %c0_216] : memref<1x32xf32, #tpu.memory_space<vmem>>, vector<1x32xf32>
    %265 = vector.broadcast %264 : vector<1x32xf32> to vector<256x32xf32>
    %266 = arith.addf %263, %265 : vector<256x32xf32>
    %cst_217 = arith.constant 0.000000e+00 : f32
    %267 = vector.broadcast %cst_217 : f32 to vector<256x32xf32>
    %268 = arith.maximumf %266, %267 : vector<256x32xf32>
    %269 = vector.shape_cast %268 : vector<256x32xf32> to vector<16x16x32xf32>
    %270 = vector.shape_cast %269 : vector<16x16x32xf32> to vector<1x16x16x32xf32>
    %c0_218 = arith.constant 0 : index
    %c0_219 = arith.constant 0 : index
    %c0_220 = arith.constant 0 : index
    %c0_221 = arith.constant 0 : index
    %271 = vector.load %arg10[%c0_218, %c0_219, %c0_220, %c0_221] : memref<1x16x16x32xf32, #tpu.memory_space<vmem>>, vector<1x16x16x32xf32>
    tpu.vector_store %arg10[%c0_218, %c0_219, %c0_220, %c0_221], %270 {strides = array<i32>} : memref<1x16x16x32xf32, #tpu.memory_space<vmem>>, vector<1x16x16x32xf32>,
    return
  }
  func.func @transform_0(%arg0: i32) -> (i32, i32, i32, i32) {
    %c0_i32 = arith.constant 0 : i32
    %c0_i32_0 = arith.constant 0 : i32
    %c0_i32_1 = arith.constant 0 : i32
    %c0_i32_2 = arith.constant 0 : i32
    return %arg0, %c0_i32, %c0_i32_0, %c0_i32_1 : i32, i32, i32, i32
  }
  func.func @transform_1(%arg0: i32) -> (i32, i32, i32) {
    %c0_i32 = arith.constant 0 : i32
    %c0_i32_0 = arith.constant 0 : i32
    %c0_i32_1 = arith.constant 0 : i32
    %c0_i32_2 = arith.constant 0 : i32
    return %c0_i32, %c0_i32_0, %c0_i32_1 : i32, i32, i32
  }
  func.func @transform_2(%arg0: i32) -> (i32, i32, i32) {
    %c0_i32 = arith.constant 0 : i32
    %c0_i32_0 = arith.constant 0 : i32
    %c0_i32_1 = arith.constant 0 : i32
    %c0_i32_2 = arith.constant 0 : i32
    return %c0_i32, %c0_i32_0, %c0_i32_1 : i32, i32, i32
  }
  func.func @transform_3(%arg0: i32) -> (i32, i32, i32) {
    %c0_i32 = arith.constant 0 : i32
    %c0_i32_0 = arith.constant 0 : i32
    %c0_i32_1 = arith.constant 0 : i32
    %c0_i32_2 = arith.constant 0 : i32
    return %c0_i32, %c0_i32_0, %c0_i32_1 : i32, i32, i32
  }
  func.func @transform_4(%arg0: i32) -> (i32, i32, i32) {
    %c0_i32 = arith.constant 0 : i32
    %c0_i32_0 = arith.constant 0 : i32
    %c0_i32_1 = arith.constant 0 : i32
    %c0_i32_2 = arith.constant 0 : i32
    return %c0_i32, %c0_i32_0, %c0_i32_1 : i32, i32, i32
  }
  func.func @transform_5(%arg0: i32) -> (i32, i32) {
    %c0_i32 = arith.constant 0 : i32
    %c0_i32_0 = arith.constant 0 : i32
    %c0_i32_1 = arith.constant 0 : i32
    return %c0_i32, %c0_i32_0 : i32, i32
  }
  func.func @transform_6(%arg0: i32) -> (i32, i32) {
    %c0_i32 = arith.constant 0 : i32
    %c0_i32_0 = arith.constant 0 : i32
    %c0_i32_1 = arith.constant 0 : i32
    return %c0_i32, %c0_i32_0 : i32, i32
  }
  func.func @transform_7(%arg0: i32) -> (i32, i32) {
    %c0_i32 = arith.constant 0 : i32
    %c0_i32_0 = arith.constant 0 : i32
    %c0_i32_1 = arith.constant 0 : i32
    return %c0_i32, %c0_i32_0 : i32, i32
  }
  func.func @transform_8(%arg0: i32) -> (i32, i32) {
    %c0_i32 = arith.constant 0 : i32
    %c0_i32_0 = arith.constant 0 : i32
    %c0_i32_1 = arith.constant 0 : i32
    return %c0_i32, %c0_i32_0 : i32, i32
  }
  func.func @transform_9(%arg0: i32) -> (i32, i32, i32, i32) {
    %c0_i32 = arith.constant 0 : i32
    %c0_i32_0 = arith.constant 0 : i32
    %c0_i32_1 = arith.constant 0 : i32
    %c0_i32_2 = arith.constant 0 : i32
    return %arg0, %c0_i32, %c0_i32_0, %c0_i32_1 : i32, i32, i32, i32
  }
}

</mosaic_0001>

<bundles_post_ra>
// kernel: lr_frame_feature_extractor.1
= control target key start
LH: loop header
LB: loop body
LE: loop exit
PB: predicated region body
PF: predicated region fallthrough
CT: control target
= control target key end

     0   :  { %14 = vsyncpa [#allocation7], 0  ;;  %s22591_s0 = inlined_call_operand.vmem [shape: f32[2,16,16,4], index: 0, kind: input, shape index: {}]   ;;  %s22592_s1 = inlined_call_operand.vmem [shape: f32[9,4,32], index: 1, kind: input, shape index: {}]   ;;  %s22593_s2 = inlined_call_operand.vmem [shape: f32[9,32,48], index: 2, kind: input, shape index: {}]   ;;  %s22594_s3 = inlined_call_operand.vmem [shape: f32[9,48,48], index: 3, kind: input, shape index: {}]   ;;  %s22595_s4 = inlined_call_operand.vmem [shape: f32[9,48,32], index: 4, kind: input, shape index: {}]   ;;  %s22596_s5 = inlined_call_operand.vmem [shape: f32[1,32], index: 5, kind: input, shape index: {}]   ;;  %s22597_s6 = inlined_call_operand.vmem [shape: f32[1,48], index: 6, kind: input, shape index: {}]   ;;  %s22598_s7 = inlined_call_operand.vmem [shape: f32[1,48], index: 7, kind: input, shape index: {}]   ;;  %s22599_s8 = inlined_call_operand.vmem [shape: f32[1,32], index: 8, kind: input, shape index: {}]   ;;  %s22600_s9 = inlined_call_operand.hbm [shape: f32[2,16,16,32], index: 9, kind: output, shape index: {}]  }
   0x1   :  { %16 = vsyncpa [#allocation7 + $0x1], 0  ;;  %s18172_s30 = smov 0   ;;  %s18174_s10 = smov 0  }
   0x2   :  { %s18176_s11 = smov 0   ;;  %s18178_s12 = smov 0  }
   0x3 LB: > { %s18193_s13 = sadd.s32 4294967295, %s18116_s12   ;;  %s12046_s14 = sadd.s32 4294967294, %s18116_s12   ;;  %s18116_s12 = sphi %s18178_s12, %s22606_s12   ;;  %s18112_s11 = sphi %s18176_s11, %s22605_s11   ;;  %s18108_s10 = sphi %s18174_s10, %s22604_s10   ;;  %s18104_s30 = sphi %s18172_s30, %s22603_s30  }
   0x4   : > { %s18197_s15 = sadd.s32 1, %s18116_s12   ;;  %s223_s16 = sadd.s32 1, %s18112_s11 }
   0x5   : > { %s220_s17 = ssub.s32 %s18116_s12, %s18197_s15  ;;  %p233_p0 = scmp.ne.s32.totalorder %s18112_s11, %s18108_s10 }
   0x6   : > { %p221_p1 = scmp.eq.s32.totalorder %s220_s17, 0  ;;  %p234_p2 = scmp.eq.s32.totalorder %s18193_s13, 1 }
   0x7   : > { %p239_p3 = scmp.ne.s32.totalorder %s18108_s10, %s18104_s30  ;;  %p240_p4 = scmp.eq.s32.totalorder %s12046_s14, 1 }
   0x8   : > { %s18208_s18 = scalar_select %p221_p1, %s18112_s11, %s223_s16  }
   0x9   : > { %p18210_p5 = por %p234_p2, %p233_p0  ;;  %p18214_p6 = por %p240_p4, %p239_p3 }
   0xa   : > { %p12049_p7 = scmp.ge.s32.totalorder %s18116_s12, 1  ;;  %p290_p8 = scmp.lt.s32.totalorder %s18116_s12, 3 }
   0xc   : > { %p291_p9 = pnand %p12049_p7, %p290_p8 }
   0xd   : > { %v12053_v0 = vld [vmem:[%s22592_s1 + $0xc] sm:$0xf] (!%p291_p9)  ;;  %vm753_vm0 = vcmask (!%p291_p9), 1043456   ;;  %p326_p10 = scmp.lt.s32.totalorder (!%p291_p9), %s18193_s13, 1  ;;  %vm331_vm1 = vcmask (!%p291_p9), 31744   ;;  %v18118_v1 = vmov (!%p291_p9), 0.0  }
   0xe   : > { %294 = sbr.rel (%p291_p9) target bundleno = 3068 (0xbfc), region = 56  ;;  %14666 = vmatprep.subr.msk.mxu0 (!%p291_p9), %vm753_vm0, %v12053_v0  ;;  %336 = vst.msk [vmem:[#allocation2 + $0x18] sm:$0xff] (!%p291_p9), %vm331_vm1, %v18118_v1  ;;  %337 = vst.msk [vmem:[#allocation2 + $0x20] sm:$0xff] (!%p291_p9), %vm331_vm1, %v18118_v1  ;;  %v18300_v2 = vld [vmem:[%s22592_s1] sm:$0xf] (!%p291_p9)  ;;  %vm334_vm2 = vcmask (!%p291_p9), 25600  }
   0xf   : > { %332 = vst.msk [vmem:[#allocation2] sm:$0xff] (!%p291_p9), %vm331_vm1, %v18118_v1  ;;  %333 = vst.msk [vmem:[#allocation2 + $0x8] sm:$0xff] (!%p291_p9), %vm331_vm1, %v18118_v1  ;;  %14667 = vmatpush3.msk.msra.mxu0 (!%p291_p9), %vm753_vm0, %v12053_v0  ;;  %v18408_v30 = vld [vmem:[%s22592_s1 + $0x18] sm:$0xf] (!%p291_p9)  ;;  %vm387_vm3 = vcmask (!%p291_p9), 261120   ;;  %vm390_vm4 = vcmask (!%p291_p9), 254976  }
  0x10   : > { %339 = vst.msk [vmem:[#allocation2 + $0x30] sm:$0xff] (!%p291_p9), %vm331_vm1, %v18118_v1  ;;  %340 = vst.msk [vmem:[#allocation2 + $0x38] sm:$0xff] (!%p291_p9), %vm331_vm1, %v18118_v1  ;;  %14716 = vmatprep.subr.msk.mxu0 (!%p291_p9), %vm753_vm0, %v18300_v2  ;;  %vm443_vm5 = vcmask (!%p291_p9), 392192   ;;  %vm446_vm6 = vcmask (!%p291_p9), 386048   ;;  %s13360_s16 = sshll.u32 (!%p291_p9), %s18193_s13, 12 }
  0x11   : > { %342 = vst.msk [vmem:[#allocation2 + $0x48] sm:$0xff] (!%p291_p9), %vm331_vm1, %v18118_v1  ;;  %343 = vst.msk [vmem:[#allocation2 + $0x50] sm:$0xff] (!%p291_p9), %vm331_vm1, %v18118_v1  ;;  %s22540_s23 = scalar_lea.hbm (!%p291_p9), %s22600_s9, %s13360_s16 }
  0x12   : > { %345 = vst.msk [vmem:[#allocation2 + $0x60] sm:$0xff] (!%p291_p9), %vm331_vm1, %v18118_v1  ;;  %346 = vst.msk [vmem:[#allocation2 + $0x68] sm:$0xff] (!%p291_p9), %vm331_vm1, %v18118_v1 }
  0x13   : > { %348 = vst.msk [vmem:[#allocation2 + $0x78] sm:$0xff] (!%p291_p9), %vm331_vm1, %v18118_v1  ;;  %349 = vst.msk [vmem:[#allocation2 + $0x80] sm:$0xff] (!%p291_p9), %vm331_vm1, %v18118_v1 }
  0x14   : > { %351 = vst.msk [vmem:[#allocation2 + $0x90] sm:$0xff] (!%p291_p9), %vm331_vm1, %v18118_v1  ;;  %352 = vst.msk [vmem:[#allocation2 + $0x98] sm:$0xff] (!%p291_p9), %vm331_vm1, %v18118_v1 }
  0x15   : > { %354 = vst.msk [vmem:[#allocation2 + $0xa8] sm:$0xff] %vm331_vm1, %v18118_v1  ;;  %355 = vst.msk [vmem:[#allocation2 + $0xb0] sm:$0xff] %vm331_vm1, %v18118_v1  ;;  %s327_s25 = scalar_select %p326_p10, %s18193_s13, 1 }
  0x16   : > { %357 = vst.msk [vmem:[#allocation2 + $0xc0] sm:$0xff] %vm331_vm1, %v18118_v1  ;;  %358 = vst.msk [vmem:[#allocation2 + $0xc8] sm:$0xff] %vm331_vm1, %v18118_v1 }
  0x17   : > { %360 = vst.msk [vmem:[#allocation2 + $0xd8] sm:$0xff] %vm331_vm1, %v18118_v1  ;;  %361 = vst.msk [vmem:[#allocation2 + $0xe0] sm:$0xff] %vm331_vm1, %v18118_v1  ;;  %s13359_s26 = sshll.u32 %s327_s25, 8  ;;  %s18119_s25 = smov [#allocation6]  }
  0x18   : > { %363 = vst.msk [vmem:[#allocation2 + $0xf0] sm:$0xff] %vm331_vm1, %v18118_v1  ;;  %364 = vst.msk [vmem:[#allocation2 + $0xf8] sm:$0xff] %vm331_vm1, %v18118_v1  ;;  %s18347_s29 = scalar_lea.vmem %s22591_s0, %s13359_s26  ;;  %s323_s26 = sand.u32 1, %s18108_s10  }
  0x19   : > { %366 = vst.msk [vmem:[#allocation2 + $0x108] sm:$0xff] %vm331_vm1, %v18118_v1  ;;  %367 = vst.msk [vmem:[#allocation2 + $0x110] sm:$0xff] %vm331_vm1, %v18118_v1  ;;  %v553_v3 = vld [vmem:[%s18347_s29] sm:$0xff]  ;;  %v554_v4 = vld [vmem:[%s18347_s29 + $0x8] sm:$0xff]  ;;  %s22550_s13 = scalar_lea.sflag [#allocation7], %s323_s26  ;;  %s18058_s27 = sshll.u32 %s18119_s25, 4  ;;  %s18059_s27 = int_to_ptr.vmem [resolvable:$false] %s18058_s27 }
  0x1a   : > { %369 = vst.msk [vmem:[#allocation2 + $0x120] sm:$0xff] %vm331_vm1, %v18118_v1  ;;  %370 = vst.msk [vmem:[#allocation2 + $0x128] sm:$0xff] %vm331_vm1, %v18118_v1  ;;  %v555_v5 = vld [vmem:[%s18347_s29 + $0x10] sm:$0xff]  ;;  %v556_v6 = vld [vmem:[%s18347_s29 + $0x18] sm:$0xff]  ;;  %s18060_s28 = scalar_lea.vmem %s18059_s27, 8192 }
  0x1b   : > { %372 = vst.msk [vmem:[#allocation2 + $0x138] sm:$0xff] %vm331_vm1, %v18118_v1  ;;  %373 = vst.msk [vmem:[#allocation2 + $0x140] sm:$0xff] %vm331_vm1, %v18118_v1  ;;  %v557_v7 = vld [vmem:[%s18347_s29 + $0x20] sm:$0xff]  ;;  %v558_v8 = vld [vmem:[%s18347_s29 + $0x28] sm:$0xff] }
  0x1c   : > { %375 = vst.msk [vmem:[#allocation2 + $0x150] sm:$0xff] %vm331_vm1, %v18118_v1  ;;  %376 = vst.msk [vmem:[#allocation2 + $0x158] sm:$0xff] %vm331_vm1, %v18118_v1  ;;  %v559_v9 = vld [vmem:[%s18347_s29 + $0x30] sm:$0xff]  ;;  %v560_v10 = vld [vmem:[%s18347_s29 + $0x38] sm:$0xff] }
  0x1d   : > { %378 = vst.msk [vmem:[#allocation2 + $0x168] sm:$0xff] %vm331_vm1, %v18118_v1  ;;  %379 = vst.msk [vmem:[#allocation2 + $0x170] sm:$0xff] %vm331_vm1, %v18118_v1  ;;  %v561_v11 = vld [vmem:[%s18347_s29 + $0x40] sm:$0xff]  ;;  %v562_v12 = vld [vmem:[%s18347_s29 + $0x48] sm:$0xff] }
  0x1e   : > { %381 = vst.msk [vmem:[#allocation2 + $0x180] sm:$0xff] %vm331_vm1, %v18118_v1  ;;  %382 = vst.msk [vmem:[#allocation2 + $0x188] sm:$0xff] %vm331_vm1, %v18118_v1  ;;  %v563_v13 = vld [vmem:[%s18347_s29 + $0x50] sm:$0xff]  ;;  %v564_v14 = vld [vmem:[%s18347_s29 + $0x58] sm:$0xff] }
  0x1f   : > { %384 = vst.msk [vmem:[#allocation2 + $0x198] sm:$0xff] %vm331_vm1, %v18118_v1  ;;  %385 = vst.msk [vmem:[#allocation2 + $0x1a0] sm:$0xff] %vm331_vm1, %v18118_v1  ;;  %v565_v15 = vld [vmem:[%s18347_s29 + $0x60] sm:$0xff]  ;;  %v566_v16 = vld [vmem:[%s18347_s29 + $0x68] sm:$0xff] }
  0x20   : > { %338 = vst.msk [vmem:[#allocation2 + $0x28] sm:$0x3] %vm334_vm2, %v18118_v1  ;;  %335 = vst.msk [vmem:[#allocation2 + $0x10] sm:$0x3] %vm334_vm2, %v18118_v1  ;;  %v567_v17 = vld [vmem:[%s18347_s29 + $0x70] sm:$0xff]  ;;  %v568_v18 = vld [vmem:[%s18347_s29 + $0x78] sm:$0xff] }
  0x21   : > { %341 = vst.msk [vmem:[#allocation2 + $0x40] sm:$0x3] %vm334_vm2, %v18118_v1  ;;  %344 = vst.msk [vmem:[#allocation2 + $0x58] sm:$0x3] %vm334_vm2, %v18118_v1  ;;  %v569_v19 = vld [vmem:[%s18347_s29 + $0x80] sm:$0xff]  ;;  %v570_v20 = vld [vmem:[%s18347_s29 + $0x88] sm:$0xff] }
  0x22   : > { %347 = vst.msk [vmem:[#allocation2 + $0x70] sm:$0x3] %vm334_vm2, %v18118_v1  ;;  %350 = vst.msk [vmem:[#allocation2 + $0x88] sm:$0x3] %vm334_vm2, %v18118_v1  ;;  %v571_v21 = vld [vmem:[%s18347_s29 + $0x90] sm:$0xff]  ;;  %v572_v22 = vld [vmem:[%s18347_s29 + $0x98] sm:$0xff] }
  0x23   : > { %353 = vst.msk [vmem:[#allocation2 + $0xa0] sm:$0x3] %vm334_vm2, %v18118_v1  ;;  %356 = vst.msk [vmem:[#allocation2 + $0xb8] sm:$0x3] %vm334_vm2, %v18118_v1  ;;  %v573_v23 = vld [vmem:[%s18347_s29 + $0xa0] sm:$0xff]  ;;  %v574_v24 = vld [vmem:[%s18347_s29 + $0xa8] sm:$0xff] }
  0x24   : > { %359 = vst.msk [vmem:[#allocation2 + $0xd0] sm:$0x3] %vm334_vm2, %v18118_v1  ;;  %362 = vst.msk [vmem:[#allocation2 + $0xe8] sm:$0x3] %vm334_vm2, %v18118_v1  ;;  %v575_v25 = vld [vmem:[%s18347_s29 + $0xb0] sm:$0xff]  ;;  %v576_v26 = vld [vmem:[%s18347_s29 + $0xb8] sm:$0xff] }
  0x25   : > { %365 = vst.msk [vmem:[#allocation2 + $0x100] sm:$0x3] %vm334_vm2, %v18118_v1  ;;  %368 = vst.msk [vmem:[#allocation2 + $0x118] sm:$0x3] %vm334_vm2, %v18118_v1  ;;  %v577_v35 = vld [vmem:[%s18347_s29 + $0xc0] sm:$0xff]  ;;  %v578_v36 = vld [vmem:[%s18347_s29 + $0xc8] sm:$0xff] }
  0x26   : > { %371 = vst.msk [vmem:[#allocation2 + $0x130] sm:$0x3] %vm334_vm2, %v18118_v1  ;;  %374 = vst.msk [vmem:[#allocation2 + $0x148] sm:$0x3] %vm334_vm2, %v18118_v1  ;;  %v579_v37 = vld [vmem:[%s18347_s29 + $0xd0] sm:$0xff]  ;;  %v580_v38 = vld [vmem:[%s18347_s29 + $0xd8] sm:$0xff] }
  0x27   : > { %377 = vst.msk [vmem:[#allocation2 + $0x160] sm:$0x3] %vm334_vm2, %v18118_v1  ;;  %380 = vst.msk [vmem:[#allocation2 + $0x178] sm:$0x3] %vm334_vm2, %v18118_v1  ;;  %v581_v39 = vld [vmem:[%s18347_s29 + $0xe0] sm:$0xff]  ;;  %v582_v40 = vld [vmem:[%s18347_s29 + $0xe8] sm:$0xff] }
  0x28   : > { %383 = vst.msk [vmem:[#allocation2 + $0x190] sm:$0x3] %vm334_vm2, %v18118_v1  ;;  %386 = vst.msk [vmem:[#allocation2 + $0x1a8] sm:$0x3] %vm334_vm2, %v18118_v1  ;;  %v583_v41 = vld [vmem:[%s18347_s29 + $0xf0] sm:$0xff]  ;;  %v584_v42 = vld [vmem:[%s18347_s29 + $0xf8] sm:$0xff] }
  0x29   : > { %586 = vst.msk [vmem:[#allocation2 + $0x19] sm:$0xff] %vm331_vm1, %v553_v3  ;;  %587 = vst.msk [vmem:[#allocation2 + $0x21] sm:$0xff] %vm331_vm1, %v554_v4  ;;  %s12050_s29 = sshll.u32 %s323_s26, 8 }
  0x2a   : > { %588 = vst.msk [vmem:[#allocation2 + $0x31] sm:$0xff] %vm331_vm1, %v555_v5  ;;  %589 = vst.msk [vmem:[#allocation2 + $0x39] sm:$0xff] %vm331_vm1, %v556_v6  ;;  %v618_v5 = vld [vmem:[#allocation2] sm:$0xff]  ;;  %v619_v6 = vld [vmem:[#allocation2 + $0x8] sm:$0xff]  ;;  %s22443_s14 = scalar_lea.vmem [#allocation6], %s12050_s29 }
  0x2b   : > { %590 = vst.msk [vmem:[#allocation2 + $0x49] sm:$0xff] %vm331_vm1, %v557_v7  ;;  %591 = vst.msk [vmem:[#allocation2 + $0x51] sm:$0xff] %vm331_vm1, %v558_v8  ;;  %v12154_v7 = vld [vmem:[%s22592_s1 + $0x4] sm:$0xf]  ;;  %v12188_v8 = vld [vmem:[%s22592_s1 + $0x10] sm:$0xf] }
  0x2c   : > { %592 = vst.msk [vmem:[#allocation2 + $0x61] sm:$0xff] %vm331_vm1, %v559_v9  ;;  %593 = vst.msk [vmem:[#allocation2 + $0x69] sm:$0xff] %vm331_vm1, %v560_v10  ;;  %v652_v9 = vld [vmem:[#allocation2 + $0x198] sm:$0xff]  ;;  %v653_v10 = vld [vmem:[#allocation2 + $0x1a0] sm:$0xff]  ;;  %s11984_s17 = sshll.u32 %s22443_s14, 4  ;;  %s22542_s17 = int_to_ptr.vmem [resolvable:$true] %s11984_s17 }
  0x2d   : > { %594 = vst.msk [vmem:[#allocation2 + $0x79] sm:$0xff] %vm331_vm1, %v561_v11  ;;  %595 = vst.msk [vmem:[#allocation2 + $0x81] sm:$0xff] %vm331_vm1, %v562_v12  ;;  %v1484_v11 = vld [vmem:[#allocation2 + $0x1] sm:$0xff]  ;;  %v1485_v12 = vld [vmem:[#allocation2 + $0x9] sm:$0xff]  ;;  %s18054_s24 = scalar_lea.vmem %s22542_s17, 4096  ;;  %p18061_p0 = scmp.lt.s32.totalorder %s22542_s17, %s18059_s27 }
  0x2e   : > { %596 = vst.msk [vmem:[#allocation2 + $0x91] sm:$0xff] %vm331_vm1, %v563_v13  ;;  %597 = vst.msk [vmem:[#allocation2 + $0x99] sm:$0xff] %vm331_vm1, %v564_v14  ;;  %v18691_v14 = vld [vmem:[%s22592_s1 + $0x1c] sm:$0xf]  ;;  %p18055_p11 = scmp.ne.s32.totalorder %s22542_s17, %s18054_s24  ;;  %p18062_p1 = scmp.lt.s32.totalorder %s18060_s28, %s18054_s24 }
  0x2f   : > { %598 = vst.msk [vmem:[#allocation2 + $0xa9] sm:$0xff] %vm331_vm1, %v565_v15  ;;  %599 = vst.msk [vmem:[#allocation2 + $0xb1] sm:$0xff] %vm331_vm1, %v566_v16 }
  0x30   : > { %600 = vst.msk [vmem:[#allocation2 + $0xc1] sm:$0xff] %vm331_vm1, %v567_v17  ;;  %601 = vst.msk [vmem:[#allocation2 + $0xc9] sm:$0xff] %vm331_vm1, %v568_v18  ;;  %v18394_v27 = vld [vmem:[#allocation2 + $0x18] sm:$0xff]  ;;  %v18396_v28 = vld [vmem:[#allocation2 + $0x20] sm:$0xff]  ;;  %p18056_p12 = pnand %p18055_p11, %p18210_p5  ;;  %p18063_p2 = por %p18062_p1, %p18061_p0 }
  0x31   : > { %602 = vst.msk [vmem:[#allocation2 + $0xd9] sm:$0xff] %vm331_vm1, %v569_v19  ;;  %603 = vst.msk [vmem:[#allocation2 + $0xe1] sm:$0xff] %vm331_vm1, %v570_v20  ;;  %v18398_v29 = vld [vmem:[#allocation2 + $0x30] sm:$0xff]  ;;  %14668 = vmatprep.mubr.msk.f32.mxu0 %vm331_vm1, %v18394_v27  ;;  %v18416_v31 = vld [vmem:[#allocation2 + $0x38] sm:$0xff] }
  0x32   : > { %604 = vst.msk [vmem:[#allocation2 + $0xf1] sm:$0xff] %vm331_vm1, %v571_v21  ;;  %605 = vst.msk [vmem:[#allocation2 + $0xf9] sm:$0xff] %vm331_vm1, %v572_v22  ;;  %14669 = vmatmul.mubr.msk.f32.vlgmr.msra.gmra.mrb[0].mxu0 %vm331_vm1, %v18396_v28  ;;  %v18418_v32 = vld [vmem:[#allocation2 + $0x48] sm:$0xff]  ;;  %v18426_v33 = vld [vmem:[#allocation2 + $0x50] sm:$0xff]  ;;  %p18057_p13 = pneg %p18056_p12 }
  0x33   : > { %606 = vst.msk [vmem:[#allocation2 + $0x109] sm:$0xff] %vm331_vm1, %v573_v23  ;;  %607 = vst.msk [vmem:[#allocation2 + $0x111] sm:$0xff] %vm331_vm1, %v574_v24  ;;  %14717 = vmatpush3.msk.msra.mxu0 %vm753_vm0, %v18300_v2  ;;  %14671 = vmatprep.mubr.msk.f32.mxu0 %vm331_vm1, %v18398_v29  ;;  %v18428_v34 = vld [vmem:[#allocation2 + $0x60] sm:$0xff]  ;;  %v18448_v43 = vld [vmem:[#allocation2 + $0x68] sm:$0xff] }
  0x34   : > { %608 = vst.msk [vmem:[#allocation2 + $0x121] sm:$0xff] %vm331_vm1, %v575_v25  ;;  %609 = vst.msk [vmem:[#allocation2 + $0x129] sm:$0xff] %vm331_vm1, %v576_v26  ;;  %14766 = vmatprep.subr.msk.mxu0 %vm753_vm0, %v18408_v30  ;;  %v18452_v44 = vld [vmem:[#allocation2 + $0x78] sm:$0xff]  ;;  %v18458_v45 = vld [vmem:[#allocation2 + $0x80] sm:$0xff]  ;;  %p18064_p3 = pnand %p18063_p2, %p18057_p13 }
  0x35   : > { %610 = vst.msk [vmem:[#allocation2 + $0x139] sm:$0xff] %vm331_vm1, %v577_v35  ;;  %611 = vst.msk [vmem:[#allocation2 + $0x141] sm:$0xff] %vm331_vm1, %v578_v36  ;;  %v18460_v46 = vld [vmem:[#allocation2 + $0x90] sm:$0xff]  ;;  %v18466_v47 = vld [vmem:[#allocation2 + $0x98] sm:$0xff] }
  0x36   : > { %14672 = vmatmul.mubr.msk.f32.gmra.mrb[2].mxu0 %vm331_vm1, %v18416_v31  ;;  %612 = vst.msk [vmem:[#allocation2 + $0x151] sm:$0xff] %vm331_vm1, %v579_v37  ;;  %613 = vst.msk [vmem:[#allocation2 + $0x159] sm:$0xff] %vm331_vm1, %v580_v38  ;;  %v18468_v48 = vld [vmem:[#allocation2 + $0xa8] sm:$0xff]  ;;  %v18474_v49 = vld [vmem:[#allocation2 + $0xb0] sm:$0xff] }
  0x37   : > { %14674 = vmatprep.mubr.msk.f32.mxu0 %vm331_vm1, %v18418_v32  ;;  %614 = vst.msk [vmem:[#allocation2 + $0x169] sm:$0xff] %vm331_vm1, %v581_v39  ;;  %615 = vst.msk [vmem:[#allocation2 + $0x171] sm:$0xff] %vm331_vm1, %v582_v40  ;;  %v18476_v50 = vld [vmem:[#allocation2 + $0xc0] sm:$0xff]  ;;  %v18482_v51 = vld [vmem:[#allocation2 + $0xc8] sm:$0xff] }
  0x38   : > { %616 = vst.msk [vmem:[#allocation2 + $0x181] sm:$0xff] %vm331_vm1, %v583_v41  ;;  %617 = vst.msk [vmem:[#allocation2 + $0x189] sm:$0xff] %vm331_vm1, %v584_v42  ;;  %v18484_v52 = vld [vmem:[#allocation2 + $0xd8] sm:$0xff]  ;;  %v18490_v53 = vld [vmem:[#allocation2 + $0xe0] sm:$0xff] }
  0x39   : > { %v18492_v54 = vld [vmem:[#allocation2 + $0xf0] sm:$0xff]  ;;  %v18498_v55 = vld [vmem:[#allocation2 + $0xf8] sm:$0xff]  ;;  %v1487_v15 = vld [vmem:[#allocation2 + $0x21] sm:$0xff]  ;;  %393 = vst.msk [vmem:[#allocation3 + $0x20] sm:$0xff] %vm387_vm3, %v18118_v1 }
  0x3a   : > { %14675 = vmatmul.mubr.msk.f32.gmra.mrb[4].mxu0 %vm331_vm1, %v18426_v33  ;;  %v18500_v56 = vld [vmem:[#allocation2 + $0x108] sm:$0xff]  ;;  %v18506_v57 = vld [vmem:[#allocation2 + $0x110] sm:$0xff]  ;;  %v18686_v13 = vld [vmem:[#allocation2 + $0x19] sm:$0xff]  ;;  %394 = vst.msk [vmem:[#allocation3 + $0x28] sm:$0x3] %vm390_vm4, %v18118_v1 }
  0x3b   : > { %14677 = vmatprep.mubr.msk.f32.mxu0 %vm331_vm1, %v18428_v34  ;;  %v18508_v58 = vld [vmem:[#allocation2 + $0x120] sm:$0xff]  ;;  %v18514_v59 = vld [vmem:[#allocation2 + $0x128] sm:$0xff]  ;;  %v18697_v16 = vld [vmem:[#allocation2 + $0x31] sm:$0xff]  ;;  %388 = vst.msk [vmem:[#allocation3] sm:$0xff] %vm387_vm3, %v18118_v1 }
  0x3c   : > { %v18516_v60 = vld [vmem:[#allocation2 + $0x138] sm:$0xff]  ;;  %v18522_v61 = vld [vmem:[#allocation2 + $0x140] sm:$0xff]  ;;  %v18706_v18 = vld [vmem:[#allocation2 + $0x49] sm:$0xff]  ;;  %389 = vst.msk [vmem:[#allocation3 + $0x8] sm:$0xff] %vm387_vm3, %v18118_v1 }
  0x3d   : > { %v18524_v62 = vld [vmem:[#allocation2 + $0x150] sm:$0xff]  ;;  %v18530_v63 = vld [vmem:[#allocation2 + $0x158] sm:$0xff]  ;;  %v18714_v20 = vld [vmem:[#allocation2 + $0x61] sm:$0xff]  ;;  %391 = vst.msk [vmem:[#allocation3 + $0x10] sm:$0x3] %vm390_vm4, %v18118_v1 }
  0x3e   : > { %14678 = vmatmul.mubr.msk.f32.gmra.mrb[6].mxu0 %vm331_vm1, %v18448_v43  ;;  %v18532_v0 = vld [vmem:[#allocation2 + $0x168] sm:$0xff]  ;;  %v18538_v2 = vld [vmem:[#allocation2 + $0x170] sm:$0xff]  ;;  %v18704_v17 = vld [vmem:[#allocation2 + $0x39] sm:$0xff]  ;;  %392 = vst.msk [vmem:[#allocation3 + $0x18] sm:$0xff] %vm387_vm3, %v18118_v1 }
  0x3f   : > { %14680 = vmatprep.mubr.msk.f32.mxu0 %vm331_vm1, %v18452_v44  ;;  %v18540_v3 = vld [vmem:[#allocation2 + $0x180] sm:$0xff]  ;;  %v18546_v4 = vld [vmem:[#allocation2 + $0x188] sm:$0xff]  ;;  %v18712_v19 = vld [vmem:[#allocation2 + $0x51] sm:$0xff]  ;;  %395 = vst.msk [vmem:[#allocation3 + $0x30] sm:$0xff] %vm387_vm3, %v18118_v1 }
  0x40   : > { %v18720_v21 = vld [vmem:[#allocation2 + $0x69] sm:$0xff]  ;;  %v18722_v22 = vld [vmem:[#allocation2 + $0x79] sm:$0xff]  ;;  %v18728_v23 = vld [vmem:[#allocation2 + $0x81] sm:$0xff]  ;;  %396 = vst.msk [vmem:[#allocation3 + $0x38] sm:$0xff] %vm387_vm3, %v18118_v1 }
  0x41   : > { %v18730_v24 = vld [vmem:[#allocation2 + $0x91] sm:$0xff]  ;;  %v18736_v25 = vld [vmem:[#allocation2 + $0x99] sm:$0xff]  ;;  %v18738_v26 = vld [vmem:[#allocation2 + $0xa9] sm:$0xff]  ;;  %397 = vst.msk [vmem:[#allocation3 + $0x40] sm:$0x3] %vm390_vm4, %v18118_v1 }
  0x42   : > { %14681 = vmatmul.mubr.msk.f32.gmra.mrb[8].mxu0 %vm331_vm1, %v18458_v45  ;;  %v18776_v35 = vld [vmem:[#allocation2 + $0x111] sm:$0xff]  ;;  %v18778_v36 = vld [vmem:[#allocation2 + $0x121] sm:$0xff]  ;;  %v18784_v37 = vld [vmem:[#allocation2 + $0x129] sm:$0xff]  ;;  %398 = vst.msk [vmem:[#allocation3 + $0x48] sm:$0xff] %vm387_vm3, %v18118_v1 }
  0x43   : > { %14683 = vmatprep.mubr.msk.f32.mxu0 %vm331_vm1, %v18460_v46  ;;  %v18786_v38 = vld [vmem:[#allocation2 + $0x139] sm:$0xff]  ;;  %v18792_v39 = vld [vmem:[#allocation2 + $0x141] sm:$0xff]  ;;  %v18794_v40 = vld [vmem:[#allocation2 + $0x151] sm:$0xff]  ;;  %399 = vst.msk [vmem:[#allocation3 + $0x50] sm:$0xff] %vm387_vm3, %v18118_v1 }
  0x44   : > { %v18800_v41 = vld [vmem:[#allocation2 + $0x159] sm:$0xff]  ;;  %v18802_v42 = vld [vmem:[#allocation2 + $0x169] sm:$0xff]  ;;  %400 = vst.msk [vmem:[#allocation3 + $0x58] sm:$0x3] %vm390_vm4, %v18118_v1  ;;  %403 = vst.msk [vmem:[#allocation3 + $0x70] sm:$0x3] %vm390_vm4, %v18118_v1 }
  0x45   : > { %401 = vst.msk [vmem:[#allocation3 + $0x60] sm:$0xff] %vm387_vm3, %v18118_v1  ;;  %402 = vst.msk [vmem:[#allocation3 + $0x68] sm:$0xff] %vm387_vm3, %v18118_v1 }
  0x46   : > { %14684 = vmatmul.mubr.msk.f32.gmra.mrb[10].mxu0 %vm331_vm1, %v18466_v47  ;;  %404 = vst.msk [vmem:[#allocation3 + $0x78] sm:$0xff] %vm387_vm3, %v18118_v1  ;;  %405 = vst.msk [vmem:[#allocation3 + $0x80] sm:$0xff] %vm387_vm3, %v18118_v1 }
  0x47   : > { %14686 = vmatprep.mubr.msk.f32.mxu0 %vm331_vm1, %v18468_v48  ;;  %406 = vst.msk [vmem:[#allocation3 + $0x88] sm:$0x3] %vm390_vm4, %v18118_v1  ;;  %409 = vst.msk [vmem:[#allocation3 + $0xa0] sm:$0x3] %vm390_vm4, %v18118_v1 }
  0x48   : > { %407 = vst.msk [vmem:[#allocation3 + $0x90] sm:$0xff] %vm387_vm3, %v18118_v1  ;;  %408 = vst.msk [vmem:[#allocation3 + $0x98] sm:$0xff] %vm387_vm3, %v18118_v1 }
  0x49   : > { %410 = vst.msk [vmem:[#allocation3 + $0xa8] sm:$0xff] %vm387_vm3, %v18118_v1  ;;  %411 = vst.msk [vmem:[#allocation3 + $0xb0] sm:$0xff] %vm387_vm3, %v18118_v1 }
  0x4a   : > { %14687 = vmatmul.mubr.msk.f32.gmra.mrb[12].mxu0 %vm331_vm1, %v18474_v49  ;;  %412 = vst.msk [vmem:[#allocation3 + $0xb8] sm:$0x3] %vm390_vm4, %v18118_v1  ;;  %415 = vst.msk [vmem:[#allocation3 + $0xd0] sm:$0x3] %vm390_vm4, %v18118_v1 }
  0x4b   : > { %14689 = vmatprep.mubr.msk.f32.mxu0 %vm331_vm1, %v18476_v50  ;;  %413 = vst.msk [vmem:[#allocation3 + $0xc0] sm:$0xff] %vm387_vm3, %v18118_v1  ;;  %414 = vst.msk [vmem:[#allocation3 + $0xc8] sm:$0xff] %vm387_vm3, %v18118_v1 }
  0x4c   : > { %416 = vst.msk [vmem:[#allocation3 + $0xd8] sm:$0xff] %vm387_vm3, %v18118_v1  ;;  %417 = vst.msk [vmem:[#allocation3 + $0xe0] sm:$0xff] %vm387_vm3, %v18118_v1 }
  0x4d   : > { %418 = vst.msk [vmem:[#allocation3 + $0xe8] sm:$0x3] %vm390_vm4, %v18118_v1  ;;  %421 = vst.msk [vmem:[#allocation3 + $0x100] sm:$0x3] %vm390_vm4, %v18118_v1 }
  0x4e   : > { %14690 = vmatmul.mubr.msk.f32.gmra.mrb[14].mxu0 %vm331_vm1, %v18482_v51  ;;  %419 = vst.msk [vmem:[#allocation3 + $0xf0] sm:$0xff] %vm387_vm3, %v18118_v1  ;;  %420 = vst.msk [vmem:[#allocation3 + $0xf8] sm:$0xff] %vm387_vm3, %v18118_v1 }
  0x4f   : > { %14692 = vmatprep.mubr.msk.f32.mxu0 %vm331_vm1, %v18484_v52  ;;  %422 = vst.msk [vmem:[#allocation3 + $0x108] sm:$0xff] %vm387_vm3, %v18118_v1  ;;  %423 = vst.msk [vmem:[#allocation3 + $0x110] sm:$0xff] %vm387_vm3, %v18118_v1 }
  0x50   : > { %424 = vst.msk [vmem:[#allocation3 + $0x118] sm:$0x3] %vm390_vm4, %v18118_v1  ;;  %427 = vst.msk [vmem:[#allocation3 + $0x130] sm:$0x3] %vm390_vm4, %v18118_v1 }
  0x51   : > { %425 = vst.msk [vmem:[#allocation3 + $0x120] sm:$0xff] %vm387_vm3, %v18118_v1  ;;  %426 = vst.msk [vmem:[#allocation3 + $0x128] sm:$0xff] %vm387_vm3, %v18118_v1 }
  0x52   : > { %14693 = vmatmul.mubr.msk.f32.gmra.mrb[16].mxu0 %vm331_vm1, %v18490_v53  ;;  %428 = vst.msk [vmem:[#allocation3 + $0x138] sm:$0xff] %vm387_vm3, %v18118_v1  ;;  %429 = vst.msk [vmem:[#allocation3 + $0x140] sm:$0xff] %vm387_vm3, %v18118_v1 }
  0x53   : > { %14695 = vmatprep.mubr.msk.f32.mxu0 %vm331_vm1, %v18492_v54  ;;  %430 = vst.msk [vmem:[#allocation3 + $0x148] sm:$0x3] %vm390_vm4, %v18118_v1  ;;  %433 = vst.msk [vmem:[#allocation3 + $0x160] sm:$0x3] %vm390_vm4, %v18118_v1 }
  0x54   : > { %431 = vst.msk [vmem:[#allocation3 + $0x150] sm:$0xff] %vm387_vm3, %v18118_v1  ;;  %432 = vst.msk [vmem:[#allocation3 + $0x158] sm:$0xff] %vm387_vm3, %v18118_v1 }
  0x55   : > { %434 = vst.msk [vmem:[#allocation3 + $0x168] sm:$0xff] %vm387_vm3, %v18118_v1  ;;  %435 = vst.msk [vmem:[#allocation3 + $0x170] sm:$0xff] %vm387_vm3, %v18118_v1 }
  0x56   : > { %14696 = vmatmul.mubr.msk.f32.gmra.mrb[18].mxu0 %vm331_vm1, %v18498_v55  ;;  %436 = vst.msk [vmem:[#allocation3 + $0x178] sm:$0x3] %vm390_vm4, %v18118_v1  ;;  %439 = vst.msk [vmem:[#allocation3 + $0x190] sm:$0x3] %vm390_vm4, %v18118_v1 }
  0x57   : > { %14698 = vmatprep.mubr.msk.f32.mxu0 %vm331_vm1, %v18500_v56  ;;  %437 = vst.msk [vmem:[#allocation3 + $0x180] sm:$0xff] %vm387_vm3, %v18118_v1  ;;  %438 = vst.msk [vmem:[#allocation3 + $0x188] sm:$0xff] %vm387_vm3, %v18118_v1 }
  0x58   : > { %440 = vst.msk [vmem:[#allocation3 + $0x198] sm:$0xff] %vm387_vm3, %v18118_v1  ;;  %441 = vst.msk [vmem:[#allocation3 + $0x1a0] sm:$0xff] %vm387_vm3, %v18118_v1 }
  0x59   : > { %442 = vst.msk [vmem:[#allocation3 + $0x1a8] sm:$0x3] %vm390_vm4, %v18118_v1 }
  0x5a   : > { %14699 = vmatmul.mubr.msk.f32.gmra.mrb[20].mxu0 %vm331_vm1, %v18506_v57  ;;  %449 = vst.msk [vmem:[#allocation4 + $0x20] sm:$0xff] %vm443_vm5, %v18118_v1  ;;  %444 = vst.msk [vmem:[#allocation4] sm:$0xff] %vm443_vm5, %v18118_v1 }
  0x5b   : > { %14701 = vmatprep.mubr.msk.f32.mxu0 %vm331_vm1, %v18508_v58  ;;  %450 = vst.msk [vmem:[#allocation4 + $0x28] sm:$0x3] %vm446_vm6, %v18118_v1  ;;  %447 = vst.msk [vmem:[#allocation4 + $0x10] sm:$0x3] %vm446_vm6, %v18118_v1 }
  0x5c   : > { %445 = vst.msk [vmem:[#allocation4 + $0x8] sm:$0xff] %vm443_vm5, %v18118_v1  ;;  %448 = vst.msk [vmem:[#allocation4 + $0x18] sm:$0xff] %vm443_vm5, %v18118_v1 }
  0x5d   : > { %451 = vst.msk [vmem:[#allocation4 + $0x30] sm:$0xff] %vm443_vm5, %v18118_v1  ;;  %452 = vst.msk [vmem:[#allocation4 + $0x38] sm:$0xff] %vm443_vm5, %v18118_v1 }
  0x5e   : > { %14702 = vmatmul.mubr.msk.f32.gmra.mrb[22].mxu0 %vm331_vm1, %v18514_v59  ;;  %453 = vst.msk [vmem:[#allocation4 + $0x40] sm:$0x3] %vm446_vm6, %v18118_v1  ;;  %456 = vst.msk [vmem:[#allocation4 + $0x58] sm:$0x3] %vm446_vm6, %v18118_v1 }
  0x5f   : > { %14704 = vmatprep.mubr.msk.f32.mxu0 %vm331_vm1, %v18516_v60  ;;  %454 = vst.msk [vmem:[#allocation4 + $0x48] sm:$0xff] %vm443_vm5, %v18118_v1  ;;  %455 = vst.msk [vmem:[#allocation4 + $0x50] sm:$0xff] %vm443_vm5, %v18118_v1 }
  0x60   : > { %457 = vst.msk [vmem:[#allocation4 + $0x60] sm:$0xff] %vm443_vm5, %v18118_v1  ;;  %458 = vst.msk [vmem:[#allocation4 + $0x68] sm:$0xff] %vm443_vm5, %v18118_v1 }
  0x61   : > { %459 = vst.msk [vmem:[#allocation4 + $0x70] sm:$0x3] %vm446_vm6, %v18118_v1  ;;  %462 = vst.msk [vmem:[#allocation4 + $0x88] sm:$0x3] %vm446_vm6, %v18118_v1 }
  0x62   : > { %14705 = vmatmul.mubr.msk.f32.gmra.mrb[24].mxu0 %vm331_vm1, %v18522_v61  ;;  %460 = vst.msk [vmem:[#allocation4 + $0x78] sm:$0xff] %vm443_vm5, %v18118_v1  ;;  %461 = vst.msk [vmem:[#allocation4 + $0x80] sm:$0xff] %vm443_vm5, %v18118_v1 }
  0x63   : > { %14707 = vmatprep.mubr.msk.f32.mxu0 %vm331_vm1, %v18524_v62  ;;  %463 = vst.msk [vmem:[#allocation4 + $0x90] sm:$0xff] %vm443_vm5, %v18118_v1  ;;  %464 = vst.msk [vmem:[#allocation4 + $0x98] sm:$0xff] %vm443_vm5, %v18118_v1 }
  0x64   : > { %465 = vst.msk [vmem:[#allocation4 + $0xa0] sm:$0x3] %vm446_vm6, %v18118_v1  ;;  %468 = vst.msk [vmem:[#allocation4 + $0xb8] sm:$0x3] %vm446_vm6, %v18118_v1 }
  0x65   : > { %466 = vst.msk [vmem:[#allocation4 + $0xa8] sm:$0xff] %vm443_vm5, %v18118_v1  ;;  %467 = vst.msk [vmem:[#allocation4 + $0xb0] sm:$0xff] %vm443_vm5, %v18118_v1 }
  0x66   : > { %14708 = vmatmul.mubr.msk.f32.gmra.mrb[26].mxu0 %vm331_vm1, %v18530_v63  ;;  %469 = vst.msk [vmem:[#allocation4 + $0xc0] sm:$0xff] %vm443_vm5, %v18118_v1  ;;  %470 = vst.msk [vmem:[#allocation4 + $0xc8] sm:$0xff] %vm443_vm5, %v18118_v1 }
  0x67   : > { %14710 = vmatprep.mubr.msk.f32.mxu0 %vm331_vm1, %v18532_v0  ;;  %471 = vst.msk [vmem:[#allocation4 + $0xd0] sm:$0x3] %vm446_vm6, %v18118_v1  ;;  %474 = vst.msk [vmem:[#allocation4 + $0xe8] sm:$0x3] %vm446_vm6, %v18118_v1 }
  0x68   : > { %472 = vst.msk [vmem:[#allocation4 + $0xd8] sm:$0xff] %vm443_vm5, %v18118_v1  ;;  %473 = vst.msk [vmem:[#allocation4 + $0xe0] sm:$0xff] %vm443_vm5, %v18118_v1 }
  0x69   : > { %475 = vst.msk [vmem:[#allocation4 + $0xf0] sm:$0xff] %vm443_vm5, %v18118_v1  ;;  %476 = vst.msk [vmem:[#allocation4 + $0xf8] sm:$0xff] %vm443_vm5, %v18118_v1 }
  0x6a   : > { %14711 = vmatmul.mubr.msk.f32.gmra.mrb[28].mxu0 %vm331_vm1, %v18538_v2  ;;  %477 = vst.msk [vmem:[#allocation4 + $0x100] sm:$0x3] %vm446_vm6, %v18118_v1  ;;  %480 = vst.msk [vmem:[#allocation4 + $0x118] sm:$0x3] %vm446_vm6, %v18118_v1 }
  0x6b   : > { %14713 = vmatprep.mubr.msk.f32.mxu0 %vm331_vm1, %v18540_v3  ;;  %478 = vst.msk [vmem:[#allocation4 + $0x108] sm:$0xff] %vm443_vm5, %v18118_v1  ;;  %479 = vst.msk [vmem:[#allocation4 + $0x110] sm:$0xff] %vm443_vm5, %v18118_v1 }
  0x6c   : > { %481 = vst.msk [vmem:[#allocation4 + $0x120] sm:$0xff] %vm443_vm5, %v18118_v1  ;;  %482 = vst.msk [vmem:[#allocation4 + $0x128] sm:$0xff] %vm443_vm5, %v18118_v1 }
  0x6d   : > { %483 = vst.msk [vmem:[#allocation4 + $0x130] sm:$0x3] %vm446_vm6, %v18118_v1  ;;  %486 = vst.msk [vmem:[#allocation4 + $0x148] sm:$0x3] %vm446_vm6, %v18118_v1 }
  0x6e   : > { %14714 = vmatmul.mubr.msk.f32.gmra.mrb[30].mxu0 %vm331_vm1, %v18546_v4  ;;  %484 = vst.msk [vmem:[#allocation4 + $0x138] sm:$0xff] %vm443_vm5, %v18118_v1  ;;  %485 = vst.msk [vmem:[#allocation4 + $0x140] sm:$0xff] %vm443_vm5, %v18118_v1 }
  0x6f   : > { %14718 = vmatprep.mubr.msk.f32.mxu0 %vm331_vm1, %v618_v5  ;;  %v19014_v5 = vld [vmem:[#allocation2 + $0xca] sm:$0xff]  ;;  %487 = vst.msk [vmem:[#allocation4 + $0x150] sm:$0xff] %vm443_vm5, %v18118_v1  ;;  %488 = vst.msk [vmem:[#allocation4 + $0x158] sm:$0xff] %vm443_vm5, %v18118_v1 }
  0x70   : > { %489 = vst.msk [vmem:[#allocation4 + $0x160] sm:$0x3] %vm446_vm6, %v18118_v1  ;;  %492 = vst.msk [vmem:[#allocation4 + $0x178] sm:$0x3] %vm446_vm6, %v18118_v1 }
  0x71   : > { %490 = vst.msk [vmem:[#allocation4 + $0x168] sm:$0xff] %vm443_vm5, %v18118_v1  ;;  %491 = vst.msk [vmem:[#allocation4 + $0x170] sm:$0xff] %vm443_vm5, %v18118_v1 }
  0x72   : > { %14719 = vmatmul.mubr.msk.f32.vlgmr.msra.gmra.mrb[0].mxu0 %vm331_vm1, %v619_v6  ;;  %v19016_v6 = vld [vmem:[#allocation2 + $0xda] sm:$0xff]  ;;  %493 = vst.msk [vmem:[#allocation4 + $0x180] sm:$0xff] %vm443_vm5, %v18118_v1  ;;  %494 = vst.msk [vmem:[#allocation4 + $0x188] sm:$0xff] %vm443_vm5, %v18118_v1 }
  0x73   : > { %14767 = vmatpush3.msk.msra.mxu0 %vm753_vm0, %v18408_v30  ;;  %14721 = vmatprep.mubr.msk.f32.mxu0 %vm331_vm1, %v18394_v27  ;;  %v18744_v27 = vld [vmem:[#allocation2 + $0xb1] sm:$0xff]  ;;  %v18754_v30 = vld [vmem:[#allocation2 + $0xd9] sm:$0xff]  ;;  %495 = vst.msk [vmem:[#allocation4 + $0x190] sm:$0x3] %vm446_vm6, %v18118_v1  ;;  %498 = vst.msk [vmem:[#allocation4 + $0x1a8] sm:$0x3] %vm446_vm6, %v18118_v1 }
  0x74   : > { %14816 = vmatprep.subr.msk.mxu0 %vm753_vm0, %v12154_v7  ;;  %496 = vst.msk [vmem:[#allocation4 + $0x198] sm:$0xff] %vm443_vm5, %v18118_v1  ;;  %497 = vst.msk [vmem:[#allocation4 + $0x1a0] sm:$0xff] %vm443_vm5, %v18118_v1 }
  0x75   : > { %499 = vst.msk [vmem:[#allocation5] sm:$0xff] %vm443_vm5, %v18118_v1  ;;  %500 = vst.msk [vmem:[#allocation5 + $0x8] sm:$0xff] %vm443_vm5, %v18118_v1 }
  0x76   : > { %14722 = vmatmul.mubr.msk.f32.gmra.mrb[2].mxu0 %vm331_vm1, %v18396_v28  ;;  %v18746_v28 = vld [vmem:[#allocation2 + $0xc1] sm:$0xff]  ;;  %501 = vst.msk [vmem:[#allocation5 + $0x10] sm:$0x3] %vm446_vm6, %v18118_v1  ;;  %504 = vst.msk [vmem:[#allocation5 + $0x28] sm:$0x3] %vm446_vm6, %v18118_v1 }
  0x77   : > { %14724 = vmatprep.mubr.msk.f32.mxu0 %vm331_vm1, %v18398_v29  ;;  %502 = vst.msk [vmem:[#allocation5 + $0x18] sm:$0xff] %vm443_vm5, %v18118_v1  ;;  %503 = vst.msk [vmem:[#allocation5 + $0x20] sm:$0xff] %vm443_vm5, %v18118_v1 }
  0x78   : > { %505 = vst.msk [vmem:[#allocation5 + $0x30] sm:$0xff] %vm443_vm5, %v18118_v1  ;;  %506 = vst.msk [vmem:[#allocation5 + $0x38] sm:$0xff] %vm443_vm5, %v18118_v1 }
  0x79   : > { %507 = vst.msk [vmem:[#allocation5 + $0x40] sm:$0x3] %vm446_vm6, %v18118_v1  ;;  %510 = vst.msk [vmem:[#allocation5 + $0x58] sm:$0x3] %vm446_vm6, %v18118_v1 }
  0x7a   : > { %14725 = vmatmul.mubr.msk.f32.gmra.mrb[4].mxu0 %vm331_vm1, %v18416_v31  ;;  %508 = vst.msk [vmem:[#allocation5 + $0x48] sm:$0xff] %vm443_vm5, %v18118_v1  ;;  %509 = vst.msk [vmem:[#allocation5 + $0x50] sm:$0xff] %vm443_vm5, %v18118_v1 }
  0x7b   : > { %14727 = vmatprep.mubr.msk.f32.mxu0 %vm331_vm1, %v18418_v32  ;;  %511 = vst.msk [vmem:[#allocation5 + $0x60] sm:$0xff] %vm443_vm5, %v18118_v1  ;;  %512 = vst.msk [vmem:[#allocation5 + $0x68] sm:$0xff] %vm443_vm5, %v18118_v1 }
  0x7c   : > { %513 = vst.msk [vmem:[#allocation5 + $0x70] sm:$0x3] %vm446_vm6, %v18118_v1  ;;  %516 = vst.msk [vmem:[#allocation5 + $0x88] sm:$0x3] %vm446_vm6, %v18118_v1 }
  0x7d   : > { %514 = vst.msk [vmem:[#allocation5 + $0x78] sm:$0xff] %vm443_vm5, %v18118_v1  ;;  %515 = vst.msk [vmem:[#allocation5 + $0x80] sm:$0xff] %vm443_vm5, %v18118_v1 }
  0x7e   : > { %14728 = vmatmul.mubr.msk.f32.gmra.mrb[6].mxu0 %vm331_vm1, %v18426_v33  ;;  %517 = vst.msk [vmem:[#allocation5 + $0x90] sm:$0xff] %vm443_vm5, %v18118_v1  ;;  %518 = vst.msk [vmem:[#allocation5 + $0x98] sm:$0xff] %vm443_vm5, %v18118_v1 }
  0x7f   : > { %14730 = vmatprep.mubr.msk.f32.mxu0 %vm331_vm1, %v18428_v34  ;;  %519 = vst.msk [vmem:[#allocation5 + $0xa0] sm:$0x3] %vm446_vm6, %v18118_v1  ;;  %522 = vst.msk [vmem:[#allocation5 + $0xb8] sm:$0x3] %vm446_vm6, %v18118_v1 }
  0x80   : > { %520 = vst.msk [vmem:[#allocation5 + $0xa8] sm:$0xff] %vm443_vm5, %v18118_v1  ;;  %521 = vst.msk [vmem:[#allocation5 + $0xb0] sm:$0xff] %vm443_vm5, %v18118_v1 }
  0x81   : > { %523 = vst.msk [vmem:[#allocation5 + $0xc0] sm:$0xff] %vm443_vm5, %v18118_v1  ;;  %524 = vst.msk [vmem:[#allocation5 + $0xc8] sm:$0xff] %vm443_vm5, %v18118_v1 }
  0x82   : > { %14731 = vmatmul.mubr.msk.f32.gmra.mrb[8].mxu0 %vm331_vm1, %v18448_v43  ;;  %525 = vst.msk [vmem:[#allocation5 + $0xd0] sm:$0x3] %vm446_vm6, %v18118_v1  ;;  %528 = vst.msk [vmem:[#allocation5 + $0xe8] sm:$0x3] %vm446_vm6, %v18118_v1 }
  0x83   : > { %14733 = vmatprep.mubr.msk.f32.mxu0 %vm331_vm1, %v18452_v44  ;;  %526 = vst.msk [vmem:[#allocation5 + $0xd8] sm:$0xff] %vm443_vm5, %v18118_v1  ;;  %527 = vst.msk [vmem:[#allocation5 + $0xe0] sm:$0xff] %vm443_vm5, %v18118_v1 }
  0x84   : > { %529 = vst.msk [vmem:[#allocation5 + $0xf0] sm:$0xff] %vm443_vm5, %v18118_v1  ;;  %530 = vst.msk [vmem:[#allocation5 + $0xf8] sm:$0xff] %vm443_vm5, %v18118_v1 }
  0x85   : > { %531 = vst.msk [vmem:[#allocation5 + $0x100] sm:$0x3] %vm446_vm6, %v18118_v1  ;;  %534 = vst.msk [vmem:[#allocation5 + $0x118] sm:$0x3] %vm446_vm6, %v18118_v1 }
  0x86   : > { %14734 = vmatmul.mubr.msk.f32.gmra.mrb[10].mxu0 %vm331_vm1, %v18458_v45  ;;  %532 = vst.msk [vmem:[#allocation5 + $0x108] sm:$0xff] %vm443_vm5, %v18118_v1  ;;  %533 = vst.msk [vmem:[#allocation5 + $0x110] sm:$0xff] %vm443_vm5, %v18118_v1 }
  0x87   : > { %14736 = vmatprep.mubr.msk.f32.mxu0 %vm331_vm1, %v18460_v46  ;;  %535 = vst.msk [vmem:[#allocation5 + $0x120] sm:$0xff] %vm443_vm5, %v18118_v1  ;;  %536 = vst.msk [vmem:[#allocation5 + $0x128] sm:$0xff] %vm443_vm5, %v18118_v1 }
  0x88   : > { %537 = vst.msk [vmem:[#allocation5 + $0x130] sm:$0x3] %vm446_vm6, %v18118_v1  ;;  %540 = vst.msk [vmem:[#allocation5 + $0x148] sm:$0x3] %vm446_vm6, %v18118_v1 }
  0x89   : > { %538 = vst.msk [vmem:[#allocation5 + $0x138] sm:$0xff] %vm443_vm5, %v18118_v1  ;;  %539 = vst.msk [vmem:[#allocation5 + $0x140] sm:$0xff] %vm443_vm5, %v18118_v1 }
  0x8a   : > { %14737 = vmatmul.mubr.msk.f32.gmra.mrb[12].mxu0 %vm331_vm1, %v18466_v47  ;;  %541 = vst.msk [vmem:[#allocation5 + $0x150] sm:$0xff] %vm443_vm5, %v18118_v1  ;;  %542 = vst.msk [vmem:[#allocation5 + $0x158] sm:$0xff] %vm443_vm5, %v18118_v1 }
  0x8b   : > { %14739 = vmatprep.mubr.msk.f32.mxu0 %vm331_vm1, %v18468_v48  ;;  %543 = vst.msk [vmem:[#allocation5 + $0x160] sm:$0x3] %vm446_vm6, %v18118_v1  ;;  %546 = vst.msk [vmem:[#allocation5 + $0x178] sm:$0x3] %vm446_vm6, %v18118_v1 }
  0x8c   : > { %544 = vst.msk [vmem:[#allocation5 + $0x168] sm:$0xff] %vm443_vm5, %v18118_v1  ;;  %545 = vst.msk [vmem:[#allocation5 + $0x170] sm:$0xff] %vm443_vm5, %v18118_v1 }
  0x8d   : > { %547 = vst.msk [vmem:[#allocation5 + $0x180] sm:$0xff] %vm443_vm5, %v18118_v1  ;;  %548 = vst.msk [vmem:[#allocation5 + $0x188] sm:$0xff] %vm443_vm5, %v18118_v1 }
  0x8e   : > { %14740 = vmatmul.mubr.msk.f32.gmra.mrb[14].mxu0 %vm331_vm1, %v18474_v49  ;;  %549 = vst.msk [vmem:[#allocation5 + $0x190] sm:$0x3] %vm446_vm6, %v18118_v1  ;;  %552 = vst.msk [vmem:[#allocation5 + $0x1a8] sm:$0x3] %vm446_vm6, %v18118_v1 }
  0x8f   : > { %14742 = vmatprep.mubr.msk.f32.mxu0 %vm331_vm1, %v18476_v50  ;;  %550 = vst.msk [vmem:[#allocation5 + $0x198] sm:$0xff] %vm443_vm5, %v18118_v1  ;;  %551 = vst.msk [vmem:[#allocation5 + $0x1a0] sm:$0xff] %vm443_vm5, %v18118_v1 }
  0x92   : > { %14743 = vmatmul.mubr.msk.f32.gmra.mrb[16].mxu0 %vm331_vm1, %v18482_v51 }
  0x93   : > { %14745 = vmatprep.mubr.msk.f32.mxu0 %vm331_vm1, %v18484_v52 }
  0x96   : > { %14746 = vmatmul.mubr.msk.f32.gmra.mrb[18].mxu0 %vm331_vm1, %v18490_v53 }
  0x97   : > { %14748 = vmatprep.mubr.msk.f32.mxu0 %vm331_vm1, %v18492_v54 }
  0x9a   : > { %14749 = vmatmul.mubr.msk.f32.gmra.mrb[20].mxu0 %vm331_vm1, %v18498_v55 }
  0x9b   : > { %14751 = vmatprep.mubr.msk.f32.mxu0 %vm331_vm1, %v18500_v56 }
  0x9e   : > { %14752 = vmatmul.mubr.msk.f32.gmra.mrb[22].mxu0 %vm331_vm1, %v18506_v57 }
  0x9f   : > { %14754 = vmatprep.mubr.msk.f32.mxu0 %vm331_vm1, %v18508_v58 }
  0xa2   : > { %14755 = vmatmul.mubr.msk.f32.gmra.mrb[24].mxu0 %vm331_vm1, %v18514_v59 }
  0xa3   : > { %14757 = vmatprep.mubr.msk.f32.mxu0 %vm331_vm1, %v18516_v60 }
  0xa6   : > { %14758 = vmatmul.mubr.msk.f32.gmra.mrb[26].mxu0 %vm331_vm1, %v18522_v61 }
  0xa7   : > { %14760 = vmatprep.mubr.msk.f32.mxu0 %vm331_vm1, %v18524_v62 }
  0xaa   : > { %14761 = vmatmul.mubr.msk.f32.gmra.mrb[28].mxu0 %vm331_vm1, %v18530_v63 }
  0xab   : > { %14763 = vmatprep.mubr.msk.f32.mxu0 %vm331_vm1, %v18532_v0 }
  0xae   : > { %14764 = vmatmul.mubr.msk.f32.gmra.mrb[30].mxu0 %vm331_vm1, %v18538_v2 }
  0xaf   : > { %14768 = vmatprep.mubr.msk.f32.mxu0 %vm331_vm1, %v18398_v29  ;;  %v18752_v29 = vld [vmem:[#allocation2 + $0xc9] sm:$0xff] }
  0xb2   : > { %14769 = vmatmul.mubr.msk.f32.vlgmr.msra.gmra.mrb[0].mxu0 %vm331_vm1, %v18416_v31  ;;  %v18760_v31 = vld [vmem:[#allocation2 + $0xe1] sm:$0xff] }
  0xb3   : > { %14817 = vmatpush3.msk.msra.mxu0 %vm753_vm0, %v12154_v7  ;;  %14771 = vmatprep.mubr.msk.f32.mxu0 %vm331_vm1, %v18418_v32  ;;  %v18762_v32 = vld [vmem:[#allocation2 + $0xf1] sm:$0xff]  ;;  %v19022_v7 = vld [vmem:[#allocation2 + $0xe2] sm:$0xff] }
  0xb4   : > { %14866 = vmatprep.subr.msk.mxu0 %vm753_vm0, %v12188_v8 }
  0xb6   : > { %14772 = vmatmul.mubr.msk.f32.gmra.mrb[2].mxu0 %vm331_vm1, %v18426_v33  ;;  %v18768_v33 = vld [vmem:[#allocation2 + $0xf9] sm:$0xff] }
  0xb7   : > { %14774 = vmatprep.mubr.msk.f32.mxu0 %vm331_vm1, %v18428_v34  ;;  %v18770_v34 = vld [vmem:[#allocation2 + $0x109] sm:$0xff] }
  0xba   : > { %14775 = vmatmul.mubr.msk.f32.gmra.mrb[4].mxu0 %vm331_vm1, %v18448_v43  ;;  %v18808_v43 = vld [vmem:[#allocation2 + $0x171] sm:$0xff] }
  0xbb   : > { %14777 = vmatprep.mubr.msk.f32.mxu0 %vm331_vm1, %v18452_v44  ;;  %v12256_v44 = vld [vmem:[%s22592_s1 + $0x8] sm:$0xf] }
  0xbe   : > { %14778 = vmatmul.mubr.msk.f32.gmra.mrb[6].mxu0 %vm331_vm1, %v18458_v45  ;;  %v1516_v45 = vld [vmem:[#allocation2 + $0x181] sm:$0xff] }
  0xbf   : > { %14780 = vmatprep.mubr.msk.f32.mxu0 %vm331_vm1, %v18460_v46  ;;  %v1517_v46 = vld [vmem:[#allocation2 + $0x189] sm:$0xff] }
  0xc2   : > { %14781 = vmatmul.mubr.msk.f32.gmra.mrb[8].mxu0 %vm331_vm1, %v18466_v47  ;;  %v12290_v47 = vld [vmem:[%s22592_s1 + $0x14] sm:$0xf] }
  0xc3   : > { %14783 = vmatprep.mubr.msk.f32.mxu0 %vm331_vm1, %v18468_v48  ;;  %v1518_v48 = vld [vmem:[#allocation2 + $0x199] sm:$0xff] }
  0xc6   : > { %14784 = vmatmul.mubr.msk.f32.gmra.mrb[10].mxu0 %vm331_vm1, %v18474_v49  ;;  %v1519_v49 = vld [vmem:[#allocation2 + $0x1a1] sm:$0xff] }
  0xc7   : > { %14786 = vmatprep.mubr.msk.f32.mxu0 %vm331_vm1, %v18476_v50  ;;  %v2414_v50 = vld [vmem:[#allocation2 + $0x2] sm:$0xff] }
  0xca   : > { %14787 = vmatmul.mubr.msk.f32.gmra.mrb[12].mxu0 %vm331_vm1, %v18482_v51  ;;  %v2415_v51 = vld [vmem:[#allocation2 + $0xa] sm:$0xff] }
  0xcb   : > { %14789 = vmatprep.mubr.msk.f32.mxu0 %vm331_vm1, %v18484_v52  ;;  %v18945_v52 = vld [vmem:[#allocation2 + $0x1a] sm:$0xff] }
  0xce   : > { %14790 = vmatmul.mubr.msk.f32.gmra.mrb[14].mxu0 %vm331_vm1, %v18490_v53  ;;  %v18950_v53 = vld [vmem:[%s22592_s1 + $0x20] sm:$0xf] }
  0xcf   : > { %14792 = vmatprep.mubr.msk.f32.mxu0 %vm331_vm1, %v18492_v54  ;;  %v18956_v54 = vld [vmem:[#allocation2 + $0x22] sm:$0xff] }
  0xd2   : > { %14793 = vmatmul.mubr.msk.f32.gmra.mrb[16].mxu0 %vm331_vm1, %v18498_v55  ;;  %v18958_v55 = vld [vmem:[#allocation2 + $0x32] sm:$0xff] }
  0xd3   : > { %14795 = vmatprep.mubr.msk.f32.mxu0 %vm331_vm1, %v18500_v56  ;;  %v18966_v56 = vld [vmem:[#allocation2 + $0x3a] sm:$0xff] }
  0xd6   : > { %14796 = vmatmul.mubr.msk.f32.gmra.mrb[18].mxu0 %vm331_vm1, %v18506_v57  ;;  %v18968_v57 = vld [vmem:[#allocation2 + $0x4a] sm:$0xff] }
  0xd7   : > { %14798 = vmatprep.mubr.msk.f32.mxu0 %vm331_vm1, %v18508_v58  ;;  %v18974_v58 = vld [vmem:[#allocation2 + $0x52] sm:$0xff] }
  0xda   : > { %14799 = vmatmul.mubr.msk.f32.gmra.mrb[20].mxu0 %vm331_vm1, %v18514_v59  ;;  %v18976_v59 = vld [vmem:[#allocation2 + $0x62] sm:$0xff] }
  0xdb   : > { %14801 = vmatprep.mubr.msk.f32.mxu0 %vm331_vm1, %v18516_v60  ;;  %v18982_v60 = vld [vmem:[#allocation2 + $0x6a] sm:$0xff] }
  0xde   : > { %14802 = vmatmul.mubr.msk.f32.gmra.mrb[22].mxu0 %vm331_vm1, %v18522_v61  ;;  %v18984_v61 = vld [vmem:[#allocation2 + $0x7a] sm:$0xff] }
  0xdf   : > { %14804 = vmatprep.mubr.msk.f32.mxu0 %vm331_vm1, %v18524_v62  ;;  %v18990_v62 = vld [vmem:[#allocation2 + $0x82] sm:$0xff] }
  0xe2   : > { %14805 = vmatmul.mubr.msk.f32.gmra.mrb[24].mxu0 %vm331_vm1, %v18530_v63  ;;  %v18992_v63 = vld [vmem:[#allocation2 + $0x92] sm:$0xff] }
  0xe3   : > { %14807 = vmatprep.mubr.msk.f32.mxu0 %vm331_vm1, %v18532_v0  ;;  %v18998_v0 = vld [vmem:[#allocation2 + $0x9a] sm:$0xff] }
  0xe6   : > { %14808 = vmatmul.mubr.msk.f32.gmra.mrb[26].mxu0 %vm331_vm1, %v18538_v2  ;;  %v19000_v2 = vld [vmem:[#allocation2 + $0xaa] sm:$0xff] }
  0xe7   : > { %14810 = vmatprep.mubr.msk.f32.mxu0 %vm331_vm1, %v18540_v3  ;;  %v19006_v3 = vld [vmem:[#allocation2 + $0xb2] sm:$0xff] }
  0xea   : > { %14811 = vmatmul.mubr.msk.f32.gmra.mrb[28].mxu0 %vm331_vm1, %v18546_v4  ;;  %v19008_v4 = vld [vmem:[#allocation2 + $0xc2] sm:$0xff] }
  0xeb   : > { %14813 = vmatprep.mubr.msk.f32.mxu0 %vm331_vm1, %v652_v9  ;;  %v19030_v9 = vld [vmem:[#allocation2 + $0xfa] sm:$0xff] }
  0xee   : > { %14814 = vmatmul.mubr.msk.f32.gmra.mrb[30].mxu0 %vm331_vm1, %v653_v10  ;;  %v19032_v10 = vld [vmem:[#allocation2 + $0x10a] sm:$0xff] }
  0xef   : > { %14818 = vmatprep.mubr.msk.f32.mxu0 %vm331_vm1, %v1484_v11  ;;  %v19038_v11 = vld [vmem:[#allocation2 + $0x112] sm:$0xff] }
  0xf2   : > { %14819 = vmatmul.mubr.msk.f32.vlgmr.msra.gmra.mrb[0].mxu0 %vm331_vm1, %v1485_v12  ;;  %v19040_v12 = vld [vmem:[#allocation2 + $0x122] sm:$0xff] }
  0xf3   : > { %14867 = vmatpush3.msk.msra.mxu0 %vm753_vm0, %v12188_v8  ;;  %14821 = vmatprep.mubr.msk.f32.mxu0 %vm331_vm1, %v18686_v13  ;;  %v19024_v8 = vld [vmem:[#allocation2 + $0xf2] sm:$0xff] }
  0xf4   : > { %14916 = vmatprep.subr.msk.mxu0 %vm753_vm0, %v18691_v14 }
  0xf6   : > { %14822 = vmatmul.mubr.msk.f32.gmra.mrb[2].mxu0 %vm331_vm1, %v1487_v15 }
  0xf7   : > { %14824 = vmatprep.mubr.msk.f32.mxu0 %vm331_vm1, %v18697_v16 }
  0xfa   : > { %14825 = vmatmul.mubr.msk.f32.gmra.mrb[4].mxu0 %vm331_vm1, %v18704_v17 }
  0xfb   : > { %14827 = vmatprep.mubr.msk.f32.mxu0 %vm331_vm1, %v18706_v18 }
  0xfe   : > { %14828 = vmatmul.mubr.msk.f32.gmra.mrb[6].mxu0 %vm331_vm1, %v18712_v19 }
  0xff   : > { %14830 = vmatprep.mubr.msk.f32.mxu0 %vm331_vm1, %v18714_v20 }
 0x102   : > { %14831 = vmatmul.mubr.msk.f32.gmra.mrb[8].mxu0 %vm331_vm1, %v18720_v21 }
 0x103   : > { %14833 = vmatprep.mubr.msk.f32.mxu0 %vm331_vm1, %v18722_v22 }
 0x106   : > { %14834 = vmatmul.mubr.msk.f32.gmra.mrb[10].mxu0 %vm331_vm1, %v18728_v23 }
 0x107   : > { %14836 = vmatprep.mubr.msk.f32.mxu0 %vm331_vm1, %v18730_v24 }
 0x10a   : > { %14837 = vmatmul.mubr.msk.f32.gmra.mrb[12].mxu0 %vm331_vm1, %v18736_v25 }
 0x10b   : > { %14839 = vmatprep.mubr.msk.f32.mxu0 %vm331_vm1, %v18738_v26 }
 0x10e   : > { %14840 = vmatmul.mubr.msk.f32.gmra.mrb[14].mxu0 %vm331_vm1, %v18744_v27 }
 0x10f   : > { %14842 = vmatprep.mubr.msk.f32.mxu0 %vm331_vm1, %v18746_v28 }
 0x112   : > { %14843 = vmatmul.mubr.msk.f32.gmra.mrb[16].mxu0 %vm331_vm1, %v18752_v29 }
 0x113   : > { %14845 = vmatprep.mubr.msk.f32.mxu0 %vm331_vm1, %v18754_v30 }
 0x116   : > { %14846 = vmatmul.mubr.msk.f32.gmra.mrb[18].mxu0 %vm331_vm1, %v18760_v31 }
 0x117   : > { %14848 = vmatprep.mubr.msk.f32.mxu0 %vm331_vm1, %v18762_v32 }
 0x11a   : > { %14849 = vmatmul.mubr.msk.f32.gmra.mrb[20].mxu0 %vm331_vm1, %v18768_v33 }
 0x11b   : > { %14851 = vmatprep.mubr.msk.f32.mxu0 %vm331_vm1, %v18770_v34 }
 0x11e   : > { %14852 = vmatmul.mubr.msk.f32.gmra.mrb[22].mxu0 %vm331_vm1, %v18776_v35 }
 0x11f   : > { %14854 = vmatprep.mubr.msk.f32.mxu0 %vm331_vm1, %v18778_v36 }
 0x122   : > { %14855 = vmatmul.mubr.msk.f32.gmra.mrb[24].mxu0 %vm331_vm1, %v18784_v37 }
 0x123   : > { %14857 = vmatprep.mubr.msk.f32.mxu0 %vm331_vm1, %v18786_v38 }
 0x126   : > { %14858 = vmatmul.mubr.msk.f32.gmra.mrb[26].mxu0 %vm331_vm1, %v18792_v39 }
 0x127   : > { %14860 = vmatprep.mubr.msk.f32.mxu0 %vm331_vm1, %v18794_v40 }
 0x12a   : > { %14861 = vmatmul.mubr.msk.f32.gmra.mrb[28].mxu0 %vm331_vm1, %v18800_v41 }
 0x12b   : > { %14863 = vmatprep.mubr.msk.f32.mxu0 %vm331_vm1, %v18802_v42 }
 0x12e   : > { %14864 = vmatmul.mubr.msk.f32.gmra.mrb[30].mxu0 %vm331_vm1, %v18808_v43 }
 0x12f   : > { %14868 = vmatprep.mubr.msk.f32.mxu0 %vm331_vm1, %v18686_v13  ;;  %v19046_v13 = vld [vmem:[#allocation2 + $0x12a] sm:$0xff] }
 0x132   : > { %14869 = vmatmul.mubr.msk.f32.vlgmr.msra.gmra.mrb[0].mxu0 %vm331_vm1, %v1487_v15  ;;  %v19054_v15 = vld [vmem:[#allocation2 + $0x142] sm:$0xff] }
 0x133   : > { %14917 = vmatpush3.msk.msra.mxu0 %vm753_vm0, %v18691_v14  ;;  %14871 = vmatprep.mubr.msk.f32.mxu0 %vm331_vm1, %v18697_v16  ;;  %v19048_v14 = vld [vmem:[#allocation2 + $0x13a] sm:$0xff] }
 0x134   : > { %14966 = vmatprep.subr.msk.mxu0 %vm753_vm0, %v12256_v44 }
 0x136   : > { %14872 = vmatmul.mubr.msk.f32.gmra.mrb[2].mxu0 %vm331_vm1, %v18704_v17 }
 0x137   : > { %14874 = vmatprep.mubr.msk.f32.mxu0 %vm331_vm1, %v18706_v18 }
 0x13a   : > { %14875 = vmatmul.mubr.msk.f32.gmra.mrb[4].mxu0 %vm331_vm1, %v18712_v19 }
 0x13b   : > { %14877 = vmatprep.mubr.msk.f32.mxu0 %vm331_vm1, %v18714_v20 }
 0x13e   : > { %14878 = vmatmul.mubr.msk.f32.gmra.mrb[6].mxu0 %vm331_vm1, %v18720_v21 }
 0x13f   : > { %14880 = vmatprep.mubr.msk.f32.mxu0 %vm331_vm1, %v18722_v22 }
 0x142   : > { %14881 = vmatmul.mubr.msk.f32.gmra.mrb[8].mxu0 %vm331_vm1, %v18728_v23 }
 0x143   : > { %14883 = vmatprep.mubr.msk.f32.mxu0 %vm331_vm1, %v18730_v24 }
 0x146   : > { %14884 = vmatmul.mubr.msk.f32.gmra.mrb[10].mxu0 %vm331_vm1, %v18736_v25 }
 0x147   : > { %14886 = vmatprep.mubr.msk.f32.mxu0 %vm331_vm1, %v18738_v26 }
 0x14a   : > { %14887 = vmatmul.mubr.msk.f32.gmra.mrb[12].mxu0 %vm331_vm1, %v18744_v27 }
 0x14b   : > { %14889 = vmatprep.mubr.msk.f32.mxu0 %vm331_vm1, %v18746_v28 }
 0x14e   : > { %14890 = vmatmul.mubr.msk.f32.gmra.mrb[14].mxu0 %vm331_vm1, %v18752_v29 }
 0x14f   : > { %14892 = vmatprep.mubr.msk.f32.mxu0 %vm331_vm1, %v18754_v30 }
 0x152   : > { %14893 = vmatmul.mubr.msk.f32.gmra.mrb[16].mxu0 %vm331_vm1, %v18760_v31 }
 0x153   : > { %14895 = vmatprep.mubr.msk.f32.mxu0 %vm331_vm1, %v18762_v32 }
 0x156   : > { %14896 = vmatmul.mubr.msk.f32.gmra.mrb[18].mxu0 %vm331_vm1, %v18768_v33 }
 0x157   : > { %14898 = vmatprep.mubr.msk.f32.mxu0 %vm331_vm1, %v18770_v34 }
 0x15a   : > { %14899 = vmatmul.mubr.msk.f32.gmra.mrb[20].mxu0 %vm331_vm1, %v18776_v35 }
 0x15b   : > { %14901 = vmatprep.mubr.msk.f32.mxu0 %vm331_vm1, %v18778_v36 }
 0x15e   : > { %14902 = vmatmul.mubr.msk.f32.gmra.mrb[22].mxu0 %vm331_vm1, %v18784_v37 }
 0x15f   : > { %14904 = vmatprep.mubr.msk.f32.mxu0 %vm331_vm1, %v18786_v38 }
 0x162   : > { %14905 = vmatmul.mubr.msk.f32.gmra.mrb[24].mxu0 %vm331_vm1, %v18792_v39 }
 0x163   : > { %14907 = vmatprep.mubr.msk.f32.mxu0 %vm331_vm1, %v18794_v40 }
 0x166   : > { %14908 = vmatmul.mubr.msk.f32.gmra.mrb[26].mxu0 %vm331_vm1, %v18800_v41 }
 0x167   : > { %14910 = vmatprep.mubr.msk.f32.mxu0 %vm331_vm1, %v18802_v42 }
 0x16a   : > { %14911 = vmatmul.mubr.msk.f32.gmra.mrb[28].mxu0 %vm331_vm1, %v18808_v43 }
 0x16b   : > { %14913 = vmatprep.mubr.msk.f32.mxu0 %vm331_vm1, %v1516_v45 }
 0x16e   : > { %14914 = vmatmul.mubr.msk.f32.gmra.mrb[30].mxu0 %vm331_vm1, %v1517_v46 }
 0x16f   : > { %14918 = vmatprep.mubr.msk.f32.mxu0 %vm331_vm1, %v18697_v16  ;;  %v19056_v16 = vld [vmem:[#allocation2 + $0x152] sm:$0xff] }
 0x172   : > { %14919 = vmatmul.mubr.msk.f32.vlgmr.msra.gmra.mrb[0].mxu0 %vm331_vm1, %v18704_v17  ;;  %v19062_v17 = vld [vmem:[#allocation2 + $0x15a] sm:$0xff] }
 0x173   : > { %14967 = vmatpush3.msk.msra.mxu0 %vm753_vm0, %v12256_v44  ;;  %14921 = vmatprep.mubr.msk.f32.mxu0 %vm331_vm1, %v18706_v18  ;;  %v19064_v18 = vld [vmem:[#allocation2 + $0x16a] sm:$0xff] }
 0x174   : > { %15016 = vmatprep.subr.msk.mxu0 %vm753_vm0, %v12290_v47 }
 0x176   : > { %14922 = vmatmul.mubr.msk.f32.gmra.mrb[2].mxu0 %vm331_vm1, %v18712_v19  ;;  %v19070_v19 = vld [vmem:[#allocation2 + $0x172] sm:$0xff] }
 0x177   : > { %14924 = vmatprep.mubr.msk.f32.mxu0 %vm331_vm1, %v18714_v20  ;;  %v2446_v20 = vld [vmem:[#allocation2 + $0x182] sm:$0xff] }
 0x17a   : > { %14925 = vmatmul.mubr.msk.f32.gmra.mrb[4].mxu0 %vm331_vm1, %v18720_v21  ;;  %v2447_v21 = vld [vmem:[#allocation2 + $0x18a] sm:$0xff] }
 0x17b   : > { %14927 = vmatprep.mubr.msk.f32.mxu0 %vm331_vm1, %v18722_v22  ;;  %v2448_v22 = vld [vmem:[#allocation2 + $0x19a] sm:$0xff] }
 0x17e   : > { %14928 = vmatmul.mubr.msk.f32.gmra.mrb[6].mxu0 %vm331_vm1, %v18728_v23  ;;  %v2449_v23 = vld [vmem:[#allocation2 + $0x1a2] sm:$0xff] }
 0x17f   : > { %14930 = vmatprep.mubr.msk.f32.mxu0 %vm331_vm1, %v18730_v24  ;;  %v12359_v24 = vld [vmem:[%s22593_s2 + $0x60] sm:$0xff] }
 0x182   : > { %14931 = vmatmul.mubr.msk.f32.gmra.mrb[8].mxu0 %vm331_vm1, %v18736_v25  ;;  %v12360_v25 = vld [vmem:[%s22593_s2 + $0x68] sm:$0xff] }
 0x183   : > { %14933 = vmatprep.mubr.msk.f32.mxu0 %vm331_vm1, %v18738_v26  ;;  %v16700_v26 = vpack.c.bf16 %v12360_v25, %v12359_v24 }
 0x185   : > { %16701 = vmatprep.subr.bf16.mxu1 %v16700_v26 }
 0x186   : > { %14934 = vmatmul.mubr.msk.f32.gmra.mrb[10].mxu0 %vm331_vm1, %v18744_v27  ;;  %16703 = vmatpush3.bf16.msra.mxu1 %v16700_v26  ;;  %v12361_v27 = vld [vmem:[%s22593_s2 + $0x70] sm:$0xff] }
 0x187   : > { %14936 = vmatprep.mubr.msk.f32.mxu0 %vm331_vm1, %v18746_v28  ;;  %v12362_v28 = vld [vmem:[%s22593_s2 + $0x78] sm:$0xff] }
 0x18a   : > { %14937 = vmatmul.mubr.msk.f32.gmra.mrb[12].mxu0 %vm331_vm1, %v18752_v29  ;;  %v16704_v29 = vpack.c.bf16 %v12362_v28, %v12361_v27 }
 0x18b   : > { %14939 = vmatprep.mubr.msk.f32.mxu0 %vm331_vm1, %v18754_v30  ;;  %v3484_v30 = vld [vmem:[%s22593_s2] sm:$0xff] }
 0x18c   : > { %16705 = vmatprep.subr.bf16.mxu1 %v16704_v29 }
 0x18d   : > { %16707 = vmatpush3.bf16.msra.mxu1 %v16704_v29 }
 0x18e   : > { %14940 = vmatmul.mubr.msk.f32.gmra.mrb[14].mxu0 %vm331_vm1, %v18760_v31  ;;  %v3485_v31 = vld [vmem:[%s22593_s2 + $0x8] sm:$0xff] }
 0x18f   : > { %14942 = vmatprep.mubr.msk.f32.mxu0 %vm331_vm1, %v18762_v32  ;;  %v16708_v32 = vpack.c.bf16 %v3485_v31, %v3484_v30 }
 0x191   : > { %16709 = vmatprep.subr.bf16.mxu1 %v16708_v32 }
 0x192   : > { %14943 = vmatmul.mubr.msk.f32.gmra.mrb[16].mxu0 %vm331_vm1, %v18768_v33  ;;  %v19327_v33 = vld [vmem:[%s22596_s5] ss:$0 sm:$0xff] }
 0x193   : > { %14945 = vmatprep.mubr.msk.f32.mxu0 %vm331_vm1, %v18770_v34 }
 0x196   : > { %14946 = vmatmul.mubr.msk.f32.gmra.mrb[18].mxu0 %vm331_vm1, %v18776_v35 }
 0x197   : > { %14948 = vmatprep.mubr.msk.f32.mxu0 %vm331_vm1, %v18778_v36 }
 0x19a   : > { %14949 = vmatmul.mubr.msk.f32.gmra.mrb[20].mxu0 %vm331_vm1, %v18784_v37 }
 0x19b   : > { %14951 = vmatprep.mubr.msk.f32.mxu0 %vm331_vm1, %v18786_v38 }
 0x19e   : > { %14952 = vmatmul.mubr.msk.f32.gmra.mrb[22].mxu0 %vm331_vm1, %v18792_v39 }
 0x19f   : > { %14954 = vmatprep.mubr.msk.f32.mxu0 %vm331_vm1, %v18794_v40 }
 0x1a2   : > { %14955 = vmatmul.mubr.msk.f32.gmra.mrb[24].mxu0 %vm331_vm1, %v18800_v41 }
 0x1a3   : > { %14957 = vmatprep.mubr.msk.f32.mxu0 %vm331_vm1, %v18802_v42 }
 0x1a6   : > { %14958 = vmatmul.mubr.msk.f32.gmra.mrb[26].mxu0 %vm331_vm1, %v18808_v43 }
 0x1a7   : > { %14960 = vmatprep.mubr.msk.f32.mxu0 %vm331_vm1, %v1516_v45 }
 0x1aa   : > { %14961 = vmatmul.mubr.msk.f32.gmra.mrb[28].mxu0 %vm331_vm1, %v1517_v46 }
 0x1ab   : > { %14963 = vmatprep.mubr.msk.f32.mxu0 %vm331_vm1, %v1518_v48 }
 0x1ae   : > { %14964 = vmatmul.mubr.msk.f32.gmra.mrb[30].mxu0 %vm331_vm1, %v1519_v49 }
 0x1af   : > { %14968 = vmatprep.mubr.msk.f32.mxu0 %vm331_vm1, %v2414_v50  ;;  %v3486_v50 = vld [vmem:[%s22593_s2 + $0x10] sm:$0xff] }
 0x1b2   : > { %14969 = vmatmul.mubr.msk.f32.vlgmr.msra.gmra.mrb[0].mxu0 %vm331_vm1, %v2415_v51  ;;  %v3487_v51 = vld [vmem:[%s22593_s2 + $0x18] sm:$0xff] }
 0x1b3   : > { %15017 = vmatpush3.msk.msra.mxu0 %vm753_vm0, %v12290_v47  ;;  %14971 = vmatprep.mubr.msk.f32.mxu0 %vm331_vm1, %v18945_v52 }
 0x1b4   : > { %15066 = vmatprep.subr.msk.mxu0 %vm753_vm0, %v18950_v53 }
 0x1b6   : > { %14972 = vmatmul.mubr.msk.f32.gmra.mrb[2].mxu0 %vm331_vm1, %v18956_v54 }
 0x1b7   : > { %14974 = vmatprep.mubr.msk.f32.mxu0 %vm331_vm1, %v18958_v55 }
 0x1ba   : > { %14975 = vmatmul.mubr.msk.f32.gmra.mrb[4].mxu0 %vm331_vm1, %v18966_v56 }
 0x1bb   : > { %14977 = vmatprep.mubr.msk.f32.mxu0 %vm331_vm1, %v18968_v57 }
 0x1be   : > { %14978 = vmatmul.mubr.msk.f32.gmra.mrb[6].mxu0 %vm331_vm1, %v18974_v58 }
 0x1bf   : > { %14980 = vmatprep.mubr.msk.f32.mxu0 %vm331_vm1, %v18976_v59 }
 0x1c2   : > { %14981 = vmatmul.mubr.msk.f32.gmra.mrb[8].mxu0 %vm331_vm1, %v18982_v60 }
 0x1c3   : > { %14983 = vmatprep.mubr.msk.f32.mxu0 %vm331_vm1, %v18984_v61 }
 0x1c6   : > { %14984 = vmatmul.mubr.msk.f32.gmra.mrb[10].mxu0 %vm331_vm1, %v18990_v62 }
 0x1c7   : > { %14986 = vmatprep.mubr.msk.f32.mxu0 %vm331_vm1, %v18992_v63 }
 0x1ca   : > { %14987 = vmatmul.mubr.msk.f32.gmra.mrb[12].mxu0 %vm331_vm1, %v18998_v0 }
 0x1cb   : > { %14989 = vmatprep.mubr.msk.f32.mxu0 %vm331_vm1, %v19000_v2 }
 0x1ce   : > { %14990 = vmatmul.mubr.msk.f32.gmra.mrb[14].mxu0 %vm331_vm1, %v19006_v3 }
 0x1cf   : > { %14992 = vmatprep.mubr.msk.f32.mxu0 %vm331_vm1, %v19008_v4 }
 0x1d2   : > { %14993 = vmatmul.mubr.msk.f32.gmra.mrb[16].mxu0 %vm331_vm1, %v19014_v5 }
 0x1d3   : > { %14995 = vmatprep.mubr.msk.f32.mxu0 %vm331_vm1, %v19016_v6 }
 0x1d6   : > { %14996 = vmatmul.mubr.msk.f32.gmra.mrb[18].mxu0 %vm331_vm1, %v19022_v7 }
 0x1d7   : > { %14998 = vmatprep.mubr.msk.f32.mxu0 %vm331_vm1, %v19024_v8 }
 0x1da   : > { %14999 = vmatmul.mubr.msk.f32.gmra.mrb[20].mxu0 %vm331_vm1, %v19030_v9 }
 0x1db   : > { %15001 = vmatprep.mubr.msk.f32.mxu0 %vm331_vm1, %v19032_v10 }
 0x1de   : > { %15002 = vmatmul.mubr.msk.f32.gmra.mrb[22].mxu0 %vm331_vm1, %v19038_v11 }
 0x1df   : > { %15004 = vmatprep.mubr.msk.f32.mxu0 %vm331_vm1, %v19040_v12 }
 0x1e2   : > { %15005 = vmatmul.mubr.msk.f32.gmra.mrb[24].mxu0 %vm331_vm1, %v19046_v13 }
 0x1e3   : > { %15007 = vmatprep.mubr.msk.f32.mxu0 %vm331_vm1, %v19048_v14 }
 0x1e6   : > { %15008 = vmatmul.mubr.msk.f32.gmra.mrb[26].mxu0 %vm331_vm1, %v19054_v15 }
 0x1e7   : > { %15010 = vmatprep.mubr.msk.f32.mxu0 %vm331_vm1, %v19056_v16 }
 0x1ea   : > { %15011 = vmatmul.mubr.msk.f32.gmra.mrb[28].mxu0 %vm331_vm1, %v19062_v17 }
 0x1eb   : > { %15013 = vmatprep.mubr.msk.f32.mxu0 %vm331_vm1, %v19064_v18 }
 0x1ee   : > { %15014 = vmatmul.mubr.msk.f32.gmra.mrb[30].mxu0 %vm331_vm1, %v19070_v19 }
 0x1ef   : > { %15018 = vmatprep.mubr.msk.f32.mxu0 %vm331_vm1, %v18945_v52 }
 0x1f2   : > { %15019 = vmatmul.mubr.msk.f32.vlgmr.msra.gmra.mrb[0].mxu0 %vm331_vm1, %v18956_v54 }
 0x1f3   : > { %15067 = vmatpush3.msk.msra.mxu0 %vm753_vm0, %v18950_v53  ;;  %15021 = vmatprep.mubr.msk.f32.mxu0 %vm331_vm1, %v18958_v55 }
 0x1f6   : > { %15022 = vmatmul.mubr.msk.f32.gmra.mrb[2].mxu0 %vm331_vm1, %v18966_v56 }
 0x1f7   : > { %15024 = vmatprep.mubr.msk.f32.mxu0 %vm331_vm1, %v18968_v57 }
 0x1fa   : > { %15025 = vmatmul.mubr.msk.f32.gmra.mrb[4].mxu0 %vm331_vm1, %v18974_v58 }
 0x1fb   : > { %15027 = vmatprep.mubr.msk.f32.mxu0 %vm331_vm1, %v18976_v59 }
 0x1fe   : > { %15028 = vmatmul.mubr.msk.f32.gmra.mrb[6].mxu0 %vm331_vm1, %v18982_v60 }
 0x1ff   : > { %15030 = vmatprep.mubr.msk.f32.mxu0 %vm331_vm1, %v18984_v61 }
 0x202   : > { %15031 = vmatmul.mubr.msk.f32.gmra.mrb[8].mxu0 %vm331_vm1, %v18990_v62 }
 0x203   : > { %15033 = vmatprep.mubr.msk.f32.mxu0 %vm331_vm1, %v18992_v63 }
 0x206   : > { %15034 = vmatmul.mubr.msk.f32.gmra.mrb[10].mxu0 %vm331_vm1, %v18998_v0 }
 0x207   : > { %15036 = vmatprep.mubr.msk.f32.mxu0 %vm331_vm1, %v19000_v2 }
 0x20a   : > { %15037 = vmatmul.mubr.msk.f32.gmra.mrb[12].mxu0 %vm331_vm1, %v19006_v3 }
 0x20b   : > { %15039 = vmatprep.mubr.msk.f32.mxu0 %vm331_vm1, %v19008_v4 }
 0x20e   : > { %15040 = vmatmul.mubr.msk.f32.gmra.mrb[14].mxu0 %vm331_vm1, %v19014_v5 }
 0x20f   : > { %15042 = vmatprep.mubr.msk.f32.mxu0 %vm331_vm1, %v19016_v6 }
 0x212   : > { %15043 = vmatmul.mubr.msk.f32.gmra.mrb[16].mxu0 %vm331_vm1, %v19022_v7 }
 0x213   : > { %15045 = vmatprep.mubr.msk.f32.mxu0 %vm331_vm1, %v19024_v8 }
 0x216   : > { %15046 = vmatmul.mubr.msk.f32.gmra.mrb[18].mxu0 %vm331_vm1, %v19030_v9 }
 0x217   : > { %15048 = vmatprep.mubr.msk.f32.mxu0 %vm331_vm1, %v19032_v10 }
 0x21a   : > { %15049 = vmatmul.mubr.msk.f32.gmra.mrb[20].mxu0 %vm331_vm1, %v19038_v11 }
 0x21b   : > { %15051 = vmatprep.mubr.msk.f32.mxu0 %vm331_vm1, %v19040_v12 }
 0x21e   : > { %15052 = vmatmul.mubr.msk.f32.gmra.mrb[22].mxu0 %vm331_vm1, %v19046_v13 }
 0x21f   : > { %15054 = vmatprep.mubr.msk.f32.mxu0 %vm331_vm1, %v19048_v14 }
 0x222   : > { %15055 = vmatmul.mubr.msk.f32.gmra.mrb[24].mxu0 %vm331_vm1, %v19054_v15 }
 0x223   : > { %15057 = vmatprep.mubr.msk.f32.mxu0 %vm331_vm1, %v19056_v16 }
 0x226   : > { %15058 = vmatmul.mubr.msk.f32.gmra.mrb[26].mxu0 %vm331_vm1, %v19062_v17 }
 0x227   : > { %15060 = vmatprep.mubr.msk.f32.mxu0 %vm331_vm1, %v19064_v18 }
 0x22a   : > { %15061 = vmatmul.mubr.msk.f32.gmra.mrb[28].mxu0 %vm331_vm1, %v19070_v19 }
 0x22b   : > { %15063 = vmatprep.mubr.msk.f32.mxu0 %vm331_vm1, %v2446_v20 }
 0x22e   : > { %15064 = vmatmul.mubr.msk.f32.gmra.mrb[30].mxu0 %vm331_vm1, %v2447_v21 }
 0x22f   : > { %15068 = vmatprep.mubr.msk.f32.mxu0 %vm331_vm1, %v18958_v55 }
 0x232   : > { %15069 = vmatmul.mubr.msk.f32.vlgmr.msra.gmra.mrb[0].mxu0 %vm331_vm1, %v18966_v56 }
 0x233   : > { %15071 = vmatprep.mubr.msk.f32.mxu0 %vm331_vm1, %v18968_v57 }
 0x236   : > { %15072 = vmatmul.mubr.msk.f32.gmra.mrb[2].mxu0 %vm331_vm1, %v18974_v58 }
 0x237   : > { %15074 = vmatprep.mubr.msk.f32.mxu0 %vm331_vm1, %v18976_v59  ;;  %v16712_v59 = vpack.c.bf16 %v3487_v51, %v3486_v50 }
 0x23a   : > { %15075 = vmatmul.mubr.msk.f32.gmra.mrb[4].mxu0 %vm331_vm1, %v18982_v60 }
 0x23b   : > { %15077 = vmatprep.mubr.msk.f32.mxu0 %vm331_vm1, %v18984_v61  ;;  %v12427_v61 = vld [vmem:[%s22593_s2 + $0xc0] sm:$0xff] }
 0x23e   : > { %15078 = vmatmul.mubr.msk.f32.gmra.mrb[6].mxu0 %vm331_vm1, %v18990_v62  ;;  %v12428_v62 = vld [vmem:[%s22593_s2 + $0xc8] sm:$0xff] }
 0x23f   : > { %15080 = vmatprep.mubr.msk.f32.mxu0 %vm331_vm1, %v18992_v63 }
 0x242   : > { %15081 = vmatmul.mubr.msk.f32.gmra.mrb[8].mxu0 %vm331_vm1, %v18998_v0 }
 0x243   : > { %15083 = vmatprep.mubr.msk.f32.mxu0 %vm331_vm1, %v19000_v2 }
 0x246   : > { %15084 = vmatmul.mubr.msk.f32.gmra.mrb[10].mxu0 %vm331_vm1, %v19006_v3 }
 0x247   : > { %15086 = vmatprep.mubr.msk.f32.mxu0 %vm331_vm1, %v19008_v4 }
 0x24a   : > { %15087 = vmatmul.mubr.msk.f32.gmra.mrb[12].mxu0 %vm331_vm1, %v19014_v5 }
 0x24b   : > { %15089 = vmatprep.mubr.msk.f32.mxu0 %vm331_vm1, %v19016_v6 }
 0x24e   : > { %15090 = vmatmul.mubr.msk.f32.gmra.mrb[14].mxu0 %vm331_vm1, %v19022_v7  ;;  %v19369_v7 = vpack.c.bf16 %v12428_v62, %v12427_v61 }
 0x24f   : > { %15092 = vmatprep.mubr.msk.f32.mxu0 %vm331_vm1, %v19024_v8 }
 0x252   : > { %15093 = vmatmul.mubr.msk.f32.gmra.mrb[16].mxu0 %vm331_vm1, %v19030_v9 }
 0x253   : > { %15095 = vmatprep.mubr.msk.f32.mxu0 %vm331_vm1, %v19032_v10 }
 0x256   : > { %15096 = vmatmul.mubr.msk.f32.gmra.mrb[18].mxu0 %vm331_vm1, %v19038_v11 }
 0x257   : > { %15098 = vmatprep.mubr.msk.f32.mxu0 %vm331_vm1, %v19040_v12 }
 0x25a   : > { %15099 = vmatmul.mubr.msk.f32.gmra.mrb[20].mxu0 %vm331_vm1, %v19046_v13 }
 0x25b   : > { %15101 = vmatprep.mubr.msk.f32.mxu0 %vm331_vm1, %v19048_v14 }
 0x25e   : > { %15102 = vmatmul.mubr.msk.f32.gmra.mrb[22].mxu0 %vm331_vm1, %v19054_v15 }
 0x25f   : > { %15104 = vmatprep.mubr.msk.f32.mxu0 %vm331_vm1, %v19056_v16 }
 0x262   : > { %15105 = vmatmul.mubr.msk.f32.gmra.mrb[24].mxu0 %vm331_vm1, %v19062_v17 }
 0x263   : > { %15107 = vmatprep.mubr.msk.f32.mxu0 %vm331_vm1, %v19064_v18 }
 0x266   : > { %15108 = vmatmul.mubr.msk.f32.gmra.mrb[26].mxu0 %vm331_vm1, %v19070_v19 }
 0x267   : > { %15110 = vmatprep.mubr.msk.f32.mxu0 %vm331_vm1, %v2446_v20 }
 0x26a   : > { %15111 = vmatmul.mubr.msk.f32.gmra.mrb[28].mxu0 %vm331_vm1, %v2447_v21 }
 0x26b   : > { %15113 = vmatprep.mubr.msk.f32.mxu0 %vm331_vm1, %v2448_v22 }
 0x26e   : > { %15114 = vmatmul.mubr.msk.f32.gmra.mrb[30].mxu0 %vm331_vm1, %v2449_v23 }
 0x305   : > { %v15070_v34 = vpop.f32.mrb[0].mxu0 }
 0x306   : > { %v3352_v35 = vadd.f32 %v15070_v34, %v19327_v33  ;;  %v3153_v36 = vpop.f32.mrb[1].mxu0 }
 0x307   : > { %v3351_v37 = vadd.f32 %v19327_v33, %v3153_v36 }
 0x308   : > { %v3384_v38 = vmax.f32 %v3352_v35, 0.0 }
 0x309   : > { %v3383_v39 = vmax.f32 %v3351_v37, 0.0  ;;  %v15073_v40 = vpop.f32.mrb[2].mxu0 }
 0x30a   : > { %3417 = vst.msk [vmem:[#allocation3 + $0x21] sm:$0xff] %vm387_vm3, %v3384_v38  ;;  %v3354_v41 = vadd.f32 %v15073_v40, %v19327_v33  ;;  %v3163_v42 = vpop.f32.mrb[3].mxu0 }
 0x30b   : > { %3416 = vst.msk [vmem:[#allocation3 + $0x19] sm:$0xff] %vm387_vm3, %v3383_v39  ;;  %v3353_v43 = vadd.f32 %v19327_v33, %v3163_v42 }
 0x30c   : > { %v3386_v44 = vmax.f32 %v3354_v41, 0.0 }
 0x30d   : > { %v3385_v45 = vmax.f32 %v3353_v43, 0.0  ;;  %v15076_v46 = vpop.f32.mrb[4].mxu0 }
 0x30e   : > { %3419 = vst.msk [vmem:[#allocation3 + $0x39] sm:$0xff] %vm387_vm3, %v3386_v44  ;;  %v3356_v47 = vadd.f32 %v15076_v46, %v19327_v33  ;;  %v3173_v48 = vpop.f32.mrb[5].mxu0 }
 0x30f   : > { %3418 = vst.msk [vmem:[#allocation3 + $0x31] sm:$0xff] %vm387_vm3, %v3385_v45  ;;  %v3355_v49 = vadd.f32 %v19327_v33, %v3173_v48 }
 0x310   : > { %v3388_v52 = vmax.f32 %v3356_v47, 0.0 }
 0x311   : > { %v3387_v53 = vmax.f32 %v3355_v49, 0.0  ;;  %v15079_v54 = vpop.f32.mrb[6].mxu0 }
 0x312   : > { %3421 = vst.msk [vmem:[#allocation3 + $0x51] sm:$0xff] %vm387_vm3, %v3388_v52  ;;  %v3358_v55 = vadd.f32 %v15079_v54, %v19327_v33  ;;  %v3183_v56 = vpop.f32.mrb[7].mxu0  ;;  %v19347_v57 = vld [vmem:[#allocation3 + $0x18] sm:$0xff]  ;;  %v19349_v58 = vld [vmem:[#allocation3 + $0x20] sm:$0xff] }
 0x313   : > { %3420 = vst.msk [vmem:[#allocation3 + $0x49] sm:$0xff] %vm387_vm3, %v3387_v53  ;;  %v3357_v60 = vadd.f32 %v19327_v33, %v3183_v56  ;;  %15124 = vmatprep.mubr.msk.f32.mxu1 %vm387_vm3, %v19347_v57 }
 0x314   : > { %v3390_v63 = vmax.f32 %v3358_v55, 0.0  ;;  %15125 = vmatmul.mubr.msk.f32.vlgmr.msra.gmra.mrb[0].mxu1 %vm387_vm3, %v19349_v58 }
 0x315   : > { %v3389_v0 = vmax.f32 %v3357_v60, 0.0  ;;  %16711 = vmatpush3.bf16.msra.mxu1 %v16708_v32  ;;  %v15082_v2 = vpop.f32.mrb[8].mxu0 }
 0x316   : > { %3423 = vst.msk [vmem:[#allocation3 + $0x69] sm:$0xff] %vm387_vm3, %v3390_v63  ;;  %v3360_v3 = vadd.f32 %v15082_v2, %v19327_v33  ;;  %v3193_v4 = vpop.f32.mrb[9].mxu0  ;;  %v19365_v5 = vld [vmem:[#allocation3 + $0x30] sm:$0xff]  ;;  %v19367_v6 = vld [vmem:[#allocation3 + $0x38] sm:$0xff]  ;;  %16713 = vmatprep.subr.bf16.mxu1 %v16712_v59 }
 0x317   : > { %3422 = vst.msk [vmem:[#allocation3 + $0x61] sm:$0xff] %vm387_vm3, %v3389_v0  ;;  %v3359_v8 = vadd.f32 %v19327_v33, %v3193_v4  ;;  %15127 = vmatprep.mubr.msk.f32.mxu1 %vm387_vm3, %v19365_v5 }
 0x318   : > { %v3392_v9 = vmax.f32 %v3360_v3, 0.0  ;;  %15128 = vmatmul.mubr.msk.f32.gmra.mrb[2].mxu1 %vm387_vm3, %v19367_v6 }
 0x319   : > { %v3391_v10 = vmax.f32 %v3359_v8, 0.0  ;;  %v15085_v11 = vpop.f32.mrb[10].mxu0  ;;  %16715 = vmatpush3.bf16.msra.mxu1 %v16712_v59 }
 0x31a   : > { %3425 = vst.msk [vmem:[#allocation3 + $0x81] sm:$0xff] %vm387_vm3, %v3392_v9  ;;  %v3362_v12 = vadd.f32 %v15085_v11, %v19327_v33  ;;  %v3203_v13 = vpop.f32.mrb[11].mxu0  ;;  %v19379_v14 = vld [vmem:[#allocation3 + $0x48] sm:$0xff]  ;;  %v19381_v15 = vld [vmem:[#allocation3 + $0x50] sm:$0xff]  ;;  %16717 = vmatprep.subr.bf16.mxu1 %v19369_v7 }
 0x31b   : > { %3424 = vst.msk [vmem:[#allocation3 + $0x79] sm:$0xff] %vm387_vm3, %v3391_v10  ;;  %v3361_v16 = vadd.f32 %v19327_v33, %v3203_v13  ;;  %15130 = vmatprep.mubr.msk.f32.mxu1 %vm387_vm3, %v19379_v14 }
 0x31c   : > { %v3394_v17 = vmax.f32 %v3362_v12, 0.0  ;;  %15131 = vmatmul.mubr.msk.f32.gmra.mrb[4].mxu1 %vm387_vm3, %v19381_v15 }
 0x31d   : > { %v3393_v18 = vmax.f32 %v3361_v16, 0.0  ;;  %v15088_v19 = vpop.f32.mrb[12].mxu0 }
 0x31e   : > { %3427 = vst.msk [vmem:[#allocation3 + $0x99] sm:$0xff] %vm387_vm3, %v3394_v17  ;;  %v3364_v20 = vadd.f32 %v15088_v19, %v19327_v33  ;;  %v3213_v21 = vpop.f32.mrb[13].mxu0  ;;  %v19392_v22 = vld [vmem:[#allocation3 + $0x60] sm:$0xff]  ;;  %v19394_v23 = vld [vmem:[#allocation3 + $0x68] sm:$0xff] }
 0x31f   : > { %3426 = vst.msk [vmem:[#allocation3 + $0x91] sm:$0xff] %vm387_vm3, %v3393_v18  ;;  %v3363_v24 = vadd.f32 %v19327_v33, %v3213_v21  ;;  %15133 = vmatprep.mubr.msk.f32.mxu1 %vm387_vm3, %v19392_v22 }
 0x320   : > { %v3396_v25 = vmax.f32 %v3364_v20, 0.0  ;;  %15134 = vmatmul.mubr.msk.f32.gmra.mrb[6].mxu1 %vm387_vm3, %v19394_v23 }
 0x321   : > { %v3395_v26 = vmax.f32 %v3363_v24, 0.0  ;;  %v15091_v27 = vpop.f32.mrb[14].mxu0 }
 0x322   : > { %3429 = vst.msk [vmem:[#allocation3 + $0xb1] sm:$0xff] %vm387_vm3, %v3396_v25  ;;  %v3366_v28 = vadd.f32 %v15091_v27, %v19327_v33  ;;  %v3223_v29 = vpop.f32.mrb[15].mxu0  ;;  %v19404_v30 = vld [vmem:[#allocation3 + $0x78] sm:$0xff]  ;;  %v19406_v31 = vld [vmem:[#allocation3 + $0x80] sm:$0xff] }
 0x323   : > { %3428 = vst.msk [vmem:[#allocation3 + $0xa9] sm:$0xff] %vm387_vm3, %v3395_v26  ;;  %v3365_v32 = vadd.f32 %v19327_v33, %v3223_v29  ;;  %15136 = vmatprep.mubr.msk.f32.mxu1 %vm387_vm3, %v19404_v30 }
 0x324   : > { %v3398_v34 = vmax.f32 %v3366_v28, 0.0  ;;  %15137 = vmatmul.mubr.msk.f32.gmra.mrb[8].mxu1 %vm387_vm3, %v19406_v31 }
 0x325   : > { %v3397_v35 = vmax.f32 %v3365_v32, 0.0  ;;  %v15094_v36 = vpop.f32.mrb[16].mxu0 }
 0x326   : > { %3431 = vst.msk [vmem:[#allocation3 + $0xc9] sm:$0xff] %vm387_vm3, %v3398_v34  ;;  %v3368_v37 = vadd.f32 %v15094_v36, %v19327_v33  ;;  %v3233_v38 = vpop.f32.mrb[17].mxu0  ;;  %v19416_v39 = vld [vmem:[#allocation3 + $0x90] sm:$0xff]  ;;  %v19418_v40 = vld [vmem:[#allocation3 + $0x98] sm:$0xff] }
 0x327   : > { %3430 = vst.msk [vmem:[#allocation3 + $0xc1] sm:$0xff] %vm387_vm3, %v3397_v35  ;;  %v3367_v41 = vadd.f32 %v19327_v33, %v3233_v38  ;;  %15139 = vmatprep.mubr.msk.f32.mxu1 %vm387_vm3, %v19416_v39 }
 0x328   : > { %v3400_v42 = vmax.f32 %v3368_v37, 0.0  ;;  %15140 = vmatmul.mubr.msk.f32.gmra.mrb[10].mxu1 %vm387_vm3, %v19418_v40 }
 0x329   : > { %v3399_v43 = vmax.f32 %v3367_v41, 0.0  ;;  %v15097_v44 = vpop.f32.mrb[18].mxu0 }
 0x32a   : > { %3433 = vst.msk [vmem:[#allocation3 + $0xe1] sm:$0xff] %vm387_vm3, %v3400_v42  ;;  %v3370_v45 = vadd.f32 %v15097_v44, %v19327_v33  ;;  %v3243_v46 = vpop.f32.mrb[19].mxu0  ;;  %v19428_v47 = vld [vmem:[#allocation3 + $0xa8] sm:$0xff]  ;;  %v19430_v48 = vld [vmem:[#allocation3 + $0xb0] sm:$0xff] }
 0x32b   : > { %3432 = vst.msk [vmem:[#allocation3 + $0xd9] sm:$0xff] %vm387_vm3, %v3399_v43  ;;  %v3369_v49 = vadd.f32 %v19327_v33, %v3243_v46  ;;  %15142 = vmatprep.mubr.msk.f32.mxu1 %vm387_vm3, %v19428_v47 }
 0x32c   : > { %v3402_v50 = vmax.f32 %v3370_v45, 0.0  ;;  %15143 = vmatmul.mubr.msk.f32.gmra.mrb[12].mxu1 %vm387_vm3, %v19430_v48 }
 0x32d   : > { %v3401_v51 = vmax.f32 %v3369_v49, 0.0  ;;  %v15100_v52 = vpop.f32.mrb[20].mxu0 }
 0x32e   : > { %3435 = vst.msk [vmem:[#allocation3 + $0xf9] sm:$0xff] %vm387_vm3, %v3402_v50  ;;  %v3372_v53 = vadd.f32 %v15100_v52, %v19327_v33  ;;  %v3253_v54 = vpop.f32.mrb[21].mxu0  ;;  %v19440_v55 = vld [vmem:[#allocation3 + $0xc0] sm:$0xff]  ;;  %v19442_v56 = vld [vmem:[#allocation3 + $0xc8] sm:$0xff] }
 0x32f   : > { %3434 = vst.msk [vmem:[#allocation3 + $0xf1] sm:$0xff] %vm387_vm3, %v3401_v51  ;;  %v3371_v59 = vadd.f32 %v19327_v33, %v3253_v54  ;;  %15145 = vmatprep.mubr.msk.f32.mxu1 %vm387_vm3, %v19440_v55 }
 0x330   : > { %v3404_v60 = vmax.f32 %v3372_v53, 0.0  ;;  %15146 = vmatmul.mubr.msk.f32.gmra.mrb[14].mxu1 %vm387_vm3, %v19442_v56 }
 0x331   : > { %v3403_v61 = vmax.f32 %v3371_v59, 0.0  ;;  %v15103_v62 = vpop.f32.mrb[22].mxu0 }
 0x332   : > { %3437 = vst.msk [vmem:[#allocation3 + $0x111] sm:$0xff] %vm387_vm3, %v3404_v60  ;;  %v3374_v63 = vadd.f32 %v15103_v62, %v19327_v33  ;;  %v3263_v0 = vpop.f32.mrb[23].mxu0  ;;  %v19452_v2 = vld [vmem:[#allocation3 + $0xd8] sm:$0xff]  ;;  %v19454_v3 = vld [vmem:[#allocation3 + $0xe0] sm:$0xff] }
 0x333   : > { %3436 = vst.msk [vmem:[#allocation3 + $0x109] sm:$0xff] %vm387_vm3, %v3403_v61  ;;  %v3373_v4 = vadd.f32 %v19327_v33, %v3263_v0  ;;  %15148 = vmatprep.mubr.msk.f32.mxu1 %vm387_vm3, %v19452_v2  ;;  %v3448_v62 = vld [vmem:[#allocation3] sm:$0xff]  ;;  %v12430_v0 = vld [vmem:[%s22593_s2 + $0xd8] sm:$0xff] }
 0x334   : > { %v3406_v8 = vmax.f32 %v3374_v63, 0.0  ;;  %15149 = vmatmul.mubr.msk.f32.gmra.mrb[16].mxu1 %vm387_vm3, %v19454_v3  ;;  %v12429_v63 = vld [vmem:[%s22593_s2 + $0xd0] sm:$0xff] }
 0x335   : > { %v3405_v9 = vmax.f32 %v3373_v4, 0.0  ;;  %v15106_v10 = vpop.f32.mrb[24].mxu0  ;;  %v3449_v4 = vld [vmem:[#allocation3 + $0x8] sm:$0xff] }
 0x336   : > { %3439 = vst.msk [vmem:[#allocation3 + $0x129] sm:$0xff] %vm387_vm3, %v3406_v8  ;;  %v3376_v11 = vadd.f32 %v15106_v10, %v19327_v33  ;;  %v3273_v12 = vpop.f32.mrb[25].mxu0  ;;  %v19464_v13 = vld [vmem:[#allocation3 + $0xf0] sm:$0xff]  ;;  %v19466_v16 = vld [vmem:[#allocation3 + $0xf8] sm:$0xff]  ;;  %v16720_v8 = vpack.c.bf16 %v12430_v0, %v12429_v63 }
 0x337   : > { %3438 = vst.msk [vmem:[#allocation3 + $0x121] sm:$0xff] %vm387_vm3, %v3405_v9  ;;  %v3375_v17 = vadd.f32 %v19327_v33, %v3273_v12  ;;  %15151 = vmatprep.mubr.msk.f32.mxu1 %vm387_vm3, %v19464_v13  ;;  %v12463_v9 = vld [vmem:[%s22593_s2 + $0x20] sm:$0xff]  ;;  %v12464_v10 = vld [vmem:[%s22593_s2 + $0x28] sm:$0xff] }
 0x338   : > { %v3408_v18 = vmax.f32 %v3376_v11, 0.0  ;;  %15152 = vmatmul.mubr.msk.f32.gmra.mrb[18].mxu1 %vm387_vm3, %v19466_v16  ;;  %v16724_v11 = vpack.c.bf16 %v12464_v10, %v12463_v9  ;;  %v12499_v12 = vld [vmem:[%s22593_s2 + $0x80] sm:$0xff]  ;;  %v4347_v9 = vld [vmem:[#allocation3 + $0x199] sm:$0xff]  ;;  %v4348_v10 = vld [vmem:[#allocation3 + $0x1a1] sm:$0xff] }
 0x339   : > { %v3407_v19 = vmax.f32 %v3375_v17, 0.0  ;;  %v15109_v20 = vpop.f32.mrb[26].mxu0  ;;  %v12500_v17 = vld [vmem:[%s22593_s2 + $0x88] sm:$0xff]  ;;  %v12607_v0 = vld [vmem:[%s22593_s2 + $0xa0] sm:$0xff] }
 0x33a   : > { %3441 = vst.msk [vmem:[#allocation3 + $0x141] sm:$0xff] %vm387_vm3, %v3408_v18  ;;  %v3378_v21 = vadd.f32 %v15109_v20, %v19327_v33  ;;  %v3283_v24 = vpop.f32.mrb[27].mxu0  ;;  %v19476_v25 = vld [vmem:[#allocation3 + $0x108] sm:$0xff]  ;;  %v19478_v26 = vld [vmem:[#allocation3 + $0x110] sm:$0xff]  ;;  %v16732_v18 = vpack.c.bf16 %v12500_v17, %v12499_v12 }
 0x33b   : > { %3440 = vst.msk [vmem:[#allocation3 + $0x139] sm:$0xff] %vm387_vm3, %v3407_v19  ;;  %v3377_v27 = vadd.f32 %v19327_v33, %v3283_v24  ;;  %15154 = vmatprep.mubr.msk.f32.mxu1 %vm387_vm3, %v19476_v25  ;;  %v19734_v19 = vld [vmem:[#allocation3 + $0x79] sm:$0xff]  ;;  %v19738_v20 = vld [vmem:[#allocation3 + $0x81] sm:$0xff]  ;;  %v12643_v17 = vld [vmem:[%s22593_s2 + $0x100] sm:$0xff] }
 0x33c   : > { %v3410_v28 = vmax.f32 %v3378_v21, 0.0  ;;  %15155 = vmatmul.mubr.msk.f32.gmra.mrb[20].mxu1 %vm387_vm3, %v19478_v26  ;;  %v19742_v21 = vld [vmem:[#allocation3 + $0x91] sm:$0xff]  ;;  %v19746_v24 = vld [vmem:[#allocation3 + $0x99] sm:$0xff] }
 0x33d   : > { %v3409_v29 = vmax.f32 %v3377_v27, 0.0  ;;  %v15112_v32 = vpop.f32.mrb[28].mxu0  ;;  %v19758_v27 = vld [vmem:[#allocation3 + $0xc1] sm:$0xff] }
 0x33e   : > { %3443 = vst.msk [vmem:[#allocation3 + $0x159] sm:$0xff] %vm387_vm3, %v3410_v28  ;;  %v3380_v34 = vadd.f32 %v15112_v32, %v19327_v33  ;;  %v3293_v35 = vpop.f32.mrb[29].mxu0  ;;  %v19488_v36 = vld [vmem:[#allocation3 + $0x120] sm:$0xff]  ;;  %v19490_v37 = vld [vmem:[#allocation3 + $0x128] sm:$0xff] }
 0x33f   : > { %3442 = vst.msk [vmem:[#allocation3 + $0x151] sm:$0xff] %vm387_vm3, %v3409_v29  ;;  %v3379_v38 = vadd.f32 %v19327_v33, %v3293_v35  ;;  %15157 = vmatprep.mubr.msk.f32.mxu1 %vm387_vm3, %v19488_v36  ;;  %v19762_v28 = vld [vmem:[#allocation3 + $0xc9] sm:$0xff]  ;;  %v19766_v29 = vld [vmem:[#allocation3 + $0xd9] sm:$0xff]  ;;  %v19770_v32 = vld [vmem:[#allocation3 + $0xe1] sm:$0xff] }
 0x340   : > { %v3412_v41 = vmax.f32 %v3380_v34, 0.0  ;;  %15158 = vmatmul.mubr.msk.f32.gmra.mrb[22].mxu1 %vm387_vm3, %v19490_v37  ;;  %v19774_v34 = vld [vmem:[#allocation3 + $0xf1] sm:$0xff]  ;;  %v19778_v35 = vld [vmem:[#allocation3 + $0xf9] sm:$0xff] }
 0x341   : > { %v3411_v42 = vmax.f32 %v3379_v38, 0.0  ;;  %v15115_v43 = vpop.f32.mrb[30].mxu0  ;;  %v19790_v38 = vld [vmem:[#allocation3 + $0x121] sm:$0xff] }
 0x342   : > { %3445 = vst.msk [vmem:[#allocation3 + $0x171] sm:$0xff] %vm387_vm3, %v3412_v41  ;;  %v3382_v44 = vadd.f32 %v15115_v43, %v19327_v33  ;;  %v3303_v45 = vpop.f32.mrb[31].mxu0  ;;  %v19500_v46 = vld [vmem:[#allocation3 + $0x138] sm:$0xff]  ;;  %v19502_v49 = vld [vmem:[#allocation3 + $0x140] sm:$0xff]  ;;  %v19794_v41 = vld [vmem:[#allocation3 + $0x129] sm:$0xff] }
 0x343   : > { %3444 = vst.msk [vmem:[#allocation3 + $0x169] sm:$0xff] %vm387_vm3, %v3411_v42  ;;  %v3381_v50 = vadd.f32 %v19327_v33, %v3303_v45  ;;  %15160 = vmatprep.mubr.msk.f32.mxu1 %vm387_vm3, %v19500_v46  ;;  %v19798_v42 = vld [vmem:[#allocation3 + $0x139] sm:$0xff]  ;;  %v19802_v43 = vld [vmem:[#allocation3 + $0x141] sm:$0xff] }
 0x344   : > { %v3414_v51 = vmax.f32 %v3382_v44, 0.0  ;;  %15161 = vmatmul.mubr.msk.f32.gmra.mrb[24].mxu1 %vm387_vm3, %v19502_v49 }
 0x345   : > { %v3413_v52 = vmax.f32 %v3381_v50, 0.0  ;;  %v19810_v45 = vld [vmem:[#allocation3 + $0x159] sm:$0xff] }
 0x346   : > { %3447 = vst.msk [vmem:[#allocation3 + $0x189] sm:$0xff] %vm387_vm3, %v3414_v51  ;;  %v19511_v53 = vld [vmem:[#allocation3 + $0x150] sm:$0xff]  ;;  %v19513_v54 = vld [vmem:[#allocation3 + $0x158] sm:$0xff]  ;;  %v12537_v50 = vld [vmem:[%s22593_s2 + $0xf0] sm:$0xff] }
 0x347   : > { %3446 = vst.msk [vmem:[#allocation3 + $0x181] sm:$0xff] %vm387_vm3, %v3413_v52  ;;  %15163 = vmatprep.mubr.msk.f32.mxu1 %vm387_vm3, %v19511_v53  ;;  %v19806_v44 = vld [vmem:[#allocation3 + $0x151] sm:$0xff]  ;;  %v12538_v51 = vld [vmem:[%s22593_s2 + $0xf8] sm:$0xff] }
 0x348   : > { %15164 = vmatmul.mubr.msk.f32.gmra.mrb[26].mxu1 %vm387_vm3, %v19513_v54  ;;  %v16744_v52 = vpack.c.bf16 %v12538_v51, %v12537_v50  ;;  %v12684_v50 = vld [vmem:[%s22594_s3 + $0xb0] sm:$0xff]  ;;  %v12685_v51 = vld [vmem:[%s22594_s3 + $0xb8] sm:$0xff] }
 0x349   : > { %v16780_v1 = vpack.c.bf16 %v12685_v51, %v12684_v50 }
 0x34a   : > { %v19520_v33 = vld [vmem:[#allocation3 + $0x168] sm:$0xff]  ;;  %v19522_v59 = vld [vmem:[#allocation3 + $0x170] sm:$0xff] }
 0x34b   : > { %15166 = vmatprep.mubr.msk.f32.mxu1 %vm387_vm3, %v19520_v33 }
 0x34c   : > { %15167 = vmatmul.mubr.msk.f32.gmra.mrb[28].mxu1 %vm387_vm3, %v19522_v59 }
 0x34e   : > { %v19528_v60 = vld [vmem:[#allocation3 + $0x180] sm:$0xff]  ;;  %v19530_v61 = vld [vmem:[#allocation3 + $0x188] sm:$0xff] }
 0x34f   : > { %15169 = vmatprep.mubr.msk.f32.mxu1 %vm387_vm3, %v19528_v60 }
 0x350   : > { %15170 = vmatmul.mubr.msk.f32.gmra.mrb[30].mxu1 %vm387_vm3, %v19530_v61 }
 0x351   : > { %15180 = vmatprep.mubr.msk.f32.mxu1 %vm387_vm3, %v3448_v62  ;;  %v12574_v62 = vld [vmem:[%s22593_s2 + $0x58] sm:$0xff] }
 0x354   : > { %15181 = vmatmul.mubr.msk.f32.vlgmr.msra.gmra.mrb[0].mxu1 %vm387_vm3, %v3449_v4  ;;  %v12608_v4 = vld [vmem:[%s22593_s2 + $0xa8] sm:$0xff] }
 0x355   : > { %16719 = vmatpush3.bf16.msra.mxu1 %v19369_v7  ;;  %15183 = vmatprep.mubr.msk.f32.mxu1 %vm387_vm3, %v19347_v57  ;;  %v12465_v57 = vld [vmem:[%s22593_s2 + $0x30] sm:$0xff] }
 0x356   : > { %16721 = vmatprep.subr.bf16.mxu1 %v16720_v8 }
 0x358   : > { %15184 = vmatmul.mubr.msk.f32.gmra.mrb[2].mxu1 %vm387_vm3, %v19349_v58  ;;  %v12466_v58 = vld [vmem:[%s22593_s2 + $0x38] sm:$0xff] }
 0x359   : > { %15186 = vmatprep.mubr.msk.f32.mxu1 %vm387_vm3, %v19365_v5  ;;  %16723 = vmatpush3.bf16.msra.mxu1 %v16720_v8  ;;  %v16728_v7 = vpack.c.bf16 %v12466_v58, %v12465_v57  ;;  %v16756_v8 = vpack.c.bf16 %v12608_v4, %v12607_v0  ;;  %v12609_v57 = vld [vmem:[%s22593_s2 + $0xb0] sm:$0xff]  ;;  %v12610_v58 = vld [vmem:[%s22593_s2 + $0xb8] sm:$0xff] }
 0x35a   : > { %16725 = vmatprep.subr.bf16.mxu1 %v16724_v11  ;;  %v16760_v12 = vpack.c.bf16 %v12610_v58, %v12609_v57 }
 0x35c   : > { %15187 = vmatmul.mubr.msk.f32.gmra.mrb[4].mxu1 %vm387_vm3, %v19367_v6 }
 0x35d   : > { %15189 = vmatprep.mubr.msk.f32.mxu1 %vm387_vm3, %v19379_v14 }
 0x360   : > { %15190 = vmatmul.mubr.msk.f32.gmra.mrb[6].mxu1 %vm387_vm3, %v19381_v15 }
 0x361   : > { %15192 = vmatprep.mubr.msk.f32.mxu1 %vm387_vm3, %v19392_v22 }
 0x364   : > { %15193 = vmatmul.mubr.msk.f32.gmra.mrb[8].mxu1 %vm387_vm3, %v19394_v23 }
 0x365   : > { %15195 = vmatprep.mubr.msk.f32.mxu1 %vm387_vm3, %v19404_v30 }
 0x368   : > { %15196 = vmatmul.mubr.msk.f32.gmra.mrb[10].mxu1 %vm387_vm3, %v19406_v31 }
 0x369   : > { %15198 = vmatprep.mubr.msk.f32.mxu1 %vm387_vm3, %v19416_v39 }
 0x36c   : > { %15199 = vmatmul.mubr.msk.f32.gmra.mrb[12].mxu1 %vm387_vm3, %v19418_v40 }
 0x36d   : > { %15201 = vmatprep.mubr.msk.f32.mxu1 %vm387_vm3, %v19428_v47 }
 0x370   : > { %15202 = vmatmul.mubr.msk.f32.gmra.mrb[14].mxu1 %vm387_vm3, %v19430_v48 }
 0x371   : > { %15204 = vmatprep.mubr.msk.f32.mxu1 %vm387_vm3, %v19440_v55 }
 0x374   : > { %15205 = vmatmul.mubr.msk.f32.gmra.mrb[16].mxu1 %vm387_vm3, %v19442_v56 }
 0x375   : > { %15207 = vmatprep.mubr.msk.f32.mxu1 %vm387_vm3, %v19452_v2 }
 0x378   : > { %15208 = vmatmul.mubr.msk.f32.gmra.mrb[18].mxu1 %vm387_vm3, %v19454_v3 }
 0x379   : > { %15210 = vmatprep.mubr.msk.f32.mxu1 %vm387_vm3, %v19464_v13 }
 0x37c   : > { %15211 = vmatmul.mubr.msk.f32.gmra.mrb[20].mxu1 %vm387_vm3, %v19466_v16 }
 0x37d   : > { %15213 = vmatprep.mubr.msk.f32.mxu1 %vm387_vm3, %v19476_v25 }
 0x380   : > { %15214 = vmatmul.mubr.msk.f32.gmra.mrb[22].mxu1 %vm387_vm3, %v19478_v26 }
 0x381   : > { %15216 = vmatprep.mubr.msk.f32.mxu1 %vm387_vm3, %v19488_v36 }
 0x384   : > { %15217 = vmatmul.mubr.msk.f32.gmra.mrb[24].mxu1 %vm387_vm3, %v19490_v37 }
 0x385   : > { %15219 = vmatprep.mubr.msk.f32.mxu1 %vm387_vm3, %v19500_v46 }
 0x388   : > { %15220 = vmatmul.mubr.msk.f32.gmra.mrb[26].mxu1 %vm387_vm3, %v19502_v49 }
 0x389   : > { %15222 = vmatprep.mubr.msk.f32.mxu1 %vm387_vm3, %v19511_v53 }
 0x38c   : > { %15223 = vmatmul.mubr.msk.f32.gmra.mrb[28].mxu1 %vm387_vm3, %v19513_v54 }
 0x38d   : > { %15225 = vmatprep.mubr.msk.f32.mxu1 %vm387_vm3, %v19520_v33 }
 0x390   : > { %15226 = vmatmul.mubr.msk.f32.gmra.mrb[30].mxu1 %vm387_vm3, %v19522_v59 }
 0x391   : > { %15236 = vmatprep.mubr.msk.f32.mxu1 %vm387_vm3, %v19365_v5  ;;  %v3482_v5 = vld [vmem:[#allocation3 + $0x198] sm:$0xff] }
 0x394   : > { %15237 = vmatmul.mubr.msk.f32.vlgmr.msra.gmra.mrb[0].mxu1 %vm387_vm3, %v19367_v6  ;;  %v3483_v6 = vld [vmem:[#allocation3 + $0x1a0] sm:$0xff] }
 0x395   : > { %16727 = vmatpush3.bf16.msra.mxu1 %v16724_v11  ;;  %15239 = vmatprep.mubr.msk.f32.mxu1 %vm387_vm3, %v19379_v14  ;;  %v4313_v14 = vld [vmem:[#allocation3 + $0x1] sm:$0xff] }
 0x396   : > { %16729 = vmatprep.subr.bf16.mxu1 %v16728_v7  ;;  %v5243_v11 = vld [vmem:[#allocation3 + $0x2] sm:$0xff] }
 0x398   : > { %15240 = vmatmul.mubr.msk.f32.gmra.mrb[2].mxu1 %vm387_vm3, %v19381_v15  ;;  %v12501_v15 = vld [vmem:[%s22593_s2 + $0x90] sm:$0xff] }
 0x399   : > { %15242 = vmatprep.mubr.msk.f32.mxu1 %vm387_vm3, %v19392_v22  ;;  %16731 = vmatpush3.bf16.msra.mxu1 %v16728_v7  ;;  %v12502_v22 = vld [vmem:[%s22593_s2 + $0x98] sm:$0xff] }
 0x39a   : > { %16733 = vmatprep.subr.bf16.mxu1 %v16732_v18  ;;  %v5244_v7 = vld [vmem:[#allocation3 + $0xa] sm:$0xff] }
 0x39c   : > { %15243 = vmatmul.mubr.msk.f32.gmra.mrb[4].mxu1 %vm387_vm3, %v19394_v23  ;;  %v4314_v23 = vld [vmem:[#allocation3 + $0x9] sm:$0xff] }
 0x39d   : > { %15245 = vmatprep.mubr.msk.f32.mxu1 %vm387_vm3, %v19404_v30  ;;  %v16736_v30 = vpack.c.bf16 %v12502_v22, %v12501_v15  ;;  %v19993_v15 = vld [vmem:[#allocation3 + $0x32] sm:$0xff]  ;;  %v19998_v22 = vld [vmem:[#allocation3 + $0x3a] sm:$0xff] }
 0x3a0   : > { %15246 = vmatmul.mubr.msk.f32.gmra.mrb[6].mxu1 %vm387_vm3, %v19406_v31  ;;  %v12535_v31 = vld [vmem:[%s22593_s2 + $0xe0] sm:$0xff] }
 0x3a1   : > { %15248 = vmatprep.mubr.msk.f32.mxu1 %vm387_vm3, %v19416_v39  ;;  %v12536_v39 = vld [vmem:[%s22593_s2 + $0xe8] sm:$0xff] }
 0x3a4   : > { %15249 = vmatmul.mubr.msk.f32.gmra.mrb[8].mxu1 %vm387_vm3, %v19418_v40  ;;  %v19699_v40 = vld [vmem:[#allocation3 + $0x19] sm:$0xff] }
 0x3a5   : > { %15251 = vmatprep.mubr.msk.f32.mxu1 %vm387_vm3, %v19428_v47  ;;  %v19703_v47 = vpack.c.bf16 %v12536_v39, %v12535_v31  ;;  %v20010_v31 = vld [vmem:[#allocation3 + $0x62] sm:$0xff]  ;;  %v20014_v39 = vld [vmem:[#allocation3 + $0x6a] sm:$0xff] }
 0x3a8   : > { %15252 = vmatmul.mubr.msk.f32.gmra.mrb[10].mxu1 %vm387_vm3, %v19430_v48  ;;  %v19705_v48 = vld [vmem:[#allocation3 + $0x21] sm:$0xff] }
 0x3a9   : > { %15254 = vmatprep.mubr.msk.f32.mxu1 %vm387_vm3, %v19440_v55  ;;  %v19709_v55 = vld [vmem:[#allocation3 + $0x31] sm:$0xff] }
 0x3ac   : > { %15255 = vmatmul.mubr.msk.f32.gmra.mrb[12].mxu1 %vm387_vm3, %v19442_v56  ;;  %v19714_v56 = vld [vmem:[#allocation3 + $0x39] sm:$0xff] }
 0x3ad   : > { %15257 = vmatprep.mubr.msk.f32.mxu1 %vm387_vm3, %v19452_v2  ;;  %v19718_v2 = vld [vmem:[#allocation3 + $0x49] sm:$0xff] }
 0x3b0   : > { %15258 = vmatmul.mubr.msk.f32.gmra.mrb[14].mxu1 %vm387_vm3, %v19454_v3  ;;  %v19722_v3 = vld [vmem:[#allocation3 + $0x51] sm:$0xff] }
 0x3b1   : > { %15260 = vmatprep.mubr.msk.f32.mxu1 %vm387_vm3, %v19464_v13  ;;  %v19726_v13 = vld [vmem:[#allocation3 + $0x61] sm:$0xff] }
 0x3b4   : > { %15261 = vmatmul.mubr.msk.f32.gmra.mrb[16].mxu1 %vm387_vm3, %v19466_v16  ;;  %v19730_v16 = vld [vmem:[#allocation3 + $0x69] sm:$0xff] }
 0x3b5   : > { %15263 = vmatprep.mubr.msk.f32.mxu1 %vm387_vm3, %v19476_v25  ;;  %v19750_v25 = vld [vmem:[#allocation3 + $0xa9] sm:$0xff] }
 0x3b8   : > { %15264 = vmatmul.mubr.msk.f32.gmra.mrb[18].mxu1 %vm387_vm3, %v19478_v26  ;;  %v19754_v26 = vld [vmem:[#allocation3 + $0xb1] sm:$0xff] }
 0x3b9   : > { %15266 = vmatprep.mubr.msk.f32.mxu1 %vm387_vm3, %v19488_v36  ;;  %v19782_v36 = vld [vmem:[#allocation3 + $0x109] sm:$0xff] }
 0x3bc   : > { %15267 = vmatmul.mubr.msk.f32.gmra.mrb[20].mxu1 %vm387_vm3, %v19490_v37  ;;  %v19786_v37 = vld [vmem:[#allocation3 + $0x111] sm:$0xff] }
 0x3bd   : > { %15269 = vmatprep.mubr.msk.f32.mxu1 %vm387_vm3, %v19500_v46  ;;  %v19814_v46 = vld [vmem:[#allocation3 + $0x169] sm:$0xff] }
 0x3c0   : > { %15270 = vmatmul.mubr.msk.f32.gmra.mrb[22].mxu1 %vm387_vm3, %v19502_v49  ;;  %v19818_v49 = vld [vmem:[#allocation3 + $0x171] sm:$0xff] }
 0x3c1   : > { %15272 = vmatprep.mubr.msk.f32.mxu1 %vm387_vm3, %v19511_v53  ;;  %v12571_v53 = vld [vmem:[%s22593_s2 + $0x40] sm:$0xff] }
 0x3c4   : > { %15273 = vmatmul.mubr.msk.f32.gmra.mrb[24].mxu1 %vm387_vm3, %v19513_v54  ;;  %v12572_v54 = vld [vmem:[%s22593_s2 + $0x48] sm:$0xff] }
 0x3c5   : > { %15275 = vmatprep.mubr.msk.f32.mxu1 %vm387_vm3, %v19520_v33  ;;  %v16748_v33 = vpack.c.bf16 %v12572_v54, %v12571_v53  ;;  %v5276_v53 = vld [vmem:[#allocation3 + $0x18a] sm:$0xff]  ;;  %v5277_v54 = vld [vmem:[#allocation3 + $0x19a] sm:$0xff] }
 0x3c8   : > { %15276 = vmatmul.mubr.msk.f32.gmra.mrb[26].mxu1 %vm387_vm3, %v19522_v59  ;;  %v4345_v59 = vld [vmem:[#allocation3 + $0x181] sm:$0xff] }
 0x3c9   : > { %15278 = vmatprep.mubr.msk.f32.mxu1 %vm387_vm3, %v19528_v60  ;;  %v4346_v60 = vld [vmem:[#allocation3 + $0x189] sm:$0xff] }
 0x3cc   : > { %15279 = vmatmul.mubr.msk.f32.gmra.mrb[28].mxu1 %vm387_vm3, %v19530_v61  ;;  %v12573_v61 = vld [vmem:[%s22593_s2 + $0x50] sm:$0xff] }
 0x3cd   : > { %15281 = vmatprep.mubr.msk.f32.mxu1 %vm387_vm3, %v3482_v5  ;;  %v16752_v63 = vpack.c.bf16 %v12574_v62, %v12573_v61  ;;  %v19983_v5 = vld [vmem:[#allocation3 + $0x1a] sm:$0xff]  ;;  %v20494_v62 = vld [vmem:[%s22597_s6] ss:$0 sm:$0xff] }
 0x3d0   : > { %15282 = vmatmul.mubr.msk.f32.gmra.mrb[30].mxu1 %vm387_vm3, %v3483_v6 }
 0x3d1   : > { %15292 = vmatprep.mubr.msk.f32.mxu1 %vm387_vm3, %v4313_v14  ;;  %v19989_v14 = vld [vmem:[#allocation3 + $0x22] sm:$0xff] }
 0x3d4   : > { %15293 = vmatmul.mubr.msk.f32.vlgmr.msra.gmra.mrb[0].mxu1 %vm387_vm3, %v4314_v23  ;;  %v20002_v23 = vld [vmem:[#allocation3 + $0x4a] sm:$0xff] }
 0x3d5   : > { %16735 = vmatpush3.bf16.msra.mxu1 %v16732_v18  ;;  %15295 = vmatprep.mubr.msk.f32.mxu1 %vm387_vm3, %v19699_v40  ;;  %v12644_v18 = vld [vmem:[%s22593_s2 + $0x108] sm:$0xff] }
 0x3d6   : > { %16737 = vmatprep.subr.bf16.mxu1 %v16736_v30  ;;  %v19987_v6 = vpack.c.bf16 %v12644_v18, %v12643_v17 }
 0x3d8   : > { %15296 = vmatmul.mubr.msk.f32.gmra.mrb[2].mxu1 %vm387_vm3, %v19705_v48 }
 0x3d9   : > { %15298 = vmatprep.mubr.msk.f32.mxu1 %vm387_vm3, %v19709_v55  ;;  %16739 = vmatpush3.bf16.msra.mxu1 %v16736_v30  ;;  %v20006_v30 = vld [vmem:[#allocation3 + $0x52] sm:$0xff] }
 0x3da   : > { %16741 = vmatprep.subr.bf16.mxu1 %v19703_v47 }
 0x3dc   : > { %15299 = vmatmul.mubr.msk.f32.gmra.mrb[4].mxu1 %vm387_vm3, %v19714_v56 }
 0x3dd   : > { %15301 = vmatprep.mubr.msk.f32.mxu1 %vm387_vm3, %v19718_v2 }
 0x3e0   : > { %15302 = vmatmul.mubr.msk.f32.gmra.mrb[6].mxu1 %vm387_vm3, %v19722_v3 }
 0x3e1   : > { %15304 = vmatprep.mubr.msk.f32.mxu1 %vm387_vm3, %v19726_v13 }
 0x3e4   : > { %15305 = vmatmul.mubr.msk.f32.gmra.mrb[8].mxu1 %vm387_vm3, %v19730_v16 }
 0x3e5   : > { %15307 = vmatprep.mubr.msk.f32.mxu1 %vm387_vm3, %v19734_v19 }
 0x3e8   : > { %15308 = vmatmul.mubr.msk.f32.gmra.mrb[10].mxu1 %vm387_vm3, %v19738_v20 }
 0x3e9   : > { %15310 = vmatprep.mubr.msk.f32.mxu1 %vm387_vm3, %v19742_v21 }
 0x3ec   : > { %15311 = vmatmul.mubr.msk.f32.gmra.mrb[12].mxu1 %vm387_vm3, %v19746_v24 }
 0x3ed   : > { %15313 = vmatprep.mubr.msk.f32.mxu1 %vm387_vm3, %v19750_v25 }
 0x3f0   : > { %15314 = vmatmul.mubr.msk.f32.gmra.mrb[14].mxu1 %vm387_vm3, %v19754_v26 }
 0x3f1   : > { %15316 = vmatprep.mubr.msk.f32.mxu1 %vm387_vm3, %v19758_v27 }
 0x3f4   : > { %15317 = vmatmul.mubr.msk.f32.gmra.mrb[16].mxu1 %vm387_vm3, %v19762_v28 }
 0x3f5   : > { %15319 = vmatprep.mubr.msk.f32.mxu1 %vm387_vm3, %v19766_v29 }
 0x3f8   : > { %15320 = vmatmul.mubr.msk.f32.gmra.mrb[18].mxu1 %vm387_vm3, %v19770_v32 }
 0x3f9   : > { %15322 = vmatprep.mubr.msk.f32.mxu1 %vm387_vm3, %v19774_v34 }
 0x3fc   : > { %15323 = vmatmul.mubr.msk.f32.gmra.mrb[20].mxu1 %vm387_vm3, %v19778_v35 }
 0x3fd   : > { %15325 = vmatprep.mubr.msk.f32.mxu1 %vm387_vm3, %v19782_v36 }
 0x400   : > { %15326 = vmatmul.mubr.msk.f32.gmra.mrb[22].mxu1 %vm387_vm3, %v19786_v37 }
 0x401   : > { %15328 = vmatprep.mubr.msk.f32.mxu1 %vm387_vm3, %v19790_v38 }
 0x404   : > { %15329 = vmatmul.mubr.msk.f32.gmra.mrb[24].mxu1 %vm387_vm3, %v19794_v41 }
 0x405   : > { %15331 = vmatprep.mubr.msk.f32.mxu1 %vm387_vm3, %v19798_v42 }
 0x408   : > { %15332 = vmatmul.mubr.msk.f32.gmra.mrb[26].mxu1 %vm387_vm3, %v19802_v43 }
 0x409   : > { %15334 = vmatprep.mubr.msk.f32.mxu1 %vm387_vm3, %v19806_v44 }
 0x40c   : > { %15335 = vmatmul.mubr.msk.f32.gmra.mrb[28].mxu1 %vm387_vm3, %v19810_v45 }
 0x40d   : > { %15337 = vmatprep.mubr.msk.f32.mxu1 %vm387_vm3, %v19814_v46 }
 0x410   : > { %15338 = vmatmul.mubr.msk.f32.gmra.mrb[30].mxu1 %vm387_vm3, %v19818_v49 }
 0x411   : > { %15348 = vmatprep.mubr.msk.f32.mxu1 %vm387_vm3, %v19699_v40  ;;  %v20018_v40 = vld [vmem:[#allocation3 + $0x7a] sm:$0xff] }
 0x414   : > { %15349 = vmatmul.mubr.msk.f32.vlgmr.msra.gmra.mrb[0].mxu1 %vm387_vm3, %v19705_v48  ;;  %v20026_v48 = vld [vmem:[#allocation3 + $0x92] sm:$0xff] }
 0x415   : > { %16743 = vmatpush3.bf16.msra.mxu1 %v19703_v47  ;;  %15351 = vmatprep.mubr.msk.f32.mxu1 %vm387_vm3, %v19709_v55  ;;  %v20022_v47 = vld [vmem:[#allocation3 + $0x82] sm:$0xff] }
 0x416   : > { %16745 = vmatprep.subr.bf16.mxu1 %v16744_v52 }
 0x418   : > { %15352 = vmatmul.mubr.msk.f32.gmra.mrb[2].mxu1 %vm387_vm3, %v19714_v56 }
 0x419   : > { %15354 = vmatprep.mubr.msk.f32.mxu1 %vm387_vm3, %v19718_v2  ;;  %16747 = vmatpush3.bf16.msra.mxu1 %v16744_v52  ;;  %v5275_v52 = vld [vmem:[#allocation3 + $0x182] sm:$0xff] }
 0x41a   : > { %16749 = vmatprep.subr.bf16.mxu1 %v16748_v33 }
 0x41c   : > { %15355 = vmatmul.mubr.msk.f32.gmra.mrb[4].mxu1 %vm387_vm3, %v19722_v3 }
 0x41d   : > { %15357 = vmatprep.mubr.msk.f32.mxu1 %vm387_vm3, %v19726_v13 }
 0x420   : > { %15358 = vmatmul.mubr.msk.f32.gmra.mrb[6].mxu1 %vm387_vm3, %v19730_v16 }
 0x421   : > { %15360 = vmatprep.mubr.msk.f32.mxu1 %vm387_vm3, %v19734_v19 }
 0x424   : > { %15361 = vmatmul.mubr.msk.f32.gmra.mrb[8].mxu1 %vm387_vm3, %v19738_v20 }
 0x425   : > { %15363 = vmatprep.mubr.msk.f32.mxu1 %vm387_vm3, %v19742_v21 }
 0x428   : > { %15364 = vmatmul.mubr.msk.f32.gmra.mrb[10].mxu1 %vm387_vm3, %v19746_v24 }
 0x429   : > { %15366 = vmatprep.mubr.msk.f32.mxu1 %vm387_vm3, %v19750_v25 }
 0x42c   : > { %15367 = vmatmul.mubr.msk.f32.gmra.mrb[12].mxu1 %vm387_vm3, %v19754_v26 }
 0x42d   : > { %15369 = vmatprep.mubr.msk.f32.mxu1 %vm387_vm3, %v19758_v27 }
 0x430   : > { %15370 = vmatmul.mubr.msk.f32.gmra.mrb[14].mxu1 %vm387_vm3, %v19762_v28 }
 0x431   : > { %15372 = vmatprep.mubr.msk.f32.mxu1 %vm387_vm3, %v19766_v29 }
 0x434   : > { %15373 = vmatmul.mubr.msk.f32.gmra.mrb[16].mxu1 %vm387_vm3, %v19770_v32 }
 0x435   : > { %15375 = vmatprep.mubr.msk.f32.mxu1 %vm387_vm3, %v19774_v34 }
 0x438   : > { %15376 = vmatmul.mubr.msk.f32.gmra.mrb[18].mxu1 %vm387_vm3, %v19778_v35 }
 0x439   : > { %15378 = vmatprep.mubr.msk.f32.mxu1 %vm387_vm3, %v19782_v36 }
 0x43c   : > { %15379 = vmatmul.mubr.msk.f32.gmra.mrb[20].mxu1 %vm387_vm3, %v19786_v37 }
 0x43d   : > { %15381 = vmatprep.mubr.msk.f32.mxu1 %vm387_vm3, %v19790_v38 }
 0x440   : > { %15382 = vmatmul.mubr.msk.f32.gmra.mrb[22].mxu1 %vm387_vm3, %v19794_v41 }
 0x441   : > { %15384 = vmatprep.mubr.msk.f32.mxu1 %vm387_vm3, %v19798_v42 }
 0x444   : > { %15385 = vmatmul.mubr.msk.f32.gmra.mrb[24].mxu1 %vm387_vm3, %v19802_v43 }
 0x445   : > { %15387 = vmatprep.mubr.msk.f32.mxu1 %vm387_vm3, %v19806_v44 }
 0x448   : > { %15388 = vmatmul.mubr.msk.f32.gmra.mrb[26].mxu1 %vm387_vm3, %v19810_v45 }
 0x449   : > { %15390 = vmatprep.mubr.msk.f32.mxu1 %vm387_vm3, %v19814_v46 }
 0x44c   : > { %15391 = vmatmul.mubr.msk.f32.gmra.mrb[28].mxu1 %vm387_vm3, %v19818_v49 }
 0x44d   : > { %15393 = vmatprep.mubr.msk.f32.mxu1 %vm387_vm3, %v4345_v59 }
 0x450   : > { %15394 = vmatmul.mubr.msk.f32.gmra.mrb[30].mxu1 %vm387_vm3, %v4346_v60 }
 0x451   : > { %15404 = vmatprep.mubr.msk.f32.mxu1 %vm387_vm3, %v19709_v55  ;;  %v20030_v55 = vld [vmem:[#allocation3 + $0x9a] sm:$0xff] }
 0x454   : > { %15405 = vmatmul.mubr.msk.f32.vlgmr.msra.gmra.mrb[0].mxu1 %vm387_vm3, %v19714_v56  ;;  %v20034_v56 = vld [vmem:[#allocation3 + $0xaa] sm:$0xff] }
 0x455   : > { %16751 = vmatpush3.bf16.msra.mxu1 %v16748_v33  ;;  %15407 = vmatprep.mubr.msk.f32.mxu1 %vm387_vm3, %v19718_v2  ;;  %v20038_v2 = vld [vmem:[#allocation3 + $0xb2] sm:$0xff]  ;;  %v5278_v33 = vld [vmem:[#allocation3 + $0x1a2] sm:$0xff] }
 0x456   : > { %16753 = vmatprep.subr.bf16.mxu1 %v16752_v63 }
 0x458   : > { %15408 = vmatmul.mubr.msk.f32.gmra.mrb[2].mxu1 %vm387_vm3, %v19722_v3  ;;  %v20042_v3 = vld [vmem:[#allocation3 + $0xc2] sm:$0xff] }
 0x459   : > { %15410 = vmatprep.mubr.msk.f32.mxu1 %vm387_vm3, %v19726_v13  ;;  %16755 = vmatpush3.bf16.msra.mxu1 %v16752_v63  ;;  %v20046_v13 = vld [vmem:[#allocation3 + $0xca] sm:$0xff] }
 0x45a   : > { %16757 = vmatprep.subr.bf16.mxu1 %v16756_v8 }
 0x45c   : > { %15411 = vmatmul.mubr.msk.f32.gmra.mrb[4].mxu1 %vm387_vm3, %v19730_v16  ;;  %v20050_v16 = vld [vmem:[#allocation3 + $0xda] sm:$0xff] }
 0x45d   : > { %15413 = vmatprep.mubr.msk.f32.mxu1 %vm387_vm3, %v19734_v19  ;;  %v20054_v19 = vld [vmem:[#allocation3 + $0xe2] sm:$0xff] }
 0x460   : > { %15414 = vmatmul.mubr.msk.f32.gmra.mrb[6].mxu1 %vm387_vm3, %v19738_v20  ;;  %v20058_v20 = vld [vmem:[#allocation3 + $0xf2] sm:$0xff] }
 0x461   : > { %15416 = vmatprep.mubr.msk.f32.mxu1 %vm387_vm3, %v19742_v21  ;;  %v20062_v21 = vld [vmem:[#allocation3 + $0xfa] sm:$0xff] }
 0x464   : > { %15417 = vmatmul.mubr.msk.f32.gmra.mrb[8].mxu1 %vm387_vm3, %v19746_v24  ;;  %v20066_v24 = vld [vmem:[#allocation3 + $0x10a] sm:$0xff] }
 0x465   : > { %15419 = vmatprep.mubr.msk.f32.mxu1 %vm387_vm3, %v19750_v25  ;;  %v20070_v25 = vld [vmem:[#allocation3 + $0x112] sm:$0xff] }
 0x468   : > { %15420 = vmatmul.mubr.msk.f32.gmra.mrb[10].mxu1 %vm387_vm3, %v19754_v26  ;;  %v20074_v26 = vld [vmem:[#allocation3 + $0x122] sm:$0xff] }
 0x469   : > { %15422 = vmatprep.mubr.msk.f32.mxu1 %vm387_vm3, %v19758_v27  ;;  %v20078_v27 = vld [vmem:[#allocation3 + $0x12a] sm:$0xff] }
 0x46c   : > { %15423 = vmatmul.mubr.msk.f32.gmra.mrb[12].mxu1 %vm387_vm3, %v19762_v28  ;;  %v20082_v28 = vld [vmem:[#allocation3 + $0x13a] sm:$0xff] }
 0x46d   : > { %15425 = vmatprep.mubr.msk.f32.mxu1 %vm387_vm3, %v19766_v29  ;;  %v20086_v29 = vld [vmem:[#allocation3 + $0x142] sm:$0xff] }
 0x470   : > { %15426 = vmatmul.mubr.msk.f32.gmra.mrb[14].mxu1 %vm387_vm3, %v19770_v32  ;;  %v20090_v32 = vld [vmem:[#allocation3 + $0x152] sm:$0xff] }
 0x471   : > { %15428 = vmatprep.mubr.msk.f32.mxu1 %vm387_vm3, %v19774_v34  ;;  %v20094_v34 = vld [vmem:[#allocation3 + $0x15a] sm:$0xff] }
 0x474   : > { %15429 = vmatmul.mubr.msk.f32.gmra.mrb[16].mxu1 %vm387_vm3, %v19778_v35  ;;  %v20098_v35 = vld [vmem:[#allocation3 + $0x16a] sm:$0xff] }
 0x475   : > { %15431 = vmatprep.mubr.msk.f32.mxu1 %vm387_vm3, %v19782_v36  ;;  %v20102_v36 = vld [vmem:[#allocation3 + $0x172] sm:$0xff] }
 0x478   : > { %15432 = vmatmul.mubr.msk.f32.gmra.mrb[18].mxu1 %vm387_vm3, %v19786_v37  ;;  %v20107_v37 = vld [vmem:[%s22593_s2 + $0x110] sm:$0xff] }
 0x479   : > { %15434 = vmatprep.mubr.msk.f32.mxu1 %vm387_vm3, %v19790_v38  ;;  %v20112_v38 = vld [vmem:[%s22593_s2 + $0x118] sm:$0xff] }
 0x47c   : > { %15435 = vmatmul.mubr.msk.f32.gmra.mrb[20].mxu1 %vm387_vm3, %v19794_v41  ;;  %v12680_v41 = vld [vmem:[%s22594_s3 + $0x90] sm:$0xff] }
 0x47d   : > { %15437 = vmatprep.mubr.msk.f32.mxu1 %vm387_vm3, %v19798_v42  ;;  %v12681_v42 = vld [vmem:[%s22594_s3 + $0x98] sm:$0xff] }
 0x480   : > { %15438 = vmatmul.mubr.msk.f32.gmra.mrb[22].mxu1 %vm387_vm3, %v19802_v43  ;;  %v20125_v43 = vld [vmem:[%s22594_s3 + $0xa0] sm:$0xff] }
 0x481   : > { %15440 = vmatprep.mubr.msk.f32.mxu1 %vm387_vm3, %v19806_v44  ;;  %v20129_v44 = vpack.c.bf16 %v12681_v42, %v12680_v41 }
 0x483   : > { %16773 = vmatprep.subr.bf16.mxu0 %v20129_v44 }
 0x484   : > { %15441 = vmatmul.mubr.msk.f32.gmra.mrb[24].mxu1 %vm387_vm3, %v19810_v45  ;;  %v20134_v45 = vld [vmem:[%s22594_s3 + $0xa8] sm:$0xff]  ;;  %16775 = vmatpush3.bf16.msra.mxu0 %v20129_v44 }
 0x485   : > { %15443 = vmatprep.mubr.msk.f32.mxu1 %vm387_vm3, %v19814_v46  ;;  %v16768_v46 = vpack.c.bf16 %v20112_v38, %v20107_v37 }
 0x488   : > { %15444 = vmatmul.mubr.msk.f32.gmra.mrb[26].mxu1 %vm387_vm3, %v19818_v49  ;;  %v16776_v49 = vpack.c.bf16 %v20134_v45, %v20125_v43 }
 0x489   : > { %15446 = vmatprep.mubr.msk.f32.mxu1 %vm387_vm3, %v4345_v59  ;;  %v6313_v59 = vld [vmem:[%s22594_s3] sm:$0xff] }
 0x48a   : > { %16777 = vmatprep.subr.bf16.mxu0 %v16776_v49 }
 0x48b   : > { %16779 = vmatpush3.bf16.msra.mxu0 %v16776_v49 }
 0x48c   : > { %15447 = vmatmul.mubr.msk.f32.gmra.mrb[28].mxu1 %vm387_vm3, %v4346_v60  ;;  %16781 = vmatprep.subr.bf16.mxu0 %v16780_v1  ;;  %v6314_v60 = vld [vmem:[%s22594_s3 + $0x8] sm:$0xff] }
 0x48d   : > { %15449 = vmatprep.mubr.msk.f32.mxu1 %vm387_vm3, %v4347_v9  ;;  %v16784_v61 = vpack.c.bf16 %v6314_v60, %v6313_v59 }
 0x48f   : > { %16783 = vmatpush3.bf16.msra.mxu0 %v16780_v1 }
 0x490   : > { %15450 = vmatmul.mubr.msk.f32.gmra.mrb[30].mxu1 %vm387_vm3, %v4348_v10  ;;  %16785 = vmatprep.subr.bf16.mxu0 %v16784_v61 }
 0x491   : > { %15460 = vmatprep.mubr.msk.f32.mxu1 %vm387_vm3, %v5243_v11 }
 0x494   : > { %15461 = vmatmul.mubr.msk.f32.vlgmr.msra.gmra.mrb[0].mxu1 %vm387_vm3, %v5244_v7 }
 0x495   : > { %16759 = vmatpush3.bf16.msra.mxu1 %v16756_v8  ;;  %15463 = vmatprep.mubr.msk.f32.mxu1 %vm387_vm3, %v19983_v5 }
 0x496   : > { %16761 = vmatprep.subr.bf16.mxu1 %v16760_v12 }
 0x498   : > { %15464 = vmatmul.mubr.msk.f32.gmra.mrb[2].mxu1 %vm387_vm3, %v19989_v14 }
 0x499   : > { %15466 = vmatprep.mubr.msk.f32.mxu1 %vm387_vm3, %v19993_v15  ;;  %16763 = vmatpush3.bf16.msra.mxu1 %v16760_v12 }
 0x49a   : > { %16765 = vmatprep.subr.bf16.mxu1 %v19987_v6 }
 0x49c   : > { %15467 = vmatmul.mubr.msk.f32.gmra.mrb[4].mxu1 %vm387_vm3, %v19998_v22 }
 0x49d   : > { %15469 = vmatprep.mubr.msk.f32.mxu1 %vm387_vm3, %v20002_v23 }
 0x4a0   : > { %15470 = vmatmul.mubr.msk.f32.gmra.mrb[6].mxu1 %vm387_vm3, %v20006_v30 }
 0x4a1   : > { %15472 = vmatprep.mubr.msk.f32.mxu1 %vm387_vm3, %v20010_v31 }
 0x4a4   : > { %15473 = vmatmul.mubr.msk.f32.gmra.mrb[8].mxu1 %vm387_vm3, %v20014_v39 }
 0x4a5   : > { %15475 = vmatprep.mubr.msk.f32.mxu1 %vm387_vm3, %v20018_v40 }
 0x4a8   : > { %15476 = vmatmul.mubr.msk.f32.gmra.mrb[10].mxu1 %vm387_vm3, %v20022_v47 }
 0x4a9   : > { %15478 = vmatprep.mubr.msk.f32.mxu1 %vm387_vm3, %v20026_v48 }
 0x4ac   : > { %15479 = vmatmul.mubr.msk.f32.gmra.mrb[12].mxu1 %vm387_vm3, %v20030_v55 }
 0x4ad   : > { %15481 = vmatprep.mubr.msk.f32.mxu1 %vm387_vm3, %v20034_v56 }
 0x4b0   : > { %15482 = vmatmul.mubr.msk.f32.gmra.mrb[14].mxu1 %vm387_vm3, %v20038_v2 }
 0x4b1   : > { %15484 = vmatprep.mubr.msk.f32.mxu1 %vm387_vm3, %v20042_v3 }
 0x4b4   : > { %15485 = vmatmul.mubr.msk.f32.gmra.mrb[16].mxu1 %vm387_vm3, %v20046_v13 }
 0x4b5   : > { %15487 = vmatprep.mubr.msk.f32.mxu1 %vm387_vm3, %v20050_v16 }
 0x4b8   : > { %15488 = vmatmul.mubr.msk.f32.gmra.mrb[18].mxu1 %vm387_vm3, %v20054_v19 }
 0x4b9   : > { %15490 = vmatprep.mubr.msk.f32.mxu1 %vm387_vm3, %v20058_v20 }
 0x4bc   : > { %15491 = vmatmul.mubr.msk.f32.gmra.mrb[20].mxu1 %vm387_vm3, %v20062_v21 }
 0x4bd   : > { %15493 = vmatprep.mubr.msk.f32.mxu1 %vm387_vm3, %v20066_v24 }
 0x4c0   : > { %15494 = vmatmul.mubr.msk.f32.gmra.mrb[22].mxu1 %vm387_vm3, %v20070_v25 }
 0x4c1   : > { %15496 = vmatprep.mubr.msk.f32.mxu1 %vm387_vm3, %v20074_v26 }
 0x4c4   : > { %15497 = vmatmul.mubr.msk.f32.gmra.mrb[24].mxu1 %vm387_vm3, %v20078_v27 }
 0x4c5   : > { %15499 = vmatprep.mubr.msk.f32.mxu1 %vm387_vm3, %v20082_v28 }
 0x4c8   : > { %15500 = vmatmul.mubr.msk.f32.gmra.mrb[26].mxu1 %vm387_vm3, %v20086_v29 }
 0x4c9   : > { %15502 = vmatprep.mubr.msk.f32.mxu1 %vm387_vm3, %v20090_v32 }
 0x4cc   : > { %15503 = vmatmul.mubr.msk.f32.gmra.mrb[28].mxu1 %vm387_vm3, %v20094_v34 }
 0x4cd   : > { %15505 = vmatprep.mubr.msk.f32.mxu1 %vm387_vm3, %v20098_v35 }
 0x4d0   : > { %15506 = vmatmul.mubr.msk.f32.gmra.mrb[30].mxu1 %vm387_vm3, %v20102_v36 }
 0x4d1   : > { %15516 = vmatprep.mubr.msk.f32.mxu1 %vm387_vm3, %v19983_v5 }
 0x4d4   : > { %15517 = vmatmul.mubr.msk.f32.vlgmr.msra.gmra.mrb[0].mxu1 %vm387_vm3, %v19989_v14 }
 0x4d5   : > { %16767 = vmatpush3.bf16.msra.mxu1 %v19987_v6  ;;  %15519 = vmatprep.mubr.msk.f32.mxu1 %vm387_vm3, %v19993_v15 }
 0x4d6   : > { %16769 = vmatprep.subr.bf16.mxu1 %v16768_v46 }
 0x4d8   : > { %15520 = vmatmul.mubr.msk.f32.gmra.mrb[2].mxu1 %vm387_vm3, %v19998_v22 }
 0x4d9   : > { %15522 = vmatprep.mubr.msk.f32.mxu1 %vm387_vm3, %v20002_v23  ;;  %16771 = vmatpush3.bf16.msra.mxu1 %v16768_v46 }
 0x4dc   : > { %15523 = vmatmul.mubr.msk.f32.gmra.mrb[4].mxu1 %vm387_vm3, %v20006_v30 }
 0x4dd   : > { %15525 = vmatprep.mubr.msk.f32.mxu1 %vm387_vm3, %v20010_v31 }
 0x4e0   : > { %15526 = vmatmul.mubr.msk.f32.gmra.mrb[6].mxu1 %vm387_vm3, %v20014_v39 }
 0x4e1   : > { %15528 = vmatprep.mubr.msk.f32.mxu1 %vm387_vm3, %v20018_v40 }
 0x4e4   : > { %15529 = vmatmul.mubr.msk.f32.gmra.mrb[8].mxu1 %vm387_vm3, %v20022_v47 }
 0x4e5   : > { %15531 = vmatprep.mubr.msk.f32.mxu1 %vm387_vm3, %v20026_v48 }
 0x4e8   : > { %15532 = vmatmul.mubr.msk.f32.gmra.mrb[10].mxu1 %vm387_vm3, %v20030_v55 }
 0x4e9   : > { %15534 = vmatprep.mubr.msk.f32.mxu1 %vm387_vm3, %v20034_v56 }
 0x4ec   : > { %15535 = vmatmul.mubr.msk.f32.gmra.mrb[12].mxu1 %vm387_vm3, %v20038_v2 }
 0x4ed   : > { %15537 = vmatprep.mubr.msk.f32.mxu1 %vm387_vm3, %v20042_v3 }
 0x4f0   : > { %15538 = vmatmul.mubr.msk.f32.gmra.mrb[14].mxu1 %vm387_vm3, %v20046_v13 }
 0x4f1   : > { %15540 = vmatprep.mubr.msk.f32.mxu1 %vm387_vm3, %v20050_v16 }
 0x4f4   : > { %15541 = vmatmul.mubr.msk.f32.gmra.mrb[16].mxu1 %vm387_vm3, %v20054_v19 }
 0x4f5   : > { %15543 = vmatprep.mubr.msk.f32.mxu1 %vm387_vm3, %v20058_v20 }
 0x4f8   : > { %15544 = vmatmul.mubr.msk.f32.gmra.mrb[18].mxu1 %vm387_vm3, %v20062_v21 }
 0x4f9   : > { %15546 = vmatprep.mubr.msk.f32.mxu1 %vm387_vm3, %v20066_v24 }
 0x4fc   : > { %15547 = vmatmul.mubr.msk.f32.gmra.mrb[20].mxu1 %vm387_vm3, %v20070_v25 }
 0x4fd   : > { %15549 = vmatprep.mubr.msk.f32.mxu1 %vm387_vm3, %v20074_v26 }
 0x500   : > { %15550 = vmatmul.mubr.msk.f32.gmra.mrb[22].mxu1 %vm387_vm3, %v20078_v27 }
 0x501   : > { %15552 = vmatprep.mubr.msk.f32.mxu1 %vm387_vm3, %v20082_v28 }
 0x504   : > { %15553 = vmatmul.mubr.msk.f32.gmra.mrb[24].mxu1 %vm387_vm3, %v20086_v29 }
 0x505   : > { %15555 = vmatprep.mubr.msk.f32.mxu1 %vm387_vm3, %v20090_v32 }
 0x508   : > { %15556 = vmatmul.mubr.msk.f32.gmra.mrb[26].mxu1 %vm387_vm3, %v20094_v34 }
 0x509   : > { %15558 = vmatprep.mubr.msk.f32.mxu1 %vm387_vm3, %v20098_v35 }
 0x50c   : > { %15559 = vmatmul.mubr.msk.f32.gmra.mrb[28].mxu1 %vm387_vm3, %v20102_v36 }
 0x50d   : > { %15561 = vmatprep.mubr.msk.f32.mxu1 %vm387_vm3, %v5275_v52 }
 0x510   : > { %15562 = vmatmul.mubr.msk.f32.gmra.mrb[30].mxu1 %vm387_vm3, %v5276_v53 }
 0x511   : > { %15572 = vmatprep.mubr.msk.f32.mxu1 %vm387_vm3, %v19993_v15  ;;  %v6315_v15 = vld [vmem:[%s22594_s3 + $0x10] sm:$0xff] }
 0x514   : > { %15573 = vmatmul.mubr.msk.f32.vlgmr.msra.gmra.mrb[0].mxu1 %vm387_vm3, %v19998_v22  ;;  %v6316_v22 = vld [vmem:[%s22594_s3 + $0x18] sm:$0xff] }
 0x515   : > { %15575 = vmatprep.mubr.msk.f32.mxu1 %vm387_vm3, %v20002_v23 }
 0x518   : > { %15576 = vmatmul.mubr.msk.f32.gmra.mrb[2].mxu1 %vm387_vm3, %v20006_v30 }
 0x519   : > { %15578 = vmatprep.mubr.msk.f32.mxu1 %vm387_vm3, %v20010_v31 }
 0x51c   : > { %15579 = vmatmul.mubr.msk.f32.gmra.mrb[4].mxu1 %vm387_vm3, %v20014_v39 }
 0x51d   : > { %15581 = vmatprep.mubr.msk.f32.mxu1 %vm387_vm3, %v20018_v40 }
 0x520   : > { %15582 = vmatmul.mubr.msk.f32.gmra.mrb[6].mxu1 %vm387_vm3, %v20022_v47 }
 0x521   : > { %15584 = vmatprep.mubr.msk.f32.mxu1 %vm387_vm3, %v20026_v48 }
 0x524   : > { %15585 = vmatmul.mubr.msk.f32.gmra.mrb[8].mxu1 %vm387_vm3, %v20030_v55  ;;  %v16788_v55 = vpack.c.bf16 %v6316_v22, %v6315_v15 }
 0x525   : > { %15587 = vmatprep.mubr.msk.f32.mxu1 %vm387_vm3, %v20034_v56 }
 0x528   : > { %15588 = vmatmul.mubr.msk.f32.gmra.mrb[10].mxu1 %vm387_vm3, %v20038_v2  ;;  %v6317_v2 = vld [vmem:[%s22594_s3 + $0x20] sm:$0xff] }
 0x529   : > { %15590 = vmatprep.mubr.msk.f32.mxu1 %vm387_vm3, %v20042_v3  ;;  %v6318_v3 = vld [vmem:[%s22594_s3 + $0x28] sm:$0xff] }
 0x52c   : > { %15591 = vmatmul.mubr.msk.f32.gmra.mrb[12].mxu1 %vm387_vm3, %v20046_v13 }
 0x52d   : > { %15593 = vmatprep.mubr.msk.f32.mxu1 %vm387_vm3, %v20050_v16 }
 0x530   : > { %15594 = vmatmul.mubr.msk.f32.gmra.mrb[14].mxu1 %vm387_vm3, %v20054_v19 }
 0x531   : > { %15596 = vmatprep.mubr.msk.f32.mxu1 %vm387_vm3, %v20058_v20 }
 0x534   : > { %15597 = vmatmul.mubr.msk.f32.gmra.mrb[16].mxu1 %vm387_vm3, %v20062_v21 }
 0x535   : > { %15599 = vmatprep.mubr.msk.f32.mxu1 %vm387_vm3, %v20066_v24 }
 0x538   : > { %15600 = vmatmul.mubr.msk.f32.gmra.mrb[18].mxu1 %vm387_vm3, %v20070_v25 }
 0x539   : > { %15602 = vmatprep.mubr.msk.f32.mxu1 %vm387_vm3, %v20074_v26  ;;  %v16792_v26 = vpack.c.bf16 %v6318_v3, %v6317_v2 }
 0x53c   : > { %15603 = vmatmul.mubr.msk.f32.gmra.mrb[20].mxu1 %vm387_vm3, %v20078_v27 }
 0x53d   : > { %15605 = vmatprep.mubr.msk.f32.mxu1 %vm387_vm3, %v20082_v28  ;;  %v12750_v28 = vld [vmem:[%s22594_s3 + $0x120] sm:$0xff] }
 0x540   : > { %15606 = vmatmul.mubr.msk.f32.gmra.mrb[22].mxu1 %vm387_vm3, %v20086_v29  ;;  %v12751_v29 = vld [vmem:[%s22594_s3 + $0x128] sm:$0xff] }
 0x541   : > { %15608 = vmatprep.mubr.msk.f32.mxu1 %vm387_vm3, %v20090_v32  ;;  %v20554_v42 = vpack.c.bf16 %v12751_v29, %v12750_v28 }
 0x544   : > { %15609 = vmatmul.mubr.msk.f32.gmra.mrb[24].mxu1 %vm387_vm3, %v20094_v34 }
 0x545   : > { %15611 = vmatprep.mubr.msk.f32.mxu1 %vm387_vm3, %v20098_v35 }
 0x548   : > { %15612 = vmatmul.mubr.msk.f32.gmra.mrb[26].mxu1 %vm387_vm3, %v20102_v36 }
 0x549   : > { %15614 = vmatprep.mubr.msk.f32.mxu1 %vm387_vm3, %v5275_v52 }
 0x54c   : > { %15615 = vmatmul.mubr.msk.f32.gmra.mrb[28].mxu1 %vm387_vm3, %v5276_v53 }
 0x54d   : > { %15617 = vmatprep.mubr.msk.f32.mxu1 %vm387_vm3, %v5277_v54 }
 0x550   : > { %15618 = vmatmul.mubr.msk.f32.gmra.mrb[30].mxu1 %vm387_vm3, %v5278_v33 }
 0x5e7   : > { %v15574_v63 = vpop.f32.mrb[0].mxu1 }
 0x5e8   : > { %v6181_v0 = vadd.f32 %v15574_v63, %v20494_v62  ;;  %v5982_v4 = vpop.f32.mrb[1].mxu1 }
 0x5e9   : > { %v6180_v8 = vadd.f32 %v20494_v62, %v5982_v4 }
 0x5ea   : > { %v6213_v9 = vmax.f32 %v6181_v0, 0.0 }
 0x5eb   : > { %v6212_v10 = vmax.f32 %v6180_v8, 0.0  ;;  %v15577_v11 = vpop.f32.mrb[2].mxu1 }
 0x5ec   : > { %6246 = vst.msk [vmem:[#allocation4 + $0x21] sm:$0xff] %vm443_vm5, %v6213_v9  ;;  %v6183_v57 = vadd.f32 %v15577_v11, %v20494_v62  ;;  %v5992_v58 = vpop.f32.mrb[3].mxu1 }
 0x5ed   : > { %6245 = vst.msk [vmem:[#allocation4 + $0x19] sm:$0xff] %vm443_vm5, %v6212_v10  ;;  %v6182_v7 = vadd.f32 %v20494_v62, %v5992_v58 }
 0x5ee   : > { %v6215_v12 = vmax.f32 %v6183_v57, 0.0 }
 0x5ef   : > { %v6214_v17 = vmax.f32 %v6182_v7, 0.0  ;;  %v15580_v18 = vpop.f32.mrb[4].mxu1 }
 0x5f0   : > { %6248 = vst.msk [vmem:[#allocation4 + $0x39] sm:$0xff] %vm443_vm5, %v6215_v12  ;;  %v6185_v5 = vadd.f32 %v15580_v18, %v20494_v62  ;;  %v6002_v6 = vpop.f32.mrb[5].mxu1 }
 0x5f1   : > { %6247 = vst.msk [vmem:[#allocation4 + $0x31] sm:$0xff] %vm443_vm5, %v6214_v17  ;;  %v6184_v14 = vadd.f32 %v20494_v62, %v6002_v6 }
 0x5f2   : > { %v6217_v23 = vmax.f32 %v6185_v5, 0.0 }
 0x5f3   : > { %v6216_v30 = vmax.f32 %v6184_v14, 0.0  ;;  %v15583_v31 = vpop.f32.mrb[6].mxu1 }
 0x5f4   : > { %6250 = vst.msk [vmem:[#allocation4 + $0x51] sm:$0xff] %vm443_vm5, %v6217_v23  ;;  %v6187_v39 = vadd.f32 %v15583_v31, %v20494_v62  ;;  %v6012_v40 = vpop.f32.mrb[7].mxu1  ;;  %v20514_v47 = vld [vmem:[#allocation4 + $0x18] sm:$0xff]  ;;  %v20516_v48 = vld [vmem:[#allocation4 + $0x20] sm:$0xff] }
 0x5f5   : > { %6249 = vst.msk [vmem:[#allocation4 + $0x49] sm:$0xff] %vm443_vm5, %v6216_v30  ;;  %v6186_v56 = vadd.f32 %v20494_v62, %v6012_v40  ;;  %15632 = vmatprep.mubr.msk.f32.mxu0 %vm443_vm5, %v20514_v47 }
 0x5f6   : > { %v6219_v13 = vmax.f32 %v6187_v39, 0.0  ;;  %15633 = vmatmul.mubr.msk.f32.vlgmr.msra.gmra.mrb[32].mxu0 %vm443_vm5, %v20516_v48 }
 0x5f7   : > { %v6218_v16 = vmax.f32 %v6186_v56, 0.0  ;;  %16787 = vmatpush3.bf16.msra.mxu0 %v16784_v61  ;;  %v15586_v19 = vpop.f32.mrb[8].mxu1 }
 0x5f8   : > { %6252 = vst.msk [vmem:[#allocation4 + $0x69] sm:$0xff] %vm443_vm5, %v6219_v13  ;;  %v6189_v20 = vadd.f32 %v15586_v19, %v20494_v62  ;;  %v6022_v21 = vpop.f32.mrb[9].mxu1  ;;  %v20532_v24 = vld [vmem:[#allocation4 + $0x30] sm:$0xff]  ;;  %v20534_v25 = vld [vmem:[#allocation4 + $0x38] sm:$0xff]  ;;  %16789 = vmatprep.subr.bf16.mxu0 %v16788_v55 }
 0x5f9   : > { %6251 = vst.msk [vmem:[#allocation4 + $0x61] sm:$0xff] %vm443_vm5, %v6218_v16  ;;  %v6188_v27 = vadd.f32 %v20494_v62, %v6022_v21  ;;  %15635 = vmatprep.mubr.msk.f32.mxu0 %vm443_vm5, %v20532_v24 }
 0x5fa   : > { %v6221_v32 = vmax.f32 %v6189_v20, 0.0  ;;  %15636 = vmatmul.mubr.msk.f32.gmra.mrb[34].mxu0 %vm443_vm5, %v20534_v25 }
 0x5fb   : > { %v6220_v34 = vmax.f32 %v6188_v27, 0.0  ;;  %v15589_v35 = vpop.f32.mrb[10].mxu1  ;;  %16791 = vmatpush3.bf16.msra.mxu0 %v16788_v55 }
 0x5fc   : > { %6254 = vst.msk [vmem:[#allocation4 + $0x81] sm:$0xff] %vm443_vm5, %v6221_v32  ;;  %v6191_v36 = vadd.f32 %v15589_v35, %v20494_v62  ;;  %v6032_v37 = vpop.f32.mrb[11].mxu1  ;;  %v20550_v38 = vld [vmem:[#allocation4 + $0x48] sm:$0xff]  ;;  %v20552_v41 = vld [vmem:[#allocation4 + $0x50] sm:$0xff]  ;;  %16793 = vmatprep.subr.bf16.mxu0 %v16792_v26 }
 0x5fd   : > { %6253 = vst.msk [vmem:[#allocation4 + $0x79] sm:$0xff] %vm443_vm5, %v6220_v34  ;;  %v6190_v43 = vadd.f32 %v20494_v62, %v6032_v37  ;;  %15638 = vmatprep.mubr.msk.f32.mxu0 %vm443_vm5, %v20550_v38 }
 0x5fe   : > { %v6223_v44 = vmax.f32 %v6191_v36, 0.0  ;;  %15639 = vmatmul.mubr.msk.f32.gmra.mrb[36].mxu0 %vm443_vm5, %v20552_v41 }
 0x5ff   : > { %v6222_v45 = vmax.f32 %v6190_v43, 0.0  ;;  %v15592_v46 = vpop.f32.mrb[12].mxu1  ;;  %16795 = vmatpush3.bf16.msra.mxu0 %v16792_v26 }
 0x600   : > { %6256 = vst.msk [vmem:[#allocation4 + $0x99] sm:$0xff] %vm443_vm5, %v6223_v44  ;;  %v6193_v49 = vadd.f32 %v15592_v46, %v20494_v62  ;;  %v6042_v50 = vpop.f32.mrb[13].mxu1  ;;  %v20564_v51 = vld [vmem:[#allocation4 + $0x60] sm:$0xff]  ;;  %v20566_v1 = vld [vmem:[#allocation4 + $0x68] sm:$0xff]  ;;  %16797 = vmatprep.subr.bf16.mxu0 %v20554_v42 }
 0x601   : > { %6255 = vst.msk [vmem:[#allocation4 + $0x91] sm:$0xff] %vm443_vm5, %v6222_v45  ;;  %v6192_v52 = vadd.f32 %v20494_v62, %v6042_v50  ;;  %15641 = vmatprep.mubr.msk.f32.mxu0 %vm443_vm5, %v20564_v51 }
 0x602   : > { %v6225_v53 = vmax.f32 %v6193_v49, 0.0  ;;  %15642 = vmatmul.mubr.msk.f32.gmra.mrb[38].mxu0 %vm443_vm5, %v20566_v1 }
 0x603   : > { %v6224_v54 = vmax.f32 %v6192_v52, 0.0  ;;  %v15595_v33 = vpop.f32.mrb[14].mxu1 }
 0x604   : > { %6258 = vst.msk [vmem:[#allocation4 + $0xb1] sm:$0xff] %vm443_vm5, %v6225_v53  ;;  %v6195_v59 = vadd.f32 %v15595_v33, %v20494_v62  ;;  %v6052_v60 = vpop.f32.mrb[15].mxu1  ;;  %v20577_v61 = vld [vmem:[#allocation4 + $0x78] sm:$0xff]  ;;  %v20579_v63 = vld [vmem:[#allocation4 + $0x80] sm:$0xff] }
 0x605   : > { %6257 = vst.msk [vmem:[#allocation4 + $0xa9] sm:$0xff] %vm443_vm5, %v6224_v54  ;;  %v6194_v0 = vadd.f32 %v20494_v62, %v6052_v60  ;;  %15644 = vmatprep.mubr.msk.f32.mxu0 %vm443_vm5, %v20577_v61 }
 0x606   : > { %v6227_v4 = vmax.f32 %v6195_v59, 0.0  ;;  %15645 = vmatmul.mubr.msk.f32.gmra.mrb[40].mxu0 %vm443_vm5, %v20579_v63 }
 0x607   : > { %v6226_v8 = vmax.f32 %v6194_v0, 0.0  ;;  %v15598_v9 = vpop.f32.mrb[16].mxu1 }
 0x608   : > { %6260 = vst.msk [vmem:[#allocation4 + $0xc9] sm:$0xff] %vm443_vm5, %v6227_v4  ;;  %v6197_v10 = vadd.f32 %v15598_v9, %v20494_v62  ;;  %v6062_v11 = vpop.f32.mrb[17].mxu1  ;;  %v20589_v57 = vld [vmem:[#allocation4 + $0x90] sm:$0xff]  ;;  %v20591_v58 = vld [vmem:[#allocation4 + $0x98] sm:$0xff] }
 0x609   : > { %6259 = vst.msk [vmem:[#allocation4 + $0xc1] sm:$0xff] %vm443_vm5, %v6226_v8  ;;  %v6196_v7 = vadd.f32 %v20494_v62, %v6062_v11  ;;  %15647 = vmatprep.mubr.msk.f32.mxu0 %vm443_vm5, %v20589_v57 }
 0x60a   : > { %v6229_v12 = vmax.f32 %v6197_v10, 0.0  ;;  %15648 = vmatmul.mubr.msk.f32.gmra.mrb[42].mxu0 %vm443_vm5, %v20591_v58 }
 0x60b   : > { %v6228_v17 = vmax.f32 %v6196_v7, 0.0  ;;  %v15601_v18 = vpop.f32.mrb[18].mxu1 }
 0x60c   : > { %6262 = vst.msk [vmem:[#allocation4 + $0xe1] sm:$0xff] %vm443_vm5, %v6229_v12  ;;  %v6199_v5 = vadd.f32 %v15601_v18, %v20494_v62  ;;  %v6072_v6 = vpop.f32.mrb[19].mxu1  ;;  %v20601_v14 = vld [vmem:[#allocation4 + $0xa8] sm:$0xff]  ;;  %v20603_v15 = vld [vmem:[#allocation4 + $0xb0] sm:$0xff] }
 0x60d   : > { %6261 = vst.msk [vmem:[#allocation4 + $0xd9] sm:$0xff] %vm443_vm5, %v6228_v17  ;;  %v6198_v22 = vadd.f32 %v20494_v62, %v6072_v6  ;;  %15650 = vmatprep.mubr.msk.f32.mxu0 %vm443_vm5, %v20601_v14 }
 0x60e   : > { %v6231_v23 = vmax.f32 %v6199_v5, 0.0  ;;  %15651 = vmatmul.mubr.msk.f32.gmra.mrb[44].mxu0 %vm443_vm5, %v20603_v15 }
 0x60f   : > { %v6230_v30 = vmax.f32 %v6198_v22, 0.0  ;;  %v15604_v31 = vpop.f32.mrb[20].mxu1 }
 0x610   : > { %6264 = vst.msk [vmem:[#allocation4 + $0xf9] sm:$0xff] %vm443_vm5, %v6231_v23  ;;  %v6201_v39 = vadd.f32 %v15604_v31, %v20494_v62  ;;  %v6082_v40 = vpop.f32.mrb[21].mxu1  ;;  %v20613_v55 = vld [vmem:[#allocation4 + $0xc0] sm:$0xff]  ;;  %v20615_v56 = vld [vmem:[#allocation4 + $0xc8] sm:$0xff] }
 0x611   : > { %6263 = vst.msk [vmem:[#allocation4 + $0xf1] sm:$0xff] %vm443_vm5, %v6230_v30  ;;  %v6200_v2 = vadd.f32 %v20494_v62, %v6082_v40  ;;  %15653 = vmatprep.mubr.msk.f32.mxu0 %vm443_vm5, %v20613_v55 }
 0x612   : > { %v6233_v3 = vmax.f32 %v6201_v39, 0.0  ;;  %15654 = vmatmul.mubr.msk.f32.gmra.mrb[46].mxu0 %vm443_vm5, %v20615_v56 }
 0x613   : > { %v6232_v13 = vmax.f32 %v6200_v2, 0.0  ;;  %v15607_v16 = vpop.f32.mrb[22].mxu1 }
 0x614   : > { %6266 = vst.msk [vmem:[#allocation4 + $0x111] sm:$0xff] %vm443_vm5, %v6233_v3  ;;  %v6203_v19 = vadd.f32 %v15607_v16, %v20494_v62  ;;  %v6092_v20 = vpop.f32.mrb[23].mxu1  ;;  %v20625_v21 = vld [vmem:[#allocation4 + $0xd8] sm:$0xff]  ;;  %v20627_v26 = vld [vmem:[#allocation4 + $0xe0] sm:$0xff]  ;;  %v12752_v16 = vld [vmem:[%s22594_s3 + $0x130] sm:$0xff] }
 0x615   : > { %6265 = vst.msk [vmem:[#allocation4 + $0x109] sm:$0xff] %vm443_vm5, %v6232_v13  ;;  %v6202_v27 = vadd.f32 %v20494_v62, %v6092_v20  ;;  %15656 = vmatprep.mubr.msk.f32.mxu0 %vm443_vm5, %v20625_v21  ;;  %v6277_v13 = vld [vmem:[#allocation4] sm:$0xff]  ;;  %v6278_v20 = vld [vmem:[#allocation4 + $0x8] sm:$0xff] }
 0x616   : > { %v6235_v28 = vmax.f32 %v6203_v19, 0.0  ;;  %15657 = vmatmul.mubr.msk.f32.gmra.mrb[48].mxu0 %vm443_vm5, %v20627_v26  ;;  %v12753_v19 = vld [vmem:[%s22594_s3 + $0x138] sm:$0xff] }
 0x617   : > { %v6234_v29 = vmax.f32 %v6202_v27, 0.0  ;;  %v15610_v32 = vpop.f32.mrb[24].mxu1  ;;  %v16800_v27 = vpack.c.bf16 %v12753_v19, %v12752_v16  ;;  %v12868_v19 = vld [vmem:[%s22594_s3 + $0x170] sm:$0xff] }
 0x618   : > { %6268 = vst.msk [vmem:[#allocation4 + $0x129] sm:$0xff] %vm443_vm5, %v6235_v28  ;;  %v6205_v34 = vadd.f32 %v15610_v32, %v20494_v62  ;;  %v6102_v35 = vpop.f32.mrb[25].mxu1  ;;  %v20637_v36 = vld [vmem:[#allocation4 + $0xf0] sm:$0xff]  ;;  %v20639_v37 = vld [vmem:[#allocation4 + $0xf8] sm:$0xff]  ;;  %v12754_v28 = vld [vmem:[%s22594_s3 + $0x140] sm:$0xff] }
 0x619   : > { %6267 = vst.msk [vmem:[#allocation4 + $0x121] sm:$0xff] %vm443_vm5, %v6234_v29  ;;  %v6204_v43 = vadd.f32 %v20494_v62, %v6102_v35  ;;  %15659 = vmatprep.mubr.msk.f32.mxu0 %vm443_vm5, %v20637_v36  ;;  %v12755_v29 = vld [vmem:[%s22594_s3 + $0x148] sm:$0xff]  ;;  %v12789_v35 = vld [vmem:[%s22594_s3 + $0x38] sm:$0xff] }
 0x61a   : > { %v6237_v44 = vmax.f32 %v6205_v34, 0.0  ;;  %15660 = vmatmul.mubr.msk.f32.gmra.mrb[50].mxu0 %vm443_vm5, %v20639_v37  ;;  %v16804_v32 = vpack.c.bf16 %v12755_v29, %v12754_v28  ;;  %v12788_v34 = vld [vmem:[%s22594_s3 + $0x30] sm:$0xff]  ;;  %v12902_v28 = vld [vmem:[%s22594_s3 + $0x60] sm:$0xff]  ;;  %v12903_v29 = vld [vmem:[%s22594_s3 + $0x68] sm:$0xff] }
 0x61b   : > { %v6236_v45 = vmax.f32 %v6204_v43, 0.0  ;;  %v15613_v46 = vpop.f32.mrb[26].mxu1 }
 0x61c   : > { %6270 = vst.msk [vmem:[#allocation4 + $0x141] sm:$0xff] %vm443_vm5, %v6237_v44  ;;  %v6207_v49 = vadd.f32 %v15613_v46, %v20494_v62  ;;  %v6112_v50 = vpop.f32.mrb[27].mxu1  ;;  %v20649_v52 = vld [vmem:[#allocation4 + $0x108] sm:$0xff]  ;;  %v20651_v53 = vld [vmem:[#allocation4 + $0x110] sm:$0xff] }
 0x61d   : > { %6269 = vst.msk [vmem:[#allocation4 + $0x139] sm:$0xff] %vm443_vm5, %v6236_v45  ;;  %v6206_v54 = vadd.f32 %v20494_v62, %v6112_v50  ;;  %15662 = vmatprep.mubr.msk.f32.mxu0 %vm443_vm5, %v20649_v52  ;;  %v12792_v44 = vld [vmem:[%s22594_s3 + $0x50] sm:$0xff]  ;;  %v12793_v45 = vld [vmem:[%s22594_s3 + $0x58] sm:$0xff] }
 0x61e   : > { %v6239_v33 = vmax.f32 %v6207_v49, 0.0  ;;  %15663 = vmatmul.mubr.msk.f32.gmra.mrb[52].mxu0 %vm443_vm5, %v20651_v53  ;;  %v16816_v46 = vpack.c.bf16 %v12793_v45, %v12792_v44  ;;  %v12827_v49 = vld [vmem:[%s22594_s3 + $0xc8] sm:$0xff]  ;;  %v20904_v50 = vld [vmem:[#allocation4 + $0x39] sm:$0xff] }
 0x61f   : > { %v6238_v59 = vmax.f32 %v6206_v54, 0.0  ;;  %v15616_v60 = vpop.f32.mrb[28].mxu1  ;;  %v20917_v54 = vld [vmem:[#allocation4 + $0x61] sm:$0xff] }
 0x620   : > { %6272 = vst.msk [vmem:[#allocation4 + $0x159] sm:$0xff] %vm443_vm5, %v6239_v33  ;;  %v6209_v0 = vadd.f32 %v15616_v60, %v20494_v62  ;;  %v6122_v4 = vpop.f32.mrb[29].mxu1  ;;  %v20661_v8 = vld [vmem:[#allocation4 + $0x120] sm:$0xff]  ;;  %v20663_v9 = vld [vmem:[#allocation4 + $0x128] sm:$0xff] }
 0x621   : > { %6271 = vst.msk [vmem:[#allocation4 + $0x151] sm:$0xff] %vm443_vm5, %v6238_v59  ;;  %v6208_v10 = vadd.f32 %v20494_v62, %v6122_v4  ;;  %15665 = vmatprep.mubr.msk.f32.mxu0 %vm443_vm5, %v20661_v8  ;;  %v20921_v33 = vld [vmem:[#allocation4 + $0x69] sm:$0xff]  ;;  %v20925_v59 = vld [vmem:[#allocation4 + $0x79] sm:$0xff]  ;;  %v20929_v60 = vld [vmem:[#allocation4 + $0x81] sm:$0xff] }
 0x622   : > { %v6241_v11 = vmax.f32 %v6209_v0, 0.0  ;;  %15666 = vmatmul.mubr.msk.f32.gmra.mrb[54].mxu0 %vm443_vm5, %v20663_v9  ;;  %v20933_v0 = vld [vmem:[#allocation4 + $0x91] sm:$0xff]  ;;  %v20937_v4 = vld [vmem:[#allocation4 + $0x99] sm:$0xff]  ;;  %v12907_v44 = vld [vmem:[%s22594_s3 + $0x88] sm:$0xff] }
 0x623   : > { %v6240_v7 = vmax.f32 %v6208_v10, 0.0  ;;  %v15619_v12 = vpop.f32.mrb[30].mxu1  ;;  %v20949_v10 = vld [vmem:[#allocation4 + $0xc1] sm:$0xff] }
 0x624   : > { %6274 = vst.msk [vmem:[#allocation4 + $0x171] sm:$0xff] %vm443_vm5, %v6241_v11  ;;  %v6211_v17 = vadd.f32 %v15619_v12, %v20494_v62  ;;  %v6132_v18 = vpop.f32.mrb[31].mxu1  ;;  %v20673_v5 = vld [vmem:[#allocation4 + $0x138] sm:$0xff]  ;;  %v20675_v6 = vld [vmem:[#allocation4 + $0x140] sm:$0xff]  ;;  %v20953_v11 = vld [vmem:[#allocation4 + $0xc9] sm:$0xff] }
 0x625   : > { %6273 = vst.msk [vmem:[#allocation4 + $0x169] sm:$0xff] %vm443_vm5, %v6240_v7  ;;  %v6210_v22 = vadd.f32 %v20494_v62, %v6132_v18  ;;  %15668 = vmatprep.mubr.msk.f32.mxu0 %vm443_vm5, %v20673_v5  ;;  %v20957_v7 = vld [vmem:[#allocation4 + $0xd9] sm:$0xff]  ;;  %v20961_v12 = vld [vmem:[#allocation4 + $0xe1] sm:$0xff] }
 0x626   : > { %v6243_v23 = vmax.f32 %v6211_v17, 0.0  ;;  %15669 = vmatmul.mubr.msk.f32.gmra.mrb[56].mxu0 %vm443_vm5, %v20675_v6  ;;  %v20965_v17 = vld [vmem:[#allocation4 + $0xf1] sm:$0xff]  ;;  %v20969_v18 = vld [vmem:[#allocation4 + $0xf9] sm:$0xff] }
 0x627   : > { %v6242_v30 = vmax.f32 %v6210_v22, 0.0  ;;  %v20981_v22 = vld [vmem:[#allocation4 + $0x121] sm:$0xff] }
 0x628   : > { %6276 = vst.msk [vmem:[#allocation4 + $0x189] sm:$0xff] %vm443_vm5, %v6243_v23  ;;  %v20684_v31 = vld [vmem:[#allocation4 + $0x150] sm:$0xff]  ;;  %v20686_v39 = vld [vmem:[#allocation4 + $0x158] sm:$0xff] }
 0x629   : > { %6275 = vst.msk [vmem:[#allocation4 + $0x181] sm:$0xff] %vm443_vm5, %v6242_v30  ;;  %15671 = vmatprep.mubr.msk.f32.mxu0 %vm443_vm5, %v20684_v31  ;;  %v20985_v23 = vld [vmem:[#allocation4 + $0x129] sm:$0xff]  ;;  %v20989_v30 = vld [vmem:[#allocation4 + $0x139] sm:$0xff] }
 0x62a   : > { %15672 = vmatmul.mubr.msk.f32.gmra.mrb[58].mxu0 %vm443_vm5, %v20686_v39 }
 0x62c   : > { %v20693_v62 = vld [vmem:[#allocation4 + $0x168] sm:$0xff]  ;;  %v20695_v40 = vld [vmem:[#allocation4 + $0x170] sm:$0xff] }
 0x62d   : > { %15674 = vmatprep.mubr.msk.f32.mxu0 %vm443_vm5, %v20693_v62 }
 0x62e   : > { %15675 = vmatmul.mubr.msk.f32.gmra.mrb[60].mxu0 %vm443_vm5, %v20695_v40 }
 0x630   : > { %v20701_v2 = vld [vmem:[#allocation4 + $0x180] sm:$0xff]  ;;  %v20703_v3 = vld [vmem:[#allocation4 + $0x188] sm:$0xff] }
 0x631   : > { %15677 = vmatprep.mubr.msk.f32.mxu0 %vm443_vm5, %v20701_v2 }
 0x632   : > { %15678 = vmatmul.mubr.msk.f32.gmra.mrb[62].mxu0 %vm443_vm5, %v20703_v3 }
 0x633   : > { %15692 = vmatprep.mubr.msk.f32.mxu0 %vm443_vm5, %v6277_v13  ;;  %v12867_v13 = vld [vmem:[%s22594_s3 + $0x168] sm:$0xff] }
 0x636   : > { %15693 = vmatmul.mubr.msk.f32.vlgmr.msra.gmra.mrb[32].mxu0 %vm443_vm5, %v6278_v20  ;;  %v12869_v20 = vld [vmem:[%s22594_s3 + $0x178] sm:$0xff] }
 0x637   : > { %16799 = vmatpush3.bf16.msra.mxu0 %v20554_v42  ;;  %15695 = vmatprep.mubr.msk.f32.mxu0 %vm443_vm5, %v20514_v47  ;;  %v16808_v42 = vpack.c.bf16 %v12789_v35, %v12788_v34  ;;  %v12790_v47 = vld [vmem:[%s22594_s3 + $0x40] sm:$0xff]  ;;  %v7181_v35 = vld [vmem:[#allocation4 + $0x189] sm:$0xff] }
 0x638   : > { %16801 = vmatprep.subr.bf16.mxu0 %v16800_v27  ;;  %v7180_v34 = vld [vmem:[#allocation4 + $0x181] sm:$0xff] }
 0x63a   : > { %15696 = vmatmul.mubr.msk.f32.gmra.mrb[34].mxu0 %vm443_vm5, %v20516_v48  ;;  %v12791_v48 = vld [vmem:[%s22594_s3 + $0x48] sm:$0xff] }
 0x63b   : > { %15698 = vmatprep.mubr.msk.f32.mxu0 %vm443_vm5, %v20532_v24  ;;  %16803 = vmatpush3.bf16.msra.mxu0 %v16800_v27  ;;  %v16812_v43 = vpack.c.bf16 %v12791_v48, %v12790_v47  ;;  %v16840_v27 = vpack.c.bf16 %v12869_v20, %v12868_v19  ;;  %v12905_v47 = vld [vmem:[%s22594_s3 + $0x78] sm:$0xff]  ;;  %v13019_v19 = vld [vmem:[%s22595_s4 + $0xa0] sm:$0xff] }
 0x63c   : > { %16805 = vmatprep.subr.bf16.mxu0 %v16804_v32 }
 0x63e   : > { %15699 = vmatmul.mubr.msk.f32.gmra.mrb[36].mxu0 %vm443_vm5, %v20534_v25 }
 0x63f   : > { %15701 = vmatprep.mubr.msk.f32.mxu0 %vm443_vm5, %v20550_v38  ;;  %16807 = vmatpush3.bf16.msra.mxu0 %v16804_v32  ;;  %v16844_v32 = vpack.c.bf16 %v12903_v29, %v12902_v28  ;;  %v12982_v29 = vld [vmem:[%s22594_s3 + $0x1a0] sm:$0xff] }
 0x640   : > { %16809 = vmatprep.subr.bf16.mxu0 %v16808_v42 }
 0x642   : > { %15702 = vmatmul.mubr.msk.f32.gmra.mrb[38].mxu0 %vm443_vm5, %v20552_v41 }
 0x643   : > { %15704 = vmatprep.mubr.msk.f32.mxu0 %vm443_vm5, %v20564_v51 }
 0x646   : > { %15705 = vmatmul.mubr.msk.f32.gmra.mrb[40].mxu0 %vm443_vm5, %v20566_v1 }
 0x647   : > { %15707 = vmatprep.mubr.msk.f32.mxu0 %vm443_vm5, %v20577_v61 }
 0x64a   : > { %15708 = vmatmul.mubr.msk.f32.gmra.mrb[42].mxu0 %vm443_vm5, %v20579_v63 }
 0x64b   : > { %15710 = vmatprep.mubr.msk.f32.mxu0 %vm443_vm5, %v20589_v57 }
 0x64e   : > { %15711 = vmatmul.mubr.msk.f32.gmra.mrb[44].mxu0 %vm443_vm5, %v20591_v58 }
 0x64f   : > { %15713 = vmatprep.mubr.msk.f32.mxu0 %vm443_vm5, %v20601_v14 }
 0x652   : > { %15714 = vmatmul.mubr.msk.f32.gmra.mrb[46].mxu0 %vm443_vm5, %v20603_v15 }
 0x653   : > { %15716 = vmatprep.mubr.msk.f32.mxu0 %vm443_vm5, %v20613_v55 }
 0x656   : > { %15717 = vmatmul.mubr.msk.f32.gmra.mrb[48].mxu0 %vm443_vm5, %v20615_v56 }
 0x657   : > { %15719 = vmatprep.mubr.msk.f32.mxu0 %vm443_vm5, %v20625_v21 }
 0x65a   : > { %15720 = vmatmul.mubr.msk.f32.gmra.mrb[50].mxu0 %vm443_vm5, %v20627_v26 }
 0x65b   : > { %15722 = vmatprep.mubr.msk.f32.mxu0 %vm443_vm5, %v20637_v36 }
 0x65e   : > { %15723 = vmatmul.mubr.msk.f32.gmra.mrb[52].mxu0 %vm443_vm5, %v20639_v37 }
 0x65f   : > { %15725 = vmatprep.mubr.msk.f32.mxu0 %vm443_vm5, %v20649_v52 }
 0x662   : > { %15726 = vmatmul.mubr.msk.f32.gmra.mrb[54].mxu0 %vm443_vm5, %v20651_v53 }
 0x663   : > { %15728 = vmatprep.mubr.msk.f32.mxu0 %vm443_vm5, %v20661_v8 }
 0x666   : > { %15729 = vmatmul.mubr.msk.f32.gmra.mrb[56].mxu0 %vm443_vm5, %v20663_v9 }
 0x667   : > { %15731 = vmatprep.mubr.msk.f32.mxu0 %vm443_vm5, %v20673_v5 }
 0x66a   : > { %15732 = vmatmul.mubr.msk.f32.gmra.mrb[58].mxu0 %vm443_vm5, %v20675_v6 }
 0x66b   : > { %15734 = vmatprep.mubr.msk.f32.mxu0 %vm443_vm5, %v20684_v31 }
 0x66e   : > { %15735 = vmatmul.mubr.msk.f32.gmra.mrb[60].mxu0 %vm443_vm5, %v20686_v39 }
 0x66f   : > { %15737 = vmatprep.mubr.msk.f32.mxu0 %vm443_vm5, %v20693_v62 }
 0x672   : > { %15738 = vmatmul.mubr.msk.f32.gmra.mrb[62].mxu0 %vm443_vm5, %v20695_v40 }
 0x673   : > { %15752 = vmatprep.mubr.msk.f32.mxu0 %vm443_vm5, %v20532_v24  ;;  %v12826_v24 = vld [vmem:[%s22594_s3 + $0xc0] sm:$0xff] }
 0x676   : > { %15753 = vmatmul.mubr.msk.f32.vlgmr.msra.gmra.mrb[32].mxu0 %vm443_vm5, %v20534_v25  ;;  %v16820_v25 = vpack.c.bf16 %v12827_v49, %v12826_v24  ;;  %v12941_v24 = vld [vmem:[%s22594_s3 + $0xf8] sm:$0xff] }
 0x677   : > { %16811 = vmatpush3.bf16.msra.mxu0 %v16808_v42  ;;  %15755 = vmatprep.mubr.msk.f32.mxu0 %vm443_vm5, %v20550_v38  ;;  %v6311_v38 = vld [vmem:[#allocation4 + $0x198] sm:$0xff]  ;;  %v12904_v42 = vld [vmem:[%s22594_s3 + $0x70] sm:$0xff] }
 0x678   : > { %16813 = vmatprep.subr.bf16.mxu0 %v16812_v43  ;;  %v16848_v48 = vpack.c.bf16 %v12905_v47, %v12904_v42  ;;  %v13022_v42 = vld [vmem:[%s22595_s4 + $0xb8] sm:$0xff] }
 0x67a   : > { %15756 = vmatmul.mubr.msk.f32.gmra.mrb[34].mxu0 %vm443_vm5, %v20552_v41  ;;  %v6312_v41 = vld [vmem:[#allocation4 + $0x1a0] sm:$0xff] }
 0x67b   : > { %15758 = vmatprep.mubr.msk.f32.mxu0 %vm443_vm5, %v20564_v51  ;;  %16815 = vmatpush3.bf16.msra.mxu0 %v16812_v43  ;;  %v7148_v51 = vld [vmem:[#allocation4 + $0x1] sm:$0xff] }
 0x67c   : > { %16817 = vmatprep.subr.bf16.mxu0 %v16816_v46  ;;  %v12906_v43 = vld [vmem:[%s22594_s3 + $0x80] sm:$0xff] }
 0x67d   : > { %v16852_v45 = vpack.c.bf16 %v12907_v44, %v12906_v43  ;;  %v8116_v43 = vld [vmem:[#allocation4 + $0x182] sm:$0xff]  ;;  %v8117_v44 = vld [vmem:[#allocation4 + $0x18a] sm:$0xff] }
 0x67e   : > { %15759 = vmatmul.mubr.msk.f32.gmra.mrb[36].mxu0 %vm443_vm5, %v20566_v1  ;;  %v12828_v1 = vld [vmem:[%s22594_s3 + $0xd0] sm:$0xff] }
 0x67f   : > { %15761 = vmatprep.mubr.msk.f32.mxu0 %vm443_vm5, %v20577_v61  ;;  %16819 = vmatpush3.bf16.msra.mxu0 %v16816_v46  ;;  %v12829_v61 = vld [vmem:[%s22594_s3 + $0xd8] sm:$0xff]  ;;  %v12940_v46 = vld [vmem:[%s22594_s3 + $0xf0] sm:$0xff] }
 0x680   : > { %16821 = vmatprep.subr.bf16.mxu0 %v16820_v25  ;;  %v16856_v49 = vpack.c.bf16 %v12941_v24, %v12940_v46  ;;  %v8119_v46 = vld [vmem:[#allocation4 + $0x1a2] sm:$0xff] }
 0x681   : > { %v9160_v24 = vld [vmem:[%s22595_s4] sm:$0xff] }
 0x682   : > { %15762 = vmatmul.mubr.msk.f32.gmra.mrb[38].mxu0 %vm443_vm5, %v20579_v63  ;;  %v7149_v63 = vld [vmem:[#allocation4 + $0x9] sm:$0xff] }
 0x683   : > { %15764 = vmatprep.mubr.msk.f32.mxu0 %vm443_vm5, %v20589_v57  ;;  %v16824_v57 = vpack.c.bf16 %v12829_v61, %v12828_v1  ;;  %v12943_v1 = vld [vmem:[%s22594_s3 + $0x108] sm:$0xff] }
 0x684   : > { %v8085_v61 = vld [vmem:[#allocation4 + $0xa] sm:$0xff] }
 0x686   : > { %15765 = vmatmul.mubr.msk.f32.gmra.mrb[40].mxu0 %vm443_vm5, %v20591_v58  ;;  %v12830_v58 = vld [vmem:[%s22594_s3 + $0xe0] sm:$0xff] }
 0x687   : > { %15767 = vmatprep.mubr.msk.f32.mxu0 %vm443_vm5, %v20601_v14  ;;  %v12831_v14 = vld [vmem:[%s22594_s3 + $0xe8] sm:$0xff] }
 0x68a   : > { %15768 = vmatmul.mubr.msk.f32.gmra.mrb[42].mxu0 %vm443_vm5, %v20603_v15  ;;  %v20884_v15 = vld [vmem:[#allocation4 + $0x19] sm:$0xff] }
 0x68b   : > { %15770 = vmatprep.mubr.msk.f32.mxu0 %vm443_vm5, %v20613_v55  ;;  %v16828_v55 = vpack.c.bf16 %v12831_v14, %v12830_v58  ;;  %v12945_v58 = vld [vmem:[%s22594_s3 + $0x118] sm:$0xff] }
 0x68c   : > { %v21186_v14 = vld [vmem:[#allocation4 + $0x1a] sm:$0xff] }
 0x68e   : > { %15771 = vmatmul.mubr.msk.f32.gmra.mrb[44].mxu0 %vm443_vm5, %v20615_v56  ;;  %v20888_v56 = vld [vmem:[#allocation4 + $0x21] sm:$0xff] }
 0x68f   : > { %15773 = vmatprep.mubr.msk.f32.mxu0 %vm443_vm5, %v20625_v21  ;;  %v12864_v21 = vld [vmem:[%s22594_s3 + $0x150] sm:$0xff] }
 0x692   : > { %15774 = vmatmul.mubr.msk.f32.gmra.mrb[46].mxu0 %vm443_vm5, %v20627_v26  ;;  %v12865_v26 = vld [vmem:[%s22594_s3 + $0x158] sm:$0xff] }
 0x693   : > { %15776 = vmatprep.mubr.msk.f32.mxu0 %vm443_vm5, %v20637_v36  ;;  %v20898_v36 = vld [vmem:[#allocation4 + $0x31] sm:$0xff] }
 0x696   : > { %15777 = vmatmul.mubr.msk.f32.gmra.mrb[48].mxu0 %vm443_vm5, %v20639_v37  ;;  %v20902_v37 = vpack.c.bf16 %v12865_v26, %v12864_v21  ;;  %v12979_v21 = vld [vmem:[%s22594_s3 + $0x188] sm:$0xff]  ;;  %v21200_v26 = vld [vmem:[#allocation4 + $0x32] sm:$0xff] }
 0x697   : > { %15779 = vmatprep.mubr.msk.f32.mxu0 %vm443_vm5, %v20649_v52  ;;  %v20908_v52 = vld [vmem:[#allocation4 + $0x49] sm:$0xff] }
 0x69a   : > { %15780 = vmatmul.mubr.msk.f32.gmra.mrb[50].mxu0 %vm443_vm5, %v20651_v53  ;;  %v20913_v53 = vld [vmem:[#allocation4 + $0x51] sm:$0xff] }
 0x69b   : > { %15782 = vmatprep.mubr.msk.f32.mxu0 %vm443_vm5, %v20661_v8  ;;  %v20941_v8 = vld [vmem:[#allocation4 + $0xa9] sm:$0xff] }
 0x69e   : > { %15783 = vmatmul.mubr.msk.f32.gmra.mrb[52].mxu0 %vm443_vm5, %v20663_v9  ;;  %v20945_v9 = vld [vmem:[#allocation4 + $0xb1] sm:$0xff] }
 0x69f   : > { %15785 = vmatprep.mubr.msk.f32.mxu0 %vm443_vm5, %v20673_v5  ;;  %v20973_v5 = vld [vmem:[#allocation4 + $0x109] sm:$0xff] }
 0x6a2   : > { %15786 = vmatmul.mubr.msk.f32.gmra.mrb[54].mxu0 %vm443_vm5, %v20675_v6  ;;  %v20977_v6 = vld [vmem:[#allocation4 + $0x111] sm:$0xff] }
 0x6a3   : > { %15788 = vmatprep.mubr.msk.f32.mxu0 %vm443_vm5, %v20684_v31  ;;  %v20993_v31 = vld [vmem:[#allocation4 + $0x141] sm:$0xff] }
 0x6a6   : > { %15789 = vmatmul.mubr.msk.f32.gmra.mrb[56].mxu0 %vm443_vm5, %v20686_v39  ;;  %v20997_v39 = vld [vmem:[#allocation4 + $0x151] sm:$0xff] }
 0x6a7   : > { %15791 = vmatprep.mubr.msk.f32.mxu0 %vm443_vm5, %v20693_v62  ;;  %v21001_v62 = vld [vmem:[#allocation4 + $0x159] sm:$0xff] }
 0x6aa   : > { %15792 = vmatmul.mubr.msk.f32.gmra.mrb[58].mxu0 %vm443_vm5, %v20695_v40  ;;  %v21005_v40 = vld [vmem:[#allocation4 + $0x169] sm:$0xff] }
 0x6ab   : > { %15794 = vmatprep.mubr.msk.f32.mxu0 %vm443_vm5, %v20701_v2  ;;  %v21009_v2 = vld [vmem:[#allocation4 + $0x171] sm:$0xff] }
 0x6ae   : > { %15795 = vmatmul.mubr.msk.f32.gmra.mrb[60].mxu0 %vm443_vm5, %v20703_v3  ;;  %v12866_v3 = vld [vmem:[%s22594_s3 + $0x160] sm:$0xff] }
 0x6af   : > { %15797 = vmatprep.mubr.msk.f32.mxu0 %vm443_vm5, %v6311_v38  ;;  %v16836_v16 = vpack.c.bf16 %v12867_v13, %v12866_v3  ;;  %v7183_v38 = vld [vmem:[#allocation4 + $0x1a1] sm:$0xff]  ;;  %v12981_v3 = vld [vmem:[%s22594_s3 + $0x198] sm:$0xff]  ;;  %v13017_v13 = vld [vmem:[%s22595_s4 + $0x90] sm:$0xff] }
 0x6b2   : > { %15798 = vmatmul.mubr.msk.f32.gmra.mrb[62].mxu0 %vm443_vm5, %v6312_v41  ;;  %v8084_v41 = vld [vmem:[#allocation4 + $0x2] sm:$0xff] }
 0x6b3   : > { %15812 = vmatprep.mubr.msk.f32.mxu0 %vm443_vm5, %v7148_v51  ;;  %v12942_v51 = vld [vmem:[%s22594_s3 + $0x100] sm:$0xff] }
 0x6b6   : > { %15813 = vmatmul.mubr.msk.f32.vlgmr.msra.gmra.mrb[32].mxu0 %vm443_vm5, %v7149_v63  ;;  %v16860_v63 = vpack.c.bf16 %v12943_v1, %v12942_v51 }
 0x6b7   : > { %16823 = vmatpush3.bf16.msra.mxu0 %v16820_v25  ;;  %15815 = vmatprep.mubr.msk.f32.mxu0 %vm443_vm5, %v20884_v15  ;;  %v7182_v25 = vld [vmem:[#allocation4 + $0x199] sm:$0xff] }
 0x6b8   : > { %16825 = vmatprep.subr.bf16.mxu0 %v16824_v57 }
 0x6ba   : > { %15816 = vmatmul.mubr.msk.f32.gmra.mrb[34].mxu0 %vm443_vm5, %v20888_v56 }
 0x6bb   : > { %15818 = vmatprep.mubr.msk.f32.mxu0 %vm443_vm5, %v20898_v36  ;;  %16827 = vmatpush3.bf16.msra.mxu0 %v16824_v57  ;;  %v12944_v57 = vld [vmem:[%s22594_s3 + $0x110] sm:$0xff] }
 0x6bc   : > { %16829 = vmatprep.subr.bf16.mxu0 %v16828_v55 }
 0x6be   : > { %15819 = vmatmul.mubr.msk.f32.gmra.mrb[36].mxu0 %vm443_vm5, %v20904_v50 }
 0x6bf   : > { %15821 = vmatprep.mubr.msk.f32.mxu0 %vm443_vm5, %v20908_v52  ;;  %16831 = vmatpush3.bf16.msra.mxu0 %v16828_v55  ;;  %v21190_v55 = vld [vmem:[#allocation4 + $0x22] sm:$0xff] }
 0x6c0   : > { %16833 = vmatprep.subr.bf16.mxu0 %v20902_v37 }
 0x6c2   : > { %15822 = vmatmul.mubr.msk.f32.gmra.mrb[38].mxu0 %vm443_vm5, %v20913_v53 }
 0x6c3   : > { %15824 = vmatprep.mubr.msk.f32.mxu0 %vm443_vm5, %v20917_v54 }
 0x6c6   : > { %15825 = vmatmul.mubr.msk.f32.gmra.mrb[40].mxu0 %vm443_vm5, %v20921_v33 }
 0x6c7   : > { %15827 = vmatprep.mubr.msk.f32.mxu0 %vm443_vm5, %v20925_v59 }
 0x6ca   : > { %15828 = vmatmul.mubr.msk.f32.gmra.mrb[42].mxu0 %vm443_vm5, %v20929_v60 }
 0x6cb   : > { %15830 = vmatprep.mubr.msk.f32.mxu0 %vm443_vm5, %v20933_v0 }
 0x6ce   : > { %15831 = vmatmul.mubr.msk.f32.gmra.mrb[44].mxu0 %vm443_vm5, %v20937_v4 }
 0x6cf   : > { %15833 = vmatprep.mubr.msk.f32.mxu0 %vm443_vm5, %v20941_v8 }
 0x6d2   : > { %15834 = vmatmul.mubr.msk.f32.gmra.mrb[46].mxu0 %vm443_vm5, %v20945_v9 }
 0x6d3   : > { %15836 = vmatprep.mubr.msk.f32.mxu0 %vm443_vm5, %v20949_v10 }
 0x6d6   : > { %15837 = vmatmul.mubr.msk.f32.gmra.mrb[48].mxu0 %vm443_vm5, %v20953_v11 }
 0x6d7   : > { %15839 = vmatprep.mubr.msk.f32.mxu0 %vm443_vm5, %v20957_v7 }
 0x6da   : > { %15840 = vmatmul.mubr.msk.f32.gmra.mrb[50].mxu0 %vm443_vm5, %v20961_v12 }
 0x6db   : > { %15842 = vmatprep.mubr.msk.f32.mxu0 %vm443_vm5, %v20965_v17 }
 0x6de   : > { %15843 = vmatmul.mubr.msk.f32.gmra.mrb[52].mxu0 %vm443_vm5, %v20969_v18 }
 0x6df   : > { %15845 = vmatprep.mubr.msk.f32.mxu0 %vm443_vm5, %v20973_v5 }
 0x6e2   : > { %15846 = vmatmul.mubr.msk.f32.gmra.mrb[54].mxu0 %vm443_vm5, %v20977_v6 }
 0x6e3   : > { %15848 = vmatprep.mubr.msk.f32.mxu0 %vm443_vm5, %v20981_v22 }
 0x6e6   : > { %15849 = vmatmul.mubr.msk.f32.gmra.mrb[56].mxu0 %vm443_vm5, %v20985_v23 }
 0x6e7   : > { %15851 = vmatprep.mubr.msk.f32.mxu0 %vm443_vm5, %v20989_v30 }
 0x6ea   : > { %15852 = vmatmul.mubr.msk.f32.gmra.mrb[58].mxu0 %vm443_vm5, %v20993_v31 }
 0x6eb   : > { %15854 = vmatprep.mubr.msk.f32.mxu0 %vm443_vm5, %v20997_v39 }
 0x6ee   : > { %15855 = vmatmul.mubr.msk.f32.gmra.mrb[60].mxu0 %vm443_vm5, %v21001_v62 }
 0x6ef   : > { %15857 = vmatprep.mubr.msk.f32.mxu0 %vm443_vm5, %v21005_v40 }
 0x6f2   : > { %15858 = vmatmul.mubr.msk.f32.gmra.mrb[62].mxu0 %vm443_vm5, %v21009_v2 }
 0x6f3   : > { %15872 = vmatprep.mubr.msk.f32.mxu0 %vm443_vm5, %v20884_v15  ;;  %v16864_v15 = vpack.c.bf16 %v12945_v58, %v12944_v57 }
 0x6f6   : > { %15873 = vmatmul.mubr.msk.f32.vlgmr.msra.gmra.mrb[32].mxu0 %vm443_vm5, %v20888_v56  ;;  %v12978_v56 = vld [vmem:[%s22594_s3 + $0x180] sm:$0xff] }
 0x6f7   : > { %16835 = vmatpush3.bf16.msra.mxu0 %v20902_v37  ;;  %15875 = vmatprep.mubr.msk.f32.mxu0 %vm443_vm5, %v20898_v36  ;;  %v21206_v37 = vld [vmem:[#allocation4 + $0x3a] sm:$0xff] }
 0x6f8   : > { %16837 = vmatprep.subr.bf16.mxu0 %v16836_v16 }
 0x6fa   : > { %15876 = vmatmul.mubr.msk.f32.gmra.mrb[34].mxu0 %vm443_vm5, %v20904_v50 }
 0x6fb   : > { %15878 = vmatprep.mubr.msk.f32.mxu0 %vm443_vm5, %v20908_v52  ;;  %16839 = vmatpush3.bf16.msra.mxu0 %v16836_v16  ;;  %v13018_v16 = vld [vmem:[%s22595_s4 + $0x98] sm:$0xff] }
 0x6fc   : > { %16841 = vmatprep.subr.bf16.mxu0 %v16840_v27  ;;  %v16880_v20 = vpack.c.bf16 %v13018_v16, %v13017_v13 }
 0x6fe   : > { %15879 = vmatmul.mubr.msk.f32.gmra.mrb[36].mxu0 %vm443_vm5, %v20913_v53  ;;  %16881 = vmatprep.subr.bf16.mxu1 %v16880_v20 }
 0x6ff   : > { %15881 = vmatprep.mubr.msk.f32.mxu0 %vm443_vm5, %v20917_v54  ;;  %16843 = vmatpush3.bf16.msra.mxu0 %v16840_v27  ;;  %v13020_v27 = vld [vmem:[%s22595_s4 + $0xa8] sm:$0xff] }
 0x700   : > { %16845 = vmatprep.subr.bf16.mxu0 %v16844_v32  ;;  %16883 = vmatpush3.bf16.msra.mxu1 %v16880_v20 }
 0x702   : > { %15882 = vmatmul.mubr.msk.f32.gmra.mrb[38].mxu0 %vm443_vm5, %v20921_v33 }
 0x703   : > { %15884 = vmatprep.mubr.msk.f32.mxu0 %vm443_vm5, %v20925_v59 }
 0x706   : > { %15885 = vmatmul.mubr.msk.f32.gmra.mrb[40].mxu0 %vm443_vm5, %v20929_v60 }
 0x707   : > { %15887 = vmatprep.mubr.msk.f32.mxu0 %vm443_vm5, %v20933_v0 }
 0x70a   : > { %15888 = vmatmul.mubr.msk.f32.gmra.mrb[42].mxu0 %vm443_vm5, %v20937_v4 }
 0x70b   : > { %15890 = vmatprep.mubr.msk.f32.mxu0 %vm443_vm5, %v20941_v8 }
 0x70e   : > { %15891 = vmatmul.mubr.msk.f32.gmra.mrb[44].mxu0 %vm443_vm5, %v20945_v9 }
 0x70f   : > { %15893 = vmatprep.mubr.msk.f32.mxu0 %vm443_vm5, %v20949_v10 }
 0x712   : > { %15894 = vmatmul.mubr.msk.f32.gmra.mrb[46].mxu0 %vm443_vm5, %v20953_v11 }
 0x713   : > { %15896 = vmatprep.mubr.msk.f32.mxu0 %vm443_vm5, %v20957_v7 }
 0x716   : > { %15897 = vmatmul.mubr.msk.f32.gmra.mrb[48].mxu0 %vm443_vm5, %v20961_v12 }
 0x717   : > { %15899 = vmatprep.mubr.msk.f32.mxu0 %vm443_vm5, %v20965_v17 }
 0x71a   : > { %15900 = vmatmul.mubr.msk.f32.gmra.mrb[50].mxu0 %vm443_vm5, %v20969_v18 }
 0x71b   : > { %15902 = vmatprep.mubr.msk.f32.mxu0 %vm443_vm5, %v20973_v5 }
 0x71e   : > { %15903 = vmatmul.mubr.msk.f32.gmra.mrb[52].mxu0 %vm443_vm5, %v20977_v6 }
 0x71f   : > { %15905 = vmatprep.mubr.msk.f32.mxu0 %vm443_vm5, %v20981_v22 }
 0x722   : > { %15906 = vmatmul.mubr.msk.f32.gmra.mrb[54].mxu0 %vm443_vm5, %v20985_v23 }
 0x723   : > { %15908 = vmatprep.mubr.msk.f32.mxu0 %vm443_vm5, %v20989_v30 }
 0x726   : > { %15909 = vmatmul.mubr.msk.f32.gmra.mrb[56].mxu0 %vm443_vm5, %v20993_v31 }
 0x727   : > { %15911 = vmatprep.mubr.msk.f32.mxu0 %vm443_vm5, %v20997_v39 }
 0x72a   : > { %15912 = vmatmul.mubr.msk.f32.gmra.mrb[58].mxu0 %vm443_vm5, %v21001_v62 }
 0x72b   : > { %15914 = vmatprep.mubr.msk.f32.mxu0 %vm443_vm5, %v21005_v40 }
 0x72e   : > { %15915 = vmatmul.mubr.msk.f32.gmra.mrb[60].mxu0 %vm443_vm5, %v21009_v2 }
 0x72f   : > { %15917 = vmatprep.mubr.msk.f32.mxu0 %vm443_vm5, %v7180_v34 }
 0x732   : > { %15918 = vmatmul.mubr.msk.f32.gmra.mrb[62].mxu0 %vm443_vm5, %v7181_v35 }
 0x733   : > { %15932 = vmatprep.mubr.msk.f32.mxu0 %vm443_vm5, %v20898_v36  ;;  %v21204_v36 = vpack.c.bf16 %v12979_v21, %v12978_v56 }
 0x736   : > { %15933 = vmatmul.mubr.msk.f32.vlgmr.msra.gmra.mrb[32].mxu0 %vm443_vm5, %v20904_v50  ;;  %v21210_v50 = vld [vmem:[#allocation4 + $0x4a] sm:$0xff] }
 0x737   : > { %16847 = vmatpush3.bf16.msra.mxu0 %v16844_v32  ;;  %15935 = vmatprep.mubr.msk.f32.mxu0 %vm443_vm5, %v20908_v52  ;;  %v21215_v52 = vld [vmem:[#allocation4 + $0x52] sm:$0xff]  ;;  %v16884_v32 = vpack.c.bf16 %v13020_v27, %v13019_v19 }
 0x738   : > { %16849 = vmatprep.subr.bf16.mxu0 %v16848_v48 }
 0x739   : > { %16885 = vmatprep.subr.bf16.mxu1 %v16884_v32 }
 0x73a   : > { %15936 = vmatmul.mubr.msk.f32.gmra.mrb[34].mxu0 %vm443_vm5, %v20913_v53  ;;  %v21219_v53 = vld [vmem:[#allocation4 + $0x62] sm:$0xff]  ;;  %16887 = vmatpush3.bf16.msra.mxu1 %v16884_v32 }
 0x73b   : > { %15938 = vmatprep.mubr.msk.f32.mxu0 %vm443_vm5, %v20917_v54  ;;  %16851 = vmatpush3.bf16.msra.mxu0 %v16848_v48  ;;  %v21223_v54 = vld [vmem:[#allocation4 + $0x6a] sm:$0xff] }
 0x73c   : > { %16853 = vmatprep.subr.bf16.mxu0 %v16852_v45 }
 0x73e   : > { %15939 = vmatmul.mubr.msk.f32.gmra.mrb[36].mxu0 %vm443_vm5, %v20921_v33  ;;  %v21227_v33 = vld [vmem:[#allocation4 + $0x7a] sm:$0xff] }
 0x73f   : > { %15941 = vmatprep.mubr.msk.f32.mxu0 %vm443_vm5, %v20925_v59  ;;  %16855 = vmatpush3.bf16.msra.mxu0 %v16852_v45  ;;  %v21231_v59 = vld [vmem:[#allocation4 + $0x82] sm:$0xff]  ;;  %v8118_v45 = vld [vmem:[#allocation4 + $0x19a] sm:$0xff] }
 0x740   : > { %16857 = vmatprep.subr.bf16.mxu0 %v16856_v49 }
 0x742   : > { %15942 = vmatmul.mubr.msk.f32.gmra.mrb[38].mxu0 %vm443_vm5, %v20929_v60  ;;  %v21235_v60 = vld [vmem:[#allocation4 + $0x92] sm:$0xff] }
 0x743   : > { %15944 = vmatprep.mubr.msk.f32.mxu0 %vm443_vm5, %v20933_v0  ;;  %v21239_v0 = vld [vmem:[#allocation4 + $0x9a] sm:$0xff] }
 0x746   : > { %15945 = vmatmul.mubr.msk.f32.gmra.mrb[40].mxu0 %vm443_vm5, %v20937_v4  ;;  %v21243_v4 = vld [vmem:[#allocation4 + $0xaa] sm:$0xff] }
 0x747   : > { %15947 = vmatprep.mubr.msk.f32.mxu0 %vm443_vm5, %v20941_v8  ;;  %v21247_v8 = vld [vmem:[#allocation4 + $0xb2] sm:$0xff] }
 0x74a   : > { %15948 = vmatmul.mubr.msk.f32.gmra.mrb[42].mxu0 %vm443_vm5, %v20945_v9  ;;  %v21251_v9 = vld [vmem:[#allocation4 + $0xc2] sm:$0xff] }
 0x74b   : > { %15950 = vmatprep.mubr.msk.f32.mxu0 %vm443_vm5, %v20949_v10  ;;  %v21255_v10 = vld [vmem:[#allocation4 + $0xca] sm:$0xff] }
 0x74e   : > { %15951 = vmatmul.mubr.msk.f32.gmra.mrb[44].mxu0 %vm443_vm5, %v20953_v11  ;;  %v21259_v11 = vld [vmem:[#allocation4 + $0xda] sm:$0xff] }
 0x74f   : > { %15953 = vmatprep.mubr.msk.f32.mxu0 %vm443_vm5, %v20957_v7  ;;  %v21263_v7 = vld [vmem:[#allocation4 + $0xe2] sm:$0xff] }
 0x752   : > { %15954 = vmatmul.mubr.msk.f32.gmra.mrb[46].mxu0 %vm443_vm5, %v20961_v12  ;;  %v21267_v12 = vld [vmem:[#allocation4 + $0xf2] sm:$0xff] }
 0x753   : > { %15956 = vmatprep.mubr.msk.f32.mxu0 %vm443_vm5, %v20965_v17  ;;  %v21271_v17 = vld [vmem:[#allocation4 + $0xfa] sm:$0xff] }
 0x756   : > { %15957 = vmatmul.mubr.msk.f32.gmra.mrb[48].mxu0 %vm443_vm5, %v20969_v18  ;;  %v21275_v18 = vld [vmem:[#allocation4 + $0x10a] sm:$0xff] }
 0x757   : > { %15959 = vmatprep.mubr.msk.f32.mxu0 %vm443_vm5, %v20973_v5  ;;  %v21279_v5 = vld [vmem:[#allocation4 + $0x112] sm:$0xff] }
 0x75a   : > { %15960 = vmatmul.mubr.msk.f32.gmra.mrb[50].mxu0 %vm443_vm5, %v20977_v6  ;;  %v21283_v6 = vld [vmem:[#allocation4 + $0x122] sm:$0xff] }
 0x75b   : > { %15962 = vmatprep.mubr.msk.f32.mxu0 %vm443_vm5, %v20981_v22  ;;  %v21287_v22 = vld [vmem:[#allocation4 + $0x12a] sm:$0xff] }
 0x75e   : > { %15963 = vmatmul.mubr.msk.f32.gmra.mrb[52].mxu0 %vm443_vm5, %v20985_v23  ;;  %v21291_v23 = vld [vmem:[#allocation4 + $0x13a] sm:$0xff] }
 0x75f   : > { %15965 = vmatprep.mubr.msk.f32.mxu0 %vm443_vm5, %v20989_v30  ;;  %v21295_v30 = vld [vmem:[#allocation4 + $0x142] sm:$0xff] }
 0x762   : > { %15966 = vmatmul.mubr.msk.f32.gmra.mrb[54].mxu0 %vm443_vm5, %v20993_v31  ;;  %v21299_v31 = vld [vmem:[#allocation4 + $0x152] sm:$0xff] }
 0x763   : > { %15968 = vmatprep.mubr.msk.f32.mxu0 %vm443_vm5, %v20997_v39  ;;  %v21303_v39 = vld [vmem:[#allocation4 + $0x15a] sm:$0xff] }
 0x766   : > { %15969 = vmatmul.mubr.msk.f32.gmra.mrb[56].mxu0 %vm443_vm5, %v21001_v62  ;;  %v21307_v62 = vld [vmem:[#allocation4 + $0x16a] sm:$0xff] }
 0x767   : > { %15971 = vmatprep.mubr.msk.f32.mxu0 %vm443_vm5, %v21005_v40  ;;  %v21311_v40 = vld [vmem:[#allocation4 + $0x172] sm:$0xff] }
 0x76a   : > { %15972 = vmatmul.mubr.msk.f32.gmra.mrb[58].mxu0 %vm443_vm5, %v21009_v2  ;;  %v12980_v2 = vld [vmem:[%s22594_s3 + $0x190] sm:$0xff] }
 0x76b   : > { %15974 = vmatprep.mubr.msk.f32.mxu0 %vm443_vm5, %v7180_v34  ;;  %v16872_v28 = vpack.c.bf16 %v12981_v3, %v12980_v2  ;;  %v12983_v34 = vld [vmem:[%s22594_s3 + $0x1a8] sm:$0xff] }
 0x76c   : > { %v16876_v47 = vpack.c.bf16 %v12983_v34, %v12982_v29 }
 0x76e   : > { %15975 = vmatmul.mubr.msk.f32.gmra.mrb[60].mxu0 %vm443_vm5, %v7181_v35  ;;  %v13021_v35 = vld [vmem:[%s22595_s4 + $0xb0] sm:$0xff] }
 0x76f   : > { %15977 = vmatprep.mubr.msk.f32.mxu0 %vm443_vm5, %v7182_v25  ;;  %v16888_v48 = vpack.c.bf16 %v13022_v42, %v13021_v35 }
 0x771   : > { %16889 = vmatprep.subr.bf16.mxu1 %v16888_v48 }
 0x772   : > { %15978 = vmatmul.mubr.msk.f32.gmra.mrb[62].mxu0 %vm443_vm5, %v7183_v38  ;;  %16891 = vmatpush3.bf16.msra.mxu1 %v16888_v48  ;;  %v21477_v38 = vld [vmem:[%s22598_s7] ss:$0 sm:$0xff] }
 0x773   : > { %15992 = vmatprep.mubr.msk.f32.mxu0 %vm443_vm5, %v8084_v41 }
 0x776   : > { %15993 = vmatmul.mubr.msk.f32.vlgmr.msra.gmra.mrb[32].mxu0 %vm443_vm5, %v8085_v61 }
 0x777   : > { %16859 = vmatpush3.bf16.msra.mxu0 %v16856_v49  ;;  %15995 = vmatprep.mubr.msk.f32.mxu0 %vm443_vm5, %v21186_v14  ;;  %v9161_v49 = vld [vmem:[%s22595_s4 + $0x8] sm:$0xff] }
 0x778   : > { %16861 = vmatprep.subr.bf16.mxu0 %v16860_v63  ;;  %v16892_v25 = vpack.c.bf16 %v9161_v49, %v9160_v24 }
 0x77a   : > { %15996 = vmatmul.mubr.msk.f32.gmra.mrb[34].mxu0 %vm443_vm5, %v21190_v55  ;;  %16893 = vmatprep.subr.bf16.mxu1 %v16892_v25 }
 0x77b   : > { %15998 = vmatprep.mubr.msk.f32.mxu0 %vm443_vm5, %v21200_v26  ;;  %16863 = vmatpush3.bf16.msra.mxu0 %v16860_v63 }
 0x77c   : > { %16865 = vmatprep.subr.bf16.mxu0 %v16864_v15 }
 0x77e   : > { %15999 = vmatmul.mubr.msk.f32.gmra.mrb[36].mxu0 %vm443_vm5, %v21206_v37 }
 0x77f   : > { %16001 = vmatprep.mubr.msk.f32.mxu0 %vm443_vm5, %v21210_v50  ;;  %16867 = vmatpush3.bf16.msra.mxu0 %v16864_v15 }
 0x780   : > { %16869 = vmatprep.subr.bf16.mxu0 %v21204_v36 }
 0x782   : > { %16002 = vmatmul.mubr.msk.f32.gmra.mrb[38].mxu0 %vm443_vm5, %v21215_v52 }
 0x783   : > { %16004 = vmatprep.mubr.msk.f32.mxu0 %vm443_vm5, %v21219_v53 }
 0x786   : > { %16005 = vmatmul.mubr.msk.f32.gmra.mrb[40].mxu0 %vm443_vm5, %v21223_v54 }
 0x787   : > { %16007 = vmatprep.mubr.msk.f32.mxu0 %vm443_vm5, %v21227_v33 }
 0x78a   : > { %16008 = vmatmul.mubr.msk.f32.gmra.mrb[42].mxu0 %vm443_vm5, %v21231_v59 }
 0x78b   : > { %16010 = vmatprep.mubr.msk.f32.mxu0 %vm443_vm5, %v21235_v60 }
 0x78e   : > { %16011 = vmatmul.mubr.msk.f32.gmra.mrb[44].mxu0 %vm443_vm5, %v21239_v0 }
 0x78f   : > { %16013 = vmatprep.mubr.msk.f32.mxu0 %vm443_vm5, %v21243_v4 }
 0x792   : > { %16014 = vmatmul.mubr.msk.f32.gmra.mrb[46].mxu0 %vm443_vm5, %v21247_v8 }
 0x793   : > { %16016 = vmatprep.mubr.msk.f32.mxu0 %vm443_vm5, %v21251_v9 }
 0x796   : > { %16017 = vmatmul.mubr.msk.f32.gmra.mrb[48].mxu0 %vm443_vm5, %v21255_v10 }
 0x797   : > { %16019 = vmatprep.mubr.msk.f32.mxu0 %vm443_vm5, %v21259_v11 }
 0x79a   : > { %16020 = vmatmul.mubr.msk.f32.gmra.mrb[50].mxu0 %vm443_vm5, %v21263_v7 }
 0x79b   : > { %16022 = vmatprep.mubr.msk.f32.mxu0 %vm443_vm5, %v21267_v12 }
 0x79e   : > { %16023 = vmatmul.mubr.msk.f32.gmra.mrb[52].mxu0 %vm443_vm5, %v21271_v17 }
 0x79f   : > { %16025 = vmatprep.mubr.msk.f32.mxu0 %vm443_vm5, %v21275_v18 }
 0x7a2   : > { %16026 = vmatmul.mubr.msk.f32.gmra.mrb[54].mxu0 %vm443_vm5, %v21279_v5 }
 0x7a3   : > { %16028 = vmatprep.mubr.msk.f32.mxu0 %vm443_vm5, %v21283_v6 }
 0x7a6   : > { %16029 = vmatmul.mubr.msk.f32.gmra.mrb[56].mxu0 %vm443_vm5, %v21287_v22 }
 0x7a7   : > { %16031 = vmatprep.mubr.msk.f32.mxu0 %vm443_vm5, %v21291_v23 }
 0x7aa   : > { %16032 = vmatmul.mubr.msk.f32.gmra.mrb[58].mxu0 %vm443_vm5, %v21295_v30 }
 0x7ab   : > { %16034 = vmatprep.mubr.msk.f32.mxu0 %vm443_vm5, %v21299_v31 }
 0x7ae   : > { %16035 = vmatmul.mubr.msk.f32.gmra.mrb[60].mxu0 %vm443_vm5, %v21303_v39 }
 0x7af   : > { %16037 = vmatprep.mubr.msk.f32.mxu0 %vm443_vm5, %v21307_v62 }
 0x7b2   : > { %16038 = vmatmul.mubr.msk.f32.gmra.mrb[62].mxu0 %vm443_vm5, %v21311_v40 }
 0x7b3   : > { %16052 = vmatprep.mubr.msk.f32.mxu0 %vm443_vm5, %v21186_v14 }
 0x7b6   : > { %16053 = vmatmul.mubr.msk.f32.vlgmr.msra.gmra.mrb[32].mxu0 %vm443_vm5, %v21190_v55 }
 0x7b7   : > { %16871 = vmatpush3.bf16.msra.mxu0 %v21204_v36  ;;  %16055 = vmatprep.mubr.msk.f32.mxu0 %vm443_vm5, %v21200_v26 }
 0x7b8   : > { %16873 = vmatprep.subr.bf16.mxu0 %v16872_v28 }
 0x7ba   : > { %16056 = vmatmul.mubr.msk.f32.gmra.mrb[34].mxu0 %vm443_vm5, %v21206_v37 }
 0x7bb   : > { %16058 = vmatprep.mubr.msk.f32.mxu0 %vm443_vm5, %v21210_v50  ;;  %16875 = vmatpush3.bf16.msra.mxu0 %v16872_v28 }
 0x7bc   : > { %16877 = vmatprep.subr.bf16.mxu0 %v16876_v47 }
 0x7be   : > { %16059 = vmatmul.mubr.msk.f32.gmra.mrb[36].mxu0 %vm443_vm5, %v21215_v52 }
 0x7bf   : > { %16061 = vmatprep.mubr.msk.f32.mxu0 %vm443_vm5, %v21219_v53  ;;  %16879 = vmatpush3.bf16.msra.mxu0 %v16876_v47 }
 0x7c2   : > { %16062 = vmatmul.mubr.msk.f32.gmra.mrb[38].mxu0 %vm443_vm5, %v21223_v54 }
 0x7c3   : > { %16064 = vmatprep.mubr.msk.f32.mxu0 %vm443_vm5, %v21227_v33 }
 0x7c6   : > { %16065 = vmatmul.mubr.msk.f32.gmra.mrb[40].mxu0 %vm443_vm5, %v21231_v59 }
 0x7c7   : > { %16067 = vmatprep.mubr.msk.f32.mxu0 %vm443_vm5, %v21235_v60 }
 0x7ca   : > { %16068 = vmatmul.mubr.msk.f32.gmra.mrb[42].mxu0 %vm443_vm5, %v21239_v0 }
 0x7cb   : > { %16070 = vmatprep.mubr.msk.f32.mxu0 %vm443_vm5, %v21243_v4 }
 0x7ce   : > { %16071 = vmatmul.mubr.msk.f32.gmra.mrb[44].mxu0 %vm443_vm5, %v21247_v8 }
 0x7cf   : > { %16073 = vmatprep.mubr.msk.f32.mxu0 %vm443_vm5, %v21251_v9 }
 0x7d2   : > { %16074 = vmatmul.mubr.msk.f32.gmra.mrb[46].mxu0 %vm443_vm5, %v21255_v10 }
 0x7d3   : > { %16076 = vmatprep.mubr.msk.f32.mxu0 %vm443_vm5, %v21259_v11 }
 0x7d6   : > { %16077 = vmatmul.mubr.msk.f32.gmra.mrb[48].mxu0 %vm443_vm5, %v21263_v7 }
 0x7d7   : > { %16079 = vmatprep.mubr.msk.f32.mxu0 %vm443_vm5, %v21267_v12 }
 0x7da   : > { %16080 = vmatmul.mubr.msk.f32.gmra.mrb[50].mxu0 %vm443_vm5, %v21271_v17 }
 0x7db   : > { %16082 = vmatprep.mubr.msk.f32.mxu0 %vm443_vm5, %v21275_v18 }
 0x7de   : > { %16083 = vmatmul.mubr.msk.f32.gmra.mrb[52].mxu0 %vm443_vm5, %v21279_v5 }
 0x7df   : > { %16085 = vmatprep.mubr.msk.f32.mxu0 %vm443_vm5, %v21283_v6 }
 0x7e2   : > { %16086 = vmatmul.mubr.msk.f32.gmra.mrb[54].mxu0 %vm443_vm5, %v21287_v22 }
 0x7e3   : > { %16088 = vmatprep.mubr.msk.f32.mxu0 %vm443_vm5, %v21291_v23 }
 0x7e6   : > { %16089 = vmatmul.mubr.msk.f32.gmra.mrb[56].mxu0 %vm443_vm5, %v21295_v30 }
 0x7e7   : > { %16091 = vmatprep.mubr.msk.f32.mxu0 %vm443_vm5, %v21299_v31 }
 0x7ea   : > { %16092 = vmatmul.mubr.msk.f32.gmra.mrb[58].mxu0 %vm443_vm5, %v21303_v39 }
 0x7eb   : > { %16094 = vmatprep.mubr.msk.f32.mxu0 %vm443_vm5, %v21307_v62 }
 0x7ee   : > { %16095 = vmatmul.mubr.msk.f32.gmra.mrb[60].mxu0 %vm443_vm5, %v21311_v40 }
 0x7ef   : > { %16097 = vmatprep.mubr.msk.f32.mxu0 %vm443_vm5, %v8116_v43 }
 0x7f2   : > { %16098 = vmatmul.mubr.msk.f32.gmra.mrb[62].mxu0 %vm443_vm5, %v8117_v44 }
 0x7f3   : > { %16112 = vmatprep.mubr.msk.f32.mxu0 %vm443_vm5, %v21200_v26 }
 0x7f6   : > { %16113 = vmatmul.mubr.msk.f32.vlgmr.msra.gmra.mrb[32].mxu0 %vm443_vm5, %v21206_v37 }
 0x7f7   : > { %16115 = vmatprep.mubr.msk.f32.mxu0 %vm443_vm5, %v21210_v50 }
 0x7fa   : > { %16116 = vmatmul.mubr.msk.f32.gmra.mrb[34].mxu0 %vm443_vm5, %v21215_v52  ;;  %v9162_v52 = vld [vmem:[%s22595_s4 + $0x10] sm:$0xff] }
 0x7fb   : > { %16118 = vmatprep.mubr.msk.f32.mxu0 %vm443_vm5, %v21219_v53  ;;  %v9163_v53 = vld [vmem:[%s22595_s4 + $0x18] sm:$0xff] }
 0x7fe   : > { %16119 = vmatmul.mubr.msk.f32.gmra.mrb[36].mxu0 %vm443_vm5, %v21223_v54 }
 0x7ff   : > { %16121 = vmatprep.mubr.msk.f32.mxu0 %vm443_vm5, %v21227_v33 }
 0x802   : > { %16122 = vmatmul.mubr.msk.f32.gmra.mrb[38].mxu0 %vm443_vm5, %v21231_v59 }
 0x803   : > { %16124 = vmatprep.mubr.msk.f32.mxu0 %vm443_vm5, %v21235_v60 }
 0x806   : > { %16125 = vmatmul.mubr.msk.f32.gmra.mrb[40].mxu0 %vm443_vm5, %v21239_v0 }
 0x807   : > { %16127 = vmatprep.mubr.msk.f32.mxu0 %vm443_vm5, %v21243_v4 }
 0x80a   : > { %16128 = vmatmul.mubr.msk.f32.gmra.mrb[42].mxu0 %vm443_vm5, %v21247_v8 }
 0x80b   : > { %16130 = vmatprep.mubr.msk.f32.mxu0 %vm443_vm5, %v21251_v9  ;;  %v16896_v9 = vpack.c.bf16 %v9163_v53, %v9162_v52 }
 0x80e   : > { %16131 = vmatmul.mubr.msk.f32.gmra.mrb[44].mxu0 %vm443_vm5, %v21255_v10 }
 0x80f   : > { %16133 = vmatprep.mubr.msk.f32.mxu0 %vm443_vm5, %v21259_v11  ;;  %v9164_v11 = vld [vmem:[%s22595_s4 + $0x20] sm:$0xff] }
 0x812   : > { %16134 = vmatmul.mubr.msk.f32.gmra.mrb[46].mxu0 %vm443_vm5, %v21263_v7  ;;  %v9165_v7 = vld [vmem:[%s22595_s4 + $0x28] sm:$0xff] }
 0x813   : > { %16136 = vmatprep.mubr.msk.f32.mxu0 %vm443_vm5, %v21267_v12 }
 0x816   : > { %16137 = vmatmul.mubr.msk.f32.gmra.mrb[48].mxu0 %vm443_vm5, %v21271_v17 }
 0x817   : > { %16139 = vmatprep.mubr.msk.f32.mxu0 %vm443_vm5, %v21275_v18 }
 0x81a   : > { %16140 = vmatmul.mubr.msk.f32.gmra.mrb[50].mxu0 %vm443_vm5, %v21279_v5 }
 0x81b   : > { %16142 = vmatprep.mubr.msk.f32.mxu0 %vm443_vm5, %v21283_v6 }
 0x81e   : > { %16143 = vmatmul.mubr.msk.f32.gmra.mrb[52].mxu0 %vm443_vm5, %v21287_v22 }
 0x81f   : > { %16145 = vmatprep.mubr.msk.f32.mxu0 %vm443_vm5, %v21291_v23 }
 0x822   : > { %16146 = vmatmul.mubr.msk.f32.gmra.mrb[54].mxu0 %vm443_vm5, %v21295_v30  ;;  %v16900_v30 = vpack.c.bf16 %v9165_v7, %v9164_v11 }
 0x823   : > { %16148 = vmatprep.mubr.msk.f32.mxu0 %vm443_vm5, %v21299_v31 }
 0x826   : > { %16149 = vmatmul.mubr.msk.f32.gmra.mrb[56].mxu0 %vm443_vm5, %v21303_v39  ;;  %v13087_v39 = vld [vmem:[%s22595_s4 + $0x120] sm:$0xff] }
 0x827   : > { %16151 = vmatprep.mubr.msk.f32.mxu0 %vm443_vm5, %v21307_v62  ;;  %v13088_v62 = vld [vmem:[%s22595_s4 + $0x128] sm:$0xff] }
 0x828   : > { %v21537_v27 = vpack.c.bf16 %v13088_v62, %v13087_v39 }
 0x82a   : > { %16152 = vmatmul.mubr.msk.f32.gmra.mrb[58].mxu0 %vm443_vm5, %v21311_v40 }
 0x82b   : > { %16154 = vmatprep.mubr.msk.f32.mxu0 %vm443_vm5, %v8116_v43 }
 0x82e   : > { %16155 = vmatmul.mubr.msk.f32.gmra.mrb[60].mxu0 %vm443_vm5, %v8117_v44 }
 0x82f   : > { %16157 = vmatprep.mubr.msk.f32.mxu0 %vm443_vm5, %v8118_v45 }
 0x832   : > { %16158 = vmatmul.mubr.msk.f32.gmra.mrb[62].mxu0 %vm443_vm5, %v8119_v46 }
 0x8c9   : > { %v16114_v41 = vpop.f32.mrb[32].mxu0 }
 0x8ca   : > { %v9028_v51 = vadd.f32 %v16114_v41, %v21477_v38  ;;  %v8829_v1 = vpop.f32.mrb[33].mxu0 }
 0x8cb   : > { %v9027_v61 = vadd.f32 %v21477_v38, %v8829_v1 }
 0x8cc   : > { %v9060_v63 = vmax.f32 %v9028_v51, 0.0 }
 0x8cd   : > { %v9059_v57 = vmax.f32 %v9027_v61, 0.0  ;;  %v16117_v58 = vpop.f32.mrb[34].mxu0 }
 0x8ce   : > { %9093 = vst.msk [vmem:[#allocation5 + $0x21] sm:$0xff] %vm443_vm5, %v9060_v63  ;;  %v9030_v14 = vadd.f32 %v16117_v58, %v21477_v38  ;;  %v8839_v15 = vpop.f32.mrb[35].mxu0 }
 0x8cf   : > { %9092 = vst.msk [vmem:[#allocation5 + $0x19] sm:$0xff] %vm443_vm5, %v9059_v57  ;;  %v9029_v55 = vadd.f32 %v21477_v38, %v8839_v15 }
 0x8d0   : > { %v9062_v56 = vmax.f32 %v9030_v14, 0.0 }
 0x8d1   : > { %v9061_v21 = vmax.f32 %v9029_v55, 0.0  ;;  %v16120_v26 = vpop.f32.mrb[36].mxu0 }
 0x8d2   : > { %9095 = vst.msk [vmem:[#allocation5 + $0x39] sm:$0xff] %vm443_vm5, %v9062_v56  ;;  %v9032_v36 = vadd.f32 %v16120_v26, %v21477_v38  ;;  %v8849_v37 = vpop.f32.mrb[37].mxu0 }
 0x8d3   : > { %9094 = vst.msk [vmem:[#allocation5 + $0x31] sm:$0xff] %vm443_vm5, %v9061_v21  ;;  %v9031_v50 = vadd.f32 %v21477_v38, %v8849_v37 }
 0x8d4   : > { %v9064_v54 = vmax.f32 %v9032_v36, 0.0 }
 0x8d5   : > { %v9063_v33 = vmax.f32 %v9031_v50, 0.0  ;;  %v16123_v59 = vpop.f32.mrb[38].mxu0 }
 0x8d6   : > { %9097 = vst.msk [vmem:[#allocation5 + $0x51] sm:$0xff] %vm443_vm5, %v9064_v54  ;;  %v9034_v60 = vadd.f32 %v16123_v59, %v21477_v38  ;;  %v8859_v0 = vpop.f32.mrb[39].mxu0  ;;  %v21497_v4 = vld [vmem:[#allocation5 + $0x18] sm:$0xff]  ;;  %v21499_v8 = vld [vmem:[#allocation5 + $0x20] sm:$0xff] }
 0x8d7   : > { %9096 = vst.msk [vmem:[#allocation5 + $0x49] sm:$0xff] %vm443_vm5, %v9063_v33  ;;  %v9033_v10 = vadd.f32 %v21477_v38, %v8859_v0  ;;  %16172 = vmatprep.mubr.msk.f32.mxu1 %vm443_vm5, %v21497_v4 }
 0x8d8   : > { %v9066_v12 = vmax.f32 %v9034_v60, 0.0  ;;  %16173 = vmatmul.mubr.msk.f32.vlgmr.msra.gmra.mrb[32].mxu1 %vm443_vm5, %v21499_v8 }
 0x8d9   : > { %v9065_v17 = vmax.f32 %v9033_v10, 0.0  ;;  %16895 = vmatpush3.bf16.msra.mxu1 %v16892_v25  ;;  %v16126_v18 = vpop.f32.mrb[40].mxu0 }
 0x8da   : > { %9099 = vst.msk [vmem:[#allocation5 + $0x69] sm:$0xff] %vm443_vm5, %v9066_v12  ;;  %v9036_v5 = vadd.f32 %v16126_v18, %v21477_v38  ;;  %v8869_v6 = vpop.f32.mrb[41].mxu0  ;;  %v21515_v22 = vld [vmem:[#allocation5 + $0x30] sm:$0xff]  ;;  %v21517_v23 = vld [vmem:[#allocation5 + $0x38] sm:$0xff]  ;;  %16897 = vmatprep.subr.bf16.mxu1 %v16896_v9 }
 0x8db   : > { %9098 = vst.msk [vmem:[#allocation5 + $0x61] sm:$0xff] %vm443_vm5, %v9065_v17  ;;  %v9035_v31 = vadd.f32 %v21477_v38, %v8869_v6  ;;  %16175 = vmatprep.mubr.msk.f32.mxu1 %vm443_vm5, %v21515_v22 }
 0x8dc   : > { %v9068_v40 = vmax.f32 %v9036_v5, 0.0  ;;  %16176 = vmatmul.mubr.msk.f32.gmra.mrb[34].mxu1 %vm443_vm5, %v21517_v23 }
 0x8dd   : > { %v9067_v2 = vmax.f32 %v9035_v31, 0.0  ;;  %v16129_v3 = vpop.f32.mrb[42].mxu0  ;;  %16899 = vmatpush3.bf16.msra.mxu1 %v16896_v9 }
 0x8de   : > { %9101 = vst.msk [vmem:[#allocation5 + $0x81] sm:$0xff] %vm443_vm5, %v9068_v40  ;;  %v9038_v13 = vadd.f32 %v16129_v3, %v21477_v38  ;;  %v8879_v16 = vpop.f32.mrb[43].mxu0  ;;  %v21533_v19 = vld [vmem:[#allocation5 + $0x48] sm:$0xff]  ;;  %v21535_v20 = vld [vmem:[#allocation5 + $0x50] sm:$0xff]  ;;  %16901 = vmatprep.subr.bf16.mxu1 %v16900_v30 }
 0x8df   : > { %9100 = vst.msk [vmem:[#allocation5 + $0x79] sm:$0xff] %vm443_vm5, %v9067_v2  ;;  %v9037_v28 = vadd.f32 %v21477_v38, %v8879_v16  ;;  %16178 = vmatprep.mubr.msk.f32.mxu1 %vm443_vm5, %v21533_v19 }
 0x8e0   : > { %v9070_v29 = vmax.f32 %v9038_v13, 0.0  ;;  %16179 = vmatmul.mubr.msk.f32.gmra.mrb[36].mxu1 %vm443_vm5, %v21535_v20 }
 0x8e1   : > { %v9069_v32 = vmax.f32 %v9037_v28, 0.0  ;;  %v16132_v34 = vpop.f32.mrb[44].mxu0  ;;  %16903 = vmatpush3.bf16.msra.mxu1 %v16900_v30 }
 0x8e2   : > { %9103 = vst.msk [vmem:[#allocation5 + $0x99] sm:$0xff] %vm443_vm5, %v9070_v29  ;;  %v9040_v35 = vadd.f32 %v16132_v34, %v21477_v38  ;;  %v8889_v42 = vpop.f32.mrb[45].mxu0  ;;  %v21547_v47 = vld [vmem:[#allocation5 + $0x60] sm:$0xff]  ;;  %v21549_v48 = vld [vmem:[#allocation5 + $0x68] sm:$0xff]  ;;  %16905 = vmatprep.subr.bf16.mxu1 %v21537_v27 }
 0x8e3   : > { %9102 = vst.msk [vmem:[#allocation5 + $0x91] sm:$0xff] %vm443_vm5, %v9069_v32  ;;  %v9039_v43 = vadd.f32 %v21477_v38, %v8889_v42  ;;  %16181 = vmatprep.mubr.msk.f32.mxu1 %vm443_vm5, %v21547_v47 }
 0x8e4   : > { %v9072_v44 = vmax.f32 %v9040_v35, 0.0  ;;  %16182 = vmatmul.mubr.msk.f32.gmra.mrb[38].mxu1 %vm443_vm5, %v21549_v48 }
 0x8e5   : > { %v9071_v45 = vmax.f32 %v9039_v43, 0.0  ;;  %v16135_v46 = vpop.f32.mrb[46].mxu0 }
 0x8e6   : > { %9105 = vst.msk [vmem:[#allocation5 + $0xb1] sm:$0xff] %vm443_vm5, %v9072_v44  ;;  %v9042_v24 = vadd.f32 %v16135_v46, %v21477_v38  ;;  %v8899_v49 = vpop.f32.mrb[47].mxu0  ;;  %v21560_v25 = vld [vmem:[#allocation5 + $0x78] sm:$0xff]  ;;  %v21562_v41 = vld [vmem:[#allocation5 + $0x80] sm:$0xff] }
 0x8e7   : > { %9104 = vst.msk [vmem:[#allocation5 + $0xa9] sm:$0xff] %vm443_vm5, %v9071_v45  ;;  %v9041_v51 = vadd.f32 %v21477_v38, %v8899_v49  ;;  %16184 = vmatprep.mubr.msk.f32.mxu1 %vm443_vm5, %v21560_v25 }
 0x8e8   : > { %v9074_v1 = vmax.f32 %v9042_v24, 0.0  ;;  %16185 = vmatmul.mubr.msk.f32.gmra.mrb[40].mxu1 %vm443_vm5, %v21562_v41 }
 0x8e9   : > { %v9073_v61 = vmax.f32 %v9041_v51, 0.0  ;;  %v16138_v63 = vpop.f32.mrb[48].mxu0 }
 0x8ea   : > { %9107 = vst.msk [vmem:[#allocation5 + $0xc9] sm:$0xff] %vm443_vm5, %v9074_v1  ;;  %v9044_v57 = vadd.f32 %v16138_v63, %v21477_v38  ;;  %v8909_v58 = vpop.f32.mrb[49].mxu0  ;;  %v21572_v14 = vld [vmem:[#allocation5 + $0x90] sm:$0xff]  ;;  %v21574_v15 = vld [vmem:[#allocation5 + $0x98] sm:$0xff] }
 0x8eb   : > { %9106 = vst.msk [vmem:[#allocation5 + $0xc1] sm:$0xff] %vm443_vm5, %v9073_v61  ;;  %v9043_v55 = vadd.f32 %v21477_v38, %v8909_v58  ;;  %16187 = vmatprep.mubr.msk.f32.mxu1 %vm443_vm5, %v21572_v14 }
 0x8ec   : > { %v9076_v56 = vmax.f32 %v9044_v57, 0.0  ;;  %16188 = vmatmul.mubr.msk.f32.gmra.mrb[42].mxu1 %vm443_vm5, %v21574_v15 }
 0x8ed   : > { %v9075_v21 = vmax.f32 %v9043_v55, 0.0  ;;  %v16141_v26 = vpop.f32.mrb[50].mxu0 }
 0x8ee   : > { %9109 = vst.msk [vmem:[#allocation5 + $0xe1] sm:$0xff] %vm443_vm5, %v9076_v56  ;;  %v9046_v36 = vadd.f32 %v16141_v26, %v21477_v38  ;;  %v8919_v37 = vpop.f32.mrb[51].mxu0  ;;  %v21584_v50 = vld [vmem:[#allocation5 + $0xa8] sm:$0xff]  ;;  %v21586_v52 = vld [vmem:[#allocation5 + $0xb0] sm:$0xff] }
 0x8ef   : > { %9108 = vst.msk [vmem:[#allocation5 + $0xd9] sm:$0xff] %vm443_vm5, %v9075_v21  ;;  %v9045_v53 = vadd.f32 %v21477_v38, %v8919_v37  ;;  %16190 = vmatprep.mubr.msk.f32.mxu1 %vm443_vm5, %v21584_v50 }
 0x8f0   : > { %v9078_v54 = vmax.f32 %v9046_v36, 0.0  ;;  %16191 = vmatmul.mubr.msk.f32.gmra.mrb[44].mxu1 %vm443_vm5, %v21586_v52 }
 0x8f1   : > { %v9077_v33 = vmax.f32 %v9045_v53, 0.0  ;;  %v16144_v59 = vpop.f32.mrb[52].mxu0 }
 0x8f2   : > { %9111 = vst.msk [vmem:[#allocation5 + $0xf9] sm:$0xff] %vm443_vm5, %v9078_v54  ;;  %v9048_v60 = vadd.f32 %v16144_v59, %v21477_v38  ;;  %v8929_v0 = vpop.f32.mrb[53].mxu0  ;;  %v21596_v9 = vld [vmem:[#allocation5 + $0xc0] sm:$0xff]  ;;  %v21598_v10 = vld [vmem:[#allocation5 + $0xc8] sm:$0xff] }
 0x8f3   : > { %9110 = vst.msk [vmem:[#allocation5 + $0xf1] sm:$0xff] %vm443_vm5, %v9077_v33  ;;  %v9047_v11 = vadd.f32 %v21477_v38, %v8929_v0  ;;  %16193 = vmatprep.mubr.msk.f32.mxu1 %vm443_vm5, %v21596_v9 }
 0x8f4   : > { %v9080_v7 = vmax.f32 %v9048_v60, 0.0  ;;  %16194 = vmatmul.mubr.msk.f32.gmra.mrb[46].mxu1 %vm443_vm5, %v21598_v10 }
 0x8f5   : > { %v9079_v12 = vmax.f32 %v9047_v11, 0.0  ;;  %v16147_v17 = vpop.f32.mrb[54].mxu0 }
 0x8f6   : > { %9113 = vst.msk [vmem:[#allocation5 + $0x111] sm:$0xff] %vm443_vm5, %v9080_v7  ;;  %v9050_v18 = vadd.f32 %v16147_v17, %v21477_v38  ;;  %v8939_v5 = vpop.f32.mrb[55].mxu0  ;;  %v21608_v6 = vld [vmem:[#allocation5 + $0xd8] sm:$0xff]  ;;  %v21610_v30 = vld [vmem:[#allocation5 + $0xe0] sm:$0xff] }
 0x8f7   : > { %9112 = vst.msk [vmem:[#allocation5 + $0x109] sm:$0xff] %vm443_vm5, %v9079_v12  ;;  %v9049_v31 = vadd.f32 %v21477_v38, %v8939_v5  ;;  %16196 = vmatprep.mubr.msk.f32.mxu1 %vm443_vm5, %v21608_v6  ;;  %v9124_v12 = vld [vmem:[#allocation5] sm:$0xff]  ;;  %v9125_v5 = vld [vmem:[#allocation5 + $0x8] sm:$0xff] }
 0x8f8   : > { %v9082_v39 = vmax.f32 %v9050_v18, 0.0  ;;  %16197 = vmatmul.mubr.msk.f32.gmra.mrb[48].mxu1 %vm443_vm5, %v21610_v30  ;;  %v13089_v17 = vld [vmem:[%s22595_s4 + $0x130] sm:$0xff]  ;;  %v13090_v18 = vld [vmem:[%s22595_s4 + $0x138] sm:$0xff] }
 0x8f9   : > { %v9081_v62 = vmax.f32 %v9049_v31, 0.0  ;;  %v16150_v40 = vpop.f32.mrb[56].mxu0  ;;  %v16908_v31 = vpack.c.bf16 %v13090_v18, %v13089_v17  ;;  %v13205_v18 = vld [vmem:[%s22595_s4 + $0x170] sm:$0xff] }
 0x8fa   : > { %9115 = vst.msk [vmem:[#allocation5 + $0x129] sm:$0xff] %vm443_vm5, %v9082_v39  ;;  %v9052_v2 = vadd.f32 %v16150_v40, %v21477_v38  ;;  %v8949_v3 = vpop.f32.mrb[57].mxu0  ;;  %v21620_v13 = vld [vmem:[#allocation5 + $0xf0] sm:$0xff]  ;;  %v21622_v16 = vld [vmem:[#allocation5 + $0xf8] sm:$0xff] }
 0x8fb   : > { %9114 = vst.msk [vmem:[#allocation5 + $0x121] sm:$0xff] %vm443_vm5, %v9081_v62  ;;  %v9051_v28 = vadd.f32 %v21477_v38, %v8949_v3  ;;  %16199 = vmatprep.mubr.msk.f32.mxu1 %vm443_vm5, %v21620_v13  ;;  %v13091_v39 = vld [vmem:[%s22595_s4 + $0x140] sm:$0xff]  ;;  %v13092_v62 = vld [vmem:[%s22595_s4 + $0x148] sm:$0xff]  ;;  %v13126_v3 = vld [vmem:[%s22595_s4 + $0x38] sm:$0xff] }
 0x8fc   : > { %v9084_v29 = vmax.f32 %v9052_v2, 0.0  ;;  %16200 = vmatmul.mubr.msk.f32.gmra.mrb[50].mxu1 %vm443_vm5, %v21622_v16  ;;  %v16912_v40 = vpack.c.bf16 %v13092_v62, %v13091_v39  ;;  %v13125_v2 = vld [vmem:[%s22595_s4 + $0x30] sm:$0xff]  ;;  %v13239_v39 = vld [vmem:[%s22595_s4 + $0x60] sm:$0xff]  ;;  %v13240_v62 = vld [vmem:[%s22595_s4 + $0x68] sm:$0xff] }
 0x8fd   : > { %v9083_v32 = vmax.f32 %v9051_v28, 0.0  ;;  %v16153_v34 = vpop.f32.mrb[58].mxu0 }
 0x8fe   : > { %9117 = vst.msk [vmem:[#allocation5 + $0x141] sm:$0xff] %vm443_vm5, %v9084_v29  ;;  %v9054_v35 = vadd.f32 %v16153_v34, %v21477_v38  ;;  %v8959_v42 = vpop.f32.mrb[59].mxu0  ;;  %v21632_v43 = vld [vmem:[#allocation5 + $0x108] sm:$0xff]  ;;  %v21634_v44 = vld [vmem:[#allocation5 + $0x110] sm:$0xff]  ;;  %v13129_v29 = vld [vmem:[%s22595_s4 + $0x50] sm:$0xff] }
 0x8ff   : > { %9116 = vst.msk [vmem:[#allocation5 + $0x139] sm:$0xff] %vm443_vm5, %v9083_v32  ;;  %v9053_v45 = vadd.f32 %v21477_v38, %v8959_v42  ;;  %16202 = vmatprep.mubr.msk.f32.mxu1 %vm443_vm5, %v21632_v43  ;;  %v13130_v32 = vld [vmem:[%s22595_s4 + $0x58] sm:$0xff]  ;;  %v21887_v42 = vld [vmem:[#allocation5 + $0x39] sm:$0xff] }
 0x900   : > { %v9086_v46 = vmax.f32 %v9054_v35, 0.0  ;;  %16203 = vmatmul.mubr.msk.f32.gmra.mrb[52].mxu1 %vm443_vm5, %v21634_v44  ;;  %v16924_v34 = vpack.c.bf16 %v13130_v32, %v13129_v29  ;;  %v13164_v35 = vld [vmem:[%s22595_s4 + $0xc8] sm:$0xff] }
 0x901   : > { %v9085_v24 = vmax.f32 %v9053_v45, 0.0  ;;  %v16156_v49 = vpop.f32.mrb[60].mxu0  ;;  %v21900_v45 = vld [vmem:[#allocation5 + $0x61] sm:$0xff]  ;;  %v13244_v29 = vld [vmem:[%s22595_s4 + $0x88] sm:$0xff] }
 0x902   : > { %9119 = vst.msk [vmem:[#allocation5 + $0x159] sm:$0xff] %vm443_vm5, %v9086_v46  ;;  %v9056_v51 = vadd.f32 %v16156_v49, %v21477_v38  ;;  %v8969_v1 = vpop.f32.mrb[61].mxu0  ;;  %v21644_v61 = vld [vmem:[#allocation5 + $0x120] sm:$0xff]  ;;  %v21646_v63 = vld [vmem:[#allocation5 + $0x128] sm:$0xff] }
 0x903   : > { %9118 = vst.msk [vmem:[#allocation5 + $0x151] sm:$0xff] %vm443_vm5, %v9085_v24  ;;  %v9055_v57 = vadd.f32 %v21477_v38, %v8969_v1  ;;  %16205 = vmatprep.mubr.msk.f32.mxu1 %vm443_vm5, %v21644_v61  ;;  %v21904_v46 = vld [vmem:[#allocation5 + $0x69] sm:$0xff]  ;;  %v21908_v24 = vld [vmem:[#allocation5 + $0x79] sm:$0xff]  ;;  %v21912_v49 = vld [vmem:[#allocation5 + $0x81] sm:$0xff] }
 0x904   : > { %v9088_v58 = vmax.f32 %v9056_v51, 0.0  ;;  %16206 = vmatmul.mubr.msk.f32.gmra.mrb[54].mxu1 %vm443_vm5, %v21646_v63  ;;  %v21916_v51 = vld [vmem:[#allocation5 + $0x91] sm:$0xff]  ;;  %v21920_v1 = vld [vmem:[#allocation5 + $0x99] sm:$0xff] }
 0x905   : > { %v9087_v55 = vmax.f32 %v9055_v57, 0.0  ;;  %v16159_v56 = vpop.f32.mrb[62].mxu0  ;;  %v21932_v57 = vld [vmem:[#allocation5 + $0xc1] sm:$0xff] }
 0x906   : > { %9121 = vst.msk [vmem:[#allocation5 + $0x171] sm:$0xff] %vm443_vm5, %v9088_v58  ;;  %v9058_v21 = vadd.f32 %v16159_v56, %v21477_v38  ;;  %v8979_v26 = vpop.f32.mrb[63].mxu0  ;;  %v21656_v36 = vld [vmem:[#allocation5 + $0x138] sm:$0xff]  ;;  %v21658_v37 = vld [vmem:[#allocation5 + $0x140] sm:$0xff]  ;;  %v21936_v58 = vld [vmem:[#allocation5 + $0xc9] sm:$0xff] }
 0x907   : > { %9120 = vst.msk [vmem:[#allocation5 + $0x169] sm:$0xff] %vm443_vm5, %v9087_v55  ;;  %v9057_v53 = vadd.f32 %v21477_v38, %v8979_v26  ;;  %16208 = vmatprep.mubr.msk.f32.mxu1 %vm443_vm5, %v21656_v36  ;;  %v21940_v55 = vld [vmem:[#allocation5 + $0xd9] sm:$0xff]  ;;  %v21944_v56 = vld [vmem:[#allocation5 + $0xe1] sm:$0xff] }
 0x908   : > { %v9090_v54 = vmax.f32 %v9058_v21, 0.0  ;;  %16209 = vmatmul.mubr.msk.f32.gmra.mrb[56].mxu1 %vm443_vm5, %v21658_v37  ;;  %v21948_v21 = vld [vmem:[#allocation5 + $0xf1] sm:$0xff]  ;;  %v21952_v26 = vld [vmem:[#allocation5 + $0xf9] sm:$0xff] }
 0x909   : > { %v9089_v33 = vmax.f32 %v9057_v53, 0.0  ;;  %v21964_v53 = vld [vmem:[#allocation5 + $0x121] sm:$0xff] }
 0x90a   : > { %9123 = vst.msk [vmem:[#allocation5 + $0x189] sm:$0xff] %vm443_vm5, %v9090_v54  ;;  %v21667_v59 = vld [vmem:[#allocation5 + $0x150] sm:$0xff]  ;;  %v21669_v60 = vld [vmem:[#allocation5 + $0x158] sm:$0xff] }
 0x90b   : > { %9122 = vst.msk [vmem:[#allocation5 + $0x181] sm:$0xff] %vm443_vm5, %v9089_v33  ;;  %16211 = vmatprep.mubr.msk.f32.mxu1 %vm443_vm5, %v21667_v59  ;;  %v21968_v54 = vld [vmem:[#allocation5 + $0x129] sm:$0xff]  ;;  %v21972_v33 = vld [vmem:[#allocation5 + $0x139] sm:$0xff] }
 0x90c   : > { %16212 = vmatmul.mubr.msk.f32.gmra.mrb[58].mxu1 %vm443_vm5, %v21669_v60 }
 0x90e   : > { %v21676_v38 = vld [vmem:[#allocation5 + $0x168] sm:$0xff]  ;;  %v21678_v0 = vld [vmem:[#allocation5 + $0x170] sm:$0xff] }
 0x90f   : > { %16214 = vmatprep.mubr.msk.f32.mxu1 %vm443_vm5, %v21676_v38 }
 0x910   : > { %16215 = vmatmul.mubr.msk.f32.gmra.mrb[60].mxu1 %vm443_vm5, %v21678_v0 }
 0x912   : > { %v21684_v11 = vld [vmem:[#allocation5 + $0x180] sm:$0xff]  ;;  %v21686_v7 = vld [vmem:[#allocation5 + $0x188] sm:$0xff] }
 0x913   : > { %16217 = vmatprep.mubr.msk.f32.mxu1 %vm443_vm5, %v21684_v11 }
 0x914   : > { %16218 = vmatmul.mubr.msk.f32.gmra.mrb[62].mxu1 %vm443_vm5, %v21686_v7 }
 0x915   : > { %16232 = vmatprep.mubr.msk.f32.mxu1 %vm443_vm5, %v9124_v12  ;;  %v13204_v12 = vld [vmem:[%s22595_s4 + $0x168] sm:$0xff] }
 0x918   : > { %16233 = vmatmul.mubr.msk.f32.vlgmr.msra.gmra.mrb[32].mxu1 %vm443_vm5, %v9125_v5  ;;  %v13206_v5 = vld [vmem:[%s22595_s4 + $0x178] sm:$0xff] }
 0x919   : > { %16907 = vmatpush3.bf16.msra.mxu1 %v21537_v27  ;;  %16235 = vmatprep.mubr.msk.f32.mxu1 %vm443_vm5, %v21497_v4  ;;  %v16916_v27 = vpack.c.bf16 %v13126_v3, %v13125_v2  ;;  %v13127_v4 = vld [vmem:[%s22595_s4 + $0x40] sm:$0xff]  ;;  %v10027_v2 = vld [vmem:[#allocation5 + $0x181] sm:$0xff] }
 0x91a   : > { %16909 = vmatprep.subr.bf16.mxu1 %v16908_v31  ;;  %v10028_v3 = vld [vmem:[#allocation5 + $0x189] sm:$0xff] }
 0x91c   : > { %16236 = vmatmul.mubr.msk.f32.gmra.mrb[34].mxu1 %vm443_vm5, %v21499_v8  ;;  %v13128_v8 = vld [vmem:[%s22595_s4 + $0x48] sm:$0xff] }
 0x91d   : > { %16238 = vmatprep.mubr.msk.f32.mxu1 %vm443_vm5, %v21515_v22  ;;  %16911 = vmatpush3.bf16.msra.mxu1 %v16908_v31  ;;  %v16920_v28 = vpack.c.bf16 %v13128_v8, %v13127_v4  ;;  %v16948_v31 = vpack.c.bf16 %v13206_v5, %v13205_v18  ;;  %v13242_v4 = vld [vmem:[%s22595_s4 + $0x78] sm:$0xff]  ;;  %v13320_v18 = vld [vmem:[%s22595_s4 + $0x1a8] sm:$0xff] }
 0x91e   : > { %16913 = vmatprep.subr.bf16.mxu1 %v16912_v40 }
 0x920   : > { %16239 = vmatmul.mubr.msk.f32.gmra.mrb[36].mxu1 %vm443_vm5, %v21517_v23 }
 0x921   : > { %16241 = vmatprep.mubr.msk.f32.mxu1 %vm443_vm5, %v21533_v19  ;;  %16915 = vmatpush3.bf16.msra.mxu1 %v16912_v40  ;;  %v16952_v40 = vpack.c.bf16 %v13240_v62, %v13239_v39  ;;  %v10964_v39 = vld [vmem:[#allocation5 + $0x18a] sm:$0xff]  ;;  %v10965_v62 = vld [vmem:[#allocation5 + $0x19a] sm:$0xff] }
 0x922   : > { %16917 = vmatprep.subr.bf16.mxu1 %v16916_v27 }
 0x924   : > { %16242 = vmatmul.mubr.msk.f32.gmra.mrb[38].mxu1 %vm443_vm5, %v21535_v20 }
 0x925   : > { %16244 = vmatprep.mubr.msk.f32.mxu1 %vm443_vm5, %v21547_v47 }
 0x928   : > { %16245 = vmatmul.mubr.msk.f32.gmra.mrb[40].mxu1 %vm443_vm5, %v21549_v48 }
 0x929   : > { %16247 = vmatprep.mubr.msk.f32.mxu1 %vm443_vm5, %v21560_v25 }
 0x92c   : > { %16248 = vmatmul.mubr.msk.f32.gmra.mrb[42].mxu1 %vm443_vm5, %v21562_v41 }
 0x92d   : > { %16250 = vmatprep.mubr.msk.f32.mxu1 %vm443_vm5, %v21572_v14 }
 0x930   : > { %16251 = vmatmul.mubr.msk.f32.gmra.mrb[44].mxu1 %vm443_vm5, %v21574_v15 }
 0x931   : > { %16253 = vmatprep.mubr.msk.f32.mxu1 %vm443_vm5, %v21584_v50 }
 0x934   : > { %16254 = vmatmul.mubr.msk.f32.gmra.mrb[46].mxu1 %vm443_vm5, %v21586_v52 }
 0x935   : > { %16256 = vmatprep.mubr.msk.f32.mxu1 %vm443_vm5, %v21596_v9 }
 0x938   : > { %16257 = vmatmul.mubr.msk.f32.gmra.mrb[48].mxu1 %vm443_vm5, %v21598_v10 }
 0x939   : > { %16259 = vmatprep.mubr.msk.f32.mxu1 %vm443_vm5, %v21608_v6 }
 0x93c   : > { %16260 = vmatmul.mubr.msk.f32.gmra.mrb[50].mxu1 %vm443_vm5, %v21610_v30 }
 0x93d   : > { %16262 = vmatprep.mubr.msk.f32.mxu1 %vm443_vm5, %v21620_v13 }
 0x940   : > { %16263 = vmatmul.mubr.msk.f32.gmra.mrb[52].mxu1 %vm443_vm5, %v21622_v16 }
 0x941   : > { %16265 = vmatprep.mubr.msk.f32.mxu1 %vm443_vm5, %v21632_v43 }
 0x944   : > { %16266 = vmatmul.mubr.msk.f32.gmra.mrb[54].mxu1 %vm443_vm5, %v21634_v44 }
 0x945   : > { %16268 = vmatprep.mubr.msk.f32.mxu1 %vm443_vm5, %v21644_v61 }
 0x948   : > { %16269 = vmatmul.mubr.msk.f32.gmra.mrb[56].mxu1 %vm443_vm5, %v21646_v63 }
 0x949   : > { %16271 = vmatprep.mubr.msk.f32.mxu1 %vm443_vm5, %v21656_v36 }
 0x94c   : > { %16272 = vmatmul.mubr.msk.f32.gmra.mrb[58].mxu1 %vm443_vm5, %v21658_v37 }
 0x94d   : > { %16274 = vmatprep.mubr.msk.f32.mxu1 %vm443_vm5, %v21667_v59 }
 0x950   : > { %16275 = vmatmul.mubr.msk.f32.gmra.mrb[60].mxu1 %vm443_vm5, %v21669_v60 }
 0x951   : > { %16277 = vmatprep.mubr.msk.f32.mxu1 %vm443_vm5, %v21676_v38 }
 0x954   : > { %16278 = vmatmul.mubr.msk.f32.gmra.mrb[62].mxu1 %vm443_vm5, %v21678_v0 }
 0x955   : > { %16292 = vmatprep.mubr.msk.f32.mxu1 %vm443_vm5, %v21515_v22  ;;  %v13163_v22 = vld [vmem:[%s22595_s4 + $0xc0] sm:$0xff] }
 0x958   : > { %16293 = vmatmul.mubr.msk.f32.vlgmr.msra.gmra.mrb[32].mxu1 %vm443_vm5, %v21517_v23  ;;  %v16928_v23 = vpack.c.bf16 %v13164_v35, %v13163_v22  ;;  %v13278_v22 = vld [vmem:[%s22595_s4 + $0xf8] sm:$0xff] }
 0x959   : > { %16919 = vmatpush3.bf16.msra.mxu1 %v16916_v27  ;;  %16295 = vmatprep.mubr.msk.f32.mxu1 %vm443_vm5, %v21533_v19  ;;  %v9158_v19 = vld [vmem:[#allocation5 + $0x198] sm:$0xff]  ;;  %v13241_v27 = vld [vmem:[%s22595_s4 + $0x70] sm:$0xff] }
 0x95a   : > { %16921 = vmatprep.subr.bf16.mxu1 %v16920_v28  ;;  %v16956_v8 = vpack.c.bf16 %v13242_v4, %v13241_v27 }
 0x95c   : > { %16296 = vmatmul.mubr.msk.f32.gmra.mrb[34].mxu1 %vm443_vm5, %v21535_v20  ;;  %v9159_v20 = vld [vmem:[#allocation5 + $0x1a0] sm:$0xff] }
 0x95d   : > { %16298 = vmatprep.mubr.msk.f32.mxu1 %vm443_vm5, %v21547_v47  ;;  %16923 = vmatpush3.bf16.msra.mxu1 %v16920_v28  ;;  %v9995_v47 = vld [vmem:[#allocation5 + $0x1] sm:$0xff]  ;;  %v13243_v28 = vld [vmem:[%s22595_s4 + $0x80] sm:$0xff] }
 0x95e   : > { %16925 = vmatprep.subr.bf16.mxu1 %v16924_v34  ;;  %v16960_v32 = vpack.c.bf16 %v13244_v29, %v13243_v28 }
 0x960   : > { %16299 = vmatmul.mubr.msk.f32.gmra.mrb[36].mxu1 %vm443_vm5, %v21549_v48  ;;  %v13165_v48 = vld [vmem:[%s22595_s4 + $0xd0] sm:$0xff] }
 0x961   : > { %16301 = vmatprep.mubr.msk.f32.mxu1 %vm443_vm5, %v21560_v25  ;;  %16927 = vmatpush3.bf16.msra.mxu1 %v16924_v34  ;;  %v13166_v25 = vld [vmem:[%s22595_s4 + $0xd8] sm:$0xff]  ;;  %v13277_v34 = vld [vmem:[%s22595_s4 + $0xf0] sm:$0xff] }
 0x962   : > { %16929 = vmatprep.subr.bf16.mxu1 %v16928_v23  ;;  %v16964_v35 = vpack.c.bf16 %v13278_v22, %v13277_v34 }
 0x964   : > { %16302 = vmatmul.mubr.msk.f32.gmra.mrb[38].mxu1 %vm443_vm5, %v21562_v41  ;;  %v9996_v41 = vld [vmem:[#allocation5 + $0x9] sm:$0xff] }
 0x965   : > { %16304 = vmatprep.mubr.msk.f32.mxu1 %vm443_vm5, %v21572_v14  ;;  %v16932_v14 = vpack.c.bf16 %v13166_v25, %v13165_v48  ;;  %v13280_v48 = vld [vmem:[%s22595_s4 + $0x108] sm:$0xff]  ;;  %v10932_v25 = vld [vmem:[#allocation5 + $0xa] sm:$0xff] }
 0x968   : > { %16305 = vmatmul.mubr.msk.f32.gmra.mrb[40].mxu1 %vm443_vm5, %v21574_v15  ;;  %v13167_v15 = vld [vmem:[%s22595_s4 + $0xe0] sm:$0xff] }
 0x969   : > { %16307 = vmatprep.mubr.msk.f32.mxu1 %vm443_vm5, %v21584_v50  ;;  %v13168_v50 = vld [vmem:[%s22595_s4 + $0xe8] sm:$0xff] }
 0x96c   : > { %16308 = vmatmul.mubr.msk.f32.gmra.mrb[42].mxu1 %vm443_vm5, %v21586_v52  ;;  %v21867_v52 = vld [vmem:[#allocation5 + $0x19] sm:$0xff] }
 0x96d   : > { %16310 = vmatprep.mubr.msk.f32.mxu1 %vm443_vm5, %v21596_v9  ;;  %v16936_v9 = vpack.c.bf16 %v13168_v50, %v13167_v15  ;;  %v13282_v15 = vld [vmem:[%s22595_s4 + $0x118] sm:$0xff]  ;;  %v22169_v50 = vld [vmem:[#allocation5 + $0x1a] sm:$0xff] }
 0x970   : > { %16311 = vmatmul.mubr.msk.f32.gmra.mrb[44].mxu1 %vm443_vm5, %v21598_v10  ;;  %v21871_v10 = vld [vmem:[#allocation5 + $0x21] sm:$0xff] }
 0x971   : > { %16313 = vmatprep.mubr.msk.f32.mxu1 %vm443_vm5, %v21608_v6  ;;  %v13201_v6 = vld [vmem:[%s22595_s4 + $0x150] sm:$0xff] }
 0x974   : > { %16314 = vmatmul.mubr.msk.f32.gmra.mrb[46].mxu1 %vm443_vm5, %v21610_v30  ;;  %v13202_v30 = vld [vmem:[%s22595_s4 + $0x158] sm:$0xff] }
 0x975   : > { %16316 = vmatprep.mubr.msk.f32.mxu1 %vm443_vm5, %v21620_v13  ;;  %v21881_v13 = vld [vmem:[#allocation5 + $0x31] sm:$0xff] }
 0x978   : > { %16317 = vmatmul.mubr.msk.f32.gmra.mrb[48].mxu1 %vm443_vm5, %v21622_v16  ;;  %v21885_v16 = vpack.c.bf16 %v13202_v30, %v13201_v6  ;;  %v13316_v6 = vld [vmem:[%s22595_s4 + $0x188] sm:$0xff] }
 0x979   : > { %16319 = vmatprep.mubr.msk.f32.mxu1 %vm443_vm5, %v21632_v43  ;;  %v21891_v43 = vld [vmem:[#allocation5 + $0x49] sm:$0xff]  ;;  %v22183_v30 = vld [vmem:[#allocation5 + $0x32] sm:$0xff] }
 0x97c   : > { %16320 = vmatmul.mubr.msk.f32.gmra.mrb[50].mxu1 %vm443_vm5, %v21634_v44  ;;  %v21896_v44 = vld [vmem:[#allocation5 + $0x51] sm:$0xff] }
 0x97d   : > { %16322 = vmatprep.mubr.msk.f32.mxu1 %vm443_vm5, %v21644_v61  ;;  %v21924_v61 = vld [vmem:[#allocation5 + $0xa9] sm:$0xff] }
 0x980   : > { %16323 = vmatmul.mubr.msk.f32.gmra.mrb[52].mxu1 %vm443_vm5, %v21646_v63  ;;  %v21928_v63 = vld [vmem:[#allocation5 + $0xb1] sm:$0xff] }
 0x981   : > { %16325 = vmatprep.mubr.msk.f32.mxu1 %vm443_vm5, %v21656_v36  ;;  %v21956_v36 = vld [vmem:[#allocation5 + $0x109] sm:$0xff] }
 0x984   : > { %16326 = vmatmul.mubr.msk.f32.gmra.mrb[54].mxu1 %vm443_vm5, %v21658_v37  ;;  %v21960_v37 = vld [vmem:[#allocation5 + $0x111] sm:$0xff] }
 0x985   : > { %16328 = vmatprep.mubr.msk.f32.mxu1 %vm443_vm5, %v21667_v59  ;;  %v21976_v59 = vld [vmem:[#allocation5 + $0x141] sm:$0xff] }
 0x988   : > { %16329 = vmatmul.mubr.msk.f32.gmra.mrb[56].mxu1 %vm443_vm5, %v21669_v60  ;;  %v21980_v60 = vld [vmem:[#allocation5 + $0x151] sm:$0xff] }
 0x989   : > { %16331 = vmatprep.mubr.msk.f32.mxu1 %vm443_vm5, %v21676_v38  ;;  %v21984_v38 = vld [vmem:[#allocation5 + $0x159] sm:$0xff] }
 0x98c   : > { %16332 = vmatmul.mubr.msk.f32.gmra.mrb[58].mxu1 %vm443_vm5, %v21678_v0  ;;  %v21988_v0 = vld [vmem:[#allocation5 + $0x169] sm:$0xff] }
 0x98d   : > { %16334 = vmatprep.mubr.msk.f32.mxu1 %vm443_vm5, %v21684_v11  ;;  %v21992_v11 = vld [vmem:[#allocation5 + $0x171] sm:$0xff] }
 0x990   : > { %16335 = vmatmul.mubr.msk.f32.gmra.mrb[60].mxu1 %vm443_vm5, %v21686_v7  ;;  %v13203_v7 = vld [vmem:[%s22595_s4 + $0x160] sm:$0xff] }
 0x991   : > { %16337 = vmatprep.mubr.msk.f32.mxu1 %vm443_vm5, %v9158_v19  ;;  %v16944_v17 = vpack.c.bf16 %v13204_v12, %v13203_v7  ;;  %v10030_v19 = vld [vmem:[#allocation5 + $0x1a1] sm:$0xff] }
 0x992   : > { %v13318_v7 = vld [vmem:[%s22595_s4 + $0x198] sm:$0xff] }
 0x994   : > { %16338 = vmatmul.mubr.msk.f32.gmra.mrb[62].mxu1 %vm443_vm5, %v9159_v20  ;;  %v10931_v20 = vld [vmem:[#allocation5 + $0x2] sm:$0xff] }
 0x995   : > { %16352 = vmatprep.mubr.msk.f32.mxu1 %vm443_vm5, %v9995_v47  ;;  %v13279_v47 = vld [vmem:[%s22595_s4 + $0x100] sm:$0xff] }
 0x998   : > { %16353 = vmatmul.mubr.msk.f32.vlgmr.msra.gmra.mrb[32].mxu1 %vm443_vm5, %v9996_v41  ;;  %v16968_v41 = vpack.c.bf16 %v13280_v48, %v13279_v47 }
 0x999   : > { %16931 = vmatpush3.bf16.msra.mxu1 %v16928_v23  ;;  %16355 = vmatprep.mubr.msk.f32.mxu1 %vm443_vm5, %v21867_v52  ;;  %v10029_v23 = vld [vmem:[#allocation5 + $0x199] sm:$0xff] }
 0x99a   : > { %16933 = vmatprep.subr.bf16.mxu1 %v16932_v14 }
 0x99c   : > { %16356 = vmatmul.mubr.msk.f32.gmra.mrb[34].mxu1 %vm443_vm5, %v21871_v10 }
 0x99d   : > { %16358 = vmatprep.mubr.msk.f32.mxu1 %vm443_vm5, %v21881_v13  ;;  %16935 = vmatpush3.bf16.msra.mxu1 %v16932_v14  ;;  %v13281_v14 = vld [vmem:[%s22595_s4 + $0x110] sm:$0xff] }
 0x99e   : > { %16937 = vmatprep.subr.bf16.mxu1 %v16936_v9 }
 0x9a0   : > { %16359 = vmatmul.mubr.msk.f32.gmra.mrb[36].mxu1 %vm443_vm5, %v21887_v42 }
 0x9a1   : > { %16361 = vmatprep.mubr.msk.f32.mxu1 %vm443_vm5, %v21891_v43  ;;  %16939 = vmatpush3.bf16.msra.mxu1 %v16936_v9  ;;  %v22173_v9 = vld [vmem:[#allocation5 + $0x22] sm:$0xff] }
 0x9a2   : > { %16941 = vmatprep.subr.bf16.mxu1 %v21885_v16 }
 0x9a4   : > { %16362 = vmatmul.mubr.msk.f32.gmra.mrb[38].mxu1 %vm443_vm5, %v21896_v44 }
 0x9a5   : > { %16364 = vmatprep.mubr.msk.f32.mxu1 %vm443_vm5, %v21900_v45 }
 0x9a8   : > { %16365 = vmatmul.mubr.msk.f32.gmra.mrb[40].mxu1 %vm443_vm5, %v21904_v46 }
 0x9a9   : > { %16367 = vmatprep.mubr.msk.f32.mxu1 %vm443_vm5, %v21908_v24 }
 0x9ac   : > { %16368 = vmatmul.mubr.msk.f32.gmra.mrb[42].mxu1 %vm443_vm5, %v21912_v49 }
 0x9ad   : > { %16370 = vmatprep.mubr.msk.f32.mxu1 %vm443_vm5, %v21916_v51 }
 0x9b0   : > { %16371 = vmatmul.mubr.msk.f32.gmra.mrb[44].mxu1 %vm443_vm5, %v21920_v1 }
 0x9b1   : > { %16373 = vmatprep.mubr.msk.f32.mxu1 %vm443_vm5, %v21924_v61 }
 0x9b4   : > { %16374 = vmatmul.mubr.msk.f32.gmra.mrb[46].mxu1 %vm443_vm5, %v21928_v63 }
 0x9b5   : > { %16376 = vmatprep.mubr.msk.f32.mxu1 %vm443_vm5, %v21932_v57 }
 0x9b8   : > { %16377 = vmatmul.mubr.msk.f32.gmra.mrb[48].mxu1 %vm443_vm5, %v21936_v58 }
 0x9b9   : > { %16379 = vmatprep.mubr.msk.f32.mxu1 %vm443_vm5, %v21940_v55 }
 0x9bc   : > { %16380 = vmatmul.mubr.msk.f32.gmra.mrb[50].mxu1 %vm443_vm5, %v21944_v56 }
 0x9bd   : > { %16382 = vmatprep.mubr.msk.f32.mxu1 %vm443_vm5, %v21948_v21 }
 0x9c0   : > { %16383 = vmatmul.mubr.msk.f32.gmra.mrb[52].mxu1 %vm443_vm5, %v21952_v26 }
 0x9c1   : > { %16385 = vmatprep.mubr.msk.f32.mxu1 %vm443_vm5, %v21956_v36 }
 0x9c4   : > { %16386 = vmatmul.mubr.msk.f32.gmra.mrb[54].mxu1 %vm443_vm5, %v21960_v37 }
 0x9c5   : > { %16388 = vmatprep.mubr.msk.f32.mxu1 %vm443_vm5, %v21964_v53 }
 0x9c8   : > { %16389 = vmatmul.mubr.msk.f32.gmra.mrb[56].mxu1 %vm443_vm5, %v21968_v54 }
 0x9c9   : > { %16391 = vmatprep.mubr.msk.f32.mxu1 %vm443_vm5, %v21972_v33 }
 0x9cc   : > { %16392 = vmatmul.mubr.msk.f32.gmra.mrb[58].mxu1 %vm443_vm5, %v21976_v59 }
 0x9cd   : > { %16394 = vmatprep.mubr.msk.f32.mxu1 %vm443_vm5, %v21980_v60 }
 0x9d0   : > { %16395 = vmatmul.mubr.msk.f32.gmra.mrb[60].mxu1 %vm443_vm5, %v21984_v38 }
 0x9d1   : > { %16397 = vmatprep.mubr.msk.f32.mxu1 %vm443_vm5, %v21988_v0 }
 0x9d4   : > { %16398 = vmatmul.mubr.msk.f32.gmra.mrb[62].mxu1 %vm443_vm5, %v21992_v11 }
 0x9d5   : > { %16412 = vmatprep.mubr.msk.f32.mxu1 %vm443_vm5, %v21867_v52  ;;  %v16972_v52 = vpack.c.bf16 %v13282_v15, %v13281_v14 }
 0x9d8   : > { %16413 = vmatmul.mubr.msk.f32.vlgmr.msra.gmra.mrb[32].mxu1 %vm443_vm5, %v21871_v10  ;;  %v13315_v10 = vld [vmem:[%s22595_s4 + $0x180] sm:$0xff] }
 0x9d9   : > { %16943 = vmatpush3.bf16.msra.mxu1 %v21885_v16  ;;  %16415 = vmatprep.mubr.msk.f32.mxu1 %vm443_vm5, %v21881_v13  ;;  %v22189_v16 = vld [vmem:[#allocation5 + $0x3a] sm:$0xff] }
 0x9da   : > { %16945 = vmatprep.subr.bf16.mxu1 %v16944_v17 }
 0x9dc   : > { %16416 = vmatmul.mubr.msk.f32.gmra.mrb[34].mxu1 %vm443_vm5, %v21887_v42 }
 0x9dd   : > { %16418 = vmatprep.mubr.msk.f32.mxu1 %vm443_vm5, %v21891_v43  ;;  %16947 = vmatpush3.bf16.msra.mxu1 %v16944_v17  ;;  %v13319_v17 = vld [vmem:[%s22595_s4 + $0x1a0] sm:$0xff] }
 0x9de   : > { %16949 = vmatprep.subr.bf16.mxu1 %v16948_v31  ;;  %v16984_v5 = vpack.c.bf16 %v13320_v18, %v13319_v17 }
 0x9e0   : > { %16419 = vmatmul.mubr.msk.f32.gmra.mrb[36].mxu1 %vm443_vm5, %v21896_v44 }
 0x9e1   : > { %16421 = vmatprep.mubr.msk.f32.mxu1 %vm443_vm5, %v21900_v45  ;;  %16951 = vmatpush3.bf16.msra.mxu1 %v16948_v31  ;;  %v10963_v31 = vld [vmem:[#allocation5 + $0x182] sm:$0xff] }
 0x9e2   : > { %16953 = vmatprep.subr.bf16.mxu1 %v16952_v40 }
 0x9e4   : > { %16422 = vmatmul.mubr.msk.f32.gmra.mrb[38].mxu1 %vm443_vm5, %v21904_v46 }
 0x9e5   : > { %16424 = vmatprep.mubr.msk.f32.mxu1 %vm443_vm5, %v21908_v24 }
 0x9e8   : > { %16425 = vmatmul.mubr.msk.f32.gmra.mrb[40].mxu1 %vm443_vm5, %v21912_v49 }
 0x9e9   : > { %16427 = vmatprep.mubr.msk.f32.mxu1 %vm443_vm5, %v21916_v51 }
 0x9ec   : > { %16428 = vmatmul.mubr.msk.f32.gmra.mrb[42].mxu1 %vm443_vm5, %v21920_v1 }
 0x9ed   : > { %16430 = vmatprep.mubr.msk.f32.mxu1 %vm443_vm5, %v21924_v61 }
 0x9f0   : > { %16431 = vmatmul.mubr.msk.f32.gmra.mrb[44].mxu1 %vm443_vm5, %v21928_v63 }
 0x9f1   : > { %16433 = vmatprep.mubr.msk.f32.mxu1 %vm443_vm5, %v21932_v57 }
 0x9f4   : > { %16434 = vmatmul.mubr.msk.f32.gmra.mrb[46].mxu1 %vm443_vm5, %v21936_v58 }
 0x9f5   : > { %16436 = vmatprep.mubr.msk.f32.mxu1 %vm443_vm5, %v21940_v55 }
 0x9f8   : > { %16437 = vmatmul.mubr.msk.f32.gmra.mrb[48].mxu1 %vm443_vm5, %v21944_v56 }
 0x9f9   : > { %16439 = vmatprep.mubr.msk.f32.mxu1 %vm443_vm5, %v21948_v21 }
 0x9fc   : > { %16440 = vmatmul.mubr.msk.f32.gmra.mrb[50].mxu1 %vm443_vm5, %v21952_v26 }
 0x9fd   : > { %16442 = vmatprep.mubr.msk.f32.mxu1 %vm443_vm5, %v21956_v36 }
 0xa00   : > { %16443 = vmatmul.mubr.msk.f32.gmra.mrb[52].mxu1 %vm443_vm5, %v21960_v37 }
 0xa01   : > { %16445 = vmatprep.mubr.msk.f32.mxu1 %vm443_vm5, %v21964_v53 }
 0xa04   : > { %16446 = vmatmul.mubr.msk.f32.gmra.mrb[54].mxu1 %vm443_vm5, %v21968_v54 }
 0xa05   : > { %16448 = vmatprep.mubr.msk.f32.mxu1 %vm443_vm5, %v21972_v33 }
 0xa08   : > { %16449 = vmatmul.mubr.msk.f32.gmra.mrb[56].mxu1 %vm443_vm5, %v21976_v59 }
 0xa09   : > { %16451 = vmatprep.mubr.msk.f32.mxu1 %vm443_vm5, %v21980_v60 }
 0xa0c   : > { %16452 = vmatmul.mubr.msk.f32.gmra.mrb[58].mxu1 %vm443_vm5, %v21984_v38 }
 0xa0d   : > { %16454 = vmatprep.mubr.msk.f32.mxu1 %vm443_vm5, %v21988_v0 }
 0xa10   : > { %16455 = vmatmul.mubr.msk.f32.gmra.mrb[60].mxu1 %vm443_vm5, %v21992_v11 }
 0xa11   : > { %16457 = vmatprep.mubr.msk.f32.mxu1 %vm443_vm5, %v10027_v2 }
 0xa14   : > { %16458 = vmatmul.mubr.msk.f32.gmra.mrb[62].mxu1 %vm443_vm5, %v10028_v3 }
 0xa15   : > { %16472 = vmatprep.mubr.msk.f32.mxu1 %vm443_vm5, %v21881_v13  ;;  %v22187_v13 = vpack.c.bf16 %v13316_v6, %v13315_v10 }
 0xa18   : > { %16473 = vmatmul.mubr.msk.f32.vlgmr.msra.gmra.mrb[32].mxu1 %vm443_vm5, %v21887_v42  ;;  %v22193_v42 = vld [vmem:[#allocation5 + $0x4a] sm:$0xff] }
 0xa19   : > { %16955 = vmatpush3.bf16.msra.mxu1 %v16952_v40  ;;  %16475 = vmatprep.mubr.msk.f32.mxu1 %vm443_vm5, %v21891_v43  ;;  %v22198_v43 = vld [vmem:[#allocation5 + $0x52] sm:$0xff]  ;;  %v10966_v40 = vld [vmem:[#allocation5 + $0x1a2] sm:$0xff] }
 0xa1a   : > { %16957 = vmatprep.subr.bf16.mxu1 %v16956_v8 }
 0xa1c   : > { %16476 = vmatmul.mubr.msk.f32.gmra.mrb[34].mxu1 %vm443_vm5, %v21896_v44  ;;  %v22202_v44 = vld [vmem:[#allocation5 + $0x62] sm:$0xff] }
 0xa1d   : > { %16478 = vmatprep.mubr.msk.f32.mxu1 %vm443_vm5, %v21900_v45  ;;  %16959 = vmatpush3.bf16.msra.mxu1 %v16956_v8  ;;  %v22206_v45 = vld [vmem:[#allocation5 + $0x6a] sm:$0xff] }
 0xa1e   : > { %16961 = vmatprep.subr.bf16.mxu1 %v16960_v32 }
 0xa20   : > { %16479 = vmatmul.mubr.msk.f32.gmra.mrb[36].mxu1 %vm443_vm5, %v21904_v46  ;;  %v22210_v46 = vld [vmem:[#allocation5 + $0x7a] sm:$0xff] }
 0xa21   : > { %16481 = vmatprep.mubr.msk.f32.mxu1 %vm443_vm5, %v21908_v24  ;;  %16963 = vmatpush3.bf16.msra.mxu1 %v16960_v32  ;;  %v22214_v24 = vld [vmem:[#allocation5 + $0x82] sm:$0xff] }
 0xa22   : > { %16965 = vmatprep.subr.bf16.mxu1 %v16964_v35 }
 0xa24   : > { %16482 = vmatmul.mubr.msk.f32.gmra.mrb[38].mxu1 %vm443_vm5, %v21912_v49  ;;  %v22218_v49 = vld [vmem:[#allocation5 + $0x92] sm:$0xff] }
 0xa25   : > { %16484 = vmatprep.mubr.msk.f32.mxu1 %vm443_vm5, %v21916_v51  ;;  %v22222_v51 = vld [vmem:[#allocation5 + $0x9a] sm:$0xff] }
 0xa28   : > { %16485 = vmatmul.mubr.msk.f32.gmra.mrb[40].mxu1 %vm443_vm5, %v21920_v1  ;;  %v22226_v1 = vld [vmem:[#allocation5 + $0xaa] sm:$0xff] }
 0xa29   : > { %16487 = vmatprep.mubr.msk.f32.mxu1 %vm443_vm5, %v21924_v61  ;;  %v22230_v61 = vld [vmem:[#allocation5 + $0xb2] sm:$0xff] }
 0xa2c   : > { %16488 = vmatmul.mubr.msk.f32.gmra.mrb[42].mxu1 %vm443_vm5, %v21928_v63  ;;  %v22234_v63 = vld [vmem:[#allocation5 + $0xc2] sm:$0xff] }
 0xa2d   : > { %16490 = vmatprep.mubr.msk.f32.mxu1 %vm443_vm5, %v21932_v57  ;;  %v22238_v57 = vld [vmem:[#allocation5 + $0xca] sm:$0xff] }
 0xa30   : > { %16491 = vmatmul.mubr.msk.f32.gmra.mrb[44].mxu1 %vm443_vm5, %v21936_v58  ;;  %v22242_v58 = vld [vmem:[#allocation5 + $0xda] sm:$0xff] }
 0xa31   : > { %16493 = vmatprep.mubr.msk.f32.mxu1 %vm443_vm5, %v21940_v55  ;;  %v22246_v55 = vld [vmem:[#allocation5 + $0xe2] sm:$0xff] }
 0xa34   : > { %16494 = vmatmul.mubr.msk.f32.gmra.mrb[46].mxu1 %vm443_vm5, %v21944_v56  ;;  %v22250_v56 = vld [vmem:[#allocation5 + $0xf2] sm:$0xff] }
 0xa35   : > { %16496 = vmatprep.mubr.msk.f32.mxu1 %vm443_vm5, %v21948_v21  ;;  %v22254_v21 = vld [vmem:[#allocation5 + $0xfa] sm:$0xff] }
 0xa38   : > { %16497 = vmatmul.mubr.msk.f32.gmra.mrb[48].mxu1 %vm443_vm5, %v21952_v26  ;;  %v22258_v26 = vld [vmem:[#allocation5 + $0x10a] sm:$0xff] }
 0xa39   : > { %16499 = vmatprep.mubr.msk.f32.mxu1 %vm443_vm5, %v21956_v36  ;;  %v22262_v36 = vld [vmem:[#allocation5 + $0x112] sm:$0xff] }
 0xa3c   : > { %16500 = vmatmul.mubr.msk.f32.gmra.mrb[50].mxu1 %vm443_vm5, %v21960_v37  ;;  %v22266_v37 = vld [vmem:[#allocation5 + $0x122] sm:$0xff] }
 0xa3d   : > { %16502 = vmatprep.mubr.msk.f32.mxu1 %vm443_vm5, %v21964_v53  ;;  %v22270_v53 = vld [vmem:[#allocation5 + $0x12a] sm:$0xff] }
 0xa40   : > { %16503 = vmatmul.mubr.msk.f32.gmra.mrb[52].mxu1 %vm443_vm5, %v21968_v54  ;;  %v22274_v54 = vld [vmem:[#allocation5 + $0x13a] sm:$0xff] }
 0xa41   : > { %16505 = vmatprep.mubr.msk.f32.mxu1 %vm443_vm5, %v21972_v33  ;;  %v22278_v33 = vld [vmem:[#allocation5 + $0x142] sm:$0xff] }
 0xa44   : > { %16506 = vmatmul.mubr.msk.f32.gmra.mrb[54].mxu1 %vm443_vm5, %v21976_v59  ;;  %v22282_v59 = vld [vmem:[#allocation5 + $0x152] sm:$0xff] }
 0xa45   : > { %16508 = vmatprep.mubr.msk.f32.mxu1 %vm443_vm5, %v21980_v60  ;;  %v22286_v60 = vld [vmem:[#allocation5 + $0x15a] sm:$0xff] }
 0xa48   : > { %16509 = vmatmul.mubr.msk.f32.gmra.mrb[56].mxu1 %vm443_vm5, %v21984_v38  ;;  %v22290_v38 = vld [vmem:[#allocation5 + $0x16a] sm:$0xff] }
 0xa49   : > { %16511 = vmatprep.mubr.msk.f32.mxu1 %vm443_vm5, %v21988_v0  ;;  %v22294_v0 = vld [vmem:[#allocation5 + $0x172] sm:$0xff] }
 0xa4c   : > { %16512 = vmatmul.mubr.msk.f32.gmra.mrb[58].mxu1 %vm443_vm5, %v21992_v11  ;;  %v13317_v11 = vld [vmem:[%s22595_s4 + $0x190] sm:$0xff] }
 0xa4d   : > { %16514 = vmatprep.mubr.msk.f32.mxu1 %vm443_vm5, %v10027_v2  ;;  %v16980_v12 = vpack.c.bf16 %v13318_v7, %v13317_v11  ;;  %v22437_v2 = vld [vmem:[%s22599_s8] ss:$0 sm:$0xff] }
 0xa50   : > { %16515 = vmatmul.mubr.msk.f32.gmra.mrb[60].mxu1 %vm443_vm5, %v10028_v3 }
 0xa51   : > { %16517 = vmatprep.mubr.msk.f32.mxu1 %vm443_vm5, %v10029_v23 }
 0xa54   : > { %16518 = vmatmul.mubr.msk.f32.gmra.mrb[62].mxu1 %vm443_vm5, %v10030_v19 }
 0xa55   : > { %16532 = vmatprep.mubr.msk.f32.mxu1 %vm443_vm5, %v10931_v20 }
 0xa58   : > { %16533 = vmatmul.mubr.msk.f32.vlgmr.msra.gmra.mrb[32].mxu1 %vm443_vm5, %v10932_v25 }
 0xa59   : > { %16967 = vmatpush3.bf16.msra.mxu1 %v16964_v35  ;;  %16535 = vmatprep.mubr.msk.f32.mxu1 %vm443_vm5, %v22169_v50 }
 0xa5a   : > { %16969 = vmatprep.subr.bf16.mxu1 %v16968_v41 }
 0xa5c   : > { %16536 = vmatmul.mubr.msk.f32.gmra.mrb[34].mxu1 %vm443_vm5, %v22173_v9 }
 0xa5d   : > { %16538 = vmatprep.mubr.msk.f32.mxu1 %vm443_vm5, %v22183_v30  ;;  %16971 = vmatpush3.bf16.msra.mxu1 %v16968_v41 }
 0xa5e   : > { %16973 = vmatprep.subr.bf16.mxu1 %v16972_v52 }
 0xa60   : > { %16539 = vmatmul.mubr.msk.f32.gmra.mrb[36].mxu1 %vm443_vm5, %v22189_v16 }
 0xa61   : > { %16541 = vmatprep.mubr.msk.f32.mxu1 %vm443_vm5, %v22193_v42  ;;  %16975 = vmatpush3.bf16.msra.mxu1 %v16972_v52 }
 0xa62   : > { %16977 = vmatprep.subr.bf16.mxu1 %v22187_v13 }
 0xa64   : > { %16542 = vmatmul.mubr.msk.f32.gmra.mrb[38].mxu1 %vm443_vm5, %v22198_v43 }
 0xa65   : > { %16544 = vmatprep.mubr.msk.f32.mxu1 %vm443_vm5, %v22202_v44 }
 0xa68   : > { %16545 = vmatmul.mubr.msk.f32.gmra.mrb[40].mxu1 %vm443_vm5, %v22206_v45 }
 0xa69   : > { %16547 = vmatprep.mubr.msk.f32.mxu1 %vm443_vm5, %v22210_v46 }
 0xa6c   : > { %16548 = vmatmul.mubr.msk.f32.gmra.mrb[42].mxu1 %vm443_vm5, %v22214_v24 }
 0xa6d   : > { %16550 = vmatprep.mubr.msk.f32.mxu1 %vm443_vm5, %v22218_v49 }
 0xa70   : > { %16551 = vmatmul.mubr.msk.f32.gmra.mrb[44].mxu1 %vm443_vm5, %v22222_v51 }
 0xa71   : > { %16553 = vmatprep.mubr.msk.f32.mxu1 %vm443_vm5, %v22226_v1 }
 0xa74   : > { %16554 = vmatmul.mubr.msk.f32.gmra.mrb[46].mxu1 %vm443_vm5, %v22230_v61 }
 0xa75   : > { %16556 = vmatprep.mubr.msk.f32.mxu1 %vm443_vm5, %v22234_v63 }
 0xa78   : > { %16557 = vmatmul.mubr.msk.f32.gmra.mrb[48].mxu1 %vm443_vm5, %v22238_v57 }
 0xa79   : > { %16559 = vmatprep.mubr.msk.f32.mxu1 %vm443_vm5, %v22242_v58 }
 0xa7c   : > { %16560 = vmatmul.mubr.msk.f32.gmra.mrb[50].mxu1 %vm443_vm5, %v22246_v55 }
 0xa7d   : > { %16562 = vmatprep.mubr.msk.f32.mxu1 %vm443_vm5, %v22250_v56 }
 0xa80   : > { %16563 = vmatmul.mubr.msk.f32.gmra.mrb[52].mxu1 %vm443_vm5, %v22254_v21 }
 0xa81   : > { %16565 = vmatprep.mubr.msk.f32.mxu1 %vm443_vm5, %v22258_v26 }
 0xa84   : > { %16566 = vmatmul.mubr.msk.f32.gmra.mrb[54].mxu1 %vm443_vm5, %v22262_v36 }
 0xa85   : > { %16568 = vmatprep.mubr.msk.f32.mxu1 %vm443_vm5, %v22266_v37 }
 0xa88   : > { %16569 = vmatmul.mubr.msk.f32.gmra.mrb[56].mxu1 %vm443_vm5, %v22270_v53 }
 0xa89   : > { %16571 = vmatprep.mubr.msk.f32.mxu1 %vm443_vm5, %v22274_v54 }
 0xa8c   : > { %16572 = vmatmul.mubr.msk.f32.gmra.mrb[58].mxu1 %vm443_vm5, %v22278_v33 }
 0xa8d   : > { %16574 = vmatprep.mubr.msk.f32.mxu1 %vm443_vm5, %v22282_v59 }
 0xa90   : > { %16575 = vmatmul.mubr.msk.f32.gmra.mrb[60].mxu1 %vm443_vm5, %v22286_v60 }
 0xa91   : > { %16577 = vmatprep.mubr.msk.f32.mxu1 %vm443_vm5, %v22290_v38 }
 0xa94   : > { %16578 = vmatmul.mubr.msk.f32.gmra.mrb[62].mxu1 %vm443_vm5, %v22294_v0 }
 0xa95   : > { %16592 = vmatprep.mubr.msk.f32.mxu1 %vm443_vm5, %v22169_v50 }
 0xa98   : > { %16593 = vmatmul.mubr.msk.f32.vlgmr.msra.gmra.mrb[32].mxu1 %vm443_vm5, %v22173_v9 }
 0xa99   : > { %16979 = vmatpush3.bf16.msra.mxu1 %v22187_v13  ;;  %16595 = vmatprep.mubr.msk.f32.mxu1 %vm443_vm5, %v22183_v30 }
 0xa9a   : > { %16981 = vmatprep.subr.bf16.mxu1 %v16980_v12 }
 0xa9c   : > { %16596 = vmatmul.mubr.msk.f32.gmra.mrb[34].mxu1 %vm443_vm5, %v22189_v16 }
 0xa9d   : > { %16598 = vmatprep.mubr.msk.f32.mxu1 %vm443_vm5, %v22193_v42  ;;  %16983 = vmatpush3.bf16.msra.mxu1 %v16980_v12 }
 0xa9e   : > { %16985 = vmatprep.subr.bf16.mxu1 %v16984_v5 }
 0xaa0   : > { %16599 = vmatmul.mubr.msk.f32.gmra.mrb[36].mxu1 %vm443_vm5, %v22198_v43 }
 0xaa1   : > { %16601 = vmatprep.mubr.msk.f32.mxu1 %vm443_vm5, %v22202_v44  ;;  %16987 = vmatpush3.bf16.msra.mxu1 %v16984_v5 }
 0xaa4   : > { %16602 = vmatmul.mubr.msk.f32.gmra.mrb[38].mxu1 %vm443_vm5, %v22206_v45 }
 0xaa5   : > { %16604 = vmatprep.mubr.msk.f32.mxu1 %vm443_vm5, %v22210_v46 }
 0xaa8   : > { %16605 = vmatmul.mubr.msk.f32.gmra.mrb[40].mxu1 %vm443_vm5, %v22214_v24 }
 0xaa9   : > { %16607 = vmatprep.mubr.msk.f32.mxu1 %vm443_vm5, %v22218_v49 }
 0xaac   : > { %16608 = vmatmul.mubr.msk.f32.gmra.mrb[42].mxu1 %vm443_vm5, %v22222_v51 }
 0xaad   : > { %16610 = vmatprep.mubr.msk.f32.mxu1 %vm443_vm5, %v22226_v1 }
 0xab0   : > { %16611 = vmatmul.mubr.msk.f32.gmra.mrb[44].mxu1 %vm443_vm5, %v22230_v61 }
 0xab1   : > { %16613 = vmatprep.mubr.msk.f32.mxu1 %vm443_vm5, %v22234_v63 }
 0xab4   : > { %16614 = vmatmul.mubr.msk.f32.gmra.mrb[46].mxu1 %vm443_vm5, %v22238_v57 }
 0xab5   : > { %16616 = vmatprep.mubr.msk.f32.mxu1 %vm443_vm5, %v22242_v58 }
 0xab8   : > { %16617 = vmatmul.mubr.msk.f32.gmra.mrb[48].mxu1 %vm443_vm5, %v22246_v55 }
 0xab9   : > { %16619 = vmatprep.mubr.msk.f32.mxu1 %vm443_vm5, %v22250_v56 }
 0xabc   : > { %16620 = vmatmul.mubr.msk.f32.gmra.mrb[50].mxu1 %vm443_vm5, %v22254_v21 }
 0xabd   : > { %16622 = vmatprep.mubr.msk.f32.mxu1 %vm443_vm5, %v22258_v26 }
 0xac0   : > { %16623 = vmatmul.mubr.msk.f32.gmra.mrb[52].mxu1 %vm443_vm5, %v22262_v36 }
 0xac1   : > { %16625 = vmatprep.mubr.msk.f32.mxu1 %vm443_vm5, %v22266_v37 }
 0xac4   : > { %16626 = vmatmul.mubr.msk.f32.gmra.mrb[54].mxu1 %vm443_vm5, %v22270_v53 }
 0xac5   : > { %16628 = vmatprep.mubr.msk.f32.mxu1 %vm443_vm5, %v22274_v54 }
 0xac8   : > { %16629 = vmatmul.mubr.msk.f32.gmra.mrb[56].mxu1 %vm443_vm5, %v22278_v33 }
 0xac9   : > { %16631 = vmatprep.mubr.msk.f32.mxu1 %vm443_vm5, %v22282_v59 }
 0xacc   : > { %16632 = vmatmul.mubr.msk.f32.gmra.mrb[58].mxu1 %vm443_vm5, %v22286_v60 }
 0xacd   : > { %16634 = vmatprep.mubr.msk.f32.mxu1 %vm443_vm5, %v22290_v38 }
 0xad0   : > { %16635 = vmatmul.mubr.msk.f32.gmra.mrb[60].mxu1 %vm443_vm5, %v22294_v0 }
 0xad1   : > { %16637 = vmatprep.mubr.msk.f32.mxu1 %vm443_vm5, %v10963_v31 }
 0xad4   : > { %16638 = vmatmul.mubr.msk.f32.gmra.mrb[62].mxu1 %vm443_vm5, %v10964_v39 }
 0xad5   : > { %16652 = vmatprep.mubr.msk.f32.mxu1 %vm443_vm5, %v22183_v30 }
 0xad8   : > { %16653 = vmatmul.mubr.msk.f32.vlgmr.msra.gmra.mrb[32].mxu1 %vm443_vm5, %v22189_v16 }
 0xad9   : > { %16655 = vmatprep.mubr.msk.f32.mxu1 %vm443_vm5, %v22193_v42 }
 0xadc   : > { %16656 = vmatmul.mubr.msk.f32.gmra.mrb[34].mxu1 %vm443_vm5, %v22198_v43 }
 0xadd   : > { %16658 = vmatprep.mubr.msk.f32.mxu1 %vm443_vm5, %v22202_v44 }
 0xae0   : > { %16659 = vmatmul.mubr.msk.f32.gmra.mrb[36].mxu1 %vm443_vm5, %v22206_v45 }
 0xae1   : > { %16661 = vmatprep.mubr.msk.f32.mxu1 %vm443_vm5, %v22210_v46 }
 0xae4   : > { %16662 = vmatmul.mubr.msk.f32.gmra.mrb[38].mxu1 %vm443_vm5, %v22214_v24 }
 0xae5   : > { %16664 = vmatprep.mubr.msk.f32.mxu1 %vm443_vm5, %v22218_v49 }
 0xae8   : > { %16665 = vmatmul.mubr.msk.f32.gmra.mrb[40].mxu1 %vm443_vm5, %v22222_v51 }
 0xae9   : > { %16667 = vmatprep.mubr.msk.f32.mxu1 %vm443_vm5, %v22226_v1 }
 0xaec   : > { %16668 = vmatmul.mubr.msk.f32.gmra.mrb[42].mxu1 %vm443_vm5, %v22230_v61 }
 0xaed   : > { %16670 = vmatprep.mubr.msk.f32.mxu1 %vm443_vm5, %v22234_v63 }
 0xaf0   : > { %16671 = vmatmul.mubr.msk.f32.gmra.mrb[44].mxu1 %vm443_vm5, %v22238_v57 }
 0xaf1   : > { %16673 = vmatprep.mubr.msk.f32.mxu1 %vm443_vm5, %v22242_v58 }
 0xaf4   : > { %16674 = vmatmul.mubr.msk.f32.gmra.mrb[46].mxu1 %vm443_vm5, %v22246_v55 }
 0xaf5   : > { %16676 = vmatprep.mubr.msk.f32.mxu1 %vm443_vm5, %v22250_v56 }
 0xaf8   : > { %16677 = vmatmul.mubr.msk.f32.gmra.mrb[48].mxu1 %vm443_vm5, %v22254_v21 }
 0xaf9   : > { %16679 = vmatprep.mubr.msk.f32.mxu1 %vm443_vm5, %v22258_v26 }
 0xafc   : > { %16680 = vmatmul.mubr.msk.f32.gmra.mrb[50].mxu1 %vm443_vm5, %v22262_v36 }
 0xafd   : > { %16682 = vmatprep.mubr.msk.f32.mxu1 %vm443_vm5, %v22266_v37 }
 0xb00   : > { %16683 = vmatmul.mubr.msk.f32.gmra.mrb[52].mxu1 %vm443_vm5, %v22270_v53 }
 0xb01   : > { %16685 = vmatprep.mubr.msk.f32.mxu1 %vm443_vm5, %v22274_v54 }
 0xb04   : > { %16686 = vmatmul.mubr.msk.f32.gmra.mrb[54].mxu1 %vm443_vm5, %v22278_v33 }
 0xb05   : > { %16688 = vmatprep.mubr.msk.f32.mxu1 %vm443_vm5, %v22282_v59 }
 0xb08   : > { %16689 = vmatmul.mubr.msk.f32.gmra.mrb[56].mxu1 %vm443_vm5, %v22286_v60 }
 0xb09   : > { %16691 = vmatprep.mubr.msk.f32.mxu1 %vm443_vm5, %v22290_v38 }
 0xb0c   : > { %16692 = vmatmul.mubr.msk.f32.gmra.mrb[58].mxu1 %vm443_vm5, %v22294_v0 }
 0xb0d   : > { %16694 = vmatprep.mubr.msk.f32.mxu1 %vm443_vm5, %v10963_v31 }
 0xb10   : > { %16695 = vmatmul.mubr.msk.f32.gmra.mrb[60].mxu1 %vm443_vm5, %v10964_v39 }
 0xb11   : > { %16697 = vmatprep.mubr.msk.f32.mxu1 %vm443_vm5, %v10965_v62 }
 0xb14   : > { %16698 = vmatmul.mubr.msk.f32.gmra.mrb[62].mxu1 %vm443_vm5, %v10966_v40 }
 0xbab   : > { %v16654_v3 = vpop.f32.mrb[32].mxu1 }
 0xbac   : > { %v11875_v27 = vadd.f32 %v16654_v3, %v22437_v2  ;;  %v11676_v4 = vpop.f32.mrb[33].mxu1 }
 0xbad   : > { %v11874_v8 = vadd.f32 %v22437_v2, %v11676_v4 }
 0xbae   : > { %v11907_v28 = vmax.f32 %v11875_v27, 0.0 }
 0xbaf   : > { %v11906_v29 = vmax.f32 %v11874_v8, 0.0  ;;  %v16657_v32 = vpop.f32.mrb[34].mxu1 }
 0xbb0   : > { %11939 = vst.msk [vmem:[%s22443_s14 + $0x8] sm:$0xff] %vm387_vm3, %v11907_v28  ;;  %v11877_v34 = vadd.f32 %v16657_v32, %v22437_v2  ;;  %v11686_v22 = vpop.f32.mrb[35].mxu1 }
 0xbb1   : > { %11938 = vst.msk [vmem:[%s22443_s14] sm:$0xff] %vm387_vm3, %v11906_v29  ;;  %v11876_v35 = vadd.f32 %v22437_v2, %v11686_v22 }
 0xbb2   : > { %v11909_v23 = vmax.f32 %v11877_v34, 0.0 }
 0xbb3   : > { %v11908_v19 = vmax.f32 %v11876_v35, 0.0  ;;  %v16660_v20 = vpop.f32.mrb[36].mxu1 }
 0xbb4   : > { %11941 = vst.msk [vmem:[%s22443_s14 + $0x18] sm:$0xff] %vm387_vm3, %v11909_v23  ;;  %v11879_v47 = vadd.f32 %v16660_v20, %v22437_v2  ;;  %v11696_v48 = vpop.f32.mrb[37].mxu1 }
 0xbb5   : > { %11940 = vst.msk [vmem:[%s22443_s14 + $0x10] sm:$0xff] %vm387_vm3, %v11908_v19  ;;  %v11878_v25 = vadd.f32 %v22437_v2, %v11696_v48 }
 0xbb6   : > { %v11911_v41 = vmax.f32 %v11879_v47, 0.0 }
 0xbb7   : > { %v11910_v14 = vmax.f32 %v11878_v25, 0.0  ;;  %v16663_v15 = vpop.f32.mrb[38].mxu1 }
 0xbb8   : > { %11943 = vst.msk [vmem:[%s22443_s14 + $0x28] sm:$0xff] %vm387_vm3, %v11911_v41  ;;  %v11881_v50 = vadd.f32 %v16663_v15, %v22437_v2  ;;  %v11706_v52 = vpop.f32.mrb[39].mxu1 }
 0xbb9   : > { %11942 = vst.msk [vmem:[%s22443_s14 + $0x20] sm:$0xff] %vm387_vm3, %v11910_v14  ;;  %v11880_v9 = vadd.f32 %v22437_v2, %v11706_v52 }
 0xbba   : > { %v11913_v10 = vmax.f32 %v11881_v50, 0.0 }
 0xbbb   : > { %v11912_v6 = vmax.f32 %v11880_v9, 0.0  ;;  %v16666_v30 = vpop.f32.mrb[40].mxu1 }
 0xbbc   : > { %11945 = vst.msk [vmem:[%s22443_s14 + $0x38] sm:$0xff] %vm387_vm3, %v11913_v10  ;;  %v11883_v13 = vadd.f32 %v16666_v30, %v22437_v2  ;;  %v11716_v16 = vpop.f32.mrb[41].mxu1 }
 0xbbd   : > { %11944 = vst.msk [vmem:[%s22443_s14 + $0x30] sm:$0xff] %vm387_vm3, %v11912_v6  ;;  %v11882_v42 = vadd.f32 %v22437_v2, %v11716_v16 }
 0xbbe   : > { %v11915_v43 = vmax.f32 %v11883_v13, 0.0 }
 0xbbf   : > { %v11914_v44 = vmax.f32 %v11882_v42, 0.0  ;;  %v16669_v45 = vpop.f32.mrb[42].mxu1 }
 0xbc0   : > { %11947 = vst.msk [vmem:[%s22443_s14 + $0x48] sm:$0xff] %vm387_vm3, %v11915_v43  ;;  %v11885_v46 = vadd.f32 %v16669_v45, %v22437_v2  ;;  %v11726_v24 = vpop.f32.mrb[43].mxu1 }
 0xbc1   : > { %11946 = vst.msk [vmem:[%s22443_s14 + $0x40] sm:$0xff] %vm387_vm3, %v11914_v44  ;;  %v11884_v49 = vadd.f32 %v22437_v2, %v11726_v24 }
 0xbc2   : > { %v11917_v51 = vmax.f32 %v11885_v46, 0.0 }
 0xbc3   : > { %v11916_v1 = vmax.f32 %v11884_v49, 0.0  ;;  %v16672_v61 = vpop.f32.mrb[44].mxu1 }
 0xbc4   : > { %11949 = vst.msk [vmem:[%s22443_s14 + $0x58] sm:$0xff] %vm387_vm3, %v11917_v51  ;;  %v11887_v63 = vadd.f32 %v16672_v61, %v22437_v2  ;;  %v11736_v57 = vpop.f32.mrb[45].mxu1 }
 0xbc5   : > { %11948 = vst.msk [vmem:[%s22443_s14 + $0x50] sm:$0xff] %vm387_vm3, %v11916_v1  ;;  %v11886_v58 = vadd.f32 %v22437_v2, %v11736_v57 }
 0xbc6   : > { %v11919_v55 = vmax.f32 %v11887_v63, 0.0 }
 0xbc7   : > { %v11918_v56 = vmax.f32 %v11886_v58, 0.0  ;;  %v16675_v21 = vpop.f32.mrb[46].mxu1 }
 0xbc8   : > { %11951 = vst.msk [vmem:[%s22443_s14 + $0x68] sm:$0xff] %vm387_vm3, %v11919_v55  ;;  %v11889_v26 = vadd.f32 %v16675_v21, %v22437_v2  ;;  %v11746_v36 = vpop.f32.mrb[47].mxu1 }
 0xbc9   : > { %11950 = vst.msk [vmem:[%s22443_s14 + $0x60] sm:$0xff] %vm387_vm3, %v11918_v56  ;;  %v11888_v37 = vadd.f32 %v22437_v2, %v11746_v36 }
 0xbca   : > { %v11921_v53 = vmax.f32 %v11889_v26, 0.0 }
 0xbcb   : > { %v11920_v54 = vmax.f32 %v11888_v37, 0.0  ;;  %v16678_v33 = vpop.f32.mrb[48].mxu1 }
 0xbcc   : > { %11953 = vst.msk [vmem:[%s22443_s14 + $0x78] sm:$0xff] %vm387_vm3, %v11921_v53  ;;  %v11891_v59 = vadd.f32 %v16678_v33, %v22437_v2  ;;  %v11756_v60 = vpop.f32.mrb[49].mxu1 }
 0xbcd   : > { %11952 = vst.msk [vmem:[%s22443_s14 + $0x70] sm:$0xff] %vm387_vm3, %v11920_v54  ;;  %v11890_v38 = vadd.f32 %v22437_v2, %v11756_v60 }
 0xbce   : > { %v11923_v0 = vmax.f32 %v11891_v59, 0.0 }
 0xbcf   : > { %v11922_v11 = vmax.f32 %v11890_v38, 0.0  ;;  %v16681_v7 = vpop.f32.mrb[50].mxu1 }
 0xbd0   : > { %11955 = vst.msk [vmem:[%s22443_s14 + $0x88] sm:$0xff] %vm387_vm3, %v11923_v0  ;;  %v11893_v12 = vadd.f32 %v16681_v7, %v22437_v2  ;;  %v11766_v17 = vpop.f32.mrb[51].mxu1 }
 0xbd1   : > { %11954 = vst.msk [vmem:[%s22443_s14 + $0x80] sm:$0xff] %vm387_vm3, %v11922_v11  ;;  %v11892_v18 = vadd.f32 %v22437_v2, %v11766_v17 }
 0xbd2   : > { %v11925_v5 = vmax.f32 %v11893_v12, 0.0 }
 0xbd3   : > { %v11924_v31 = vmax.f32 %v11892_v18, 0.0  ;;  %v16684_v39 = vpop.f32.mrb[52].mxu1 }
 0xbd4   : > { %11957 = vst.msk [vmem:[%s22443_s14 + $0x98] sm:$0xff] %vm387_vm3, %v11925_v5  ;;  %v11895_v62 = vadd.f32 %v16684_v39, %v22437_v2  ;;  %v11776_v40 = vpop.f32.mrb[53].mxu1 }
 0xbd5   : > { %11956 = vst.msk [vmem:[%s22443_s14 + $0x90] sm:$0xff] %vm387_vm3, %v11924_v31  ;;  %v11894_v3 = vadd.f32 %v22437_v2, %v11776_v40 }
 0xbd6   : > { %v11927_v27 = vmax.f32 %v11895_v62, 0.0 }
 0xbd7   : > { %v11926_v4 = vmax.f32 %v11894_v3, 0.0  ;;  %v16687_v8 = vpop.f32.mrb[54].mxu1 }
 0xbd8   : > { %11959 = vst.msk [vmem:[%s22443_s14 + $0xa8] sm:$0xff] %vm387_vm3, %v11927_v27  ;;  %v11897_v28 = vadd.f32 %v16687_v8, %v22437_v2  ;;  %v11786_v29 = vpop.f32.mrb[55].mxu1 }
 0xbd9   : > { %11958 = vst.msk [vmem:[%s22443_s14 + $0xa0] sm:$0xff] %vm387_vm3, %v11926_v4  ;;  %v11896_v32 = vadd.f32 %v22437_v2, %v11786_v29 }
 0xbda   : > { %v11929_v34 = vmax.f32 %v11897_v28, 0.0 }
 0xbdb   : > { %v11928_v22 = vmax.f32 %v11896_v32, 0.0  ;;  %v16690_v35 = vpop.f32.mrb[56].mxu1 }
 0xbdc   : > { %11961 = vst.msk [vmem:[%s22443_s14 + $0xb8] sm:$0xff] %vm387_vm3, %v11929_v34  ;;  %v11899_v23 = vadd.f32 %v16690_v35, %v22437_v2  ;;  %v11796_v19 = vpop.f32.mrb[57].mxu1 }
 0xbdd   : > { %11960 = vst.msk [vmem:[%s22443_s14 + $0xb0] sm:$0xff] %vm387_vm3, %v11928_v22  ;;  %v11898_v20 = vadd.f32 %v22437_v2, %v11796_v19 }
 0xbde   : > { %v11931_v47 = vmax.f32 %v11899_v23, 0.0 }
 0xbdf   : > { %v11930_v48 = vmax.f32 %v11898_v20, 0.0  ;;  %v16693_v25 = vpop.f32.mrb[58].mxu1 }
 0xbe0   : > { %11963 = vst.msk [vmem:[%s22443_s14 + $0xc8] sm:$0xff] %vm387_vm3, %v11931_v47  ;;  %v11901_v41 = vadd.f32 %v16693_v25, %v22437_v2  ;;  %v11806_v14 = vpop.f32.mrb[59].mxu1 }
 0xbe1   : > { %11962 = vst.msk [vmem:[%s22443_s14 + $0xc0] sm:$0xff] %vm387_vm3, %v11930_v48  ;;  %v11900_v15 = vadd.f32 %v22437_v2, %v11806_v14 }
 0xbe2   : > { %v11933_v50 = vmax.f32 %v11901_v41, 0.0 }
 0xbe3   : > { %v11932_v52 = vmax.f32 %v11900_v15, 0.0  ;;  %v16696_v9 = vpop.f32.mrb[60].mxu1 }
 0xbe4   : > { %11965 = vst.msk [vmem:[%s22443_s14 + $0xd8] sm:$0xff] %vm387_vm3, %v11933_v50  ;;  %v11903_v10 = vadd.f32 %v16696_v9, %v22437_v2  ;;  %v11816_v6 = vpop.f32.mrb[61].mxu1 }
 0xbe5   : > { %11964 = vst.msk [vmem:[%s22443_s14 + $0xd0] sm:$0xff] %vm387_vm3, %v11932_v52  ;;  %v11902_v30 = vadd.f32 %v22437_v2, %v11816_v6 }
 0xbe6   : > { %v11935_v13 = vmax.f32 %v11903_v10, 0.0 }
 0xbe7   : > { %v11934_v16 = vmax.f32 %v11902_v30, 0.0  ;;  %v16699_v42 = vpop.f32.mrb[62].mxu1 }
 0xbe8   : > { %11967 = vst.msk [vmem:[%s22443_s14 + $0xe8] sm:$0xff] %vm387_vm3, %v11935_v13  ;;  %v11905_v43 = vadd.f32 %v16699_v42, %v22437_v2  ;;  %v11826_v44 = vpop.f32.mrb[63].mxu1 }
 0xbe9   : > { %11966 = vst.msk [vmem:[%s22443_s14 + $0xe0] sm:$0xff] %vm387_vm3, %v11934_v16  ;;  %v11904_v45 = vadd.f32 %v22437_v2, %v11826_v44 }
 0xbea   : > { %v11937_v46 = vmax.f32 %v11905_v43, 0.0 }
 0xbeb   : > { %v11936_v24 = vmax.f32 %v11904_v45, 0.0 }
 0xbec   : > { %11969 = vst.msk [vmem:[%s22443_s14 + $0xf8] sm:$0xff] %vm387_vm3, %v11937_v46 }
 0xbed   : > { %11968 = vst.msk [vmem:[%s22443_s14 + $0xf0] sm:$0xff] %vm387_vm3, %v11936_v24 }
 0xbee   : > { %18067 = shalt.err (!%p18064_p3)
}
 0xbef   : > { %s18068_s26 = scalar_lea.hbm %s22540_s23, 4096  ;;  %s18072_s16 = scalar_lea.hbm %s22600_s9, 8192 }
 0xbf0   : > { %p18069_p4 = scmp.ne.s32.totalorder %s22540_s23, %s18068_s26  ;;  %p18073_p9 = scmp.lt.u32.totalorder %s22540_s23, %s22600_s9 }
 0xbf1   : > { %p18074_p10 = scmp.lt.u32.totalorder %s18072_s16, %s18068_s26  ;;  %p18076_p12 = scmp.lt.u32.totalorder %s18068_s26, %s22540_s23 }
 0xbf2   : > { %p18070_p7 = pnand %p18069_p4, %p18210_p5 }
 0xbf3   : > { %p18075_p11 = por %p18074_p10, %p18073_p9 }
 0xbf4   : > { %p18071_p8 = pneg %p18070_p7 }
 0xbf5   : > { %p18077_p13 = por %p18076_p12, %p18075_p11 }
 0xbf7   : > { %p18078_p0 = pnand %p18077_p13, %p18071_p8 }
 0xbf9   : > { %18081 = shalt.err (!%p18078_p0)
}
 0xbfa   : > { %s18120_s24 = smov 128   ;;  %s18121_s25 = smov 8  }
 0xbfb   : > { %18012 = dma.vmem_to_hbm [thread:$0]  (%p18210_p5), %s22542_s17, 4096, %s22540_s23, %s22550_s13, %s18120_s24, %s18120_s24, %s18121_s25  }
 0xbfc PF: > { %p18018_p1 = scmp.ge.s32.totalorder %s18116_s12, 2  ;;  %s11999_s27 = sand.u32 1, %s18104_s30  }
 0xbfd   : > { %s12000_s28 = scalar_lea.sflag [#allocation7], %s11999_s27 }
 0xbfe   : > { %p18015_p2 = pnand %p18018_p1, %p18214_p6 }
 0xc00   : > { %18099 = dma.done.wait (!%p18015_p2), %s12000_s28, 4096  }
 0xc01   : > { %18101 = vsyncadd (!%p18015_p2), %s12000_s28, 4294963200  ;;  %p19_p3 = scmp.ge.s32.totalorder %s18197_s15, 4   ;;  %s22603_s30 = smov %s18108_s10 }
 0xc02   : > { %s22604_s10 = smov %s18112_s11  ;;  %s22605_s11 = smov %s18208_s18 }
 0xc03   : > { %s22606_s12 = smov %s18197_s15  ;;  %21 = sbr.rel (!%p19_p3) target bundleno = 3 (0x3), region = 127 }
 0xc0a   :  { %12005 = vsyncpa [#allocation7], 1 }
 0xc0b   :  { %12007 = vsyncpa [#allocation7 + $0x1], 1 }

</bundles_post_ra>
